<compile_context>
chip_gen: v7x
topology: tpu7x:2x2x1
jax: 0.10.0
libtpu: 0.0.40
codegen_flags: <defaults>
</compile_context>

<pallas_src>
import functools

import jax
import jax.numpy as jnp
from jax.experimental import pallas as pl
from jax.experimental.pallas import tpu as pltpu


_LANE = 128
_WEIGHT_DTYPE = jnp.bfloat16


def _round_up(n, m):
    return ((n + m - 1) // m) * m


# ---------------------------------------------------------------------------
# Fused Pallas kernel:
#   enc1 -> ReLU -> enc2 -> ReLU -> [z_mean | z_log_var] -> reparameterize
#   -> dec1 -> ReLU -> dec2 -> ReLU -> dec3 -> Sigmoid
# Everything (weights + activations) lives in VMEM for the whole kernel.
# ---------------------------------------------------------------------------

def _vae_fused_kernel(
    x_ref, eps_ref,
    w1_ref, b1_ref, w2_ref, b2_ref,
    wz_ref, bz_ref,
    wd1_ref, bd1_ref, wd2_ref, bd2_ref, wd3_ref, bd3_ref,
    dec_ref, zmean_ref, zlogvar_ref, z_ref,
    *, latent_pad,
):
    def linear(h, w_ref, b_ref):
        # MXU-native bf16 x bf16 matmul, f32 accumulation; bias add in f32.
        y = jnp.dot(h.astype(_WEIGHT_DTYPE), w_ref[...],
                    preferred_element_type=jnp.float32)
        return y + b_ref[...]                      # (B, out) + (1, out)

    x = x_ref[...]                                            # (B, Din_p) f32
    h = jnp.maximum(linear(x, w1_ref, b1_ref), 0.0)           # (B, 512)
    h = jnp.maximum(linear(h, w2_ref, b2_ref), 0.0)           # (B, 2048)

    zm_zlv = linear(h, wz_ref, bz_ref)                        # (B, 2*Lp)
    z_mean = zm_zlv[:, :latent_pad]
    z_log_var = zm_zlv[:, latent_pad:]

    # Reparameterization trick (epsilon padded with zeros in padded lanes).
    z = z_mean + jnp.exp(0.5 * z_log_var) * eps_ref[...]

    d = jnp.maximum(linear(z, wd1_ref, bd1_ref), 0.0)         # (B, 2048)
    d = jnp.maximum(linear(d, wd2_ref, bd2_ref), 0.0)         # (B, 512)
    decoded = jax.nn.sigmoid(linear(d, wd3_ref, bd3_ref))     # (B, Din_p)

    dec_ref[...] = decoded.astype(dec_ref.dtype)
    zmean_ref[...] = z_mean.astype(zmean_ref.dtype)
    zlogvar_ref[...] = z_log_var.astype(zlogvar_ref.dtype)
    z_ref[...] = z.astype(z_ref.dtype)


# ---------------------------------------------------------------------------
# Parameter construction (deterministic, mimics PyTorch Linear default init:
# U(-1/sqrt(fan_in), 1/sqrt(fan_in)) for both weight and bias).
# Weights stored as [in, out] (transpose of torch Linear.weight).
# ---------------------------------------------------------------------------

def _init_linear(key, fan_in, fan_out, dtype=jnp.float32):
    kw, kb = jax.random.split(key)
    bound = 1.0 / float(fan_in) ** 0.5
    w = jax.random.uniform(kw, (fan_in, fan_out), dtype, -bound, bound)
    b = jax.random.uniform(kb, (1, fan_out), dtype, -bound, bound)
    return w, b


def init_vae_params(key, input_dim, latent_dim):
    keys = jax.random.split(key, 7)
    return {
        "enc1": _init_linear(keys[0], input_dim, 500),
        "enc2": _init_linear(keys[1], 500, 2000),
        "z_mean": _init_linear(keys[2], 2000, latent_dim),
        "z_log_var": _init_linear(keys[3], 2000, latent_dim),
        "dec1": _init_linear(keys[4], latent_dim, 2000),
        "dec2": _init_linear(keys[5], 2000, 500),
        "dec3": _init_linear(keys[6], 500, input_dim),
    }


def _pad_wb(w, b, rows, cols):
    """Zero-pad a (w, b) pair to [rows, cols] / [1, cols]; cast w to bf16."""
    wp = jnp.pad(w, ((0, rows - w.shape[0]), (0, cols - w.shape[1])))
    bp = jnp.pad(b, ((0, 0), (0, cols - b.shape[1])))
    return wp.astype(_WEIGHT_DTYPE), bp.astype(jnp.float32)


def prepare_padded_params(params, input_dim, latent_dim):
    """Zero-pad every feature dim to a multiple of 128 and cast weights to
    bf16. Zero padding keeps the math exactly equivalent (ReLU(0)=0, padded
    weight rows/cols contribute nothing)."""
    din_p = _round_up(input_dim, _LANE)
    h1_p = _round_up(500, _LANE)      # 512
    h2_p = _round_up(2000, _LANE)     # 2048
    lat_p = _round_up(latent_dim, _LANE)

    w1, b1 = _pad_wb(*params["enc1"], din_p, h1_p)
    w2, b2 = _pad_wb(*params["enc2"], h1_p, h2_p)
    wzm, bzm = _pad_wb(*params["z_mean"], h2_p, lat_p)
    wzl, bzl = _pad_wb(*params["z_log_var"], h2_p, lat_p)
    wz = jnp.concatenate([wzm, wzl], axis=1)        # (2048, 2*lat_p)
    bz = jnp.concatenate([bzm, bzl], axis=1)
    wd1, bd1 = _pad_wb(*params["dec1"], lat_p, h2_p)
    wd2, bd2 = _pad_wb(*params["dec2"], h2_p, h1_p)
    wd3, bd3 = _pad_wb(*params["dec3"], h1_p, din_p)

    return dict(w1=w1, b1=b1, w2=w2, b2=b2, wz=wz, bz=bz,
                wd1=wd1, bd1=bd1, wd2=wd2, bd2=bd2, wd3=wd3, bd3=bd3)


# ---------------------------------------------------------------------------
# Forward pass (matches the PyTorch module's forward semantics).
# ---------------------------------------------------------------------------

def vae_forward(padded_params, x, eps_key, *, input_dim, latent_dim):
    p = padded_params
    B = x.shape[0]
    din_p = p["w1"].shape[0]
    latent_pad = p["wd1"].shape[0]

    x_p = jnp.pad(x.astype(jnp.float32), ((0, 0), (0, din_p - input_dim)))
    # epsilon ~ N(0,1) over the real latent dims (same as torch.randn_like);
    # padded lanes get zeros so the padded z stays exactly zero.
    eps = jax.random.normal(eps_key, (B, latent_dim), jnp.float32)
    eps_p = jnp.pad(eps, ((0, 0), (0, latent_pad - latent_dim)))

    out_shapes = (
        jax.ShapeDtypeStruct((B, din_p), jnp.float32),       # decoded (padded)
        jax.ShapeDtypeStruct((B, latent_pad), jnp.float32),  # z_mean
        jax.ShapeDtypeStruct((B, latent_pad), jnp.float32),  # z_log_var
        jax.ShapeDtypeStruct((B, latent_pad), jnp.float32),  # z
    )

    dec_p, zm_p, zlv_p, z_p = pl.pallas_call(
        functools.partial(_vae_fused_kernel, latent_pad=latent_pad),
        out_shape=out_shapes,
        # No grid: single invocation; every operand is a whole-array VMEM
        # block (total ~6 MiB incl. bf16 weights — fits all generations).
        compiler_params=pltpu.CompilerParams(
            vmem_limit_bytes=32 * 1024 * 1024),
    )(x_p, eps_p,
      p["w1"], p["b1"], p["w2"], p["b2"],
      p["wz"], p["bz"],
      p["wd1"], p["bd1"], p["wd2"], p["bd2"], p["wd3"], p["bd3"])

    return (dec_p[:, :input_dim],
            zm_p[:, :latent_dim],
            zlv_p[:, :latent_dim],
            z_p[:, :latent_dim])


# ---------------------------------------------------------------------------
# Pure-JAX f32 reference (for numerical validation of the fused kernel).
# ---------------------------------------------------------------------------

def vae_forward_reference(params, x, eps_key, latent_dim):
    def lin(h, wb):
        return h @ wb[0] + wb[1]

    h = jax.nn.relu(lin(x, params["enc1"]))
    h = jax.nn.relu(lin(h, params["enc2"]))
    z_mean = lin(h, params["z_mean"])
    z_log_var = lin(h, params["z_log_var"])
    eps = jax.random.normal(eps_key, (x.shape[0], latent_dim), jnp.float32)
    z = z_mean + jnp.exp(0.5 * z_log_var) * eps
    d = jax.nn.relu(lin(z, params["dec1"]))
    d = jax.nn.relu(lin(d, params["dec2"]))
    decoded = jax.nn.sigmoid(lin(d, params["dec3"]))
    return decoded, z_mean, z_log_var, z


# ---------------------------------------------------------------------------
# Demo / smoke test
# ---------------------------------------------------------------------------

if __name__ == "__main__":
    input_dim = 64
    latent_dim = 16
    batch = 8

    root = jax.random.PRNGKey(0)
    k_params, k_x, k_eps = jax.random.split(root, 3)

    params = init_vae_params(k_params, input_dim, latent_dim)
    padded = prepare_padded_params(params, input_dim, latent_dim)
    x = jax.random.uniform(k_x, (batch, input_dim), jnp.float32)

    fwd = jax.jit(functools.partial(
        vae_forward, input_dim=input_dim, latent_dim=latent_dim))
    decoded, z_mean, z_log_var, z = fwd(padded, x, k_eps)
    jax.block_until_ready((decoded, z_mean, z_log_var, z))

    # Shape / range checks.
    assert decoded.shape == (batch, input_dim)
    assert z_mean.shape == (batch, latent_dim)
    assert z_log_var.shape == (batch, latent_dim)
    assert z.shape == (batch, latent_dim)
    assert bool(jnp.all(decoded >= 0.0)) and bool(jnp.all(decoded <= 1.0))

    # Numerical check vs. pure-JAX f32 reference (kernel uses bf16 weights,
    # so allow a generous tolerance).
    ref = vae_forward_reference(params, x, k_eps, latent_dim)
    for got, want in zip((decoded, z_mean, z_log_var, z), ref):
        assert bool(jnp.allclose(got, want, atol=5e-2, rtol=5e-2)), (
            float(jnp.max(jnp.abs(got - want))))

    print("KERNEL_OK")
</pallas_src>

<mosaic_0001>
module attributes {stable_mosaic.version = 11 : i64} {
  func.func @_vae_fused_kernel(%arg0: memref<8x128xf32, #tpu.memory_space<vmem>>, %arg1: memref<8x128xf32, #tpu.memory_space<vmem>>, %arg2: memref<128x512xbf16, #tpu.memory_space<vmem>>, %arg3: memref<1x512xf32, #tpu.memory_space<vmem>>, %arg4: memref<512x2048xbf16, #tpu.memory_space<vmem>>, %arg5: memref<1x2048xf32, #tpu.memory_space<vmem>>, %arg6: memref<2048x256xbf16, #tpu.memory_space<vmem>>, %arg7: memref<1x256xf32, #tpu.memory_space<vmem>>, %arg8: memref<128x2048xbf16, #tpu.memory_space<vmem>>, %arg9: memref<1x2048xf32, #tpu.memory_space<vmem>>, %arg10: memref<2048x512xbf16, #tpu.memory_space<vmem>>, %arg11: memref<1x512xf32, #tpu.memory_space<vmem>>, %arg12: memref<512x128xbf16, #tpu.memory_space<vmem>>, %arg13: memref<1x128xf32, #tpu.memory_space<vmem>>, %arg14: memref<8x128xf32, #tpu.memory_space<vmem>>, %arg15: memref<8x128xf32, #tpu.memory_space<vmem>>, %arg16: memref<8x128xf32, #tpu.memory_space<vmem>>, %arg17: memref<8x128xf32, #tpu.memory_space<vmem>>) attributes {dimension_semantics = [], scalar_prefetch = 0 : i64, scratch_operands = 0 : i64, tpu.core_type = #tpu.core_type<tc>} {
    %c0 = arith.constant 0 : index
    %c0_0 = arith.constant 0 : index
    %0 = vector.load %arg0[%c0, %c0_0] : memref<8x128xf32, #tpu.memory_space<vmem>>, vector<8x128xf32>
    %1 = arith.truncf %0 : vector<8x128xf32> to vector<8x128xbf16>
    %c0_1 = arith.constant 0 : index
    %c0_2 = arith.constant 0 : index
    %2 = vector.load %arg2[%c0_1, %c0_2] : memref<128x512xbf16, #tpu.memory_space<vmem>>, vector<128x512xbf16>
    %cst = arith.constant dense<0.000000e+00> : vector<8x512xf32>
    %3 = tpu.matmul %1, %2, %cst {dimension_numbers = #tpu.dot_dimension_numbers<[1], [0], [0], [1], [0, 0, 1, 1], [], []>} : vector<8x128xbf16>, vector<128x512xbf16>, vector<8x512xf32> -> vector<8x512xf32>
    %c0_3 = arith.constant 0 : index
    %c0_4 = arith.constant 0 : index
    %4 = vector.load %arg3[%c0_3, %c0_4] : memref<1x512xf32, #tpu.memory_space<vmem>>, vector<1x512xf32>
    %5 = vector.broadcast %4 : vector<1x512xf32> to vector<8x512xf32>
    %6 = arith.addf %3, %5 : vector<8x512xf32>
    %cst_5 = arith.constant 0.000000e+00 : f32
    %7 = vector.broadcast %cst_5 : f32 to vector<8x512xf32>
    %8 = arith.maximumf %6, %7 : vector<8x512xf32>
    %9 = arith.truncf %8 : vector<8x512xf32> to vector<8x512xbf16>
    %c0_6 = arith.constant 0 : index
    %c0_7 = arith.constant 0 : index
    %10 = vector.load %arg4[%c0_6, %c0_7] : memref<512x2048xbf16, #tpu.memory_space<vmem>>, vector<512x2048xbf16>
    %cst_8 = arith.constant dense<0.000000e+00> : vector<8x2048xf32>
    %11 = tpu.matmul %9, %10, %cst_8 {dimension_numbers = #tpu.dot_dimension_numbers<[1], [0], [0], [1], [0, 0, 1, 1], [], []>} : vector<8x512xbf16>, vector<512x2048xbf16>, vector<8x2048xf32> -> vector<8x2048xf32>
    %c0_9 = arith.constant 0 : index
    %c0_10 = arith.constant 0 : index
    %12 = vector.load %arg5[%c0_9, %c0_10] : memref<1x2048xf32, #tpu.memory_space<vmem>>, vector<1x2048xf32>
    %13 = vector.broadcast %12 : vector<1x2048xf32> to vector<8x2048xf32>
    %14 = arith.addf %11, %13 : vector<8x2048xf32>
    %cst_11 = arith.constant 0.000000e+00 : f32
    %15 = vector.broadcast %cst_11 : f32 to vector<8x2048xf32>
    %16 = arith.maximumf %14, %15 : vector<8x2048xf32>
    %17 = arith.truncf %16 : vector<8x2048xf32> to vector<8x2048xbf16>
    %c0_12 = arith.constant 0 : index
    %c0_13 = arith.constant 0 : index
    %18 = vector.load %arg6[%c0_12, %c0_13] : memref<2048x256xbf16, #tpu.memory_space<vmem>>, vector<2048x256xbf16>
    %cst_14 = arith.constant dense<0.000000e+00> : vector<8x256xf32>
    %19 = tpu.matmul %17, %18, %cst_14 {dimension_numbers = #tpu.dot_dimension_numbers<[1], [0], [0], [1], [0, 0, 1, 1], [], []>} : vector<8x2048xbf16>, vector<2048x256xbf16>, vector<8x256xf32> -> vector<8x256xf32>
    %c0_15 = arith.constant 0 : index
    %c0_16 = arith.constant 0 : index
    %20 = vector.load %arg7[%c0_15, %c0_16] : memref<1x256xf32, #tpu.memory_space<vmem>>, vector<1x256xf32>
    %21 = vector.broadcast %20 : vector<1x256xf32> to vector<8x256xf32>
    %22 = arith.addf %19, %21 : vector<8x256xf32>
    %23 = vector.extract_strided_slice %22 {offsets = [0, 0], sizes = [8, 128], strides = [1, 1]} : vector<8x256xf32> to vector<8x128xf32>
    %24 = vector.extract_strided_slice %22 {offsets = [0, 128], sizes = [8, 128], strides = [1, 1]} : vector<8x256xf32> to vector<8x128xf32>
    %cst_17 = arith.constant 5.000000e-01 : f32
    %25 = vector.broadcast %cst_17 : f32 to vector<8x128xf32>
    %26 = arith.mulf %25, %24 : vector<8x128xf32>
    %27 = math.exp %26 : vector<8x128xf32>
    %c0_18 = arith.constant 0 : index
    %c0_19 = arith.constant 0 : index
    %28 = vector.load %arg1[%c0_18, %c0_19] : memref<8x128xf32, #tpu.memory_space<vmem>>, vector<8x128xf32>
    %29 = arith.mulf %27, %28 : vector<8x128xf32>
    %30 = arith.addf %23, %29 : vector<8x128xf32>
    %31 = arith.truncf %30 : vector<8x128xf32> to vector<8x128xbf16>
    %c0_20 = arith.constant 0 : index
    %c0_21 = arith.constant 0 : index
    %32 = vector.load %arg8[%c0_20, %c0_21] : memref<128x2048xbf16, #tpu.memory_space<vmem>>, vector<128x2048xbf16>
    %cst_22 = arith.constant dense<0.000000e+00> : vector<8x2048xf32>
    %33 = tpu.matmul %31, %32, %cst_22 {dimension_numbers = #tpu.dot_dimension_numbers<[1], [0], [0], [1], [0, 0, 1, 1], [], []>} : vector<8x128xbf16>, vector<128x2048xbf16>, vector<8x2048xf32> -> vector<8x2048xf32>
    %c0_23 = arith.constant 0 : index
    %c0_24 = arith.constant 0 : index
    %34 = vector.load %arg9[%c0_23, %c0_24] : memref<1x2048xf32, #tpu.memory_space<vmem>>, vector<1x2048xf32>
    %35 = vector.broadcast %34 : vector<1x2048xf32> to vector<8x2048xf32>
    %36 = arith.addf %33, %35 : vector<8x2048xf32>
    %cst_25 = arith.constant 0.000000e+00 : f32
    %37 = vector.broadcast %cst_25 : f32 to vector<8x2048xf32>
    %38 = arith.maximumf %36, %37 : vector<8x2048xf32>
    %39 = arith.truncf %38 : vector<8x2048xf32> to vector<8x2048xbf16>
    %c0_26 = arith.constant 0 : index
    %c0_27 = arith.constant 0 : index
    %40 = vector.load %arg10[%c0_26, %c0_27] : memref<2048x512xbf16, #tpu.memory_space<vmem>>, vector<2048x512xbf16>
    %cst_28 = arith.constant dense<0.000000e+00> : vector<8x512xf32>
    %41 = tpu.matmul %39, %40, %cst_28 {dimension_numbers = #tpu.dot_dimension_numbers<[1], [0], [0], [1], [0, 0, 1, 1], [], []>} : vector<8x2048xbf16>, vector<2048x512xbf16>, vector<8x512xf32> -> vector<8x512xf32>
    %c0_29 = arith.constant 0 : index
    %c0_30 = arith.constant 0 : index
    %42 = vector.load %arg11[%c0_29, %c0_30] : memref<1x512xf32, #tpu.memory_space<vmem>>, vector<1x512xf32>
    %43 = vector.broadcast %42 : vector<1x512xf32> to vector<8x512xf32>
    %44 = arith.addf %41, %43 : vector<8x512xf32>
    %cst_31 = arith.constant 0.000000e+00 : f32
    %45 = vector.broadcast %cst_31 : f32 to vector<8x512xf32>
    %46 = arith.maximumf %44, %45 : vector<8x512xf32>
    %47 = arith.truncf %46 : vector<8x512xf32> to vector<8x512xbf16>
    %c0_32 = arith.constant 0 : index
    %c0_33 = arith.constant 0 : index
    %48 = vector.load %arg12[%c0_32, %c0_33] : memref<512x128xbf16, #tpu.memory_space<vmem>>, vector<512x128xbf16>
    %cst_34 = arith.constant dense<0.000000e+00> : vector<8x128xf32>
    %49 = tpu.matmul %47, %48, %cst_34 {dimension_numbers = #tpu.dot_dimension_numbers<[1], [0], [0], [1], [0, 0, 1, 1], [], []>} : vector<8x512xbf16>, vector<512x128xbf16>, vector<8x128xf32> -> vector<8x128xf32>
    %c0_35 = arith.constant 0 : index
    %c0_36 = arith.constant 0 : index
    %50 = vector.load %arg13[%c0_35, %c0_36] : memref<1x128xf32, #tpu.memory_space<vmem>>, vector<1x128xf32>
    %51 = vector.broadcast %50 : vector<1x128xf32> to vector<8x128xf32>
    %52 = arith.addf %49, %51 : vector<8x128xf32>
    %53 = arith.negf %52 : vector<8x128xf32>
    %54 = math.exp %53 : vector<8x128xf32>
    %cst_37 = arith.constant 1.000000e+00 : f32
    %55 = vector.broadcast %cst_37 : f32 to vector<8x128xf32>
    %56 = arith.addf %55, %54 : vector<8x128xf32>
    %57 = arith.divf %55, %56 : vector<8x128xf32>
    %c0_38 = arith.constant 0 : index
    %c0_39 = arith.constant 0 : index
    %58 = vector.load %arg14[%c0_38, %c0_39] : memref<8x128xf32, #tpu.memory_space<vmem>>, vector<8x128xf32>
    tpu.vector_store %arg14[%c0_38, %c0_39], %57 {strides = array<i32>} : memref<8x128xf32, #tpu.memory_space<vmem>>, vector<8x128xf32>,
    %c0_40 = arith.constant 0 : index
    %c0_41 = arith.constant 0 : index
    %59 = vector.load %arg15[%c0_40, %c0_41] : memref<8x128xf32, #tpu.memory_space<vmem>>, vector<8x128xf32>
    tpu.vector_store %arg15[%c0_40, %c0_41], %23 {strides = array<i32>} : memref<8x128xf32, #tpu.memory_space<vmem>>, vector<8x128xf32>,
    %c0_42 = arith.constant 0 : index
    %c0_43 = arith.constant 0 : index
    %60 = vector.load %arg16[%c0_42, %c0_43] : memref<8x128xf32, #tpu.memory_space<vmem>>, vector<8x128xf32>
    tpu.vector_store %arg16[%c0_42, %c0_43], %24 {strides = array<i32>} : memref<8x128xf32, #tpu.memory_space<vmem>>, vector<8x128xf32>,
    %c0_44 = arith.constant 0 : index
    %c0_45 = arith.constant 0 : index
    %61 = vector.load %arg17[%c0_44, %c0_45] : memref<8x128xf32, #tpu.memory_space<vmem>>, vector<8x128xf32>
    tpu.vector_store %arg17[%c0_44, %c0_45], %30 {strides = array<i32>} : memref<8x128xf32, #tpu.memory_space<vmem>>, vector<8x128xf32>,
    return
  }
}

</mosaic_0001>

<bundles_post_ra>
// kernel: vae_forward.1
= control target key start
LH: loop header
LB: loop body
LE: loop exit
PB: predicated region body
PF: predicated region fallthrough
CT: control target
= control target key end

     0   :  { %s15601_s0 = inlined_call_operand.vmem [shape: f32[8,128], index: 0, kind: input, shape index: {}]   ;;  %s15602_s1 = inlined_call_operand.vmem [shape: f32[8,128], index: 1, kind: input, shape index: {}]   ;;  %s15603_s2 = inlined_call_operand.hbm [shape: bf16[128,512], index: 2, kind: input, shape index: {}]   ;;  %s15604_s3 = inlined_call_operand.hbm [shape: f32[1,512], index: 3, kind: input, shape index: {}]   ;;  %s15605_s4 = inlined_call_operand.hbm [shape: bf16[512,2048], index: 4, kind: input, shape index: {}]   ;;  %s15606_s5 = inlined_call_operand.hbm [shape: f32[1,2048], index: 5, kind: input, shape index: {}]   ;;  %s15607_s6 = inlined_call_operand.hbm [shape: bf16[2048,256], index: 6, kind: input, shape index: {}]   ;;  %s15608_s7 = inlined_call_operand.hbm [shape: f32[1,256], index: 7, kind: input, shape index: {}]   ;;  %s15609_s8 = inlined_call_operand.hbm [shape: bf16[128,2048], index: 8, kind: input, shape index: {}]   ;;  %s15610_s9 = inlined_call_operand.hbm [shape: f32[1,2048], index: 9, kind: input, shape index: {}]   ;;  %s15611_s10 = inlined_call_operand.hbm [shape: bf16[2048,512], index: 10, kind: input, shape index: {}]   ;;  %s15612_s11 = inlined_call_operand.hbm [shape: f32[1,512], index: 11, kind: input, shape index: {}]   ;;  %s15613_s12 = inlined_call_operand.hbm [shape: bf16[512,128], index: 12, kind: input, shape index: {}]   ;;  %s15614_s13 = inlined_call_operand.hbm [shape: f32[1,128], index: 13, kind: input, shape index: {}]   ;;  %s15615_s14 = inlined_call_operand.hbm [shape: f32[8,128], index: 14, kind: output, shape index: {0}]   ;;  %s15616_s15 = inlined_call_operand.hbm [shape: f32[8,128], index: 15, kind: output, shape index: {1}]   ;;  %s15617_s16 = inlined_call_operand.hbm [shape: f32[8,128], index: 16, kind: output, shape index: {2}]   ;;  %s15618_s17 = inlined_call_operand.hbm [shape: f32[8,128], index: 17, kind: output, shape index: {3}]  }
   0x1   :  { %15619 = sst [smem:[#allocation38_spill]] %s15601_s0 }
   0x2   :  { %15620 = sst [smem:[#allocation39_spill]] %s15602_s1 }
   0x3   :  { %23 = vsyncpa [#allocation3], 0 }
   0x4   :  { %24 = vsyncpa [#allocation6], 0 }
   0x5   :  { %25 = vsyncpa [#allocation9], 0 }
   0x6   :  { %26 = vsyncpa [#allocation12], 0 }
   0x7   :  { %27 = vsyncpa [#allocation15], 0 }
   0x8   :  { %28 = vsyncpa [#allocation18], 0 }
   0x9   :  { %29 = vsyncpa [#allocation21], 0 }
   0xa   :  { %30 = vsyncpa [#allocation4], 0 }
   0xb   :  { %31 = vsyncpa [#allocation24], 0 }
   0xc   :  { %32 = vsyncpa [#allocation27], 0  ;;  %s14914_s24 = smov [#allocation5]   ;;  %s14915_s26 = smov [#allocation8]  }
   0xd   :  { %s55_s25 = sshll.u32 %s14914_s24, 4  ;;  %s77_s27 = sshll.u32 %s14915_s26, 4  ;;  %s56_s25 = int_to_ptr.vmem [resolvable:$true] %s55_s25  ;;  %s78_s27 = int_to_ptr.vmem [resolvable:$true] %s77_s27 }
   0xe   :  { %s14542_s0 = scalar_lea.hbm %s15604_s3, 64 }
   0xf   :  { %p14543_p0 = scmp.ne.s32.totalorder %s15604_s3, %s14542_s0  ;;  %p14546_p1 = scmp.lt.u32.totalorder %s14542_s0, %s15604_s3 }
  0x11   :  { %p14548_p2 = pnand %p14546_p1, %p14543_p0 }
  0x13   :  { %14551 = shalt.err (!%p14548_p2)
}
  0x14   :  { %s14552_s20 = scalar_lea.vmem %s56_s25, 64  ;;  %p14557_p4 = scmp.lt.s32.totalorder %s56_s25, %s56_s25 }
  0x15   :  { %p14553_p3 = scmp.ne.s32.totalorder %s56_s25, %s14552_s20  ;;  %p14558_p5 = scmp.lt.s32.totalorder %s14552_s20, %s14552_s20 }
  0x17   :  { %p14559_p6 = por %p14558_p5, %p14557_p4 }
  0x19   :  { %p14560_p7 = pnand %p14559_p6, %p14553_p3 }
  0x1b   :  { %14563 = shalt.err (!%p14560_p7)
}
  0x1c   :  { %58 = dma.hbm_to_vmem [thread:$0]  %s15604_s3, 64, %s56_s25, [#allocation6]  }
  0x1d   :  { %s14564_s26 = scalar_lea.hbm %s15606_s5, 256 }
  0x1e   :  { %p14565_p8 = scmp.ne.s32.totalorder %s15606_s5, %s14564_s26  ;;  %p14568_p9 = scmp.lt.u32.totalorder %s14564_s26, %s15606_s5 }
  0x20   :  { %p14570_p10 = pnand %p14568_p9, %p14565_p8 }
  0x22   :  { %14573 = shalt.err (!%p14570_p10)
}
  0x23   :  { %s14574_s18 = scalar_lea.vmem %s78_s27, 256  ;;  %p14579_p12 = scmp.lt.s32.totalorder %s78_s27, %s78_s27 }
  0x24   :  { %p14575_p11 = scmp.ne.s32.totalorder %s78_s27, %s14574_s18  ;;  %p14580_p13 = scmp.lt.s32.totalorder %s14574_s18, %s14574_s18 }
  0x26   :  { %p14581_p0 = por %p14580_p13, %p14579_p12 }
  0x28   :  { %p14582_p1 = pnand %p14581_p0, %p14575_p11 }
  0x2a   :  { %14585 = shalt.err (!%p14582_p1)
}
  0x2b   :  { %80 = dma.hbm_to_vmem [thread:$0]  %s15606_s5, 256, %s78_s27, [#allocation9]  }
  0x2c   :  { %s14916_s19 = smov [#allocation11]   ;;  %s14917_s20 = smov [#allocation14]  }
  0x2d   :  { %s99_s1 = sshll.u32 %s14916_s19, 4  ;;  %s121_s21 = sshll.u32 %s14917_s20, 4  ;;  %s100_s1 = int_to_ptr.vmem [resolvable:$true] %s99_s1  ;;  %s122_s21 = int_to_ptr.vmem [resolvable:$true] %s121_s21 }
  0x2e   :  { %s14586_s24 = scalar_lea.hbm %s15608_s7, 32 }
  0x2f   :  { %p14587_p2 = scmp.ne.s32.totalorder %s15608_s7, %s14586_s24  ;;  %p14590_p3 = scmp.lt.u32.totalorder %s14586_s24, %s15608_s7 }
  0x31   :  { %p14592_p4 = pnand %p14590_p3, %p14587_p2 }
  0x33   :  { %14595 = shalt.err (!%p14592_p4)
}
  0x34   :  { %s14596_s5 = scalar_lea.vmem %s100_s1, 32  ;;  %p14601_p6 = scmp.lt.s32.totalorder %s100_s1, %s100_s1 }
  0x35   :  { %p14597_p5 = scmp.ne.s32.totalorder %s100_s1, %s14596_s5  ;;  %p14602_p7 = scmp.lt.s32.totalorder %s14596_s5, %s14596_s5 }
  0x37   :  { %p14603_p8 = por %p14602_p7, %p14601_p6 }
  0x39   :  { %p14604_p9 = pnand %p14603_p8, %p14597_p5 }
  0x3b   :  { %14607 = shalt.err (!%p14604_p9)
}
  0x3c   :  { %102 = dma.hbm_to_vmem [thread:$0]  %s15608_s7, 32, %s100_s1, [#allocation12]  }
  0x3d   :  { %s14608_s25 = scalar_lea.hbm %s15610_s9, 256 }
  0x3e   :  { %p14609_p10 = scmp.ne.s32.totalorder %s15610_s9, %s14608_s25  ;;  %p14612_p11 = scmp.lt.u32.totalorder %s14608_s25, %s15610_s9 }
  0x40   :  { %p14614_p12 = pnand %p14612_p11, %p14609_p10 }
  0x42   :  { %14617 = shalt.err (!%p14614_p12)
}
  0x43   :  { %s14618_s24 = scalar_lea.vmem %s122_s21, 256  ;;  %p14623_p0 = scmp.lt.s32.totalorder %s122_s21, %s122_s21 }
  0x44   :  { %p14619_p13 = scmp.ne.s32.totalorder %s122_s21, %s14618_s24  ;;  %p14624_p1 = scmp.lt.s32.totalorder %s14618_s24, %s14618_s24 }
  0x46   :  { %p14625_p2 = por %p14624_p1, %p14623_p0 }
  0x48   :  { %p14626_p3 = pnand %p14625_p2, %p14619_p13 }
  0x4a   :  { %14629 = shalt.err (!%p14626_p3)
}
  0x4b   :  { %124 = dma.hbm_to_vmem [thread:$0]  %s15610_s9, 256, %s122_s21, [#allocation15]  }
  0x4c   :  { %s14918_s26 = smov [#allocation17]   ;;  %s14919_s29 = smov [#allocation2]  }
  0x4d   :  { %s143_s28 = sshll.u32 %s14918_s26, 4  ;;  %s42_s0 = sshll.u32 %s14919_s29, 4  ;;  %s144_s28 = int_to_ptr.vmem [resolvable:$true] %s143_s28  ;;  %s15076_s0 = int_to_ptr.vmem [resolvable:$true] %s42_s0 }
  0x4e   :  { %s14630_s30 = scalar_lea.hbm %s15612_s11, 64 }
  0x4f   :  { %p14631_p4 = scmp.ne.s32.totalorder %s15612_s11, %s14630_s30  ;;  %p14634_p5 = scmp.lt.u32.totalorder %s14630_s30, %s15612_s11 }
  0x51   :  { %p14636_p6 = pnand %p14634_p5, %p14631_p4 }
  0x53   :  { %14639 = shalt.err (!%p14636_p6)
}
  0x54   :  { %s14640_s9 = scalar_lea.vmem %s144_s28, 64  ;;  %p14645_p8 = scmp.lt.s32.totalorder %s144_s28, %s144_s28 }
  0x55   :  { %p14641_p7 = scmp.ne.s32.totalorder %s144_s28, %s14640_s9  ;;  %p14646_p9 = scmp.lt.s32.totalorder %s14640_s9, %s14640_s9 }
  0x57   :  { %p14647_p10 = por %p14646_p9, %p14645_p8 }
  0x59   :  { %p14648_p11 = pnand %p14647_p10, %p14641_p7 }
  0x5b   :  { %14651 = shalt.err (!%p14648_p11)
}
  0x5c   :  { %146 = dma.hbm_to_vmem [thread:$0]  %s15612_s11, 64, %s144_s28, [#allocation18]  }
  0x5d   :  { %s14652_s24 = scalar_lea.hbm %s15603_s2, 4096 }
  0x5e   :  { %p14653_p12 = scmp.ne.s32.totalorder %s15603_s2, %s14652_s24  ;;  %p14656_p13 = scmp.lt.u32.totalorder %s14652_s24, %s15603_s2 }
  0x60   :  { %p14658_p0 = pnand %p14656_p13, %p14653_p12 }
  0x62   :  { %14661 = shalt.err (!%p14658_p0)
}
  0x63   :  { %s14662_s5 = scalar_lea.vmem %s15076_s0, 4096  ;;  %p14667_p2 = scmp.lt.s32.totalorder %s15076_s0, %s15076_s0 }
  0x64   :  { %p14663_p1 = scmp.ne.s32.totalorder %s15076_s0, %s14662_s5  ;;  %p14668_p3 = scmp.lt.s32.totalorder %s14662_s5, %s14662_s5 }
  0x66   :  { %p14669_p4 = por %p14668_p3, %p14667_p2 }
  0x68   :  { %p14670_p5 = pnand %p14669_p4, %p14663_p1 }
  0x6a   :  { %14673 = shalt.err (!%p14670_p5)
}
  0x6b   :  { %s14920_s11 = smov 256   ;;  %s14921_s28 = smov 16  }
  0x6c   :  { %48 = dma.hbm_to_vmem [thread:$0]  %s15603_s2, 4096, %s15076_s0, [#allocation3], %s14920_s11, %s14920_s11, %s14921_s28  }
  0x6d   :  { %s14922_s18 = smov [#allocation7]   ;;  %s14674_s9 = scalar_lea.hbm %s15605_s4, 65536 }
  0x6e   :  { %s64_s3 = sshll.u32 %s14922_s18, 4  ;;  %p14675_p6 = scmp.ne.s32.totalorder %s15605_s4, %s14674_s9  ;;  %s65_s3 = int_to_ptr.vmem [resolvable:$true] %s64_s3 }
  0x6f   :  { %p14678_p7 = scmp.lt.u32.totalorder %s14674_s9, %s15605_s4 }
  0x71   :  { %p14680_p8 = pnand %p14678_p7, %p14675_p6 }
  0x73   :  { %14683 = shalt.err (!%p14680_p8)
}
  0x74   :  { %s14684_s24 = scalar_lea.vmem %s65_s3, 65536  ;;  %p14689_p10 = scmp.lt.s32.totalorder %s65_s3, %s65_s3 }
  0x75   :  { %p14685_p9 = scmp.ne.s32.totalorder %s65_s3, %s14684_s24  ;;  %p14690_p11 = scmp.lt.s32.totalorder %s14684_s24, %s14684_s24 }
  0x77   :  { %p14691_p12 = por %p14690_p11, %p14689_p10 }
  0x79   :  { %p14692_p13 = pnand %p14691_p12, %p14685_p9 }
  0x7b   :  { %14695 = shalt.err (!%p14692_p13)
}
  0x7c   :  { %s14923_s2 = smov 1024   ;;  %s14924_s0 = smov 64  }
  0x7d   :  { %70 = dma.hbm_to_vmem [thread:$0]  %s15605_s4, 65536, %s65_s3, [#allocation6], %s14923_s2, %s14923_s2, %s14924_s0  }
  0x7e   :  { %s14925_s26 = smov [#allocation10]   ;;  %s14696_s30 = scalar_lea.hbm %s15607_s6, 32768 }
  0x7f   :  { %s86_s29 = sshll.u32 %s14925_s26, 4  ;;  %p14697_p0 = scmp.ne.s32.totalorder %s15607_s6, %s14696_s30  ;;  %s87_s29 = int_to_ptr.vmem [resolvable:$true] %s86_s29 }
  0x80   :  { %p14700_p1 = scmp.lt.u32.totalorder %s14696_s30, %s15607_s6 }
  0x82   :  { %p14702_p2 = pnand %p14700_p1, %p14697_p0 }
  0x84   :  { %14705 = shalt.err (!%p14702_p2)
}
  0x85   :  { %s14706_s21 = scalar_lea.vmem %s87_s29, 32768  ;;  %p14711_p4 = scmp.lt.s32.totalorder %s87_s29, %s87_s29 }
  0x86   :  { %p14707_p3 = scmp.ne.s32.totalorder %s87_s29, %s14706_s21  ;;  %p14712_p5 = scmp.lt.s32.totalorder %s14706_s21, %s14706_s21 }
  0x88   :  { %p14713_p6 = por %p14712_p5, %p14711_p4 }
  0x8a   :  { %p14714_p7 = pnand %p14713_p6, %p14707_p3 }
  0x8c   :  { %14717 = shalt.err (!%p14714_p7)
}
  0x8d   :  { %s14926_s4 = smov 128   ;;  %s14927_s3 = smov 8  }
  0x8e   :  { %92 = dma.hbm_to_vmem [thread:$0]  %s15607_s6, 32768, %s87_s29, [#allocation9], %s14926_s4, %s14926_s4, %s14927_s3  }
  0x8f   :  { %s14928_s23 = smov [#allocation13]   ;;  %s14929_s7 = smov [#allocation16]  }
  0x90   :  { %s108_s24 = sshll.u32 %s14928_s23, 4  ;;  %s130_s1 = sshll.u32 %s14929_s7, 4  ;;  %s109_s24 = int_to_ptr.vmem [resolvable:$true] %s108_s24  ;;  %s15137_s1 = int_to_ptr.vmem [resolvable:$true] %s130_s1 }
  0x91   :  { %s14718_s27 = scalar_lea.hbm %s15609_s8, 16384 }
  0x92   :  { %p14719_p8 = scmp.ne.s32.totalorder %s15609_s8, %s14718_s27  ;;  %p14722_p9 = scmp.lt.u32.totalorder %s14718_s27, %s15609_s8 }
  0x94   :  { %p14724_p10 = pnand %p14722_p9, %p14719_p8 }
  0x96   :  { %14727 = shalt.err (!%p14724_p10)
}
  0x97   :  { %s14728_s6 = scalar_lea.vmem %s109_s24, 16384  ;;  %p14733_p12 = scmp.lt.s32.totalorder %s109_s24, %s109_s24 }
  0x98   :  { %p14729_p11 = scmp.ne.s32.totalorder %s109_s24, %s14728_s6  ;;  %p14734_p13 = scmp.lt.s32.totalorder %s14728_s6, %s14728_s6 }
  0x9a   :  { %p14735_p0 = por %p14734_p13, %p14733_p12 }
  0x9c   :  { %p14736_p1 = pnand %p14735_p0, %p14729_p11 }
  0x9e   :  { %14739 = shalt.err (!%p14736_p1)
}
  0x9f   :  { %114 = dma.hbm_to_vmem [thread:$0]  %s15609_s8, 16384, %s109_s24, [#allocation12], %s14923_s2, %s14923_s2, %s14924_s0  }
  0xa0   :  { %s14740_s3 = scalar_lea.hbm %s15611_s10, 65536 }
  0xa1   :  { %p14741_p2 = scmp.ne.s32.totalorder %s15611_s10, %s14740_s3  ;;  %p14744_p3 = scmp.lt.u32.totalorder %s14740_s3, %s15611_s10 }
  0xa3   :  { %p14746_p4 = pnand %p14744_p3, %p14741_p2 }
  0xa5   :  { %14749 = shalt.err (!%p14746_p4)
}
  0xa6   :  { %s14750_s26 = scalar_lea.vmem %s15137_s1, 65536  ;;  %p14755_p6 = scmp.lt.s32.totalorder %s15137_s1, %s15137_s1 }
  0xa7   :  { %p14751_p5 = scmp.ne.s32.totalorder %s15137_s1, %s14750_s26  ;;  %p14756_p7 = scmp.lt.s32.totalorder %s14750_s26, %s14750_s26 }
  0xa9   :  { %p14757_p8 = por %p14756_p7, %p14755_p6 }
  0xab   :  { %p14758_p9 = pnand %p14757_p8, %p14751_p5 }
  0xad   :  { %14761 = shalt.err (!%p14758_p9)
}
  0xae   :  { %136 = dma.hbm_to_vmem [thread:$0]  %s15611_s10, 65536, %s15137_s1, [#allocation15], %s14920_s11, %s14920_s11, %s14921_s28  }
  0xaf   :  { %s14930_s24 = smov [#allocation19]   ;;  %s14931_s27 = smov [#allocation20]  }
  0xb0   :  { %s152_s5 = sshll.u32 %s14930_s24, 4  ;;  %s165_s30 = sshll.u32 %s14931_s27, 4  ;;  %s153_s5 = int_to_ptr.vmem [resolvable:$true] %s152_s5  ;;  %s166_s30 = int_to_ptr.vmem [resolvable:$true] %s165_s30 }
  0xb1   :  { %s14762_s19 = scalar_lea.hbm %s15613_s12, 4096 }
  0xb2   :  { %p14763_p10 = scmp.ne.s32.totalorder %s15613_s12, %s14762_s19  ;;  %p14766_p11 = scmp.lt.u32.totalorder %s14762_s19, %s15613_s12 }
  0xb4   :  { %p14768_p12 = pnand %p14766_p11, %p14763_p10 }
  0xb6   :  { %14771 = shalt.err (!%p14768_p12)
}
  0xb7   :  { %s14772_s10 = scalar_lea.vmem %s153_s5, 4096  ;;  %p14777_p0 = scmp.lt.s32.totalorder %s153_s5, %s153_s5 }
  0xb8   :  { %p14773_p13 = scmp.ne.s32.totalorder %s153_s5, %s14772_s10  ;;  %p14778_p1 = scmp.lt.s32.totalorder %s14772_s10, %s14772_s10 }
  0xba   :  { %p14779_p2 = por %p14778_p1, %p14777_p0 }
  0xbc   :  { %p14780_p3 = pnand %p14779_p2, %p14773_p13 }
  0xbe   :  { %14783 = shalt.err (!%p14780_p3)
}
  0xbf   :  { %s14932_s11 = smov 4   ;;  %s14784_s20 = scalar_lea.hbm %s15614_s13, 16 }
  0xc0   :  { %158 = dma.hbm_to_vmem [thread:$0]  %s15613_s12, 4096, %s153_s5, [#allocation18], %s14924_s0, %s14924_s0, %s14932_s11  }
  0xc1   :  { %p14785_p4 = scmp.ne.s32.totalorder %s15614_s13, %s14784_s20  ;;  %p14788_p5 = scmp.lt.u32.totalorder %s14784_s20, %s15614_s13 }
  0xc3   :  { %p14790_p6 = pnand %p14788_p5, %p14785_p4 }
  0xc5   :  { %14793 = shalt.err (!%p14790_p6)
}
  0xc6   :  { %s14794_s8 = scalar_lea.vmem %s166_s30, 16  ;;  %s14798_s2 = scalar_lea.vmem %s166_s30, 32 }
  0xc7   :  { %p14795_p7 = scmp.ne.s32.totalorder %s166_s30, %s14794_s8  ;;  %p14799_p8 = scmp.lt.s32.totalorder %s166_s30, %s166_s30 }
  0xc8   :  { %p14800_p9 = scmp.lt.s32.totalorder %s14798_s2, %s14794_s8 }
  0xca   :  { %p14801_p10 = por %p14800_p9, %p14799_p8 }
  0xcc   :  { %p14802_p11 = pnand %p14801_p10, %p14795_p7 }
  0xce   :  { %14805 = shalt.err (!%p14802_p11)
}
  0xcf   :  { %168 = dma.hbm_to_vmem [thread:$0]  %s15614_s13, 16, %s166_s30, [#allocation21]  }
  0xd0   :  { %14894 = dma.done.wait [#allocation3], 4096  }
  0xd1   :  { %14895 = vsyncadd [#allocation3], 4294963200 }
  0xd2   :  { %14896 = dma.done.wait [#allocation6], 65600  }
  0xd3   :  { %14897 = vsyncadd [#allocation6], 4294901696 }
  0xd4   :  { %14898 = dma.done.wait [#allocation9], 33024  }
  0xd5   :  { %14899 = vsyncadd [#allocation9], 4294934272 }
  0xd6   :  { %14900 = dma.done.wait [#allocation12], 16416  }
  0xd7   :  { %14901 = vsyncadd [#allocation12], 4294950880 }
  0xd8   :  { %14902 = dma.done.wait [#allocation15], 65792  }
  0xd9   :  { %14903 = vsyncadd [#allocation15], 4294901504 }
  0xda   :  { %14904 = dma.done.wait [#allocation18], 4160  }
  0xdb   :  { %14905 = vsyncadd [#allocation18], 4294963136 }
  0xdc   :  { %14906 = dma.done.wait [#allocation21], 16  }
  0xdd   :  { %14907 = vsyncadd [#allocation21], 4294967280  ;;  %v14933_v0 = vmov 0   ;;  %v13302_v1 = vld [vmem:[#allocation2 + $0x4] ss:$16 sps:$4 sm:$0xff]   ;;  %s15621_s5 = sld [smem:[#allocation38_spill]] }
  0xde   :  { %454 = vmatprep.mubr.bf16.mxu1 %v14933_v0  ;;  %v13304_v2 = vld [vmem:[#allocation2] ss:$16 sps:$4 sm:$0xff]   ;;  %422 = vmatprep.subr.bf16.mxu1 %v13302_v1  ;;  %v13305_v3 = vld [vmem:[#allocation2 + $0x24] ss:$16 sps:$4 sm:$0xff]   ;;  %v13328_v19 = vld [vmem:[#allocation2 + $0xc] ss:$16 sps:$4 sm:$0xff]  }
  0xdf   :  { %423 = vmatpush1.bf16.msra.mxu1 %v13304_v2  ;;  %v13307_v4 = vld [vmem:[#allocation2 + $0x20] ss:$16 sps:$4 sm:$0xff]   ;;  %v13308_v5 = vld [vmem:[#allocation2 + $0x44] ss:$16 sps:$4 sm:$0xff]   ;;  %v13326_v29 = vld [vmem:[#allocation2 + $0x8] ss:$16 sps:$4 sm:$0xff]  }
  0xe0   :  { %424 = vmatprep.subr.bf16.mxu1 %v13305_v3  ;;  %v13310_v6 = vld [vmem:[#allocation2 + $0x40] ss:$16 sps:$4 sm:$0xff]   ;;  %v13311_v7 = vld [vmem:[#allocation2 + $0x64] ss:$16 sps:$4 sm:$0xff]   ;;  %v13331_v30 = vld [vmem:[#allocation2 + $0x2c] ss:$16 sps:$4 sm:$0xff]  }
  0xe1   :  { %v13313_v8 = vld [vmem:[#allocation2 + $0x60] ss:$16 sps:$4 sm:$0xff]   ;;  %v13314_v9 = vld [vmem:[#allocation2 + $0x84] ss:$16 sps:$4 sm:$0xff]   ;;  %v13329_v33 = vld [vmem:[#allocation2 + $0x28] ss:$16 sps:$4 sm:$0xff]  }
  0xe2   :  { %v13316_v10 = vld [vmem:[#allocation2 + $0x80] ss:$16 sps:$4 sm:$0xff]   ;;  %v13317_v11 = vld [vmem:[#allocation2 + $0xa4] ss:$16 sps:$4 sm:$0xff]   ;;  %v13334_v36 = vld [vmem:[#allocation2 + $0x4c] ss:$16 sps:$4 sm:$0xff]  }
  0xe3   :  { %425 = vmatpush1.bf16.msra.mxu1 %v13307_v4  ;;  %v13319_v12 = vld [vmem:[#allocation2 + $0xa0] ss:$16 sps:$4 sm:$0xff]   ;;  %v13320_v13 = vld [vmem:[#allocation2 + $0xc4] ss:$16 sps:$4 sm:$0xff]   ;;  %v13332_v40 = vld [vmem:[#allocation2 + $0x48] ss:$16 sps:$4 sm:$0xff]  }
  0xe4   :  { %426 = vmatprep.subr.bf16.mxu1 %v13308_v5  ;;  %v13322_v14 = vld [vmem:[#allocation2 + $0xc0] ss:$16 sps:$4 sm:$0xff]   ;;  %v13323_v15 = vld [vmem:[#allocation2 + $0xe4] ss:$16 sps:$4 sm:$0xff]   ;;  %v13337_v42 = vld [vmem:[#allocation2 + $0x6c] ss:$16 sps:$4 sm:$0xff]  }
  0xe5   :  { %v13325_v16 = vld [vmem:[#allocation2 + $0xe0] ss:$16 sps:$4 sm:$0xff]   ;;  %v768_v18 = vld [vmem:[#allocation7 + $0x800] sm:$0xff]  ;;  %v13340_v48 = vld [vmem:[#allocation2 + $0x8c] ss:$16 sps:$4 sm:$0xff]   ;;  %s15622_s18 = sld [smem:[#allocation39_spill]] }
  0xe6   :  { %v206_v17 = vld [vmem:[%s15621_s5] sm:$0xff]  ;;  %v13335_v46 = vld [vmem:[#allocation2 + $0x68] ss:$16 sps:$4 sm:$0xff]   ;;  %v13343_v52 = vld [vmem:[#allocation2 + $0xac] ss:$16 sps:$4 sm:$0xff]   ;;  %s14934_s25 = smov [#allocation23]  }
  0xe7   :  { %427 = vmatpush1.bf16.msra.mxu1 %v13310_v6  ;;  %v776_v20 = vld [vmem:[#allocation7 + $0x840] sm:$0xff]  ;;  %v15204_v25 = vpack.c.bf16 %v206_v17, %v206_v17  ;;  %v13346_v55 = vld [vmem:[#allocation2 + $0xcc] ss:$16 sps:$4 sm:$0xff]   ;;  %s11578_s19 = sshll.u32 %s14934_s25, 4  ;;  %s11579_s19 = int_to_ptr.vmem [resolvable:$true] %s11578_s19 }
  0xe8   :  { %428 = vmatprep.subr.bf16.mxu1 %v13311_v7  ;;  %v11913_v21 = vcombine.high %v768_v18, %v776_v20  ;;  %v11912_v22 = vcombine.low %v768_v18, %v776_v20  ;;  %v784_v23 = vld [vmem:[#allocation7 + $0x880] sm:$0xff]  ;;  %v13349_v57 = vld [vmem:[#allocation2 + $0xec] ss:$16 sps:$4 sm:$0xff]   ;;  %s14806_s6 = scalar_lea.vmem %s11579_s19, 128  ;;  %p14811_p13 = scmp.lt.s32.totalorder %s11579_s19, %s11579_s19 }
  0xe9   :  { %v792_v24 = vld [vmem:[#allocation7 + $0x8c0] sm:$0xff]  ;;  %p14807_p12 = scmp.ne.s32.totalorder %s11579_s19, %s14806_s6  ;;  %p14812_p0 = scmp.lt.s32.totalorder %s14806_s6, %s14806_s6 }
  0xea   :  { %v11929_v26 = vcombine.high %v784_v23, %v792_v24  ;;  %v800_v27 = vld [vmem:[#allocation7 + $0x900] sm:$0xff]  ;;  %3709 = vmatprep.subr.bf16.mxu0 %v11913_v21  ;;  %v11928_v31 = vcombine.low %v784_v23, %v792_v24 }
  0xeb   :  { %429 = vmatpush1.bf16.msra.mxu1 %v13313_v8  ;;  %v808_v28 = vld [vmem:[#allocation7 + $0x940] sm:$0xff]  ;;  %3710 = vmatpush1.bf16.msra.mxu0 %v11912_v22  ;;  %p14813_p1 = por %p14812_p0, %p14811_p13 }
  0xec   :  { %430 = vmatprep.subr.bf16.mxu1 %v13314_v9  ;;  %3711 = vmatprep.subr.bf16.mxu0 %v11929_v26  ;;  %v11945_v32 = vcombine.high %v800_v27, %v808_v28  ;;  %v816_v34 = vld [vmem:[#allocation7 + $0x980] sm:$0xff]  ;;  %v11944_v37 = vcombine.low %v800_v27, %v808_v28 }
  0xed   :  { %v824_v35 = vld [vmem:[#allocation7 + $0x9c0] sm:$0xff]  ;;  %p14814_p2 = pnand %p14813_p1, %p14807_p12 }
  0xee   :  { %v832_v38 = vld [vmem:[#allocation7 + $0xa00] sm:$0xff]  ;;  %v11961_v41 = vcombine.high %v816_v34, %v824_v35  ;;  %v11960_v43 = vcombine.low %v816_v34, %v824_v35 }
  0xef   :  { %431 = vmatpush1.bf16.msra.mxu1 %v13316_v10  ;;  %3712 = vmatpush1.bf16.msra.mxu0 %v11928_v31  ;;  %v840_v39 = vld [vmem:[#allocation7 + $0xa40] sm:$0xff] }
  0xf0   :  { %432 = vmatprep.subr.bf16.mxu1 %v13317_v11  ;;  %3713 = vmatprep.subr.bf16.mxu0 %v11945_v32  ;;  %v848_v44 = vld [vmem:[#allocation7 + $0xa80] sm:$0xff]  ;;  %v11977_v47 = vcombine.high %v832_v38, %v840_v39  ;;  %v11976_v49 = vcombine.low %v832_v38, %v840_v39 }
  0xf1   :  { %v856_v45 = vld [vmem:[#allocation7 + $0xac0] sm:$0xff] }
  0xf2   :  { %v13338_v50 = vld [vmem:[#allocation2 + $0x88] ss:$16 sps:$4 sm:$0xff]   ;;  %v11993_v51 = vcombine.high %v848_v44, %v856_v45  ;;  %v11992_v53 = vcombine.low %v848_v44, %v856_v45 }
  0xf3   :  { %433 = vmatpush1.bf16.msra.mxu1 %v13319_v12  ;;  %3714 = vmatpush1.bf16.msra.mxu0 %v11944_v37  ;;  %v13341_v54 = vld [vmem:[#allocation2 + $0xa8] ss:$16 sps:$4 sm:$0xff]  }
  0xf4   :  { %434 = vmatprep.subr.bf16.mxu1 %v13320_v13  ;;  %3715 = vmatprep.subr.bf16.mxu0 %v11961_v41  ;;  %v13344_v56 = vld [vmem:[#allocation2 + $0xc8] ss:$16 sps:$4 sm:$0xff]  }
  0xf5   :  { %v512_v58 = vld [vmem:[#allocation7] sm:$0xff] }
  0xf6   :  { %v520_v59 = vld [vmem:[#allocation7 + $0x40] sm:$0xff] }
  0xf7   :  { %435 = vmatpush1.bf16.msra.mxu1 %v13322_v14  ;;  %3716 = vmatpush1.bf16.msra.mxu0 %v11960_v43  ;;  %v13347_v60 = vld [vmem:[#allocation2 + $0xe8] ss:$16 sps:$4 sm:$0xff]   ;;  %v11657_v63 = vcombine.high %v512_v58, %v520_v59  ;;  %v11656_v1 = vcombine.low %v512_v58, %v520_v59 }
  0xf8   :  { %436 = vmatprep.subr.bf16.mxu1 %v13323_v15  ;;  %3717 = vmatprep.subr.bf16.mxu0 %v11977_v47  ;;  %v528_v61 = vld [vmem:[#allocation7 + $0x80] sm:$0xff] }
  0xf9   :  { %v536_v62 = vld [vmem:[#allocation7 + $0xc0] sm:$0xff] }
  0xfa   :  { %v544_v2 = vld [vmem:[#allocation7 + $0x100] sm:$0xff]  ;;  %v11673_v4 = vcombine.high %v528_v61, %v536_v62  ;;  %v11672_v5 = vcombine.low %v528_v61, %v536_v62 }
  0xfb   :  { %437 = vmatpush1.bf16.msra.mxu1 %v13325_v16  ;;  %3718 = vmatpush1.bf16.msra.mxu0 %v11976_v49  ;;  %v552_v3 = vld [vmem:[#allocation7 + $0x140] sm:$0xff] }
  0xfc   :  { %463 = vmatprep.subr.bf16.mxu1 %v13328_v19  ;;  %3719 = vmatprep.subr.bf16.mxu0 %v11993_v51  ;;  %v560_v6 = vld [vmem:[#allocation7 + $0x180] sm:$0xff]  ;;  %v11689_v8 = vcombine.high %v544_v2, %v552_v3  ;;  %v11688_v9 = vcombine.low %v544_v2, %v552_v3 }
  0xfd   :  { %v568_v7 = vld [vmem:[#allocation7 + $0x1c0] sm:$0xff] }
  0xfe   :  { %455 = vmatmul.mubr.bf16.vlgmr.msra.gmra.mrb[0].mxu1 %v15204_v25  ;;  %v576_v10 = vld [vmem:[#allocation7 + $0x200] sm:$0xff]  ;;  %v11705_v12 = vcombine.high %v560_v6, %v568_v7  ;;  %v11704_v13 = vcombine.low %v560_v6, %v568_v7  ;;  %v15209_v6 = vld [vmem:[#allocation7 + $0x8] sm:$0xff] }
  0xff   :  { %464 = vmatpush1.bf16.msra.mxu1 %v13326_v29  ;;  %495 = vmatprep.mubr.bf16.mxu1 %v14933_v0  ;;  %v584_v11 = vld [vmem:[#allocation7 + $0x240] sm:$0xff] }
 0x100   :  { %465 = vmatprep.subr.bf16.mxu1 %v13331_v30  ;;  %3720 = vmatpush1.bf16.msra.mxu0 %v11992_v53  ;;  %v592_v14 = vld [vmem:[#allocation7 + $0x280] sm:$0xff]  ;;  %v11721_v16 = vcombine.high %v576_v10, %v584_v11  ;;  %v11720_v17 = vcombine.low %v576_v10, %v584_v11 }
 0x101   :  { %v600_v15 = vld [vmem:[#allocation7 + $0x2c0] sm:$0xff] }
 0x102   :  { %v608_v18 = vld [vmem:[#allocation7 + $0x300] sm:$0xff]  ;;  %v11737_v20 = vcombine.high %v592_v14, %v600_v15  ;;  %v11736_v21 = vcombine.low %v592_v14, %v600_v15 }
 0x103   :  { %466 = vmatpush1.bf16.msra.mxu1 %v13329_v33  ;;  %v616_v19 = vld [vmem:[#allocation7 + $0x340] sm:$0xff] }
 0x104   :  { %467 = vmatprep.subr.bf16.mxu1 %v13334_v36  ;;  %v624_v22 = vld [vmem:[#allocation7 + $0x380] sm:$0xff]  ;;  %v11753_v24 = vcombine.high %v608_v18, %v616_v19 }
 0x105   :  { %v632_v23 = vld [vmem:[#allocation7 + $0x3c0] sm:$0xff] }
 0x106   :  { %v640_v26 = vld [vmem:[#allocation7 + $0x400] sm:$0xff]  ;;  %v11769_v28 = vcombine.high %v624_v22, %v632_v23  ;;  %v11768_v29 = vcombine.low %v624_v22, %v632_v23 }
 0x107   :  { %468 = vmatpush1.bf16.msra.mxu1 %v13332_v40  ;;  %v648_v27 = vld [vmem:[#allocation7 + $0x440] sm:$0xff] }
 0x108   :  { %469 = vmatprep.subr.bf16.mxu1 %v13337_v42  ;;  %v656_v30 = vld [vmem:[#allocation7 + $0x480] sm:$0xff]  ;;  %v11785_v32 = vcombine.high %v640_v26, %v648_v27  ;;  %v11784_v33 = vcombine.low %v640_v26, %v648_v27 }
 0x109   :  { %v664_v31 = vld [vmem:[#allocation7 + $0x4c0] sm:$0xff] }
 0x10a   :  { %v672_v34 = vld [vmem:[#allocation7 + $0x500] sm:$0xff]  ;;  %v11801_v36 = vcombine.high %v656_v30, %v664_v31  ;;  %v11800_v37 = vcombine.low %v656_v30, %v664_v31 }
 0x10b   :  { %470 = vmatpush1.bf16.msra.mxu1 %v13335_v46  ;;  %v680_v35 = vld [vmem:[#allocation7 + $0x540] sm:$0xff] }
 0x10c   :  { %471 = vmatprep.subr.bf16.mxu1 %v13340_v48  ;;  %v688_v38 = vld [vmem:[#allocation7 + $0x580] sm:$0xff]  ;;  %v11817_v40 = vcombine.high %v672_v34, %v680_v35  ;;  %v11816_v41 = vcombine.low %v672_v34, %v680_v35 }
 0x10d   :  { %v696_v39 = vld [vmem:[#allocation7 + $0x5c0] sm:$0xff] }
 0x10e   :  { %v704_v42 = vld [vmem:[#allocation7 + $0x600] sm:$0xff]  ;;  %v11833_v44 = vcombine.high %v688_v38, %v696_v39  ;;  %v11832_v45 = vcombine.low %v688_v38, %v696_v39 }
 0x10f   :  { %472 = vmatpush1.bf16.msra.mxu1 %v13338_v50  ;;  %v712_v43 = vld [vmem:[#allocation7 + $0x640] sm:$0xff] }
 0x110   :  { %473 = vmatprep.subr.bf16.mxu1 %v13343_v52  ;;  %v720_v46 = vld [vmem:[#allocation7 + $0x680] sm:$0xff]  ;;  %v11849_v48 = vcombine.high %v704_v42, %v712_v43  ;;  %v11848_v49 = vcombine.low %v704_v42, %v712_v43  ;;  %v15219_v42 = vld [vmem:[#allocation7 + $0x50] sm:$0xff] }
 0x111   :  { %v728_v47 = vld [vmem:[#allocation7 + $0x6c0] sm:$0xff] }
 0x112   :  { %v11865_v50 = vcombine.high %v720_v46, %v728_v47  ;;  %v736_v51 = vld [vmem:[#allocation7 + $0x700] sm:$0xff] }
 0x113   :  { %474 = vmatpush1.bf16.msra.mxu1 %v13341_v54  ;;  %v744_v52 = vld [vmem:[#allocation7 + $0x740] sm:$0xff]  ;;  %v11864_v54 = vcombine.low %v720_v46, %v728_v47  ;;  %v15227_v47 = vld [vmem:[#allocation5] sm:$0xf] }
 0x114   :  { %475 = vmatprep.subr.bf16.mxu1 %v13346_v55  ;;  %v864_v53 = vld [vmem:[#allocation7 + $0xb00] sm:$0xff]  ;;  %v11880_v62 = vcombine.low %v736_v51, %v744_v52 }
 0x115   :  { %v872_v55 = vld [vmem:[#allocation7 + $0xb40] sm:$0xff] }
 0x116   :  { %v12008_v58 = vcombine.low %v864_v53, %v872_v55  ;;  %v752_v59 = vld [vmem:[#allocation7 + $0x780] sm:$0xff] }
 0x117   :  { %476 = vmatpush1.bf16.msra.mxu1 %v13344_v56  ;;  %v11881_v56 = vcombine.high %v736_v51, %v744_v52  ;;  %v880_v61 = vld [vmem:[#allocation7 + $0xb80] sm:$0xff] }
 0x118   :  { %477 = vmatprep.subr.bf16.mxu1 %v13349_v57  ;;  %v12009_v57 = vcombine.high %v864_v53, %v872_v55  ;;  %v920_v14 = vld [vmem:[#allocation7 + $0xcc0] sm:$0xff] }
 0x119   :  { %v952_v22 = vld [vmem:[#allocation7 + $0xdc0] sm:$0xff] }
 0x11a   :  { %3721 = vmatprep.subr.bf16.mxu0 %v12009_v57  ;;  %v968_v26 = vld [vmem:[#allocation7 + $0xe40] sm:$0xff] }
 0x11b   :  { %478 = vmatpush1.bf16.msra.mxu1 %v13347_v60  ;;  %v760_v60 = vld [vmem:[#allocation7 + $0x7c0] sm:$0xff]  ;;  %3722 = vmatpush1.bf16.msra.mxu0 %v12008_v58 }
 0x11c   :  { %3668 = vmatprep.subr.bf16.mxu1 %v11657_v63  ;;  %v888_v63 = vld [vmem:[#allocation7 + $0xbc0] sm:$0xff]  ;;  %v11896_v7 = vcombine.low %v752_v59, %v760_v60 }
 0x11d   :  { %v12025_v2 = vcombine.high %v880_v61, %v888_v63  ;;  %v12024_v3 = vcombine.low %v880_v61, %v888_v63  ;;  %v984_v30 = vld [vmem:[#allocation7 + $0xec0] sm:$0xff]  ;;  %v537_v61 = vld [vmem:[#allocation7 + $0xc8] sm:$0xff] }
 0x11e   :  { %496 = vmatmul.mubr.bf16.vlgmr.msra.gmra.mrb[4].mxu1 %v15204_v25  ;;  %v11752_v25 = vcombine.low %v608_v18, %v616_v19  ;;  %v936_v18 = vld [vmem:[#allocation7 + $0xd40] sm:$0xff] }
 0x11f   :  { %3669 = vmatpush1.bf16.msra.mxu1 %v11656_v1  ;;  %v11897_v1 = vcombine.high %v752_v59, %v760_v60  ;;  %3723 = vmatprep.subr.bf16.mxu0 %v12025_v2  ;;  %v1000_v34 = vld [vmem:[#allocation7 + $0xf40] sm:$0xff]  ;;  %v529_v59 = vld [vmem:[#allocation7 + $0x88] sm:$0xff] }
 0x120   :  { %3670 = vmatprep.subr.bf16.mxu1 %v11673_v4  ;;  %v896_v4 = vld [vmem:[#allocation7 + $0xc00] sm:$0xff]  ;;  %3724 = vmatpush1.bf16.msra.mxu0 %v12024_v3  ;;  %v545_v2 = vld [vmem:[#allocation7 + $0x108] sm:$0xff] }
 0x121   :  { %v1016_v38 = vld [vmem:[#allocation7 + $0xfc0] sm:$0xff]  ;;  %v553_v3 = vld [vmem:[#allocation7 + $0x148] sm:$0xff] }
 0x123   :  { %3671 = vmatpush1.bf16.msra.mxu1 %v11672_v5  ;;  %v904_v5 = vld [vmem:[#allocation7 + $0xc40] sm:$0xff] }
 0x124   :  { %3672 = vmatprep.subr.bf16.mxu1 %v11689_v8  ;;  %v12041_v8 = vcombine.high %v896_v4, %v904_v5 }
 0x126   :  { %3725 = vmatprep.subr.bf16.mxu0 %v12041_v8  ;;  %v569_v8 = vld [vmem:[#allocation7 + $0x1c8] sm:$0xff] }
 0x127   :  { %3673 = vmatpush1.bf16.msra.mxu1 %v11688_v9  ;;  %v15211_v9 = vld [vmem:[#allocation7 + $0x48] sm:$0xff] }
 0x128   :  { %3674 = vmatprep.subr.bf16.mxu1 %v11705_v12  ;;  %v11658_v10 = vcombine.low %v15209_v6, %v15211_v9  ;;  %v11659_v11 = vcombine.high %v15209_v6, %v15211_v9  ;;  %v12040_v12 = vcombine.low %v896_v4, %v904_v5  ;;  %v11674_v4 = vcombine.low %v529_v59, %v537_v61  ;;  %v601_v6 = vld [vmem:[#allocation7 + $0x2c8] sm:$0xff] }
 0x129   :  { %v11691_v5 = vcombine.high %v545_v2, %v553_v3 }
 0x12a   :  { %3726 = vmatpush1.bf16.msra.mxu0 %v12040_v12 }
 0x12b   :  { %3675 = vmatpush1.bf16.msra.mxu1 %v11704_v13  ;;  %v912_v13 = vld [vmem:[#allocation7 + $0xc80] sm:$0xff] }
 0x12c   :  { %3676 = vmatprep.subr.bf16.mxu1 %v11721_v16  ;;  %v12057_v15 = vcombine.high %v912_v13, %v920_v14  ;;  %v12056_v16 = vcombine.low %v912_v13, %v920_v14  ;;  %v577_v13 = vld [vmem:[#allocation7 + $0x208] sm:$0xff] }
 0x12d   :  { %v585_v14 = vld [vmem:[#allocation7 + $0x248] sm:$0xff] }
 0x12e   :  { %3727 = vmatprep.subr.bf16.mxu0 %v12057_v15  ;;  %v11722_v9 = vcombine.low %v577_v13, %v585_v14 }
 0x12f   :  { %3677 = vmatpush1.bf16.msra.mxu1 %v11720_v17  ;;  %3728 = vmatpush1.bf16.msra.mxu0 %v12056_v16  ;;  %v928_v17 = vld [vmem:[#allocation7 + $0xd00] sm:$0xff]  ;;  %v11723_v16 = vcombine.high %v577_v13, %v585_v14  ;;  %v713_v13 = vld [vmem:[#allocation7 + $0x648] sm:$0xff]  ;;  %v578_v14 = vld [vmem:[#allocation7 + $0x210] sm:$0xff] }
 0x130   :  { %3678 = vmatprep.subr.bf16.mxu1 %v11737_v20  ;;  %v12073_v19 = vcombine.high %v928_v17, %v936_v18  ;;  %v12072_v20 = vcombine.low %v928_v17, %v936_v18  ;;  %v593_v17 = vld [vmem:[#allocation7 + $0x288] sm:$0xff] }
 0x131   :  { %v609_v18 = vld [vmem:[#allocation7 + $0x308] sm:$0xff] }
 0x132   :  { %3729 = vmatprep.subr.bf16.mxu0 %v12073_v19  ;;  %v617_v19 = vld [vmem:[#allocation7 + $0x348] sm:$0xff] }
 0x133   :  { %3679 = vmatpush1.bf16.msra.mxu1 %v11736_v21  ;;  %3730 = vmatpush1.bf16.msra.mxu0 %v12072_v20  ;;  %v944_v21 = vld [vmem:[#allocation7 + $0xd80] sm:$0xff] }
 0x134   :  { %3680 = vmatprep.subr.bf16.mxu1 %v11753_v24  ;;  %v12089_v23 = vcombine.high %v944_v21, %v952_v22  ;;  %v12088_v24 = vcombine.low %v944_v21, %v952_v22  ;;  %v11738_v21 = vcombine.low %v593_v17, %v601_v6 }
 0x136   :  { %3731 = vmatprep.subr.bf16.mxu0 %v12089_v23  ;;  %v11755_v23 = vcombine.high %v609_v18, %v617_v19 }
 0x137   :  { %3681 = vmatpush1.bf16.msra.mxu1 %v11752_v25  ;;  %3732 = vmatpush1.bf16.msra.mxu0 %v12088_v24  ;;  %v960_v25 = vld [vmem:[#allocation7 + $0xe00] sm:$0xff]  ;;  %v625_v24 = vld [vmem:[#allocation7 + $0x388] sm:$0xff] }
 0x138   :  { %3682 = vmatprep.subr.bf16.mxu1 %v11769_v28  ;;  %v12105_v27 = vcombine.high %v960_v25, %v968_v26  ;;  %v12104_v28 = vcombine.low %v960_v25, %v968_v26  ;;  %v633_v25 = vld [vmem:[#allocation7 + $0x3c8] sm:$0xff] }
 0x13a   :  { %3733 = vmatprep.subr.bf16.mxu0 %v12105_v27  ;;  %v11754_v27 = vcombine.low %v609_v18, %v617_v19  ;;  %v729_v18 = vld [vmem:[#allocation7 + $0x6c8] sm:$0xff]  ;;  %v594_v19 = vld [vmem:[#allocation7 + $0x290] sm:$0xff] }
 0x13b   :  { %3683 = vmatpush1.bf16.msra.mxu1 %v11768_v29  ;;  %3734 = vmatpush1.bf16.msra.mxu0 %v12104_v28  ;;  %v976_v29 = vld [vmem:[#allocation7 + $0xe80] sm:$0xff] }
 0x13c   :  { %3684 = vmatprep.subr.bf16.mxu1 %v11785_v32  ;;  %v12121_v31 = vcombine.high %v976_v29, %v984_v30  ;;  %v12120_v32 = vcombine.low %v976_v29, %v984_v30  ;;  %v11771_v29 = vcombine.high %v625_v24, %v633_v25  ;;  %v641_v30 = vld [vmem:[#allocation7 + $0x408] sm:$0xff] }
 0x13e   :  { %3735 = vmatprep.subr.bf16.mxu0 %v12121_v31 }
 0x13f   :  { %3685 = vmatpush1.bf16.msra.mxu1 %v11784_v33  ;;  %3736 = vmatpush1.bf16.msra.mxu0 %v12120_v32  ;;  %v992_v33 = vld [vmem:[#allocation7 + $0xf00] sm:$0xff]  ;;  %v649_v32 = vld [vmem:[#allocation7 + $0x448] sm:$0xff] }
 0x140   :  { %3686 = vmatprep.subr.bf16.mxu1 %v11801_v36  ;;  %v12137_v35 = vcombine.high %v992_v33, %v1000_v34  ;;  %v12136_v36 = vcombine.low %v992_v33, %v1000_v34 }
 0x142   :  { %3737 = vmatprep.subr.bf16.mxu0 %v12137_v35 }
 0x143   :  { %3687 = vmatpush1.bf16.msra.mxu1 %v11800_v37  ;;  %3738 = vmatpush1.bf16.msra.mxu0 %v12136_v36  ;;  %v1008_v37 = vld [vmem:[#allocation7 + $0xf80] sm:$0xff] }
 0x144   :  { %3688 = vmatprep.subr.bf16.mxu1 %v11817_v40  ;;  %v12153_v39 = vcombine.high %v1008_v37, %v1016_v38  ;;  %v12152_v40 = vcombine.low %v1008_v37, %v1016_v38  ;;  %v11770_v37 = vcombine.low %v625_v24, %v633_v25 }
 0x146   :  { %3739 = vmatprep.subr.bf16.mxu0 %v12153_v39 }
 0x147   :  { %3689 = vmatpush1.bf16.msra.mxu1 %v11816_v41  ;;  %3740 = vmatpush1.bf16.msra.mxu0 %v12152_v40  ;;  %v15217_v41 = vld [vmem:[#allocation7 + $0x10] sm:$0xff]  ;;  %v11787_v40 = vcombine.high %v641_v30, %v649_v32 }
 0x148   :  { %3690 = vmatprep.subr.bf16.mxu1 %v11833_v44  ;;  %v11660_v43 = vcombine.low %v15217_v41, %v15219_v42  ;;  %v11661_v44 = vcombine.high %v15217_v41, %v15219_v42 }
 0x14a   :  { %3832 = vmatprep.subr.bf16.mxu0 %v11661_v44  ;;  %v657_v44 = vld [vmem:[#allocation7 + $0x488] sm:$0xff] }
 0x14b   :  { %3691 = vmatpush1.bf16.msra.mxu1 %v11832_v45  ;;  %v242_v45 = vlaneseq }
 0x14c   :  { %3692 = vmatprep.subr.bf16.mxu1 %v11849_v48 }
 0x14d   :  { %v15225_v46 = vshrl.u32 %v242_v45, 7  ;;  %v665_v45 = vld [vmem:[#allocation7 + $0x4c8] sm:$0xff] }
 0x14f   :  { %3693 = vmatpush1.bf16.msra.mxu1 %v11848_v49  ;;  %v15230_v48 = vsub.s32 0, %v15225_v46  ;;  %v15233_v49 = vsub.s32 1, %v15225_v46  ;;  %v15250_v20 = vsub.s32 2, %v15225_v46  ;;  %v15253_v22 = vsub.s32 3, %v15225_v46 }
 0x150   :  { %3694 = vmatprep.subr.bf16.mxu1 %v11865_v50 }
 0x151   :  { %v245_v50 = vrot.slane %v15227_v47, %v15230_v48  ;;  %v249_v51 = vrot.slane %v15227_v47, %v15233_v49  ;;  %v253_v26 = vrot.slane %v15227_v47, %v15250_v20  ;;  %v257_v28 = vrot.slane %v15227_v47, %v15253_v22  ;;  %v538_v47 = vld [vmem:[#allocation7 + $0xd0] sm:$0xff] }
 0x153   :  { %3695 = vmatpush1.bf16.msra.mxu1 %v11864_v54 }
 0x154   :  { %3696 = vmatprep.subr.bf16.mxu1 %v11881_v56 }
 0x157   :  { %3697 = vmatpush1.bf16.msra.mxu1 %v11880_v62 }
 0x158   :  { %3698 = vmatprep.subr.bf16.mxu1 %v11897_v1  ;;  %v11675_v1 = vcombine.high %v529_v59, %v537_v61  ;;  %v11802_v61 = vcombine.low %v657_v44, %v665_v45 }
 0x15b   :  { %3699 = vmatpush1.bf16.msra.mxu1 %v11896_v7  ;;  %v561_v7 = vld [vmem:[#allocation7 + $0x188] sm:$0xff] }
 0x15c   :  { %3750 = vmatprep.subr.bf16.mxu1 %v11659_v11  ;;  %v11690_v11 = vcombine.low %v545_v2, %v553_v3  ;;  %v11707_v12 = vcombine.high %v561_v7, %v569_v8  ;;  %v11706_v15 = vcombine.low %v561_v7, %v569_v8  ;;  %v562_v7 = vld [vmem:[#allocation7 + $0x190] sm:$0xff] }
 0x15d   :  { %v570_v8 = vld [vmem:[#allocation7 + $0x1d0] sm:$0xff] }
 0x15e   :  { %v11709_v42 = vcombine.high %v562_v7, %v570_v8 }
 0x1d1   :  { %v456_v52 = vpop.f32.mrb[0].mxu1 }
 0x1d2   :  { %v457_v53 = vadd.f32 %v456_v52, %v245_v50  ;;  %v458_v54 = vpop.f32.mrb[1].mxu1  ;;  %v530_v50 = vld [vmem:[#allocation7 + $0x90] sm:$0xff] }
 0x1d3   :  { %v459_v55 = vadd.f32 %v458_v54, %v249_v51  ;;  %v460_v56 = vpop.f32.mrb[2].mxu1  ;;  %v11677_v59 = vcombine.high %v530_v50, %v538_v47 }
 0x1d4   :  { %v504_v57 = vmax.f32 %v457_v53, 0.0  ;;  %v461_v58 = vpop.f32.mrb[3].mxu1  ;;  %v11786_v53 = vcombine.low %v641_v30, %v649_v32  ;;  %v673_v56 = vld [vmem:[#allocation7 + $0x508] sm:$0xff]  ;;  %v618_v30 = vld [vmem:[#allocation7 + $0x350] sm:$0xff] }
 0x1d5   :  { %v505_v60 = vmax.f32 %v459_v55, 0.0  ;;  %v11803_v55 = vcombine.high %v657_v44, %v665_v45  ;;  %v546_v58 = vld [vmem:[#allocation7 + $0x110] sm:$0xff] }
 0x1d6   :  { %v15239_v62 = vpack.c.bf16 %v504_v57, %v504_v57  ;;  %v681_v57 = vld [vmem:[#allocation7 + $0x548] sm:$0xff] }
 0x1d7   :  { %v15241_v63 = vpack.c.bf16 %v505_v60, %v505_v60  ;;  %v554_v60 = vld [vmem:[#allocation7 + $0x150] sm:$0xff]  ;;  %v11819_v2 = vcombine.high %v673_v56, %v681_v57 }
 0x1d8   :  { %v11693_v3 = vcombine.high %v546_v58, %v554_v60 }
 0x1d9   :  { %3700 = vmatprep.mubr.bf16.mxu1 %v15241_v63 }
 0x1da   :  { %3701 = vmatmul.mubr.bf16.vlgmr.msra.gmra.mrb[8].mxu1 %v15239_v62 }
 0x1db   :  { %3751 = vmatpush1.bf16.msra.mxu1 %v11658_v10  ;;  %3782 = vmatprep.mubr.bf16.mxu1 %v15241_v63  ;;  %v11739_v10 = vcombine.high %v593_v17, %v601_v6  ;;  %v11708_v17 = vcombine.low %v562_v7, %v570_v8  ;;  %v809_v7 = vld [vmem:[#allocation7 + $0x948] sm:$0xff]  ;;  %v674_v8 = vld [vmem:[#allocation7 + $0x510] sm:$0xff] }
 0x1dc   :  { %3752 = vmatprep.subr.bf16.mxu1 %v11675_v1  ;;  %v11676_v1 = vcombine.low %v530_v50, %v538_v47  ;;  %v769_v50 = vld [vmem:[#allocation7 + $0x808] sm:$0xff]  ;;  %v642_v47 = vld [vmem:[#allocation7 + $0x410] sm:$0xff] }
 0x1df   :  { %3753 = vmatpush1.bf16.msra.mxu1 %v11674_v4  ;;  %v689_v4 = vld [vmem:[#allocation7 + $0x588] sm:$0xff] }
 0x1e0   :  { %3754 = vmatprep.subr.bf16.mxu1 %v11691_v5  ;;  %v697_v5 = vld [vmem:[#allocation7 + $0x5c8] sm:$0xff] }
 0x1e1   :  { %v11835_v41 = vcombine.high %v689_v4, %v697_v5 }
 0x1e3   :  { %3755 = vmatpush1.bf16.msra.mxu1 %v11690_v11  ;;  %v11818_v11 = vcombine.low %v673_v56, %v681_v57 }
 0x1e4   :  { %3756 = vmatprep.subr.bf16.mxu1 %v11707_v12  ;;  %v11692_v12 = vcombine.low %v546_v58, %v554_v60  ;;  %v793_v60 = vld [vmem:[#allocation7 + $0x8c8] sm:$0xff] }
 0x1e7   :  { %3757 = vmatpush1.bf16.msra.mxu1 %v11706_v15  ;;  %v586_v15 = vld [vmem:[#allocation7 + $0x250] sm:$0xff] }
 0x1e8   :  { %3758 = vmatprep.subr.bf16.mxu1 %v11723_v16  ;;  %v11834_v16 = vcombine.low %v689_v4, %v697_v5  ;;  %v11724_v24 = vcombine.low %v578_v14, %v586_v15  ;;  %v801_v5 = vld [vmem:[#allocation7 + $0x908] sm:$0xff] }
 0x1eb   :  { %3759 = vmatpush1.bf16.msra.mxu1 %v11722_v9  ;;  %v11725_v9 = vcombine.high %v578_v14, %v586_v15  ;;  %v825_v14 = vld [vmem:[#allocation7 + $0x9c8] sm:$0xff]  ;;  %v690_v15 = vld [vmem:[#allocation7 + $0x590] sm:$0xff] }
 0x1ec   :  { %3760 = vmatprep.subr.bf16.mxu1 %v11739_v10  ;;  %v721_v10 = vld [vmem:[#allocation7 + $0x688] sm:$0xff] }
 0x1ed   :  { %v11867_v25 = vcombine.high %v721_v10, %v729_v18 }
 0x1ef   :  { %3761 = vmatpush1.bf16.msra.mxu1 %v11738_v21  ;;  %v602_v21 = vld [vmem:[#allocation7 + $0x2d0] sm:$0xff] }
 0x1f0   :  { %3762 = vmatprep.subr.bf16.mxu1 %v11755_v23  ;;  %v11740_v32 = vcombine.low %v594_v19, %v602_v21 }
 0x1f1   :  { %v497_v31 = vpop.f32.mrb[4].mxu1 }
 0x1f2   :  { %v498_v33 = vadd.f32 %v497_v31, %v253_v26  ;;  %v499_v34 = vpop.f32.mrb[5].mxu1  ;;  %v11741_v26 = vcombine.high %v594_v19, %v602_v21  ;;  %v11866_v31 = vcombine.low %v721_v10, %v729_v18  ;;  %v833_v18 = vld [vmem:[#allocation7 + $0xa08] sm:$0xff]  ;;  %v706_v21 = vld [vmem:[#allocation7 + $0x610] sm:$0xff] }
 0x1f3   :  { %v500_v35 = vadd.f32 %v499_v34, %v257_v28  ;;  %3763 = vmatpush1.bf16.msra.mxu1 %v11754_v27  ;;  %v501_v36 = vpop.f32.mrb[6].mxu1  ;;  %v737_v27 = vld [vmem:[#allocation7 + $0x708] sm:$0xff] }
 0x1f4   :  { %v506_v38 = vmax.f32 %v498_v33, 0.0  ;;  %v502_v39 = vpop.f32.mrb[7].mxu1  ;;  %3764 = vmatprep.subr.bf16.mxu1 %v11771_v29  ;;  %v745_v28 = vld [vmem:[#allocation7 + $0x748] sm:$0xff]  ;;  %v610_v29 = vld [vmem:[#allocation7 + $0x310] sm:$0xff] }
 0x1f5   :  { %v507_v51 = vmax.f32 %v500_v35, 0.0  ;;  %v11883_v33 = vcombine.high %v737_v27, %v745_v28  ;;  %v11757_v34 = vcombine.high %v610_v29, %v618_v30  ;;  %v753_v35 = vld [vmem:[#allocation7 + $0x788] sm:$0xff]  ;;  %v11882_v39 = vcombine.low %v737_v27, %v745_v28 }
 0x1f6   :  { %v15261_v54 = vpack.c.bf16 %v506_v38, %v506_v38  ;;  %v761_v36 = vld [vmem:[#allocation7 + $0x7c8] sm:$0xff]  ;;  %v634_v38 = vld [vmem:[#allocation7 + $0x3d0] sm:$0xff] }
 0x1f7   :  { %v15259_v52 = vpack.c.bf16 %v507_v51, %v507_v51  ;;  %3765 = vmatpush1.bf16.msra.mxu1 %v11770_v37  ;;  %v626_v37 = vld [vmem:[#allocation7 + $0x390] sm:$0xff]  ;;  %v11899_v44 = vcombine.high %v753_v35, %v761_v36  ;;  %v777_v51 = vld [vmem:[#allocation7 + $0x848] sm:$0xff] }
 0x1f8   :  { %3766 = vmatprep.subr.bf16.mxu1 %v11787_v40  ;;  %v11756_v40 = vcombine.low %v610_v29, %v618_v30  ;;  %v11773_v45 = vcombine.high %v626_v37, %v634_v38  ;;  %v11772_v56 = vcombine.low %v626_v37, %v634_v38  ;;  %v11915_v57 = vcombine.high %v769_v50, %v777_v51  ;;  %v841_v19 = vld [vmem:[#allocation7 + $0xa48] sm:$0xff]  ;;  %v722_v30 = vld [vmem:[#allocation7 + $0x690] sm:$0xff] }
 0x1f9   :  { %3741 = vmatprep.mubr.bf16.mxu0 %v15259_v52  ;;  %v11979_v27 = vcombine.high %v833_v18, %v841_v19  ;;  %v849_v28 = vld [vmem:[#allocation7 + $0xa88] sm:$0xff]  ;;  %v738_v38 = vld [vmem:[#allocation7 + $0x710] sm:$0xff] }
 0x1fa   :  { %3742 = vmatmul.mubr.bf16.vlgmr.msra.gmra.mrb[0].mxu0 %v15261_v54  ;;  %v857_v29 = vld [vmem:[#allocation7 + $0xac8] sm:$0xff] }
 0x1fb   :  { %3767 = vmatpush1.bf16.msra.mxu1 %v11786_v53  ;;  %3833 = vmatpush1.bf16.msra.mxu0 %v11660_v43  ;;  %v705_v43 = vld [vmem:[#allocation7 + $0x608] sm:$0xff]  ;;  %v650_v53 = vld [vmem:[#allocation7 + $0x450] sm:$0xff] }
 0x1fc   :  { %3864 = vmatprep.mubr.bf16.mxu0 %v15241_v63  ;;  %3768 = vmatprep.subr.bf16.mxu1 %v11803_v55  ;;  %v11851_v6 = vcombine.high %v705_v43, %v713_v13  ;;  %v11850_v23 = vcombine.low %v705_v43, %v713_v13  ;;  %v11898_v55 = vcombine.low %v753_v35, %v761_v36  ;;  %v817_v13 = vld [vmem:[#allocation7 + $0x988] sm:$0xff] }
 0x1fd   :  { %3834 = vmatprep.subr.bf16.mxu0 %v11677_v59  ;;  %v11789_v58 = vcombine.high %v642_v47, %v650_v53  ;;  %v785_v59 = vld [vmem:[#allocation7 + $0x888] sm:$0xff]  ;;  %v11947_v43 = vcombine.high %v801_v5, %v809_v7  ;;  %v11963_v10 = vcombine.high %v817_v13, %v825_v14  ;;  %v11995_v35 = vcombine.high %v849_v28, %v857_v29 }
 0x1fe   :  { %v11931_v4 = vcombine.high %v785_v59, %v793_v60  ;;  %v865_v36 = vld [vmem:[#allocation7 + $0xb08] sm:$0xff] }
 0x1ff   :  { %3769 = vmatpush1.bf16.msra.mxu1 %v11802_v61  ;;  %3835 = vmatpush1.bf16.msra.mxu0 %v11676_v1  ;;  %v658_v61 = vld [vmem:[#allocation7 + $0x490] sm:$0xff]  ;;  %v873_v37 = vld [vmem:[#allocation7 + $0xb48] sm:$0xff] }
 0x200   :  { %3770 = vmatprep.subr.bf16.mxu1 %v11819_v2  ;;  %3836 = vmatprep.subr.bf16.mxu0 %v11693_v3  ;;  %v666_v1 = vld [vmem:[#allocation7 + $0x4d0] sm:$0xff]  ;;  %v11914_v2 = vcombine.low %v769_v50, %v777_v51  ;;  %v11788_v3 = vcombine.low %v642_v47, %v650_v53  ;;  %v12011_v50 = vcombine.high %v865_v36, %v873_v37  ;;  %v881_v51 = vld [vmem:[#allocation7 + $0xb88] sm:$0xff] }
 0x201   :  { %v889_v47 = vld [vmem:[#allocation7 + $0xbc8] sm:$0xff] }
 0x203   :  { %3771 = vmatpush1.bf16.msra.mxu1 %v11818_v11  ;;  %3837 = vmatpush1.bf16.msra.mxu0 %v11692_v12  ;;  %v11805_v11 = vcombine.high %v658_v61, %v666_v1  ;;  %v682_v12 = vld [vmem:[#allocation7 + $0x550] sm:$0xff] }
 0x204   :  { %3772 = vmatprep.subr.bf16.mxu1 %v11835_v41  ;;  %3838 = vmatprep.subr.bf16.mxu0 %v11709_v42  ;;  %v11930_v41 = vcombine.low %v785_v59, %v793_v60  ;;  %v11804_v42 = vcombine.low %v658_v61, %v666_v1  ;;  %v12027_v59 = vcombine.high %v881_v51, %v889_v47  ;;  %v897_v60 = vld [vmem:[#allocation7 + $0xc08] sm:$0xff]  ;;  %v770_v1 = vld [vmem:[#allocation7 + $0x810] sm:$0xff] }
 0x205   :  { %v905_v61 = vld [vmem:[#allocation7 + $0xc48] sm:$0xff] }
 0x207   :  { %3773 = vmatpush1.bf16.msra.mxu1 %v11834_v16  ;;  %3839 = vmatpush1.bf16.msra.mxu0 %v11708_v17  ;;  %v11821_v16 = vcombine.high %v674_v8, %v682_v12  ;;  %v698_v17 = vld [vmem:[#allocation7 + $0x5d0] sm:$0xff] }
 0x208   :  { %3774 = vmatprep.subr.bf16.mxu1 %v11851_v6  ;;  %3840 = vmatprep.subr.bf16.mxu0 %v11725_v9  ;;  %v11946_v6 = vcombine.low %v801_v5, %v809_v7  ;;  %v11820_v9 = vcombine.low %v674_v8, %v682_v12  ;;  %v12043_v7 = vcombine.high %v897_v60, %v905_v61  ;;  %v913_v8 = vld [vmem:[#allocation7 + $0xc88] sm:$0xff]  ;;  %v786_v12 = vld [vmem:[#allocation7 + $0x890] sm:$0xff] }
 0x20b   :  { %3775 = vmatpush1.bf16.msra.mxu1 %v11850_v23  ;;  %3841 = vmatpush1.bf16.msra.mxu0 %v11724_v24  ;;  %v11837_v23 = vcombine.high %v690_v15, %v698_v17  ;;  %v714_v24 = vld [vmem:[#allocation7 + $0x650] sm:$0xff] }
 0x20c   :  { %3776 = vmatprep.subr.bf16.mxu1 %v11867_v25  ;;  %3842 = vmatprep.subr.bf16.mxu0 %v11741_v26  ;;  %v11962_v25 = vcombine.low %v817_v13, %v825_v14  ;;  %v11836_v26 = vcombine.low %v690_v15, %v698_v17  ;;  %v929_v14 = vld [vmem:[#allocation7 + $0xd08] sm:$0xff] }
 0x20d   :  { %v937_v15 = vld [vmem:[#allocation7 + $0xd48] sm:$0xff] }
 0x20f   :  { %3777 = vmatpush1.bf16.msra.mxu1 %v11866_v31  ;;  %3843 = vmatpush1.bf16.msra.mxu0 %v11740_v32  ;;  %v11853_v31 = vcombine.high %v706_v21, %v714_v24  ;;  %v730_v32 = vld [vmem:[#allocation7 + $0x6d0] sm:$0xff] }
 0x210   :  { %3778 = vmatprep.subr.bf16.mxu1 %v11883_v33  ;;  %3844 = vmatprep.subr.bf16.mxu0 %v11757_v34  ;;  %v11978_v33 = vcombine.low %v833_v18, %v841_v19  ;;  %v11852_v34 = vcombine.low %v706_v21, %v714_v24  ;;  %v12075_v19 = vcombine.high %v929_v14, %v937_v15  ;;  %v945_v21 = vld [vmem:[#allocation7 + $0xd88] sm:$0xff]  ;;  %v818_v24 = vld [vmem:[#allocation7 + $0x990] sm:$0xff] }
 0x213   :  { %3779 = vmatpush1.bf16.msra.mxu1 %v11882_v39  ;;  %3845 = vmatpush1.bf16.msra.mxu0 %v11756_v40  ;;  %v11869_v39 = vcombine.high %v722_v30, %v730_v32  ;;  %v746_v40 = vld [vmem:[#allocation7 + $0x750] sm:$0xff] }
 0x214   :  { %3780 = vmatprep.subr.bf16.mxu1 %v11899_v44  ;;  %3846 = vmatprep.subr.bf16.mxu0 %v11773_v45  ;;  %v11994_v44 = vcombine.low %v849_v28, %v857_v29  ;;  %v11868_v45 = vcombine.low %v722_v30, %v730_v32  ;;  %v11885_v53 = vcombine.high %v738_v38, %v746_v40  ;;  %v961_v30 = vld [vmem:[#allocation7 + $0xe08] sm:$0xff]  ;;  %v834_v32 = vld [vmem:[#allocation7 + $0xa10] sm:$0xff] }
 0x217   :  { %3781 = vmatpush1.bf16.msra.mxu1 %v11898_v55  ;;  %3847 = vmatpush1.bf16.msra.mxu0 %v11772_v56  ;;  %v754_v55 = vld [vmem:[#allocation7 + $0x790] sm:$0xff] }
 0x218   :  { %3791 = vmatprep.subr.bf16.mxu1 %v11915_v57  ;;  %3848 = vmatprep.subr.bf16.mxu0 %v11789_v58  ;;  %v762_v56 = vld [vmem:[#allocation7 + $0x7d0] sm:$0xff]  ;;  %v12010_v57 = vcombine.low %v865_v36, %v873_v37  ;;  %v11884_v58 = vcombine.low %v738_v38, %v746_v40  ;;  %v977_v38 = vld [vmem:[#allocation7 + $0xe88] sm:$0xff] }
 0x219   :  { %v11900_v5 = vcombine.low %v754_v55, %v762_v56  ;;  %v850_v40 = vld [vmem:[#allocation7 + $0xa90] sm:$0xff] }
 0x21a   :  { %3783 = vmatmul.mubr.bf16.vlgmr.msra.gmra.mrb[12].mxu1 %v15239_v62 }
 0x21b   :  { %3792 = vmatpush1.bf16.msra.mxu1 %v11914_v2  ;;  %3823 = vmatprep.mubr.bf16.mxu1 %v15259_v52  ;;  %v11901_v2 = vcombine.high %v754_v55, %v762_v56  ;;  %v1001_v55 = vld [vmem:[#allocation7 + $0xf48] sm:$0xff]  ;;  %v866_v56 = vld [vmem:[#allocation7 + $0xb10] sm:$0xff] }
 0x21c   :  { %3849 = vmatpush1.bf16.msra.mxu0 %v11788_v3  ;;  %3793 = vmatprep.subr.bf16.mxu1 %v11931_v4  ;;  %v778_v3 = vld [vmem:[#allocation7 + $0x850] sm:$0xff]  ;;  %v12026_v4 = vcombine.low %v881_v51, %v889_v47 }
 0x21d   :  { %3850 = vmatprep.subr.bf16.mxu0 %v11805_v11  ;;  %v921_v11 = vld [vmem:[#allocation7 + $0xcc8] sm:$0xff]  ;;  %v11916_v13 = vcombine.low %v770_v1, %v778_v3 }
 0x21e   :  { %v12059_v17 = vcombine.high %v913_v8, %v921_v11 }
 0x21f   :  { %3794 = vmatpush1.bf16.msra.mxu1 %v11930_v41  ;;  %v11917_v41 = vcombine.high %v770_v1, %v778_v3  ;;  %v1009_v1 = vld [vmem:[#allocation7 + $0xf88] sm:$0xff]  ;;  %v882_v3 = vld [vmem:[#allocation7 + $0xb90] sm:$0xff] }
 0x220   :  { %3851 = vmatpush1.bf16.msra.mxu0 %v11804_v42  ;;  %3795 = vmatprep.subr.bf16.mxu1 %v11947_v43  ;;  %v794_v42 = vld [vmem:[#allocation7 + $0x8d0] sm:$0xff]  ;;  %v12042_v43 = vcombine.low %v897_v60, %v905_v61 }
 0x221   :  { %3852 = vmatprep.subr.bf16.mxu0 %v11821_v16  ;;  %v802_v16 = vld [vmem:[#allocation7 + $0x910] sm:$0xff]  ;;  %v11932_v18 = vcombine.low %v786_v12, %v794_v42 }
 0x223   :  { %3796 = vmatpush1.bf16.msra.mxu1 %v11946_v6  ;;  %v11933_v6 = vcombine.high %v786_v12, %v794_v42  ;;  %v898_v12 = vld [vmem:[#allocation7 + $0xc10] sm:$0xff]  ;;  %v515_v42 = vld [vmem:[#allocation7 + $0x18] sm:$0xff] }
 0x224   :  { %3853 = vmatpush1.bf16.msra.mxu0 %v11820_v9  ;;  %3797 = vmatprep.subr.bf16.mxu1 %v11963_v10  ;;  %v810_v9 = vld [vmem:[#allocation7 + $0x950] sm:$0xff]  ;;  %v12058_v10 = vcombine.low %v913_v8, %v921_v11 }
 0x225   :  { %3854 = vmatprep.subr.bf16.mxu0 %v11837_v23  ;;  %v953_v23 = vld [vmem:[#allocation7 + $0xdc8] sm:$0xff]  ;;  %v11948_v28 = vcombine.low %v802_v16, %v810_v9 }
 0x226   :  { %v12091_v29 = vcombine.high %v945_v21, %v953_v23 }
 0x227   :  { %3798 = vmatpush1.bf16.msra.mxu1 %v11962_v25  ;;  %v11949_v25 = vcombine.high %v802_v16, %v810_v9  ;;  %v531_v9 = vld [vmem:[#allocation7 + $0x98] sm:$0xff] }
 0x228   :  { %3855 = vmatpush1.bf16.msra.mxu0 %v11836_v26  ;;  %3799 = vmatprep.subr.bf16.mxu1 %v11979_v27  ;;  %v826_v26 = vld [vmem:[#allocation7 + $0x9d0] sm:$0xff]  ;;  %v12074_v27 = vcombine.low %v929_v14, %v937_v15 }
 0x229   :  { %3856 = vmatprep.subr.bf16.mxu0 %v11853_v31  ;;  %v969_v31 = vld [vmem:[#allocation7 + $0xe48] sm:$0xff]  ;;  %v11964_v36 = vcombine.low %v818_v24, %v826_v26 }
 0x22a   :  { %v12107_v37 = vcombine.high %v961_v30, %v969_v31 }
 0x22b   :  { %3800 = vmatpush1.bf16.msra.mxu1 %v11978_v33  ;;  %v11965_v33 = vcombine.high %v818_v24, %v826_v26  ;;  %v930_v24 = vld [vmem:[#allocation7 + $0xd10] sm:$0xff]  ;;  %v547_v26 = vld [vmem:[#allocation7 + $0x118] sm:$0xff] }
 0x22c   :  { %3857 = vmatpush1.bf16.msra.mxu0 %v11852_v34  ;;  %3801 = vmatprep.subr.bf16.mxu1 %v11995_v35  ;;  %v842_v34 = vld [vmem:[#allocation7 + $0xa50] sm:$0xff]  ;;  %v12090_v35 = vcombine.low %v945_v21, %v953_v23 }
 0x22d   :  { %3858 = vmatprep.subr.bf16.mxu0 %v11869_v39  ;;  %v985_v39 = vld [vmem:[#allocation7 + $0xec8] sm:$0xff]  ;;  %v11980_v51 = vcombine.low %v834_v32, %v842_v34 }
 0x22e   :  { %v12123_v47 = vcombine.high %v977_v38, %v985_v39 }
 0x22f   :  { %3802 = vmatpush1.bf16.msra.mxu1 %v11994_v44  ;;  %v11981_v44 = vcombine.high %v834_v32, %v842_v34  ;;  %v946_v32 = vld [vmem:[#allocation7 + $0xd90] sm:$0xff]  ;;  %v563_v34 = vld [vmem:[#allocation7 + $0x198] sm:$0xff] }
 0x230   :  { %3859 = vmatpush1.bf16.msra.mxu0 %v11868_v45  ;;  %3803 = vmatprep.subr.bf16.mxu1 %v12011_v50  ;;  %v858_v45 = vld [vmem:[#allocation7 + $0xad0] sm:$0xff]  ;;  %v12106_v50 = vcombine.low %v961_v30, %v969_v31 }
 0x231   :  { %3860 = vmatprep.subr.bf16.mxu0 %v11885_v53  ;;  %v993_v53 = vld [vmem:[#allocation7 + $0xf08] sm:$0xff]  ;;  %v11996_v60 = vcombine.low %v850_v40, %v858_v45 }
 0x232   :  { %v12139_v61 = vcombine.high %v993_v53, %v1001_v55 }
 0x233   :  { %3804 = vmatpush1.bf16.msra.mxu1 %v12010_v57  ;;  %v11997_v57 = vcombine.high %v850_v40, %v858_v45  ;;  %v962_v40 = vld [vmem:[#allocation7 + $0xe10] sm:$0xff]  ;;  %v579_v45 = vld [vmem:[#allocation7 + $0x218] sm:$0xff] }
 0x234   :  { %3861 = vmatpush1.bf16.msra.mxu0 %v11884_v58  ;;  %3805 = vmatprep.subr.bf16.mxu1 %v12027_v59  ;;  %v874_v58 = vld [vmem:[#allocation7 + $0xb50] sm:$0xff]  ;;  %v12122_v59 = vcombine.low %v977_v38, %v985_v39 }
 0x235   :  { %3862 = vmatprep.subr.bf16.mxu0 %v11901_v2  ;;  %v1017_v2 = vld [vmem:[#allocation7 + $0xfc8] sm:$0xff]  ;;  %v12012_v8 = vcombine.low %v866_v56, %v874_v58 }
 0x236   :  { %v12155_v11 = vcombine.high %v1009_v1, %v1017_v2  ;;  %v12154_v14 = vcombine.low %v1009_v1, %v1017_v2 }
 0x237   :  { %3806 = vmatpush1.bf16.msra.mxu1 %v12026_v4  ;;  %v12013_v4 = vcombine.high %v866_v56, %v874_v58  ;;  %v978_v56 = vld [vmem:[#allocation7 + $0xe90] sm:$0xff]  ;;  %v595_v58 = vld [vmem:[#allocation7 + $0x298] sm:$0xff] }
 0x238   :  { %3863 = vmatpush1.bf16.msra.mxu0 %v11900_v5  ;;  %3807 = vmatprep.subr.bf16.mxu1 %v12043_v7  ;;  %v890_v5 = vld [vmem:[#allocation7 + $0xbd0] sm:$0xff]  ;;  %v12138_v7 = vcombine.low %v993_v53, %v1001_v55 }
 0x239   :  { %3873 = vmatprep.subr.bf16.mxu0 %v11917_v41  ;;  %v906_v41 = vld [vmem:[#allocation7 + $0xc50] sm:$0xff]  ;;  %v12028_v15 = vcombine.low %v882_v3, %v890_v5 }
 0x23a   :  { %v12044_v21 = vcombine.low %v898_v12, %v906_v41 }
 0x23b   :  { %3865 = vmatmul.mubr.bf16.vlgmr.msra.gmra.mrb[4].mxu0 %v15239_v62  ;;  %3808 = vmatpush1.bf16.msra.mxu1 %v12042_v43  ;;  %v12029_v43 = vcombine.high %v882_v3, %v890_v5  ;;  %v994_v3 = vld [vmem:[#allocation7 + $0xf10] sm:$0xff]  ;;  %v611_v5 = vld [vmem:[#allocation7 + $0x318] sm:$0xff] }
 0x23c   :  { %3874 = vmatpush1.bf16.msra.mxu0 %v11916_v13  ;;  %3905 = vmatprep.mubr.bf16.mxu0 %v15259_v52  ;;  %v523_v13 = vld [vmem:[#allocation7 + $0x58] sm:$0xff] }
 0x23d   :  { %3809 = vmatprep.subr.bf16.mxu1 %v12059_v17  ;;  %3875 = vmatprep.subr.bf16.mxu0 %v11933_v6  ;;  %v11663_v16 = vcombine.high %v515_v42, %v523_v13  ;;  %v914_v17 = vld [vmem:[#allocation7 + $0xc90] sm:$0xff] }
 0x23e   :  { %v922_v6 = vld [vmem:[#allocation7 + $0xcd0] sm:$0xff] }
 0x23f   :  { %3810 = vmatpush1.bf16.msra.mxu1 %v12058_v10  ;;  %v12045_v10 = vcombine.high %v898_v12, %v906_v41  ;;  %v12060_v30 = vcombine.low %v914_v17, %v922_v6 }
 0x240   :  { %3876 = vmatpush1.bf16.msra.mxu0 %v11932_v18  ;;  %3811 = vmatprep.subr.bf16.mxu1 %v12075_v19  ;;  %v539_v18 = vld [vmem:[#allocation7 + $0xd8] sm:$0xff]  ;;  %v11662_v19 = vcombine.low %v515_v42, %v523_v13  ;;  %v1010_v42 = vld [vmem:[#allocation7 + $0xf90] sm:$0xff] }
 0x241   :  { %3877 = vmatprep.subr.bf16.mxu0 %v11949_v25  ;;  %v11679_v23 = vcombine.high %v531_v9, %v539_v18  ;;  %v938_v25 = vld [vmem:[#allocation7 + $0xd50] sm:$0xff]  ;;  %v627_v13 = vld [vmem:[#allocation7 + $0x398] sm:$0xff] }
 0x242   :  { %v12076_v38 = vcombine.low %v930_v24, %v938_v25 }
 0x243   :  { %3812 = vmatpush1.bf16.msra.mxu1 %v12074_v27  ;;  %v12061_v27 = vcombine.high %v914_v17, %v922_v6 }
 0x244   :  { %3878 = vmatpush1.bf16.msra.mxu0 %v11948_v28  ;;  %3813 = vmatprep.subr.bf16.mxu1 %v12091_v29  ;;  %v555_v28 = vld [vmem:[#allocation7 + $0x158] sm:$0xff]  ;;  %v11678_v29 = vcombine.low %v531_v9, %v539_v18  ;;  %v516_v18 = vld [vmem:[#allocation7 + $0x20] sm:$0xff] }
 0x245   :  { %3879 = vmatprep.subr.bf16.mxu0 %v11965_v33  ;;  %v11695_v31 = vcombine.high %v547_v26, %v555_v28  ;;  %v954_v33 = vld [vmem:[#allocation7 + $0xdd0] sm:$0xff]  ;;  %v643_v9 = vld [vmem:[#allocation7 + $0x418] sm:$0xff] }
 0x246   :  { %v12092_v53 = vcombine.low %v946_v32, %v954_v33 }
 0x247   :  { %3814 = vmatpush1.bf16.msra.mxu1 %v12090_v35  ;;  %v12077_v35 = vcombine.high %v930_v24, %v938_v25 }
 0x248   :  { %3880 = vmatpush1.bf16.msra.mxu0 %v11964_v36  ;;  %3815 = vmatprep.subr.bf16.mxu1 %v12107_v37  ;;  %v571_v36 = vld [vmem:[#allocation7 + $0x1d8] sm:$0xff]  ;;  %v11694_v37 = vcombine.low %v547_v26, %v555_v28  ;;  %v532_v28 = vld [vmem:[#allocation7 + $0xa0] sm:$0xff] }
 0x249   :  { %3881 = vmatprep.subr.bf16.mxu0 %v11981_v44  ;;  %v11711_v39 = vcombine.high %v563_v34, %v571_v36  ;;  %v970_v44 = vld [vmem:[#allocation7 + $0xe50] sm:$0xff]  ;;  %v659_v26 = vld [vmem:[#allocation7 + $0x498] sm:$0xff] }
 0x24a   :  { %v12108_v1 = vcombine.low %v962_v40, %v970_v44 }
 0x24b   :  { %3816 = vmatpush1.bf16.msra.mxu1 %v12106_v50  ;;  %v12093_v50 = vcombine.high %v946_v32, %v954_v33 }
 0x24c   :  { %3882 = vmatpush1.bf16.msra.mxu0 %v11980_v51  ;;  %3817 = vmatprep.subr.bf16.mxu1 %v12123_v47  ;;  %v587_v51 = vld [vmem:[#allocation7 + $0x258] sm:$0xff]  ;;  %v11710_v47 = vcombine.low %v563_v34, %v571_v36 }
 0x24d   :  { %3883 = vmatprep.subr.bf16.mxu0 %v11997_v57  ;;  %v11727_v55 = vcombine.high %v579_v45, %v587_v51  ;;  %v986_v57 = vld [vmem:[#allocation7 + $0xed0] sm:$0xff]  ;;  %v683_v36 = vld [vmem:[#allocation7 + $0x558] sm:$0xff] }
 0x24e   :  { %v12124_v12 = vcombine.low %v978_v56, %v986_v57 }
 0x24f   :  { %3818 = vmatpush1.bf16.msra.mxu1 %v12122_v59  ;;  %v12109_v59 = vcombine.high %v962_v40, %v970_v44 }
 0x250   :  { %3884 = vmatpush1.bf16.msra.mxu0 %v11996_v60  ;;  %3819 = vmatprep.subr.bf16.mxu1 %v12139_v61  ;;  %v603_v60 = vld [vmem:[#allocation7 + $0x2d8] sm:$0xff]  ;;  %v11726_v61 = vcombine.low %v579_v45, %v587_v51 }
 0x251   :  { %3885 = vmatprep.subr.bf16.mxu0 %v12013_v4  ;;  %v11743_v2 = vcombine.high %v595_v58, %v603_v60  ;;  %v1002_v4 = vld [vmem:[#allocation7 + $0xf50] sm:$0xff]  ;;  %v699_v51 = vld [vmem:[#allocation7 + $0x5d8] sm:$0xff] }
 0x252   :  { %v12140_v17 = vcombine.low %v994_v3, %v1002_v4 }
 0x253   :  { %3820 = vmatpush1.bf16.msra.mxu1 %v12138_v7  ;;  %v12125_v7 = vcombine.high %v978_v56, %v986_v57 }
 0x254   :  { %3886 = vmatpush1.bf16.msra.mxu0 %v12012_v8  ;;  %3821 = vmatprep.subr.bf16.mxu1 %v12155_v11  ;;  %v619_v8 = vld [vmem:[#allocation7 + $0x358] sm:$0xff]  ;;  %v11742_v11 = vcombine.low %v595_v58, %v603_v60 }
 0x255   :  { %3887 = vmatprep.subr.bf16.mxu0 %v12029_v43  ;;  %v11759_v41 = vcombine.high %v611_v5, %v619_v8  ;;  %v1018_v43 = vld [vmem:[#allocation7 + $0xfd0] sm:$0xff]  ;;  %v715_v60 = vld [vmem:[#allocation7 + $0x658] sm:$0xff] }
 0x256   :  { %v12156_v24 = vcombine.low %v1010_v42, %v1018_v43 }
 0x257   :  { %3822 = vmatpush1.bf16.msra.mxu1 %v12154_v14  ;;  %v12141_v14 = vcombine.high %v994_v3, %v1002_v4 }
 0x258   :  { %3888 = vmatpush1.bf16.msra.mxu0 %v12028_v15  ;;  %3914 = vmatprep.subr.bf16.mxu1 %v11663_v16  ;;  %v635_v15 = vld [vmem:[#allocation7 + $0x3d8] sm:$0xff]  ;;  %v11758_v16 = vcombine.low %v611_v5, %v619_v8 }
 0x259   :  { %3889 = vmatprep.subr.bf16.mxu0 %v12045_v10  ;;  %v11775_v6 = vcombine.high %v627_v13, %v635_v15  ;;  %v651_v10 = vld [vmem:[#allocation7 + $0x458] sm:$0xff] }
 0x25a   :  { %3824 = vmatmul.mubr.bf16.vlgmr.msra.gmra.mrb[12].mxu1 %v15261_v54  ;;  %v11791_v25 = vcombine.high %v643_v9, %v651_v10  ;;  %v731_v8 = vld [vmem:[#allocation7 + $0x6d8] sm:$0xff] }
 0x25b   :  { %3915 = vmatpush1.bf16.msra.mxu1 %v11662_v19  ;;  %3946 = vmatprep.mubr.bf16.mxu1 %v15241_v63  ;;  %v12157_v19 = vcombine.high %v1010_v42, %v1018_v43 }
 0x25c   :  { %3890 = vmatpush1.bf16.msra.mxu0 %v12044_v21  ;;  %3916 = vmatprep.subr.bf16.mxu1 %v11679_v23  ;;  %v524_v21 = vld [vmem:[#allocation7 + $0x60] sm:$0xff]  ;;  %v11774_v23 = vcombine.low %v627_v13, %v635_v15  ;;  %v747_v15 = vld [vmem:[#allocation7 + $0x758] sm:$0xff] }
 0x25d   :  { %3891 = vmatprep.subr.bf16.mxu0 %v12061_v27  ;;  %v667_v27 = vld [vmem:[#allocation7 + $0x4d8] sm:$0xff]  ;;  %v11664_v32 = vcombine.low %v516_v18, %v524_v21 }
 0x25e   :  { %v11807_v33 = vcombine.high %v659_v26, %v667_v27 }
 0x25f   :  { %3917 = vmatpush1.bf16.msra.mxu1 %v11678_v29  ;;  %v11665_v29 = vcombine.high %v516_v18, %v524_v21  ;;  %v763_v21 = vld [vmem:[#allocation7 + $0x7d8] sm:$0xff] }
 0x260   :  { %3892 = vmatpush1.bf16.msra.mxu0 %v12060_v30  ;;  %3918 = vmatprep.subr.bf16.mxu1 %v11695_v31  ;;  %v540_v30 = vld [vmem:[#allocation7 + $0xe0] sm:$0xff]  ;;  %v11790_v31 = vcombine.low %v643_v9, %v651_v10 }
 0x261   :  { %3893 = vmatprep.subr.bf16.mxu0 %v12077_v35  ;;  %v11681_v34 = vcombine.high %v532_v28, %v540_v30  ;;  %v675_v35 = vld [vmem:[#allocation7 + $0x518] sm:$0xff]  ;;  %v11680_v40 = vcombine.low %v532_v28, %v540_v30 }
 0x262   :  { %v11823_v44 = vcombine.high %v675_v35, %v683_v36  ;;  %v779_v30 = vld [vmem:[#allocation7 + $0x858] sm:$0xff] }
 0x263   :  { %3919 = vmatpush1.bf16.msra.mxu1 %v11694_v37  ;;  %v548_v37 = vld [vmem:[#allocation7 + $0x120] sm:$0xff] }
 0x264   :  { %3894 = vmatpush1.bf16.msra.mxu0 %v12076_v38  ;;  %3920 = vmatprep.subr.bf16.mxu1 %v11711_v39  ;;  %v556_v38 = vld [vmem:[#allocation7 + $0x160] sm:$0xff]  ;;  %v11806_v39 = vcombine.low %v659_v26, %v667_v27 }
 0x265   :  { %3895 = vmatprep.subr.bf16.mxu0 %v12093_v50  ;;  %v11697_v45 = vcombine.high %v548_v37, %v556_v38  ;;  %v691_v50 = vld [vmem:[#allocation7 + $0x598] sm:$0xff]  ;;  %v11696_v56 = vcombine.low %v548_v37, %v556_v38 }
 0x266   :  { %v11839_v57 = vcombine.high %v691_v50, %v699_v51  ;;  %v787_v37 = vld [vmem:[#allocation7 + $0x898] sm:$0xff] }
 0x267   :  { %3921 = vmatpush1.bf16.msra.mxu1 %v11710_v47  ;;  %v564_v47 = vld [vmem:[#allocation7 + $0x1a0] sm:$0xff]  ;;  %v795_v38 = vld [vmem:[#allocation7 + $0x8d8] sm:$0xff] }
 0x268   :  { %3896 = vmatpush1.bf16.msra.mxu0 %v12092_v53  ;;  %3922 = vmatprep.subr.bf16.mxu1 %v11727_v55  ;;  %v572_v53 = vld [vmem:[#allocation7 + $0x1e0] sm:$0xff]  ;;  %v11822_v55 = vcombine.low %v675_v35, %v683_v36 }
 0x269   :  { %3897 = vmatprep.subr.bf16.mxu0 %v12109_v59  ;;  %v11713_v58 = vcombine.high %v564_v47, %v572_v53  ;;  %v707_v59 = vld [vmem:[#allocation7 + $0x618] sm:$0xff]  ;;  %v11712_v3 = vcombine.low %v564_v47, %v572_v53 }
 0x26a   :  { %v11855_v4 = vcombine.high %v707_v59, %v715_v60  ;;  %v803_v47 = vld [vmem:[#allocation7 + $0x918] sm:$0xff] }
 0x26b   :  { %3923 = vmatpush1.bf16.msra.mxu1 %v11726_v61  ;;  %v580_v61 = vld [vmem:[#allocation7 + $0x220] sm:$0xff]  ;;  %v811_v53 = vld [vmem:[#allocation7 + $0x958] sm:$0xff] }
 0x26c   :  { %3898 = vmatpush1.bf16.msra.mxu0 %v12108_v1  ;;  %3924 = vmatprep.subr.bf16.mxu1 %v11743_v2  ;;  %v588_v1 = vld [vmem:[#allocation7 + $0x260] sm:$0xff]  ;;  %v11838_v2 = vcombine.low %v691_v50, %v699_v51  ;;  %v11935_v50 = vcombine.high %v787_v37, %v795_v38 }
 0x26d   :  { %3899 = vmatprep.subr.bf16.mxu0 %v12125_v7  ;;  %v11729_v5 = vcombine.high %v580_v61, %v588_v1  ;;  %v723_v7 = vld [vmem:[#allocation7 + $0x698] sm:$0xff]  ;;  %v11728_v42 = vcombine.low %v580_v61, %v588_v1 }
 0x26e   :  { %v11871_v43 = vcombine.high %v723_v7, %v731_v8  ;;  %v819_v61 = vld [vmem:[#allocation7 + $0x998] sm:$0xff] }
 0x26f   :  { %3925 = vmatpush1.bf16.msra.mxu1 %v11742_v11  ;;  %v596_v11 = vld [vmem:[#allocation7 + $0x2a0] sm:$0xff]  ;;  %v827_v1 = vld [vmem:[#allocation7 + $0x9d8] sm:$0xff] }
 0x270   :  { %3900 = vmatpush1.bf16.msra.mxu0 %v12124_v12  ;;  %3926 = vmatprep.subr.bf16.mxu1 %v11759_v41  ;;  %v604_v12 = vld [vmem:[#allocation7 + $0x2e0] sm:$0xff]  ;;  %v11854_v41 = vcombine.low %v707_v59, %v715_v60  ;;  %v11951_v59 = vcombine.high %v803_v47, %v811_v53 }
 0x271   :  { %3901 = vmatprep.subr.bf16.mxu0 %v12141_v14  ;;  %v11745_v13 = vcombine.high %v596_v11, %v604_v12  ;;  %v739_v14 = vld [vmem:[#allocation7 + $0x718] sm:$0xff]  ;;  %v11744_v9 = vcombine.low %v596_v11, %v604_v12 }
 0x272   :  { %v11887_v10 = vcombine.high %v739_v14, %v747_v15  ;;  %v835_v11 = vld [vmem:[#allocation7 + $0xa18] sm:$0xff] }
 0x273   :  { %3927 = vmatpush1.bf16.msra.mxu1 %v11758_v16  ;;  %v612_v16 = vld [vmem:[#allocation7 + $0x320] sm:$0xff]  ;;  %v843_v12 = vld [vmem:[#allocation7 + $0xa58] sm:$0xff] }
 0x274   :  { %3902 = vmatpush1.bf16.msra.mxu0 %v12140_v17  ;;  %3928 = vmatprep.subr.bf16.mxu1 %v11775_v6  ;;  %v620_v17 = vld [vmem:[#allocation7 + $0x360] sm:$0xff]  ;;  %v11870_v6 = vcombine.low %v723_v7, %v731_v8  ;;  %v11967_v7 = vcombine.high %v819_v61, %v827_v1 }
 0x275   :  { %3903 = vmatprep.subr.bf16.mxu0 %v12157_v19  ;;  %v11761_v18 = vcombine.high %v612_v16, %v620_v17  ;;  %v755_v19 = vld [vmem:[#allocation7 + $0x798] sm:$0xff]  ;;  %v11760_v26 = vcombine.low %v612_v16, %v620_v17 }
 0x276   :  { %v11903_v27 = vcombine.high %v755_v19, %v763_v21  ;;  %v851_v16 = vld [vmem:[#allocation7 + $0xa98] sm:$0xff] }
 0x277   :  { %3929 = vmatpush1.bf16.msra.mxu1 %v11774_v23  ;;  %v628_v23 = vld [vmem:[#allocation7 + $0x3a0] sm:$0xff]  ;;  %v859_v17 = vld [vmem:[#allocation7 + $0xad8] sm:$0xff] }
 0x278   :  { %3904 = vmatpush1.bf16.msra.mxu0 %v12156_v24  ;;  %3930 = vmatprep.subr.bf16.mxu1 %v11791_v25  ;;  %v636_v24 = vld [vmem:[#allocation7 + $0x3e0] sm:$0xff]  ;;  %v11886_v25 = vcombine.low %v739_v14, %v747_v15  ;;  %v11983_v14 = vcombine.high %v835_v11, %v843_v12 }
 0x279   :  { %3996 = vmatprep.subr.bf16.mxu0 %v11665_v29  ;;  %v11777_v28 = vcombine.high %v628_v23, %v636_v24  ;;  %v771_v29 = vld [vmem:[#allocation7 + $0x818] sm:$0xff] }
 0x27a   :  { %v11919_v35 = vcombine.high %v771_v29, %v779_v30 }
 0x27b   :  { %3906 = vmatmul.mubr.bf16.vlgmr.msra.gmra.mrb[4].mxu0 %v15261_v54  ;;  %3931 = vmatpush1.bf16.msra.mxu1 %v11790_v31  ;;  %v644_v31 = vld [vmem:[#allocation7 + $0x420] sm:$0xff] }
 0x27c   :  { %3997 = vmatpush1.bf16.msra.mxu0 %v11664_v32  ;;  %4028 = vmatprep.mubr.bf16.mxu0 %v15241_v63  ;;  %v652_v32 = vld [vmem:[#allocation7 + $0x460] sm:$0xff] }
 0x27d   :  { %3932 = vmatprep.subr.bf16.mxu1 %v11807_v33  ;;  %3998 = vmatprep.subr.bf16.mxu0 %v11681_v34  ;;  %v11902_v33 = vcombine.low %v755_v19, %v763_v21  ;;  %v11776_v34 = vcombine.low %v628_v23, %v636_v24  ;;  %v11793_v36 = vcombine.high %v644_v31, %v652_v32  ;;  %v867_v23 = vld [vmem:[#allocation7 + $0xb18] sm:$0xff] }
 0x27e   :  { %v11999_v19 = vcombine.high %v851_v16, %v859_v17  ;;  %v875_v24 = vld [vmem:[#allocation7 + $0xb58] sm:$0xff] }
 0x27f   :  { %3933 = vmatpush1.bf16.msra.mxu1 %v11806_v39  ;;  %v660_v39 = vld [vmem:[#allocation7 + $0x4a0] sm:$0xff] }
 0x280   :  { %3999 = vmatpush1.bf16.msra.mxu0 %v11680_v40  ;;  %3934 = vmatprep.subr.bf16.mxu1 %v11823_v44  ;;  %v668_v40 = vld [vmem:[#allocation7 + $0x4e0] sm:$0xff]  ;;  %v11918_v44 = vcombine.low %v771_v29, %v779_v30  ;;  %v12015_v29 = vcombine.high %v867_v23, %v875_v24 }
 0x281   :  { %4000 = vmatprep.subr.bf16.mxu0 %v11697_v45  ;;  %v11792_v45 = vcombine.low %v644_v31, %v652_v32  ;;  %v11809_v51 = vcombine.high %v660_v39, %v668_v40  ;;  %v883_v32 = vld [vmem:[#allocation7 + $0xb98] sm:$0xff] }
 0x283   :  { %3935 = vmatpush1.bf16.msra.mxu1 %v11822_v55  ;;  %v676_v55 = vld [vmem:[#allocation7 + $0x520] sm:$0xff] }
 0x284   :  { %4001 = vmatpush1.bf16.msra.mxu0 %v11696_v56  ;;  %3936 = vmatprep.subr.bf16.mxu1 %v11839_v57  ;;  %v684_v56 = vld [vmem:[#allocation7 + $0x560] sm:$0xff]  ;;  %v11934_v57 = vcombine.low %v787_v37, %v795_v38  ;;  %v12014_v38 = vcombine.low %v867_v23, %v875_v24 }
 0x285   :  { %4002 = vmatprep.subr.bf16.mxu0 %v11713_v58  ;;  %v11808_v58 = vcombine.low %v660_v39, %v668_v40  ;;  %v11825_v60 = vcombine.high %v676_v55, %v684_v56  ;;  %v836_v23 = vld [vmem:[#allocation7 + $0xa20] sm:$0xff] }
 0x286   :  { %v844_v24 = vld [vmem:[#allocation7 + $0xa60] sm:$0xff] }
 0x287   :  { %3937 = vmatpush1.bf16.msra.mxu1 %v11838_v2  ;;  %v692_v2 = vld [vmem:[#allocation7 + $0x5a0] sm:$0xff] }
 0x288   :  { %4003 = vmatpush1.bf16.msra.mxu0 %v11712_v3  ;;  %3938 = vmatprep.subr.bf16.mxu1 %v11855_v4  ;;  %v700_v3 = vld [vmem:[#allocation7 + $0x5e0] sm:$0xff]  ;;  %v11950_v4 = vcombine.low %v803_v47, %v811_v53 }
 0x289   :  { %4004 = vmatprep.subr.bf16.mxu0 %v11729_v5  ;;  %v11824_v5 = vcombine.low %v676_v55, %v684_v56  ;;  %v11841_v8 = vcombine.high %v692_v2, %v700_v3  ;;  %v772_v47 = vld [vmem:[#allocation7 + $0x820] sm:$0xff] }
 0x28a   :  { %v780_v53 = vld [vmem:[#allocation7 + $0x860] sm:$0xff] }
 0x28b   :  { %3939 = vmatpush1.bf16.msra.mxu1 %v11854_v41  ;;  %v708_v41 = vld [vmem:[#allocation7 + $0x620] sm:$0xff] }
 0x28c   :  { %4005 = vmatpush1.bf16.msra.mxu0 %v11728_v42  ;;  %3940 = vmatprep.subr.bf16.mxu1 %v11871_v43  ;;  %v716_v42 = vld [vmem:[#allocation7 + $0x660] sm:$0xff]  ;;  %v11966_v43 = vcombine.low %v819_v61, %v827_v1 }
 0x28d   :  { %4006 = vmatprep.subr.bf16.mxu0 %v11745_v13  ;;  %v11840_v13 = vcombine.low %v692_v2, %v700_v3  ;;  %v11857_v15 = vcombine.high %v708_v41, %v716_v42  ;;  %v788_v61 = vld [vmem:[#allocation7 + $0x8a0] sm:$0xff]  ;;  %v11920_v3 = vcombine.low %v772_v47, %v780_v53 }
 0x28e   :  { %v796_v1 = vld [vmem:[#allocation7 + $0x8e0] sm:$0xff] }
 0x28f   :  { %3941 = vmatpush1.bf16.msra.mxu1 %v11870_v6  ;;  %v724_v6 = vld [vmem:[#allocation7 + $0x6a0] sm:$0xff] }
 0x290   :  { %4007 = vmatpush1.bf16.msra.mxu0 %v11744_v9  ;;  %3942 = vmatprep.subr.bf16.mxu1 %v11887_v10  ;;  %v732_v9 = vld [vmem:[#allocation7 + $0x6e0] sm:$0xff]  ;;  %v11982_v10 = vcombine.low %v835_v11, %v843_v12 }
 0x291   :  { %4008 = vmatprep.subr.bf16.mxu0 %v11761_v18  ;;  %v11856_v18 = vcombine.low %v708_v41, %v716_v42  ;;  %v11873_v21 = vcombine.high %v724_v6, %v732_v9  ;;  %v804_v11 = vld [vmem:[#allocation7 + $0x920] sm:$0xff]  ;;  %v11936_v42 = vcombine.low %v788_v61, %v796_v1 }
 0x292   :  { %v812_v12 = vld [vmem:[#allocation7 + $0x960] sm:$0xff] }
 0x293   :  { %3943 = vmatpush1.bf16.msra.mxu1 %v11886_v25  ;;  %v740_v25 = vld [vmem:[#allocation7 + $0x720] sm:$0xff] }
 0x294   :  { %4009 = vmatpush1.bf16.msra.mxu0 %v11760_v26  ;;  %3944 = vmatprep.subr.bf16.mxu1 %v11903_v27  ;;  %v748_v26 = vld [vmem:[#allocation7 + $0x760] sm:$0xff]  ;;  %v11998_v27 = vcombine.low %v851_v16, %v859_v17 }
 0x295   :  { %4010 = vmatprep.subr.bf16.mxu0 %v11777_v28  ;;  %v11872_v28 = vcombine.low %v724_v6, %v732_v9  ;;  %v11889_v31 = vcombine.high %v740_v25, %v748_v26  ;;  %v11888_v40 = vcombine.low %v740_v25, %v748_v26  ;;  %v820_v16 = vld [vmem:[#allocation7 + $0x9a0] sm:$0xff]  ;;  %v11952_v9 = vcombine.low %v804_v11, %v812_v12 }
 0x296   :  { %v828_v17 = vld [vmem:[#allocation7 + $0x9e0] sm:$0xff] }
 0x297   :  { %3945 = vmatpush1.bf16.msra.mxu1 %v11902_v33  ;;  %v891_v33 = vld [vmem:[#allocation7 + $0xbd8] sm:$0xff]  ;;  %v11968_v26 = vcombine.low %v820_v16, %v828_v17 }
 0x298   :  { %4011 = vmatpush1.bf16.msra.mxu0 %v11776_v34  ;;  %3955 = vmatprep.subr.bf16.mxu1 %v11919_v35  ;;  %v756_v35 = vld [vmem:[#allocation7 + $0x7a0] sm:$0xff]  ;;  %v12030_v55 = vcombine.low %v883_v32, %v891_v33 }
 0x299   :  { %4012 = vmatprep.subr.bf16.mxu0 %v11793_v36  ;;  %v764_v36 = vld [vmem:[#allocation7 + $0x7e0] sm:$0xff] }
 0x29a   :  { %3947 = vmatmul.mubr.bf16.vlgmr.msra.gmra.mrb[16].mxu1 %v15239_v62  ;;  %v11904_v56 = vcombine.low %v756_v35, %v764_v36 }
 0x29b   :  { %3956 = vmatpush1.bf16.msra.mxu1 %v11918_v44  ;;  %3987 = vmatprep.mubr.bf16.mxu1 %v15259_v52  ;;  %v12031_v44 = vcombine.high %v883_v32, %v891_v33  ;;  %v987_v32 = vld [vmem:[#allocation7 + $0xed8] sm:$0xff]  ;;  %v852_v33 = vld [vmem:[#allocation7 + $0xaa0] sm:$0xff] }
 0x29c   :  { %4013 = vmatpush1.bf16.msra.mxu0 %v11792_v45  ;;  %3957 = vmatprep.subr.bf16.mxu1 %v11935_v50  ;;  %v11905_v45 = vcombine.high %v756_v35, %v764_v36  ;;  %v899_v50 = vld [vmem:[#allocation7 + $0xc18] sm:$0xff]  ;;  %v860_v35 = vld [vmem:[#allocation7 + $0xae0] sm:$0xff] }
 0x29d   :  { %4014 = vmatprep.subr.bf16.mxu0 %v11809_v51  ;;  %v907_v51 = vld [vmem:[#allocation7 + $0xc58] sm:$0xff] }
 0x29e   :  { %v12046_v2 = vcombine.low %v899_v50, %v907_v51 }
 0x29f   :  { %3958 = vmatpush1.bf16.msra.mxu1 %v11934_v57  ;;  %v12047_v57 = vcombine.high %v899_v50, %v907_v51  ;;  %v1003_v50 = vld [vmem:[#allocation7 + $0xf58] sm:$0xff]  ;;  %v868_v51 = vld [vmem:[#allocation7 + $0xb20] sm:$0xff] }
 0x2a0   :  { %4015 = vmatpush1.bf16.msra.mxu0 %v11808_v58  ;;  %3959 = vmatprep.subr.bf16.mxu1 %v11951_v59  ;;  %v11921_v58 = vcombine.high %v772_v47, %v780_v53  ;;  %v915_v59 = vld [vmem:[#allocation7 + $0xc98] sm:$0xff]  ;;  %v876_v47 = vld [vmem:[#allocation7 + $0xb60] sm:$0xff] }
 0x2a1   :  { %4016 = vmatprep.subr.bf16.mxu0 %v11825_v60  ;;  %v923_v60 = vld [vmem:[#allocation7 + $0xcd8] sm:$0xff] }
 0x2a2   :  { %v12062_v41 = vcombine.low %v915_v59, %v923_v60 }
 0x2a3   :  { %3960 = vmatpush1.bf16.msra.mxu1 %v11950_v4  ;;  %v12063_v4 = vcombine.high %v915_v59, %v923_v60  ;;  %v12017_v60 = vcombine.high %v868_v51, %v876_v47 }
 0x2a4   :  { %4017 = vmatpush1.bf16.msra.mxu0 %v11824_v5  ;;  %3961 = vmatprep.subr.bf16.mxu1 %v11967_v7  ;;  %v11937_v5 = vcombine.high %v788_v61, %v796_v1  ;;  %v931_v7 = vld [vmem:[#allocation7 + $0xd18] sm:$0xff] }
 0x2a5   :  { %4018 = vmatprep.subr.bf16.mxu0 %v11841_v8  ;;  %v939_v8 = vld [vmem:[#allocation7 + $0xd58] sm:$0xff] }
 0x2a6   :  { %v12078_v6 = vcombine.low %v931_v7, %v939_v8  ;;  %v1011_v61 = vld [vmem:[#allocation7 + $0xf98] sm:$0xff] }
 0x2a7   :  { %3962 = vmatpush1.bf16.msra.mxu1 %v11966_v43  ;;  %v12079_v43 = vcombine.high %v931_v7, %v939_v8  ;;  %v1019_v1 = vld [vmem:[#allocation7 + $0xfd8] sm:$0xff] }
 0x2a8   :  { %4019 = vmatpush1.bf16.msra.mxu0 %v11840_v13  ;;  %3963 = vmatprep.subr.bf16.mxu1 %v11983_v14  ;;  %v11953_v13 = vcombine.high %v804_v11, %v812_v12  ;;  %v947_v14 = vld [vmem:[#allocation7 + $0xd98] sm:$0xff]  ;;  %v12016_v12 = vcombine.low %v868_v51, %v876_v47  ;;  %v581_v51 = vld [vmem:[#allocation7 + $0x228] sm:$0xff] }
 0x2a9   :  { %4020 = vmatprep.subr.bf16.mxu0 %v11857_v15  ;;  %v955_v15 = vld [vmem:[#allocation7 + $0xdd8] sm:$0xff]  ;;  %v589_v47 = vld [vmem:[#allocation7 + $0x268] sm:$0xff] }
 0x2aa   :  { %v12094_v25 = vcombine.low %v947_v14, %v955_v15 }
 0x2ab   :  { %3964 = vmatpush1.bf16.msra.mxu1 %v11982_v10  ;;  %v12095_v10 = vcombine.high %v947_v14, %v955_v15  ;;  %v908_v14 = vld [vmem:[#allocation7 + $0xc60] sm:$0xff]  ;;  %v12158_v15 = vcombine.low %v1011_v61, %v1019_v1 }
 0x2ac   :  { %4021 = vmatpush1.bf16.msra.mxu0 %v11856_v18  ;;  %3965 = vmatprep.subr.bf16.mxu1 %v11999_v19  ;;  %v11969_v18 = vcombine.high %v820_v16, %v828_v17  ;;  %v963_v19 = vld [vmem:[#allocation7 + $0xe18] sm:$0xff] }
 0x2ad   :  { %v15279_v30 = vpop.f32.mrb[8].mxu1  ;;  %4022 = vmatprep.subr.bf16.mxu0 %v11873_v21  ;;  %v971_v21 = vld [vmem:[#allocation7 + $0xe58] sm:$0xff] }
 0x2ae   :  { %v15281_v34 = vpop.f32.mrb[9].mxu1  ;;  %v12110_v36 = vcombine.low %v963_v19, %v971_v21 }
 0x2af   :  { %3966 = vmatpush1.bf16.msra.mxu1 %v11998_v27  ;;  %v3706_v37 = vpop.f32.mrb[10].mxu1  ;;  %v12111_v27 = vcombine.high %v963_v19, %v971_v21  ;;  %v924_v19 = vld [vmem:[#allocation7 + $0xce0] sm:$0xff] }
 0x2b0   :  { %4023 = vmatpush1.bf16.msra.mxu0 %v11872_v28  ;;  %v3707_v39 = vpop.f32.mrb[11].mxu1  ;;  %3967 = vmatprep.subr.bf16.mxu1 %v12015_v29  ;;  %v1024_v28 = vld [vmem:[#allocation8] sm:$0xff]  ;;  %v11985_v29 = vcombine.high %v836_v23, %v844_v24 }
 0x2b1   :  { %4024 = vmatprep.subr.bf16.mxu0 %v11889_v31  ;;  %v979_v31 = vld [vmem:[#allocation7 + $0xe98] sm:$0xff]  ;;  %v1031_v37 = vrot.slane %v1024_v28, %v15230_v48 }
 0x2b2   :  { %v12127_v39 = vcombine.high %v979_v31, %v987_v32  ;;  %v12126_v53 = vcombine.low %v979_v31, %v987_v32 }
 0x2b3   :  { %3968 = vmatpush1.bf16.msra.mxu1 %v12014_v38  ;;  %v11984_v38 = vcombine.low %v836_v23, %v844_v24 }
 0x2b4   :  { %4025 = vmatpush1.bf16.msra.mxu0 %v11888_v40  ;;  %3969 = vmatprep.subr.bf16.mxu1 %v12031_v44  ;;  %v1035_v40 = vrot.slane %v1024_v28, %v15233_v49  ;;  %v12001_v44 = vcombine.high %v852_v33, %v860_v35  ;;  %v932_v28 = vld [vmem:[#allocation7 + $0xd20] sm:$0xff] }
 0x2b5   :  { %4026 = vmatprep.subr.bf16.mxu0 %v11905_v45  ;;  %v995_v45 = vld [vmem:[#allocation7 + $0xf18] sm:$0xff] }
 0x2b6   :  { %v12142_v8 = vcombine.low %v995_v45, %v1003_v50 }
 0x2b7   :  { %3970 = vmatpush1.bf16.msra.mxu1 %v12030_v55  ;;  %v3703_v55 = vadd.f32 %v15279_v30, %v1031_v37  ;;  %v573_v37 = vld [vmem:[#allocation7 + $0x1e8] sm:$0xff] }
 0x2b8   :  { %4027 = vmatpush1.bf16.msra.mxu0 %v11904_v56  ;;  %3971 = vmatprep.subr.bf16.mxu1 %v12047_v57  ;;  %v12000_v56 = vcombine.low %v852_v33, %v860_v35  ;;  %v12143_v57 = vcombine.high %v995_v45, %v1003_v50 }
 0x2b9   :  { %4037 = vmatprep.subr.bf16.mxu0 %v11921_v58  ;;  %v3705_v58 = vadd.f32 %v15281_v34, %v1035_v40  ;;  %v12159_v34 = vcombine.high %v1011_v61, %v1019_v1  ;;  %v605_v61 = vld [vmem:[#allocation7 + $0x2e8] sm:$0xff]  ;;  %v980_v1 = vld [vmem:[#allocation7 + $0xea0] sm:$0xff] }
 0x2bb   :  { %4029 = vmatmul.mubr.bf16.vlgmr.msra.gmra.mrb[8].mxu0 %v15239_v62  ;;  %3972 = vmatpush1.bf16.msra.mxu1 %v12046_v2 }
 0x2bc   :  { %4038 = vmatpush1.bf16.msra.mxu0 %v11920_v3  ;;  %4069 = vmatprep.mubr.bf16.mxu0 %v15259_v52 }
 0x2bd   :  { %3973 = vmatprep.subr.bf16.mxu1 %v12063_v4  ;;  %4039 = vmatprep.subr.bf16.mxu0 %v11937_v5  ;;  %v884_v4 = vld [vmem:[#allocation7 + $0xba0] sm:$0xff] }
 0x2be   :  { %v892_v5 = vld [vmem:[#allocation7 + $0xbe0] sm:$0xff] }
 0x2bf   :  { %3974 = vmatpush1.bf16.msra.mxu1 %v12062_v41  ;;  %v12033_v41 = vcombine.high %v884_v4, %v892_v5  ;;  %v12032_v16 = vcombine.low %v884_v4, %v892_v5  ;;  %v11730_v4 = vcombine.low %v581_v51, %v589_v47 }
 0x2c0   :  { %4040 = vmatpush1.bf16.msra.mxu0 %v11936_v42  ;;  %3975 = vmatprep.subr.bf16.mxu1 %v12079_v43  ;;  %v517_v42 = vld [vmem:[#allocation7 + $0x28] sm:$0xff] }
 0x2c1   :  { %4041 = vmatprep.subr.bf16.mxu0 %v11953_v13  ;;  %v525_v43 = vld [vmem:[#allocation7 + $0x68] sm:$0xff]  ;;  %v900_v13 = vld [vmem:[#allocation7 + $0xc20] sm:$0xff] }
 0x2c2   :  { %v11667_v17 = vcombine.high %v517_v42, %v525_v43  ;;  %v11666_v21 = vcombine.low %v517_v42, %v525_v43  ;;  %v12048_v23 = vcombine.low %v900_v13, %v908_v14 }
 0x2c3   :  { %3976 = vmatpush1.bf16.msra.mxu1 %v12078_v6  ;;  %v12049_v6 = vcombine.high %v900_v13, %v908_v14 }
 0x2c4   :  { %4042 = vmatpush1.bf16.msra.mxu0 %v11952_v9  ;;  %3977 = vmatprep.subr.bf16.mxu1 %v12095_v10  ;;  %v533_v9 = vld [vmem:[#allocation7 + $0xa8] sm:$0xff] }
 0x2c5   :  { %4043 = vmatprep.subr.bf16.mxu0 %v11969_v18  ;;  %v541_v10 = vld [vmem:[#allocation7 + $0xe8] sm:$0xff]  ;;  %v916_v18 = vld [vmem:[#allocation7 + $0xca0] sm:$0xff] }
 0x2c6   :  { %v11683_v24 = vcombine.high %v533_v9, %v541_v10  ;;  %v11682_v31 = vcombine.low %v533_v9, %v541_v10  ;;  %v12064_v32 = vcombine.low %v916_v18, %v924_v19 }
 0x2c7   :  { %3978 = vmatpush1.bf16.msra.mxu1 %v12094_v25  ;;  %v12065_v25 = vcombine.high %v916_v18, %v924_v19 }
 0x2c8   :  { %4044 = vmatpush1.bf16.msra.mxu0 %v11968_v26  ;;  %3979 = vmatprep.subr.bf16.mxu1 %v12111_v27  ;;  %v549_v26 = vld [vmem:[#allocation7 + $0x128] sm:$0xff] }
 0x2c9   :  { %4045 = vmatprep.subr.bf16.mxu0 %v11985_v29  ;;  %v557_v27 = vld [vmem:[#allocation7 + $0x168] sm:$0xff]  ;;  %v940_v29 = vld [vmem:[#allocation7 + $0xd60] sm:$0xff] }
 0x2ca   :  { %v11699_v33 = vcombine.high %v549_v26, %v557_v27  ;;  %v12081_v35 = vcombine.high %v932_v28, %v940_v29  ;;  %v11698_v40 = vcombine.low %v549_v26, %v557_v27 }
 0x2cb   :  { %3980 = vmatpush1.bf16.msra.mxu1 %v12110_v36  ;;  %v565_v36 = vld [vmem:[#allocation7 + $0x1a8] sm:$0xff] }
 0x2cc   :  { %4046 = vmatpush1.bf16.msra.mxu0 %v11984_v38  ;;  %3981 = vmatprep.subr.bf16.mxu1 %v12127_v39  ;;  %v948_v38 = vld [vmem:[#allocation7 + $0xda0] sm:$0xff]  ;;  %v11715_v45 = vcombine.high %v565_v36, %v573_v37 }
 0x2cd   :  { %v3743_v59 = vpop.f32.mrb[0].mxu0  ;;  %4047 = vmatprep.subr.bf16.mxu0 %v12001_v44  ;;  %v956_v39 = vld [vmem:[#allocation7 + $0xde0] sm:$0xff]  ;;  %v12080_v44 = vcombine.low %v932_v28, %v940_v29 }
 0x2ce   :  { %v15289_v2 = vadd.f32 %v3743_v59, %v3703_v55  ;;  %v3745_v3 = vpop.f32.mrb[1].mxu0  ;;  %v12097_v50 = vcombine.high %v948_v38, %v956_v39  ;;  %v972_v55 = vld [vmem:[#allocation7 + $0xe60] sm:$0xff] }
 0x2cf   :  { %v15291_v7 = vadd.f32 %v3745_v3, %v3705_v58  ;;  %3982 = vmatpush1.bf16.msra.mxu1 %v12126_v53  ;;  %v3747_v30 = vpop.f32.mrb[2].mxu0  ;;  %v964_v53 = vld [vmem:[#allocation7 + $0xe20] sm:$0xff]  ;;  %v11731_v58 = vcombine.high %v581_v51, %v589_v47 }
 0x2d0   :  { %4048 = vmatpush1.bf16.msra.mxu0 %v12000_v56  ;;  %v3748_v11 = vpop.f32.mrb[3].mxu0  ;;  %3983 = vmatprep.subr.bf16.mxu1 %v12143_v57  ;;  %v11714_v56 = vcombine.low %v565_v36, %v573_v37  ;;  %v12096_v57 = vcombine.low %v948_v38, %v956_v39  ;;  %v12113_v59 = vcombine.high %v964_v53, %v972_v55  ;;  %v988_v3 = vld [vmem:[#allocation7 + $0xee0] sm:$0xff] }
 0x2d1   :  { %4049 = vmatprep.subr.bf16.mxu0 %v12017_v60  ;;  %v597_v60 = vld [vmem:[#allocation7 + $0x2a8] sm:$0xff]  ;;  %v12112_v5 = vcombine.low %v964_v53, %v972_v55  ;;  %v12128_v43 = vcombine.low %v980_v1, %v988_v3 }
 0x2d2   :  { %v11747_v30 = vcombine.high %v597_v60, %v605_v61  ;;  %v613_v11 = vld [vmem:[#allocation7 + $0x328] sm:$0xff]  ;;  %v11746_v42 = vcombine.low %v597_v60, %v605_v61 }
 0x2d3   :  { %3984 = vmatpush1.bf16.msra.mxu1 %v12142_v8  ;;  %v12129_v8 = vcombine.high %v980_v1, %v988_v3 }
 0x2d4   :  { %4050 = vmatpush1.bf16.msra.mxu0 %v12016_v12  ;;  %3985 = vmatprep.subr.bf16.mxu1 %v12159_v34  ;;  %v621_v12 = vld [vmem:[#allocation7 + $0x368] sm:$0xff]  ;;  %v996_v34 = vld [vmem:[#allocation7 + $0xf20] sm:$0xff] }
 0x2d5   :  { %4051 = vmatprep.subr.bf16.mxu0 %v12033_v41  ;;  %v1004_v41 = vld [vmem:[#allocation7 + $0xf60] sm:$0xff]  ;;  %v11763_v13 = vcombine.high %v613_v11, %v621_v12  ;;  %v11762_v9 = vcombine.low %v613_v11, %v621_v12 }
 0x2d6   :  { %v12145_v14 = vcombine.high %v996_v34, %v1004_v41  ;;  %v12144_v10 = vcombine.low %v996_v34, %v1004_v41 }
 0x2d7   :  { %3986 = vmatpush1.bf16.msra.mxu1 %v12158_v15  ;;  %v629_v15 = vld [vmem:[#allocation7 + $0x3a8] sm:$0xff] }
 0x2d8   :  { %4052 = vmatpush1.bf16.msra.mxu0 %v12032_v16  ;;  %4078 = vmatprep.subr.bf16.mxu1 %v11667_v17  ;;  %v637_v16 = vld [vmem:[#allocation7 + $0x3e8] sm:$0xff]  ;;  %v1012_v17 = vld [vmem:[#allocation7 + $0xfa0] sm:$0xff] }
 0x2d9   :  { %4053 = vmatprep.subr.bf16.mxu0 %v12049_v6  ;;  %v1020_v6 = vld [vmem:[#allocation7 + $0xfe0] sm:$0xff]  ;;  %v11779_v18 = vcombine.high %v629_v15, %v637_v16  ;;  %v11778_v26 = vcombine.low %v629_v15, %v637_v16 }
 0x2da   :  { %3988 = vmatmul.mubr.bf16.vlgmr.msra.gmra.mrb[16].mxu1 %v15261_v54  ;;  %v12161_v19 = vcombine.high %v1012_v17, %v1020_v6  ;;  %v12160_v27 = vcombine.low %v1012_v17, %v1020_v6 }
 0x2db   :  { %4079 = vmatpush1.bf16.msra.mxu1 %v11666_v21  ;;  %4110 = vmatprep.mubr.bf16.mxu1 %v15241_v63  ;;  %v645_v21 = vld [vmem:[#allocation7 + $0x428] sm:$0xff] }
 0x2dc   :  { %4054 = vmatpush1.bf16.msra.mxu0 %v12048_v23  ;;  %4080 = vmatprep.subr.bf16.mxu1 %v11683_v24  ;;  %v653_v23 = vld [vmem:[#allocation7 + $0x468] sm:$0xff]  ;;  %v518_v24 = vld [vmem:[#allocation7 + $0x30] sm:$0xff] }
 0x2dd   :  { %4055 = vmatprep.subr.bf16.mxu0 %v12065_v25  ;;  %v526_v25 = vld [vmem:[#allocation7 + $0x70] sm:$0xff]  ;;  %v11795_v28 = vcombine.high %v645_v21, %v653_v23  ;;  %v11794_v36 = vcombine.low %v645_v21, %v653_v23 }
 0x2de   :  { %v11669_v29 = vcombine.high %v518_v24, %v526_v25  ;;  %v11668_v37 = vcombine.low %v518_v24, %v526_v25 }
 0x2df   :  { %4081 = vmatpush1.bf16.msra.mxu1 %v11682_v31  ;;  %v661_v31 = vld [vmem:[#allocation7 + $0x4a8] sm:$0xff] }
 0x2e0   :  { %4056 = vmatpush1.bf16.msra.mxu0 %v12064_v32  ;;  %4082 = vmatprep.subr.bf16.mxu1 %v11699_v33  ;;  %v669_v32 = vld [vmem:[#allocation7 + $0x4e8] sm:$0xff]  ;;  %v534_v33 = vld [vmem:[#allocation7 + $0xb0] sm:$0xff] }
 0x2e1   :  { %4057 = vmatprep.subr.bf16.mxu0 %v12081_v35  ;;  %v542_v35 = vld [vmem:[#allocation7 + $0xf0] sm:$0xff]  ;;  %v11811_v38 = vcombine.high %v661_v31, %v669_v32  ;;  %v11810_v51 = vcombine.low %v661_v31, %v669_v32 }
 0x2e2   :  { %v11685_v39 = vcombine.high %v534_v33, %v542_v35  ;;  %v11684_v47 = vcombine.low %v534_v33, %v542_v35 }
 0x2e3   :  { %4083 = vmatpush1.bf16.msra.mxu1 %v11698_v40  ;;  %v677_v40 = vld [vmem:[#allocation7 + $0x528] sm:$0xff] }
 0x2e4   :  { %4058 = vmatpush1.bf16.msra.mxu0 %v12080_v44  ;;  %4084 = vmatprep.subr.bf16.mxu1 %v11715_v45  ;;  %v685_v44 = vld [vmem:[#allocation7 + $0x568] sm:$0xff]  ;;  %v550_v45 = vld [vmem:[#allocation7 + $0x130] sm:$0xff] }
 0x2e5   :  { %4059 = vmatprep.subr.bf16.mxu0 %v12097_v50  ;;  %v558_v50 = vld [vmem:[#allocation7 + $0x170] sm:$0xff]  ;;  %v11827_v53 = vcombine.high %v677_v40, %v685_v44  ;;  %v11826_v60 = vcombine.low %v677_v40, %v685_v44 }
 0x2e6   :  { %v11701_v55 = vcombine.high %v550_v45, %v558_v50  ;;  %v11700_v61 = vcombine.low %v550_v45, %v558_v50 }
 0x2e7   :  { %4085 = vmatpush1.bf16.msra.mxu1 %v11714_v56  ;;  %v693_v56 = vld [vmem:[#allocation7 + $0x5a8] sm:$0xff] }
 0x2e8   :  { %4060 = vmatpush1.bf16.msra.mxu0 %v12096_v57  ;;  %4086 = vmatprep.subr.bf16.mxu1 %v11731_v58  ;;  %v701_v57 = vld [vmem:[#allocation7 + $0x5e8] sm:$0xff]  ;;  %v566_v58 = vld [vmem:[#allocation7 + $0x1b0] sm:$0xff] }
 0x2e9   :  { %4061 = vmatprep.subr.bf16.mxu0 %v12113_v59  ;;  %v574_v59 = vld [vmem:[#allocation7 + $0x1f0] sm:$0xff]  ;;  %v11843_v1 = vcombine.high %v693_v56, %v701_v57  ;;  %v11842_v11 = vcombine.low %v693_v56, %v701_v57 }
 0x2ea   :  { %v11717_v3 = vcombine.high %v566_v58, %v574_v59  ;;  %v11716_v12 = vcombine.low %v566_v58, %v574_v59 }
 0x2eb   :  { %4087 = vmatpush1.bf16.msra.mxu1 %v11730_v4  ;;  %v709_v4 = vld [vmem:[#allocation7 + $0x628] sm:$0xff] }
 0x2ec   :  { %4062 = vmatpush1.bf16.msra.mxu0 %v12112_v5  ;;  %4088 = vmatprep.subr.bf16.mxu1 %v11747_v30  ;;  %v717_v5 = vld [vmem:[#allocation7 + $0x668] sm:$0xff]  ;;  %v582_v30 = vld [vmem:[#allocation7 + $0x230] sm:$0xff] }
 0x2ed   :  { %4063 = vmatprep.subr.bf16.mxu0 %v12129_v8  ;;  %v590_v8 = vld [vmem:[#allocation7 + $0x270] sm:$0xff]  ;;  %v11859_v34 = vcombine.high %v709_v4, %v717_v5  ;;  %v11858_v15 = vcombine.low %v709_v4, %v717_v5 }
 0x2ee   :  { %v11733_v41 = vcombine.high %v582_v30, %v590_v8  ;;  %v11732_v16 = vcombine.low %v582_v30, %v590_v8 }
 0x2ef   :  { %4089 = vmatpush1.bf16.msra.mxu1 %v11746_v42  ;;  %v725_v42 = vld [vmem:[#allocation7 + $0x6a8] sm:$0xff] }
 0x2f0   :  { %4064 = vmatpush1.bf16.msra.mxu0 %v12128_v43  ;;  %4090 = vmatprep.subr.bf16.mxu1 %v11763_v13  ;;  %v733_v43 = vld [vmem:[#allocation7 + $0x6e8] sm:$0xff]  ;;  %v598_v13 = vld [vmem:[#allocation7 + $0x2b0] sm:$0xff] }
 0x2f1   :  { %4065 = vmatprep.subr.bf16.mxu0 %v12145_v14  ;;  %v606_v14 = vld [vmem:[#allocation7 + $0x2f0] sm:$0xff]  ;;  %v11875_v17 = vcombine.high %v725_v42, %v733_v43  ;;  %v11874_v21 = vcombine.low %v725_v42, %v733_v43 }
 0x2f2   :  { %v11749_v6 = vcombine.high %v598_v13, %v606_v14  ;;  %v11748_v23 = vcombine.low %v598_v13, %v606_v14 }
 0x2f3   :  { %4091 = vmatpush1.bf16.msra.mxu1 %v11762_v9  ;;  %v741_v9 = vld [vmem:[#allocation7 + $0x728] sm:$0xff] }
 0x2f4   :  { %4066 = vmatpush1.bf16.msra.mxu0 %v12144_v10  ;;  %4092 = vmatprep.subr.bf16.mxu1 %v11779_v18  ;;  %v749_v10 = vld [vmem:[#allocation7 + $0x768] sm:$0xff]  ;;  %v614_v18 = vld [vmem:[#allocation7 + $0x330] sm:$0xff] }
 0x2f5   :  { %4067 = vmatprep.subr.bf16.mxu0 %v12161_v19  ;;  %v622_v19 = vld [vmem:[#allocation7 + $0x370] sm:$0xff]  ;;  %v11891_v24 = vcombine.high %v741_v9, %v749_v10  ;;  %v11890_v31 = vcombine.low %v741_v9, %v749_v10 }
 0x2f6   :  { %v11765_v25 = vcombine.high %v614_v18, %v622_v19  ;;  %v11764_v32 = vcombine.low %v614_v18, %v622_v19 }
 0x2f7   :  { %4093 = vmatpush1.bf16.msra.mxu1 %v11778_v26  ;;  %v757_v26 = vld [vmem:[#allocation7 + $0x7a8] sm:$0xff] }
 0x2f8   :  { %4068 = vmatpush1.bf16.msra.mxu0 %v12160_v27  ;;  %4094 = vmatprep.subr.bf16.mxu1 %v11795_v28  ;;  %v765_v27 = vld [vmem:[#allocation7 + $0x7e8] sm:$0xff]  ;;  %v630_v28 = vld [vmem:[#allocation7 + $0x3b0] sm:$0xff] }
 0x2f9   :  { %4160 = vmatprep.subr.bf16.mxu0 %v11669_v29  ;;  %v638_v29 = vld [vmem:[#allocation7 + $0x3f0] sm:$0xff]  ;;  %v11907_v33 = vcombine.high %v757_v26, %v765_v27  ;;  %v11906_v40 = vcombine.low %v757_v26, %v765_v27 }
 0x2fa   :  { %v11781_v35 = vcombine.high %v630_v28, %v638_v29  ;;  %v11780_v44 = vcombine.low %v630_v28, %v638_v29 }
 0x2fb   :  { %4070 = vmatmul.mubr.bf16.vlgmr.msra.gmra.mrb[8].mxu0 %v15261_v54  ;;  %4095 = vmatpush1.bf16.msra.mxu1 %v11794_v36  ;;  %v773_v36 = vld [vmem:[#allocation7 + $0x828] sm:$0xff] }
 0x2fc   :  { %4161 = vmatpush1.bf16.msra.mxu0 %v11668_v37  ;;  %4192 = vmatprep.mubr.bf16.mxu0 %v15241_v63  ;;  %v781_v37 = vld [vmem:[#allocation7 + $0x868] sm:$0xff] }
 0x2fd   :  { %4096 = vmatprep.subr.bf16.mxu1 %v11811_v38  ;;  %4162 = vmatprep.subr.bf16.mxu0 %v11685_v39  ;;  %v646_v38 = vld [vmem:[#allocation7 + $0x430] sm:$0xff]  ;;  %v11923_v45 = vcombine.high %v773_v36, %v781_v37  ;;  %v11922_v56 = vcombine.low %v773_v36, %v781_v37 }
 0x2fe   :  { %v654_v39 = vld [vmem:[#allocation7 + $0x470] sm:$0xff] }
 0x2ff   :  { %4097 = vmatpush1.bf16.msra.mxu1 %v11810_v51  ;;  %v11797_v50 = vcombine.high %v646_v38, %v654_v39  ;;  %v789_v51 = vld [vmem:[#allocation7 + $0x8a8] sm:$0xff]  ;;  %v11796_v57 = vcombine.low %v646_v38, %v654_v39 }
 0x300   :  { %4163 = vmatpush1.bf16.msra.mxu0 %v11684_v47  ;;  %4098 = vmatprep.subr.bf16.mxu1 %v11827_v53  ;;  %v797_v47 = vld [vmem:[#allocation7 + $0x8e8] sm:$0xff]  ;;  %v662_v53 = vld [vmem:[#allocation7 + $0x4b0] sm:$0xff] }
 0x301   :  { %4164 = vmatprep.subr.bf16.mxu0 %v11701_v55  ;;  %v670_v55 = vld [vmem:[#allocation7 + $0x4f0] sm:$0xff]  ;;  %v11939_v58 = vcombine.high %v789_v51, %v797_v47  ;;  %v11938_v4 = vcombine.low %v789_v51, %v797_v47 }
 0x302   :  { %v11813_v59 = vcombine.high %v662_v53, %v670_v55  ;;  %v11812_v5 = vcombine.low %v662_v53, %v670_v55  ;;  %v758_v51 = vld [vmem:[#allocation7 + $0x7b0] sm:$0xff] }
 0x303   :  { %4099 = vmatpush1.bf16.msra.mxu1 %v11826_v60  ;;  %v805_v60 = vld [vmem:[#allocation7 + $0x928] sm:$0xff]  ;;  %v766_v47 = vld [vmem:[#allocation7 + $0x7f0] sm:$0xff] }
 0x304   :  { %4165 = vmatpush1.bf16.msra.mxu0 %v11700_v61  ;;  %4100 = vmatprep.subr.bf16.mxu1 %v11843_v1  ;;  %v813_v61 = vld [vmem:[#allocation7 + $0x968] sm:$0xff]  ;;  %v678_v1 = vld [vmem:[#allocation7 + $0x530] sm:$0xff] }
 0x305   :  { %4166 = vmatprep.subr.bf16.mxu0 %v11717_v3  ;;  %v686_v3 = vld [vmem:[#allocation7 + $0x570] sm:$0xff]  ;;  %v11955_v30 = vcombine.high %v805_v60, %v813_v61  ;;  %v11954_v42 = vcombine.low %v805_v60, %v813_v61  ;;  %v901_v60 = vld [vmem:[#allocation7 + $0xc28] sm:$0xff] }
 0x306   :  { %v11829_v8 = vcombine.high %v678_v1, %v686_v3  ;;  %v11828_v43 = vcombine.low %v678_v1, %v686_v3  ;;  %v909_v61 = vld [vmem:[#allocation7 + $0xc68] sm:$0xff]  ;;  %v774_v1 = vld [vmem:[#allocation7 + $0x830] sm:$0xff] }
 0x307   :  { %4101 = vmatpush1.bf16.msra.mxu1 %v11842_v11  ;;  %v821_v11 = vld [vmem:[#allocation7 + $0x9a8] sm:$0xff]  ;;  %v782_v3 = vld [vmem:[#allocation7 + $0x870] sm:$0xff] }
 0x308   :  { %4167 = vmatpush1.bf16.msra.mxu0 %v11716_v12  ;;  %4102 = vmatprep.subr.bf16.mxu1 %v11859_v34  ;;  %v829_v12 = vld [vmem:[#allocation7 + $0x9e8] sm:$0xff]  ;;  %v694_v34 = vld [vmem:[#allocation7 + $0x5b0] sm:$0xff] }
 0x309   :  { %4168 = vmatprep.subr.bf16.mxu0 %v11733_v41  ;;  %v702_v41 = vld [vmem:[#allocation7 + $0x5f0] sm:$0xff]  ;;  %v11971_v13 = vcombine.high %v821_v11, %v829_v12  ;;  %v11970_v9 = vcombine.low %v821_v11, %v829_v12  ;;  %v917_v11 = vld [vmem:[#allocation7 + $0xca8] sm:$0xff] }
 0x30a   :  { %v11845_v14 = vcombine.high %v694_v34, %v702_v41  ;;  %v11844_v10 = vcombine.low %v694_v34, %v702_v41  ;;  %v925_v12 = vld [vmem:[#allocation7 + $0xce8] sm:$0xff]  ;;  %v790_v34 = vld [vmem:[#allocation7 + $0x8b0] sm:$0xff] }
 0x30b   :  { %4103 = vmatpush1.bf16.msra.mxu1 %v11858_v15  ;;  %v837_v15 = vld [vmem:[#allocation7 + $0xa28] sm:$0xff]  ;;  %v798_v41 = vld [vmem:[#allocation7 + $0x8f0] sm:$0xff] }
 0x30c   :  { %4169 = vmatpush1.bf16.msra.mxu0 %v11732_v16  ;;  %4104 = vmatprep.subr.bf16.mxu1 %v11875_v17  ;;  %v845_v16 = vld [vmem:[#allocation7 + $0xa68] sm:$0xff]  ;;  %v710_v17 = vld [vmem:[#allocation7 + $0x630] sm:$0xff] }
 0x30d   :  { %4170 = vmatprep.subr.bf16.mxu0 %v11749_v6  ;;  %v718_v6 = vld [vmem:[#allocation7 + $0x670] sm:$0xff]  ;;  %v11987_v18 = vcombine.high %v837_v15, %v845_v16  ;;  %v11986_v26 = vcombine.low %v837_v15, %v845_v16  ;;  %v933_v15 = vld [vmem:[#allocation7 + $0xd28] sm:$0xff] }
 0x30e   :  { %v11861_v19 = vcombine.high %v710_v17, %v718_v6  ;;  %v11860_v27 = vcombine.low %v710_v17, %v718_v6  ;;  %v941_v16 = vld [vmem:[#allocation7 + $0xd68] sm:$0xff]  ;;  %v806_v17 = vld [vmem:[#allocation7 + $0x930] sm:$0xff] }
 0x30f   :  { %4105 = vmatpush1.bf16.msra.mxu1 %v11874_v21  ;;  %v853_v21 = vld [vmem:[#allocation7 + $0xaa8] sm:$0xff]  ;;  %v814_v6 = vld [vmem:[#allocation7 + $0x970] sm:$0xff] }
 0x310   :  { %4171 = vmatpush1.bf16.msra.mxu0 %v11748_v23  ;;  %4106 = vmatprep.subr.bf16.mxu1 %v11891_v24  ;;  %v861_v23 = vld [vmem:[#allocation7 + $0xae8] sm:$0xff]  ;;  %v726_v24 = vld [vmem:[#allocation7 + $0x6b0] sm:$0xff] }
 0x311   :  { %4172 = vmatprep.subr.bf16.mxu0 %v11765_v25  ;;  %v734_v25 = vld [vmem:[#allocation7 + $0x6f0] sm:$0xff]  ;;  %v12003_v28 = vcombine.high %v853_v21, %v861_v23  ;;  %v12002_v36 = vcombine.low %v853_v21, %v861_v23  ;;  %v949_v21 = vld [vmem:[#allocation7 + $0xda8] sm:$0xff] }
 0x312   :  { %v11877_v29 = vcombine.high %v726_v24, %v734_v25  ;;  %v11876_v37 = vcombine.low %v726_v24, %v734_v25  ;;  %v957_v23 = vld [vmem:[#allocation7 + $0xde8] sm:$0xff]  ;;  %v822_v24 = vld [vmem:[#allocation7 + $0x9b0] sm:$0xff] }
 0x313   :  { %4107 = vmatpush1.bf16.msra.mxu1 %v11890_v31  ;;  %v869_v31 = vld [vmem:[#allocation7 + $0xb28] sm:$0xff]  ;;  %v830_v25 = vld [vmem:[#allocation7 + $0x9f0] sm:$0xff] }
 0x314   :  { %4173 = vmatpush1.bf16.msra.mxu0 %v11764_v32  ;;  %4108 = vmatprep.subr.bf16.mxu1 %v11907_v33  ;;  %v877_v32 = vld [vmem:[#allocation7 + $0xb68] sm:$0xff]  ;;  %v742_v33 = vld [vmem:[#allocation7 + $0x730] sm:$0xff] }
 0x315   :  { %4174 = vmatprep.subr.bf16.mxu0 %v11781_v35  ;;  %v750_v35 = vld [vmem:[#allocation7 + $0x770] sm:$0xff]  ;;  %v12019_v38 = vcombine.high %v869_v31, %v877_v32  ;;  %v12018_v55 = vcombine.low %v869_v31, %v877_v32  ;;  %v965_v31 = vld [vmem:[#allocation7 + $0xe28] sm:$0xff] }
 0x316   :  { %v973_v32 = vld [vmem:[#allocation7 + $0xe68] sm:$0xff] }
 0x317   :  { %4109 = vmatpush1.bf16.msra.mxu1 %v11906_v40  ;;  %v11893_v40 = vcombine.high %v742_v33, %v750_v35 }
 0x318   :  { %4175 = vmatpush1.bf16.msra.mxu0 %v11780_v44  ;;  %4119 = vmatprep.subr.bf16.mxu1 %v11923_v45  ;;  %v885_v44 = vld [vmem:[#allocation7 + $0xba8] sm:$0xff] }
 0x319   :  { %4176 = vmatprep.subr.bf16.mxu0 %v11797_v50  ;;  %v893_v45 = vld [vmem:[#allocation7 + $0xbe8] sm:$0xff] }
 0x31a   :  { %4111 = vmatmul.mubr.bf16.vlgmr.msra.gmra.mrb[20].mxu1 %v15239_v62 }
 0x31b   :  { %4120 = vmatpush1.bf16.msra.mxu1 %v11922_v56  ;;  %4151 = vmatprep.mubr.bf16.mxu1 %v15259_v52 }
 0x31c   :  { %4177 = vmatpush1.bf16.msra.mxu0 %v11796_v57  ;;  %4121 = vmatprep.subr.bf16.mxu1 %v11939_v58  ;;  %v11892_v57 = vcombine.low %v742_v33, %v750_v35  ;;  %v12035_v58 = vcombine.high %v885_v44, %v893_v45  ;;  %v838_v33 = vld [vmem:[#allocation7 + $0xa30] sm:$0xff] }
 0x31d   :  { %4178 = vmatprep.subr.bf16.mxu0 %v11813_v59  ;;  %v11909_v59 = vcombine.high %v758_v51, %v766_v47  ;;  %v846_v35 = vld [vmem:[#allocation7 + $0xa70] sm:$0xff] }
 0x31f   :  { %4122 = vmatpush1.bf16.msra.mxu1 %v11938_v4  ;;  %v12034_v4 = vcombine.low %v885_v44, %v893_v45  ;;  %v981_v44 = vld [vmem:[#allocation7 + $0xea8] sm:$0xff] }
 0x320   :  { %4179 = vmatpush1.bf16.msra.mxu0 %v11812_v5  ;;  %4123 = vmatprep.subr.bf16.mxu1 %v11955_v30  ;;  %v11908_v5 = vcombine.low %v758_v51, %v766_v47  ;;  %v12051_v30 = vcombine.high %v901_v60, %v909_v61  ;;  %v989_v45 = vld [vmem:[#allocation7 + $0xee8] sm:$0xff]  ;;  %v854_v51 = vld [vmem:[#allocation7 + $0xab0] sm:$0xff] }
 0x321   :  { %4180 = vmatprep.subr.bf16.mxu0 %v11829_v8  ;;  %v11925_v8 = vcombine.high %v774_v1, %v782_v3  ;;  %v862_v47 = vld [vmem:[#allocation7 + $0xaf0] sm:$0xff] }
 0x323   :  { %4124 = vmatpush1.bf16.msra.mxu1 %v11954_v42  ;;  %v12050_v42 = vcombine.low %v901_v60, %v909_v61  ;;  %v870_v60 = vld [vmem:[#allocation7 + $0xb30] sm:$0xff] }
 0x324   :  { %4181 = vmatpush1.bf16.msra.mxu0 %v11828_v43  ;;  %4125 = vmatprep.subr.bf16.mxu1 %v11971_v13  ;;  %v11924_v43 = vcombine.low %v774_v1, %v782_v3  ;;  %v12067_v13 = vcombine.high %v917_v11, %v925_v12  ;;  %v878_v61 = vld [vmem:[#allocation7 + $0xb70] sm:$0xff]  ;;  %v12130_v1 = vcombine.low %v981_v44, %v989_v45 }
 0x325   :  { %4182 = vmatprep.subr.bf16.mxu0 %v11845_v14  ;;  %v11941_v14 = vcombine.high %v790_v34, %v798_v41  ;;  %v12004_v3 = vcombine.low %v854_v51, %v862_v47 }
 0x327   :  { %4126 = vmatpush1.bf16.msra.mxu1 %v11970_v9  ;;  %v12066_v9 = vcombine.low %v917_v11, %v925_v12  ;;  %v886_v12 = vld [vmem:[#allocation7 + $0xbb0] sm:$0xff] }
 0x328   :  { %4183 = vmatpush1.bf16.msra.mxu0 %v11844_v10  ;;  %4127 = vmatprep.subr.bf16.mxu1 %v11987_v18  ;;  %v11940_v10 = vcombine.low %v790_v34, %v798_v41  ;;  %v12083_v18 = vcombine.high %v933_v15, %v941_v16  ;;  %v894_v34 = vld [vmem:[#allocation7 + $0xbf0] sm:$0xff] }
 0x329   :  { %4184 = vmatprep.subr.bf16.mxu0 %v11861_v19  ;;  %v11957_v19 = vcombine.high %v806_v17, %v814_v6 }
 0x32b   :  { %4128 = vmatpush1.bf16.msra.mxu1 %v11986_v26  ;;  %v12082_v26 = vcombine.low %v933_v15, %v941_v16  ;;  %v12037_v16 = vcombine.high %v886_v12, %v894_v34 }
 0x32c   :  { %4185 = vmatpush1.bf16.msra.mxu0 %v11860_v27  ;;  %4129 = vmatprep.subr.bf16.mxu1 %v12003_v28  ;;  %v11956_v27 = vcombine.low %v806_v17, %v814_v6  ;;  %v12099_v28 = vcombine.high %v949_v21, %v957_v23  ;;  %v519_v17 = vld [vmem:[#allocation7 + $0x38] sm:$0xff] }
 0x32d   :  { %v15299_v39 = vpop.f32.mrb[12].mxu1  ;;  %4186 = vmatprep.subr.bf16.mxu0 %v11877_v29  ;;  %v11973_v29 = vcombine.high %v822_v24, %v830_v25  ;;  %v527_v6 = vld [vmem:[#allocation7 + $0x78] sm:$0xff] }
 0x32e   :  { %v15301_v50 = vpop.f32.mrb[13].mxu1 }
 0x32f   :  { %v3829_v53 = vpop.f32.mrb[14].mxu1  ;;  %4130 = vmatpush1.bf16.msra.mxu1 %v12002_v36  ;;  %v12098_v36 = vcombine.low %v949_v21, %v957_v23  ;;  %v11671_v21 = vcombine.high %v519_v17, %v527_v6 }
 0x330   :  { %4187 = vmatpush1.bf16.msra.mxu0 %v11876_v37  ;;  %v3830_v56 = vpop.f32.mrb[15].mxu1  ;;  %4131 = vmatprep.subr.bf16.mxu1 %v12019_v38  ;;  %v11972_v37 = vcombine.low %v822_v24, %v830_v25  ;;  %v12115_v38 = vcombine.high %v965_v31, %v973_v32  ;;  %v12114_v53 = vcombine.low %v965_v31, %v973_v32  ;;  %v535_v24 = vld [vmem:[#allocation7 + $0xb8] sm:$0xff] }
 0x331   :  { %4188 = vmatprep.subr.bf16.mxu0 %v11893_v40  ;;  %v11989_v40 = vcombine.high %v838_v33, %v846_v35  ;;  %v12131_v56 = vcombine.high %v981_v44, %v989_v45  ;;  %v543_v25 = vld [vmem:[#allocation7 + $0xf8] sm:$0xff] }
 0x332   :  { %v11687_v31 = vcombine.high %v535_v24, %v543_v25 }
 0x333   :  { %4132 = vmatpush1.bf16.msra.mxu1 %v12018_v55  ;;  %v11988_v55 = vcombine.low %v838_v33, %v846_v35  ;;  %v551_v33 = vld [vmem:[#allocation7 + $0x138] sm:$0xff] }
 0x334   :  { %4189 = vmatpush1.bf16.msra.mxu0 %v11892_v57  ;;  %4133 = vmatprep.subr.bf16.mxu1 %v12035_v58  ;;  %v12005_v57 = vcombine.high %v854_v51, %v862_v47  ;;  %v997_v58 = vld [vmem:[#allocation7 + $0xf28] sm:$0xff]  ;;  %v559_v35 = vld [vmem:[#allocation7 + $0x178] sm:$0xff] }
 0x335   :  { %4190 = vmatprep.subr.bf16.mxu0 %v11909_v59  ;;  %v1005_v59 = vld [vmem:[#allocation7 + $0xf68] sm:$0xff]  ;;  %v11703_v44 = vcombine.high %v551_v33, %v559_v35  ;;  %v567_v51 = vld [vmem:[#allocation7 + $0x1b8] sm:$0xff] }
 0x336   :  { %v575_v47 = vld [vmem:[#allocation7 + $0x1f8] sm:$0xff] }
 0x337   :  { %4134 = vmatpush1.bf16.msra.mxu1 %v12034_v4  ;;  %v12147_v4 = vcombine.high %v997_v58, %v1005_v59 }
 0x338   :  { %4191 = vmatpush1.bf16.msra.mxu0 %v11908_v5  ;;  %4135 = vmatprep.subr.bf16.mxu1 %v12051_v30  ;;  %v12021_v5 = vcombine.high %v870_v60, %v878_v61  ;;  %v1013_v30 = vld [vmem:[#allocation7 + $0xfa8] sm:$0xff] }
 0x339   :  { %4201 = vmatprep.subr.bf16.mxu0 %v11925_v8  ;;  %v1021_v8 = vld [vmem:[#allocation7 + $0xfe8] sm:$0xff] }
 0x33b   :  { %4193 = vmatmul.mubr.bf16.vlgmr.msra.gmra.mrb[12].mxu0 %v15239_v62  ;;  %4136 = vmatpush1.bf16.msra.mxu1 %v12050_v42  ;;  %v12146_v42 = vcombine.low %v997_v58, %v1005_v59  ;;  %v11719_v58 = vcombine.high %v567_v51, %v575_v47 }
 0x33c   :  { %4202 = vmatpush1.bf16.msra.mxu0 %v11924_v43  ;;  %4233 = vmatprep.mubr.bf16.mxu0 %v15259_v52 }
 0x33d   :  { %4137 = vmatprep.subr.bf16.mxu1 %v12067_v13  ;;  %4203 = vmatprep.subr.bf16.mxu0 %v11941_v14  ;;  %v12020_v13 = vcombine.low %v870_v60, %v878_v61  ;;  %v12163_v14 = vcombine.high %v1013_v30, %v1021_v8  ;;  %v591_v60 = vld [vmem:[#allocation7 + $0x278] sm:$0xff]  ;;  %v966_v61 = vld [vmem:[#allocation7 + $0xe30] sm:$0xff] }
 0x33f   :  { %4138 = vmatpush1.bf16.msra.mxu1 %v12066_v9  ;;  %v902_v9 = vld [vmem:[#allocation7 + $0xc30] sm:$0xff] }
 0x340   :  { %4204 = vmatpush1.bf16.msra.mxu0 %v11940_v10  ;;  %4139 = vmatprep.subr.bf16.mxu1 %v12083_v18  ;;  %v910_v10 = vld [vmem:[#allocation7 + $0xc70] sm:$0xff]  ;;  %v12162_v18 = vcombine.low %v1013_v30, %v1021_v8  ;;  %v599_v8 = vld [vmem:[#allocation7 + $0x2b8] sm:$0xff] }
 0x341   :  { %4205 = vmatprep.subr.bf16.mxu0 %v11957_v19  ;;  %v12036_v19 = vcombine.low %v886_v12, %v894_v34  ;;  %v12053_v23 = vcombine.high %v902_v9, %v910_v10  ;;  %v607_v12 = vld [vmem:[#allocation7 + $0x2f8] sm:$0xff]  ;;  %v982_v34 = vld [vmem:[#allocation7 + $0xeb0] sm:$0xff] }
 0x343   :  { %4140 = vmatpush1.bf16.msra.mxu1 %v12082_v26  ;;  %v918_v26 = vld [vmem:[#allocation7 + $0xcb0] sm:$0xff] }
 0x344   :  { %4206 = vmatpush1.bf16.msra.mxu0 %v11956_v27  ;;  %4141 = vmatprep.subr.bf16.mxu1 %v12099_v28  ;;  %v926_v27 = vld [vmem:[#allocation7 + $0xcf0] sm:$0xff]  ;;  %v11670_v28 = vcombine.low %v519_v17, %v527_v6  ;;  %v623_v17 = vld [vmem:[#allocation7 + $0x378] sm:$0xff] }
 0x345   :  { %4207 = vmatprep.subr.bf16.mxu0 %v11973_v29  ;;  %v12052_v29 = vcombine.low %v902_v9, %v910_v10  ;;  %v12069_v32 = vcombine.high %v918_v26, %v926_v27  ;;  %v998_v6 = vld [vmem:[#allocation7 + $0xf30] sm:$0xff]  ;;  %v11750_v10 = vcombine.low %v599_v8, %v607_v12 }
 0x346   :  { %v1006_v9 = vld [vmem:[#allocation7 + $0xf70] sm:$0xff] }
 0x347   :  { %4142 = vmatpush1.bf16.msra.mxu1 %v12098_v36  ;;  %v934_v36 = vld [vmem:[#allocation7 + $0xd30] sm:$0xff] }
 0x348   :  { %4208 = vmatpush1.bf16.msra.mxu0 %v11972_v37  ;;  %4143 = vmatprep.subr.bf16.mxu1 %v12115_v38  ;;  %v942_v37 = vld [vmem:[#allocation7 + $0xd70] sm:$0xff]  ;;  %v11686_v38 = vcombine.low %v535_v24, %v543_v25  ;;  %v639_v24 = vld [vmem:[#allocation7 + $0x3f8] sm:$0xff] }
 0x349   :  { %4209 = vmatprep.subr.bf16.mxu0 %v11989_v40  ;;  %v12068_v40 = vcombine.low %v918_v26, %v926_v27  ;;  %v12085_v45 = vcombine.high %v934_v36, %v942_v37  ;;  %v1014_v25 = vld [vmem:[#allocation7 + $0xfb0] sm:$0xff] }
 0x34a   :  { %v1022_v26 = vld [vmem:[#allocation7 + $0xff0] sm:$0xff] }
 0x34b   :  { %4144 = vmatpush1.bf16.msra.mxu1 %v12114_v53  ;;  %v950_v53 = vld [vmem:[#allocation7 + $0xdb0] sm:$0xff] }
 0x34c   :  { %4210 = vmatpush1.bf16.msra.mxu0 %v11988_v55  ;;  %4145 = vmatprep.subr.bf16.mxu1 %v12131_v56  ;;  %v958_v55 = vld [vmem:[#allocation7 + $0xdf0] sm:$0xff]  ;;  %v11702_v56 = vcombine.low %v551_v33, %v559_v35  ;;  %v655_v33 = vld [vmem:[#allocation7 + $0x478] sm:$0xff] }
 0x34d   :  { %4211 = vmatprep.subr.bf16.mxu0 %v12005_v57  ;;  %v12084_v57 = vcombine.low %v934_v36, %v942_v37  ;;  %v12101_v59 = vcombine.high %v950_v53, %v958_v55  ;;  %v12164_v36 = vcombine.low %v1014_v25, %v1022_v26 }
 0x34e   :  { %v15305_v11 = vpop.f32.mrb[4].mxu0 }
 0x34f   :  { %v15307_v41 = vpop.f32.mrb[5].mxu0  ;;  %4146 = vmatpush1.bf16.msra.mxu1 %v12130_v1  ;;  %v974_v1 = vld [vmem:[#allocation7 + $0xe70] sm:$0xff] }
 0x350   :  { %v3911_v43 = vpop.f32.mrb[6].mxu0  ;;  %4212 = vmatpush1.bf16.msra.mxu0 %v12004_v3  ;;  %4147 = vmatprep.subr.bf16.mxu1 %v12147_v4  ;;  %v11718_v3 = vcombine.low %v567_v51, %v575_v47  ;;  %v12100_v4 = vcombine.low %v950_v53, %v958_v55  ;;  %v12117_v30 = vcombine.high %v966_v61, %v974_v1  ;;  %v13350_v47 = vld [vmem:[#allocation10] ss:$8 sps:$4 sm:$0xff]   ;;  %v13355_v55 = vld [vmem:[#allocation10 + $0x14] ss:$8 sps:$4 sm:$0xff]  }
 0x351   :  { %v3912_v15 = vpop.f32.mrb[7].mxu0  ;;  %4213 = vmatprep.subr.bf16.mxu0 %v12021_v5 }
 0x353   :  { %4148 = vmatpush1.bf16.msra.mxu1 %v12146_v42  ;;  %v990_v42 = vld [vmem:[#allocation7 + $0xef0] sm:$0xff] }
 0x354   :  { %4214 = vmatpush1.bf16.msra.mxu0 %v12020_v13  ;;  %4149 = vmatprep.subr.bf16.mxu1 %v12163_v14  ;;  %v12116_v13 = vcombine.low %v966_v61, %v974_v1  ;;  %v11751_v14 = vcombine.high %v599_v8, %v607_v12  ;;  %v12133_v15 = vcombine.high %v982_v34, %v990_v42  ;;  %v695_v61 = vld [vmem:[#allocation7 + $0x5b8] sm:$0xff] }
 0x355   :  { %4215 = vmatprep.subr.bf16.mxu0 %v12037_v16  ;;  %v615_v16 = vld [vmem:[#allocation7 + $0x338] sm:$0xff] }
 0x356   :  { %v11766_v27 = vcombine.low %v615_v16, %v623_v17  ;;  %v703_v1 = vld [vmem:[#allocation7 + $0x5f8] sm:$0xff] }
 0x357   :  { %4150 = vmatpush1.bf16.msra.mxu1 %v12162_v18  ;;  %v12132_v18 = vcombine.low %v982_v34, %v990_v42  ;;  %v711_v8 = vld [vmem:[#allocation7 + $0x638] sm:$0xff]  ;;  %v11846_v34 = vcombine.low %v695_v61, %v703_v1  ;;  %v13359_v42 = vld [vmem:[#allocation10 + $0x30] ss:$8 sps:$4 sm:$0xff]  }
 0x358   :  { %4216 = vmatpush1.bf16.msra.mxu0 %v12036_v19  ;;  %4242 = vmatprep.subr.bf16.mxu1 %v11671_v21  ;;  %v11767_v19 = vcombine.high %v615_v16, %v623_v17  ;;  %v12149_v21 = vcombine.high %v998_v6, %v1006_v9  ;;  %v719_v12 = vld [vmem:[#allocation7 + $0x678] sm:$0xff] }
 0x359   :  { %4217 = vmatprep.subr.bf16.mxu0 %v12053_v23  ;;  %v631_v23 = vld [vmem:[#allocation7 + $0x3b8] sm:$0xff]  ;;  %v11862_v16 = vcombine.low %v711_v8, %v719_v12 }
 0x35a   :  { %4152 = vmatmul.mubr.bf16.vlgmr.msra.gmra.mrb[20].mxu1 %v15261_v54  ;;  %v11782_v35 = vcombine.low %v631_v23, %v639_v24  ;;  %v13362_v17 = vld [vmem:[#allocation10 + $0x40] ss:$8 sps:$4 sm:$0xff]  }
 0x35b   :  { %4243 = vmatpush1.bf16.msra.mxu1 %v11670_v28  ;;  %4274 = vmatprep.mubr.bf16.mxu1 %v15241_v63  ;;  %v583_v63 = vld [vmem:[#allocation7 + $0x238] sm:$0xff]  ;;  %v12148_v28 = vcombine.low %v998_v6, %v1006_v9  ;;  %v13367_v9 = vld [vmem:[#allocation10 + $0x54] ss:$8 sps:$4 sm:$0xff]  }
 0x35c   :  { %4218 = vmatpush1.bf16.msra.mxu0 %v12052_v29  ;;  %4244 = vmatprep.subr.bf16.mxu1 %v11687_v31  ;;  %v11735_v5 = vcombine.high %v583_v63, %v591_v60  ;;  %v11734_v43 = vcombine.low %v583_v63, %v591_v60  ;;  %v11783_v29 = vcombine.high %v631_v23, %v639_v24  ;;  %v13358_v60 = vld [vmem:[#allocation10 + $0x24] ss:$8 sps:$4 sm:$0xff]  }
 0x35d   :  { %4219 = vmatprep.subr.bf16.mxu0 %v12069_v32  ;;  %v12165_v31 = vcombine.high %v1014_v25, %v1022_v26  ;;  %v647_v32 = vld [vmem:[#allocation7 + $0x438] sm:$0xff] }
 0x35e   :  { %v11799_v37 = vcombine.high %v647_v32, %v655_v33  ;;  %v11798_v51 = vcombine.low %v647_v32, %v655_v33  ;;  %v13370_v24 = vld [vmem:[#allocation10 + $0x64] ss:$8 sps:$4 sm:$0xff]  }
 0x35f   :  { %4245 = vmatpush1.bf16.msra.mxu1 %v11686_v38  ;;  %v13352_v38 = vld [vmem:[#allocation10 + $0x4] ss:$8 sps:$4 sm:$0xff]  }
 0x360   :  { %4220 = vmatpush1.bf16.msra.mxu0 %v12068_v40  ;;  %4246 = vmatprep.subr.bf16.mxu1 %v11703_v44  ;;  %v4325_v40 = vmax.f32 %v15291_v7, 0.0  ;;  %v663_v44 = vld [vmem:[#allocation7 + $0x4b8] sm:$0xff]  ;;  %v13353_v7 = vld [vmem:[#allocation10 + $0x10] ss:$8 sps:$4 sm:$0xff]  }
 0x361   :  { %4221 = vmatprep.subr.bf16.mxu0 %v12085_v45  ;;  %v671_v45 = vld [vmem:[#allocation7 + $0x4f8] sm:$0xff] }
 0x362   :  { %v11815_v53 = vcombine.high %v663_v44, %v671_v45  ;;  %v759_v25 = vld [vmem:[#allocation7 + $0x7b8] sm:$0xff] }
 0x363   :  { %4247 = vmatpush1.bf16.msra.mxu1 %v11702_v56  ;;  %v679_v56 = vld [vmem:[#allocation7 + $0x538] sm:$0xff] }
 0x364   :  { %4222 = vmatpush1.bf16.msra.mxu0 %v12084_v57  ;;  %4248 = vmatprep.subr.bf16.mxu1 %v11719_v58  ;;  %v687_v57 = vld [vmem:[#allocation7 + $0x578] sm:$0xff]  ;;  %v4341_v58 = vpack.c.bf16 %v4325_v40, %v4325_v40 }
 0x365   :  { %4223 = vmatprep.subr.bf16.mxu0 %v12101_v59  ;;  %v11814_v59 = vcombine.low %v663_v44, %v671_v45  ;;  %v11831_v63 = vcombine.high %v679_v56, %v687_v57  ;;  %v767_v26 = vld [vmem:[#allocation7 + $0x7f8] sm:$0xff] }
 0x366   :  { %v775_v32 = vld [vmem:[#allocation7 + $0x838] sm:$0xff] }
 0x367   :  { %4249 = vmatpush1.bf16.msra.mxu1 %v11718_v3  ;;  %v11830_v3 = vcombine.low %v679_v56, %v687_v57  ;;  %v783_v33 = vld [vmem:[#allocation7 + $0x878] sm:$0xff] }
 0x368   :  { %4224 = vmatpush1.bf16.msra.mxu0 %v12100_v4  ;;  %4250 = vmatprep.subr.bf16.mxu1 %v11735_v5  ;;  %v13356_v4 = vld [vmem:[#allocation10 + $0x20] ss:$8 sps:$4 sm:$0xff]   ;;  %v11847_v5 = vcombine.high %v695_v61, %v703_v1  ;;  %v11926_v45 = vcombine.low %v775_v32, %v783_v33 }
 0x369   :  { %4225 = vmatprep.subr.bf16.mxu0 %v12117_v30  ;;  %v13361_v30 = vld [vmem:[#allocation10 + $0x34] ss:$8 sps:$4 sm:$0xff]   ;;  %v791_v40 = vld [vmem:[#allocation7 + $0x8b8] sm:$0xff] }
 0x36a   :  { %v799_v44 = vld [vmem:[#allocation7 + $0x8f8] sm:$0xff] }
 0x36b   :  { %4251 = vmatpush1.bf16.msra.mxu1 %v11734_v43  ;;  %v11863_v43 = vcombine.high %v711_v8, %v719_v12  ;;  %v815_v56 = vld [vmem:[#allocation7 + $0x978] sm:$0xff]  ;;  %v11942_v57 = vcombine.low %v791_v40, %v799_v44 }
 0x36c   :  { %4226 = vmatpush1.bf16.msra.mxu0 %v12116_v13  ;;  %4252 = vmatprep.subr.bf16.mxu1 %v11751_v14  ;;  %v13364_v13 = vld [vmem:[#allocation10 + $0x44] ss:$8 sps:$4 sm:$0xff]   ;;  %v13380_v1 = vld [vmem:[#allocation10 + $0xa0] ss:$8 sps:$4 sm:$0xff]  }
 0x36d   :  { %4227 = vmatprep.subr.bf16.mxu0 %v12133_v15  ;;  %v727_v14 = vld [vmem:[#allocation7 + $0x6b8] sm:$0xff] }
 0x36e   :  { %v735_v15 = vld [vmem:[#allocation7 + $0x6f8] sm:$0xff] }
 0x36f   :  { %4253 = vmatpush1.bf16.msra.mxu1 %v11750_v10  ;;  %v11879_v6 = vcombine.high %v727_v14, %v735_v15  ;;  %v743_v10 = vld [vmem:[#allocation7 + $0x738] sm:$0xff] }
 0x370   :  { %4228 = vmatpush1.bf16.msra.mxu0 %v12132_v18  ;;  %4254 = vmatprep.subr.bf16.mxu1 %v11767_v19  ;;  %v751_v18 = vld [vmem:[#allocation7 + $0x778] sm:$0xff]  ;;  %v11878_v19 = vcombine.low %v727_v14, %v735_v15  ;;  %v13391_v15 = vld [vmem:[#allocation10 + $0xd4] ss:$8 sps:$4 sm:$0xff]  }
 0x371   :  { %4229 = vmatprep.subr.bf16.mxu0 %v12149_v21  ;;  %v13365_v21 = vld [vmem:[#allocation10 + $0x50] ss:$8 sps:$4 sm:$0xff]   ;;  %v11895_v23 = vcombine.high %v743_v10, %v751_v18  ;;  %v13388_v12 = vld [vmem:[#allocation10 + $0xc4] ss:$8 sps:$4 sm:$0xff]  }
 0x373   :  { %4255 = vmatpush1.bf16.msra.mxu1 %v11766_v27  ;;  %v11894_v27 = vcombine.low %v743_v10, %v751_v18 }
 0x374   :  { %4230 = vmatpush1.bf16.msra.mxu0 %v12148_v28  ;;  %4256 = vmatprep.subr.bf16.mxu1 %v11783_v29  ;;  %v13368_v28 = vld [vmem:[#allocation10 + $0x60] ss:$8 sps:$4 sm:$0xff]   ;;  %v11911_v29 = vcombine.high %v759_v25, %v767_v26 }
 0x375   :  { %4231 = vmatprep.subr.bf16.mxu0 %v12165_v31  ;;  %v13373_v31 = vld [vmem:[#allocation10 + $0x74] ss:$8 sps:$4 sm:$0xff]  }
 0x377   :  { %4257 = vmatpush1.bf16.msra.mxu1 %v11782_v35  ;;  %v11910_v35 = vcombine.low %v759_v25, %v767_v26 }
 0x378   :  { %4232 = vmatpush1.bf16.msra.mxu0 %v12164_v36  ;;  %4258 = vmatprep.subr.bf16.mxu1 %v11799_v37  ;;  %v13371_v36 = vld [vmem:[#allocation10 + $0x70] ss:$8 sps:$4 sm:$0xff]   ;;  %v11927_v37 = vcombine.high %v775_v32, %v783_v33  ;;  %v13397_v33 = vld [vmem:[#allocation10 + $0xf4] ss:$8 sps:$4 sm:$0xff]  }
 0x379   :  { %5904 = vmatprep.subr.bf16.mxu0 %v13352_v38  ;;  %v13376_v38 = vld [vmem:[#allocation10 + $0x84] ss:$8 sps:$4 sm:$0xff]  }
 0x37b   :  { %4234 = vmatmul.mubr.bf16.vlgmr.msra.gmra.mrb[12].mxu0 %v15261_v54  ;;  %4259 = vmatpush1.bf16.msra.mxu1 %v11798_v51  ;;  %v13374_v51 = vld [vmem:[#allocation10 + $0x80] ss:$8 sps:$4 sm:$0xff]  }
 0x37c   :  { %5905 = vmatpush1.bf16.msra.mxu0 %v13350_v47  ;;  %5936 = vmatprep.mubr.bf16.mxu0 %v4341_v58  ;;  %v11943_v47 = vcombine.high %v791_v40, %v799_v44  ;;  %v13377_v58 = vld [vmem:[#allocation10 + $0x90] ss:$8 sps:$4 sm:$0xff]  }
 0x37d   :  { %4260 = vmatprep.subr.bf16.mxu1 %v11815_v53  ;;  %5906 = vmatprep.subr.bf16.mxu0 %v13355_v55  ;;  %v13379_v53 = vld [vmem:[#allocation10 + $0x94] ss:$8 sps:$4 sm:$0xff]   ;;  %v807_v55 = vld [vmem:[#allocation7 + $0x938] sm:$0xff]  ;;  %v13395_v40 = vld [vmem:[#allocation10 + $0xf0] ss:$8 sps:$4 sm:$0xff]  }
 0x37e   :  { %v11958_v61 = vcombine.low %v807_v55, %v815_v56 }
 0x37f   :  { %4261 = vmatpush1.bf16.msra.mxu1 %v11814_v59  ;;  %v11959_v59 = vcombine.high %v807_v55, %v815_v56  ;;  %v927_v55 = vld [vmem:[#allocation7 + $0xcf8] sm:$0xff] }
 0x380   :  { %5907 = vmatpush1.bf16.msra.mxu0 %v13353_v7  ;;  %4262 = vmatprep.subr.bf16.mxu1 %v11831_v63  ;;  %v13382_v7 = vld [vmem:[#allocation10 + $0xa4] ss:$8 sps:$4 sm:$0xff]  }
 0x381   :  { %5908 = vmatprep.subr.bf16.mxu0 %v13358_v60  ;;  %v823_v63 = vld [vmem:[#allocation7 + $0x9b8] sm:$0xff] }
 0x382   :  { %v831_v60 = vld [vmem:[#allocation7 + $0x9f8] sm:$0xff] }
 0x383   :  { %4263 = vmatpush1.bf16.msra.mxu1 %v11830_v3  ;;  %v11975_v3 = vcombine.high %v823_v63, %v831_v60 }
 0x384   :  { %5909 = vmatpush1.bf16.msra.mxu0 %v13356_v4  ;;  %4264 = vmatprep.subr.bf16.mxu1 %v11847_v5  ;;  %v839_v4 = vld [vmem:[#allocation7 + $0xa38] sm:$0xff] }
 0x385   :  { %5910 = vmatprep.subr.bf16.mxu0 %v13361_v30  ;;  %v847_v5 = vld [vmem:[#allocation7 + $0xa78] sm:$0xff]  ;;  %v13383_v30 = vld [vmem:[#allocation10 + $0xb0] ss:$8 sps:$4 sm:$0xff]  }
 0x386   :  { %v11991_v8 = vcombine.high %v839_v4, %v847_v5 }
 0x387   :  { %4265 = vmatpush1.bf16.msra.mxu1 %v11846_v34  ;;  %v855_v34 = vld [vmem:[#allocation7 + $0xab8] sm:$0xff] }
 0x388   :  { %5911 = vmatpush1.bf16.msra.mxu0 %v13359_v42  ;;  %4266 = vmatprep.subr.bf16.mxu1 %v11863_v43  ;;  %v863_v42 = vld [vmem:[#allocation7 + $0xaf8] sm:$0xff]  ;;  %v11990_v43 = vcombine.low %v839_v4, %v847_v5 }
 0x389   :  { %5912 = vmatprep.subr.bf16.mxu0 %v13364_v13  ;;  %v13386_v13 = vld [vmem:[#allocation10 + $0xc0] ss:$8 sps:$4 sm:$0xff]   ;;  %v12007_v14 = vcombine.high %v855_v34, %v863_v42 }
 0x38a   :  { %v959_v4 = vld [vmem:[#allocation7 + $0xdf8] sm:$0xff] }
 0x38b   :  { %4267 = vmatpush1.bf16.msra.mxu1 %v11862_v16  ;;  %v871_v16 = vld [vmem:[#allocation7 + $0xb38] sm:$0xff] }
 0x38c   :  { %5913 = vmatpush1.bf16.msra.mxu0 %v13362_v17  ;;  %4268 = vmatprep.subr.bf16.mxu1 %v11879_v6  ;;  %v879_v17 = vld [vmem:[#allocation7 + $0xb78] sm:$0xff]  ;;  %v12006_v6 = vcombine.low %v855_v34, %v863_v42 }
 0x38d   :  { %5914 = vmatprep.subr.bf16.mxu0 %v13367_v9  ;;  %v13389_v9 = vld [vmem:[#allocation10 + $0xd0] ss:$8 sps:$4 sm:$0xff]   ;;  %v12023_v10 = vcombine.high %v871_v16, %v879_v17  ;;  %v975_v34 = vld [vmem:[#allocation7 + $0xe78] sm:$0xff] }
 0x38f   :  { %4269 = vmatpush1.bf16.msra.mxu1 %v11878_v19  ;;  %v13394_v19 = vld [vmem:[#allocation10 + $0xe4] ss:$8 sps:$4 sm:$0xff]  }
 0x390   :  { %5915 = vmatpush1.bf16.msra.mxu0 %v13365_v21  ;;  %4270 = vmatprep.subr.bf16.mxu1 %v11895_v23  ;;  %v887_v21 = vld [vmem:[#allocation7 + $0xbb8] sm:$0xff] }
 0x391   :  { %5916 = vmatprep.subr.bf16.mxu0 %v13370_v24  ;;  %v895_v23 = vld [vmem:[#allocation7 + $0xbf8] sm:$0xff]  ;;  %v15317_v24 = vld [vmem:[#allocation8] sm:$0xff] }
 0x392   :  { %v1043_v25 = vrot.slane %v15317_v24, %v15253_v22  ;;  %v12039_v32 = vcombine.high %v887_v21, %v895_v23 }
 0x393   :  { %4271 = vmatpush1.bf16.msra.mxu1 %v11894_v27 }
 0x394   :  { %5917 = vmatpush1.bf16.msra.mxu0 %v13368_v28  ;;  %4272 = vmatprep.subr.bf16.mxu1 %v11911_v29  ;;  %v12022_v28 = vcombine.low %v871_v16, %v879_v17  ;;  %v991_v16 = vld [vmem:[#allocation7 + $0xef8] sm:$0xff] }
 0x395   :  { %5918 = vmatprep.subr.bf16.mxu0 %v13373_v31  ;;  %v13392_v31 = vld [vmem:[#allocation10 + $0xe0] ss:$8 sps:$4 sm:$0xff]  }
 0x397   :  { %4273 = vmatpush1.bf16.msra.mxu1 %v11910_v35  ;;  %v903_v35 = vld [vmem:[#allocation7 + $0xc38] sm:$0xff] }
 0x398   :  { %5919 = vmatpush1.bf16.msra.mxu0 %v13371_v36  ;;  %4283 = vmatprep.subr.bf16.mxu1 %v11927_v37  ;;  %v911_v36 = vld [vmem:[#allocation7 + $0xc78] sm:$0xff]  ;;  %v13147_v37 = vadd.f32 %v15301_v50, %v1043_v25  ;;  %v13413_v25 = vld [vmem:[#allocation10 + $0x150] ss:$8 sps:$4 sm:$0xff]  }
 0x399   :  { %5920 = vmatprep.subr.bf16.mxu0 %v13376_v38  ;;  %v12038_v38 = vcombine.low %v887_v21, %v895_v23  ;;  %v12055_v44 = vcombine.high %v903_v35, %v911_v36  ;;  %v12054_v56 = vcombine.low %v903_v35, %v911_v36  ;;  %v1007_v21 = vld [vmem:[#allocation7 + $0xf78] sm:$0xff] }
 0x39a   :  { %4275 = vmatmul.mubr.bf16.vlgmr.msra.gmra.mrb[24].mxu1 %v15239_v62  ;;  %v13385_v62 = vld [vmem:[#allocation10 + $0xb4] ss:$8 sps:$4 sm:$0xff]  }
 0x39b   :  { %4284 = vmatpush1.bf16.msra.mxu1 %v11926_v45  ;;  %4315 = vmatprep.mubr.bf16.mxu1 %v15259_v52  ;;  %v11974_v52 = vcombine.low %v823_v63, %v831_v60  ;;  %v4324_v45 = vmax.f32 %v15289_v2, 0.0  ;;  %v943_v63 = vld [vmem:[#allocation7 + $0xd78] sm:$0xff] }
 0x39c   :  { %5921 = vmatpush1.bf16.msra.mxu0 %v13374_v51  ;;  %4285 = vmatprep.subr.bf16.mxu1 %v11943_v47  ;;  %v13400_v51 = vld [vmem:[#allocation10 + $0x104] ss:$8 sps:$4 sm:$0xff]   ;;  %v4327_v47 = vmax.f32 %v13147_v37, 0.0  ;;  %v13416_v37 = vld [vmem:[#allocation10 + $0x160] ss:$8 sps:$4 sm:$0xff]  }
 0x39d   :  { %5922 = vmatprep.subr.bf16.mxu0 %v13379_v53  ;;  %v919_v53 = vld [vmem:[#allocation7 + $0xcb8] sm:$0xff] }
 0x39e   :  { %v12071_v50 = vcombine.high %v919_v53, %v927_v55  ;;  %v4343_v60 = vpack.c.bf16 %v4327_v47, %v4327_v47  ;;  %v12070_v2 = vcombine.low %v919_v53, %v927_v55  ;;  %v13424_v47 = vld [vmem:[#allocation10 + $0x184] ss:$8 sps:$4 sm:$0xff]   ;;  %v13422_v53 = vld [vmem:[#allocation10 + $0x180] ss:$8 sps:$4 sm:$0xff]   ;;  %v13427_v55 = vld [vmem:[#allocation10 + $0x194] ss:$8 sps:$4 sm:$0xff]  }
 0x39f   :  { %4286 = vmatpush1.bf16.msra.mxu1 %v11942_v57  ;;  %v13398_v57 = vld [vmem:[#allocation10 + $0x100] ss:$8 sps:$4 sm:$0xff]  }
 0x3a0   :  { %5923 = vmatpush1.bf16.msra.mxu0 %v13377_v58  ;;  %4287 = vmatprep.subr.bf16.mxu1 %v11959_v59  ;;  %v4340_v58 = vpack.c.bf16 %v4324_v45, %v4324_v45  ;;  %v13403_v59 = vld [vmem:[#allocation10 + $0x114] ss:$8 sps:$4 sm:$0xff]  }
 0x3a1   :  { %5924 = vmatprep.subr.bf16.mxu0 %v13382_v7  ;;  %v935_v7 = vld [vmem:[#allocation7 + $0xd38] sm:$0xff] }
 0x3a2   :  { %v12086_v5 = vcombine.low %v935_v7, %v943_v63 }
 0x3a3   :  { %4288 = vmatpush1.bf16.msra.mxu1 %v11958_v61  ;;  %v13401_v61 = vld [vmem:[#allocation10 + $0x110] ss:$8 sps:$4 sm:$0xff]  }
 0x3a4   :  { %5925 = vmatpush1.bf16.msra.mxu0 %v13380_v1  ;;  %4289 = vmatprep.subr.bf16.mxu1 %v11975_v3  ;;  %v12087_v1 = vcombine.high %v935_v7, %v943_v63  ;;  %v13406_v3 = vld [vmem:[#allocation10 + $0x124] ss:$8 sps:$4 sm:$0xff]   ;;  %v13434_v63 = vld [vmem:[#allocation10 + $0x1c0] ss:$8 sps:$4 sm:$0xff]  }
 0x3a5   :  { %5926 = vmatprep.subr.bf16.mxu0 %v13385_v62  ;;  %v951_v62 = vld [vmem:[#allocation7 + $0xdb8] sm:$0xff] }
 0x3a6   :  { %v12102_v42 = vcombine.low %v951_v62, %v959_v4  ;;  %v13436_v7 = vld [vmem:[#allocation10 + $0x1c4] ss:$8 sps:$4 sm:$0xff]  }
 0x3a7   :  { %4290 = vmatpush1.bf16.msra.mxu1 %v11974_v52  ;;  %v13404_v52 = vld [vmem:[#allocation10 + $0x120] ss:$8 sps:$4 sm:$0xff]  }
 0x3a8   :  { %5927 = vmatpush1.bf16.msra.mxu0 %v13383_v30  ;;  %4291 = vmatprep.subr.bf16.mxu1 %v11991_v8  ;;  %v12103_v30 = vcombine.high %v951_v62, %v959_v4  ;;  %v13409_v8 = vld [vmem:[#allocation10 + $0x134] ss:$8 sps:$4 sm:$0xff]   ;;  %v13440_v62 = vld [vmem:[#allocation10 + $0x1e0] ss:$8 sps:$4 sm:$0xff]  }
 0x3a9   :  { %5928 = vmatprep.subr.bf16.mxu0 %v13388_v12  ;;  %v967_v12 = vld [vmem:[#allocation7 + $0xe38] sm:$0xff] }
 0x3aa   :  { %v12118_v17 = vcombine.low %v967_v12, %v975_v34 }
 0x3ab   :  { %4292 = vmatpush1.bf16.msra.mxu1 %v11990_v43  ;;  %v13407_v43 = vld [vmem:[#allocation10 + $0x130] ss:$8 sps:$4 sm:$0xff]  }
 0x3ac   :  { %5929 = vmatpush1.bf16.msra.mxu0 %v13386_v13  ;;  %4293 = vmatprep.subr.bf16.mxu1 %v12007_v14  ;;  %v12119_v13 = vcombine.high %v967_v12, %v975_v34  ;;  %v13412_v14 = vld [vmem:[#allocation10 + $0x144] ss:$8 sps:$4 sm:$0xff]  }
 0x3ad   :  { %v15315_v18 = vpop.f32.mrb[16].mxu1  ;;  %5930 = vmatprep.subr.bf16.mxu0 %v13391_v15  ;;  %v983_v15 = vld [vmem:[#allocation7 + $0xeb8] sm:$0xff] }
 0x3ae   :  { %v15321_v26 = vpop.f32.mrb[17].mxu1  ;;  %v12134_v23 = vcombine.low %v983_v15, %v991_v16  ;;  %v13448_v12 = vld [vmem:[#allocation10 + $0x204] ss:$8 sps:$4 sm:$0xff]  }
 0x3af   :  { %v3993_v27 = vpop.f32.mrb[18].mxu1  ;;  %4294 = vmatpush1.bf16.msra.mxu1 %v12006_v6  ;;  %v13410_v6 = vld [vmem:[#allocation10 + $0x140] ss:$8 sps:$4 sm:$0xff]  }
 0x3b0   :  { %5931 = vmatpush1.bf16.msra.mxu0 %v13389_v9  ;;  %v3994_v29 = vpop.f32.mrb[19].mxu1  ;;  %4295 = vmatprep.subr.bf16.mxu1 %v12023_v10  ;;  %v12135_v9 = vcombine.high %v983_v15, %v991_v16  ;;  %v13415_v10 = vld [vmem:[#allocation10 + $0x154] ss:$8 sps:$4 sm:$0xff]   ;;  %v13454_v15 = vld [vmem:[#allocation10 + $0x224] ss:$8 sps:$4 sm:$0xff]  }
 0x3b1   :  { %5932 = vmatprep.subr.bf16.mxu0 %v13394_v19  ;;  %v999_v19 = vld [vmem:[#allocation7 + $0xf38] sm:$0xff]  ;;  %v13457_v16 = vld [vmem:[#allocation10 + $0x234] ss:$8 sps:$4 sm:$0xff]  }
 0x3b2   :  { %v12151_v27 = vcombine.high %v999_v19, %v1007_v21  ;;  %v1015_v29 = vld [vmem:[#allocation7 + $0xfb8] sm:$0xff]  ;;  %v12150_v35 = vcombine.low %v999_v19, %v1007_v21  ;;  %v13461_v19 = vld [vmem:[#allocation10 + $0x250] ss:$8 sps:$4 sm:$0xff]  }
 0x3b3   :  { %4296 = vmatpush1.bf16.msra.mxu1 %v12022_v28  ;;  %v13418_v28 = vld [vmem:[#allocation10 + $0x164] ss:$8 sps:$4 sm:$0xff]  }
 0x3b4   :  { %5933 = vmatpush1.bf16.msra.mxu0 %v13392_v31  ;;  %4297 = vmatprep.subr.bf16.mxu1 %v12039_v32  ;;  %v1023_v31 = vld [vmem:[#allocation7 + $0xff8] sm:$0xff] }
 0x3b5   :  { %5934 = vmatprep.subr.bf16.mxu0 %v13397_v33  ;;  %v12166_v45 = vcombine.low %v1015_v29, %v1023_v31  ;;  %v13466_v21 = vld [vmem:[#allocation10 + $0x264] ss:$8 sps:$4 sm:$0xff]  }
 0x3b7   :  { %4298 = vmatpush1.bf16.msra.mxu1 %v12038_v38  ;;  %v12167_v38 = vcombine.high %v1015_v29, %v1023_v31  ;;  %v13470_v29 = vld [vmem:[#allocation10 + $0x280] ss:$8 sps:$4 sm:$0xff]   ;;  %v13475_v31 = vld [vmem:[#allocation10 + $0x294] ss:$8 sps:$4 sm:$0xff]  }
 0x3b8   :  { %5935 = vmatpush1.bf16.msra.mxu0 %v13395_v40  ;;  %4299 = vmatprep.subr.bf16.mxu1 %v12055_v44  ;;  %v13421_v44 = vld [vmem:[#allocation10 + $0x174] ss:$8 sps:$4 sm:$0xff]  }
 0x3b9   :  { %5945 = vmatprep.subr.bf16.mxu0 %v13400_v51  ;;  %v13419_v51 = vld [vmem:[#allocation10 + $0x170] ss:$8 sps:$4 sm:$0xff]  }
 0x3bb   :  { %5937 = vmatmul.mubr.bf16.vlgmr.msra.gmra.mrb[16].mxu0 %v4340_v58  ;;  %4300 = vmatpush1.bf16.msra.mxu1 %v12054_v56  ;;  %v13425_v56 = vld [vmem:[#allocation10 + $0x190] ss:$8 sps:$4 sm:$0xff]   ;;  %v13428_v58 = vld [vmem:[#allocation10 + $0x1a0] ss:$8 sps:$4 sm:$0xff]  }
 0x3bc   :  { %5946 = vmatpush1.bf16.msra.mxu0 %v13398_v57  ;;  %5977 = vmatprep.mubr.bf16.mxu0 %v4343_v60  ;;  %v13430_v57 = vld [vmem:[#allocation10 + $0x1a4] ss:$8 sps:$4 sm:$0xff]   ;;  %v13439_v60 = vld [vmem:[#allocation10 + $0x1d4] ss:$8 sps:$4 sm:$0xff]  }
 0x3bd   :  { %4301 = vmatprep.subr.bf16.mxu1 %v12071_v50  ;;  %5947 = vmatprep.subr.bf16.mxu0 %v13403_v59  ;;  %v13433_v50 = vld [vmem:[#allocation10 + $0x1b4] ss:$8 sps:$4 sm:$0xff]   ;;  %v13431_v59 = vld [vmem:[#allocation10 + $0x1b0] ss:$8 sps:$4 sm:$0xff]  }
 0x3bf   :  { %4302 = vmatpush1.bf16.msra.mxu1 %v12070_v2  ;;  %v13437_v2 = vld [vmem:[#allocation10 + $0x1d0] ss:$8 sps:$4 sm:$0xff]  }
 0x3c0   :  { %5948 = vmatpush1.bf16.msra.mxu0 %v13401_v61  ;;  %4303 = vmatprep.subr.bf16.mxu1 %v12087_v1  ;;  %v1039_v61 = vrot.slane %v15317_v24, %v15250_v20  ;;  %v13442_v1 = vld [vmem:[#allocation10 + $0x1e4] ss:$8 sps:$4 sm:$0xff]  }
 0x3c1   :  { %5949 = vmatprep.subr.bf16.mxu0 %v13406_v3 }
 0x3c2   :  { %v13146_v4 = vadd.f32 %v15299_v39, %v1039_v61  ;;  %v13449_v39 = vld [vmem:[#allocation10 + $0x210] ss:$8 sps:$4 sm:$0xff]   ;;  %v13493_v61 = vld [vmem:[#allocation10 + $0x2f4] ss:$8 sps:$4 sm:$0xff]  }
 0x3c3   :  { %4304 = vmatpush1.bf16.msra.mxu1 %v12086_v5  ;;  %v13445_v5 = vld [vmem:[#allocation10 + $0x1f4] ss:$8 sps:$4 sm:$0xff]  }
 0x3c4   :  { %5950 = vmatpush1.bf16.msra.mxu0 %v13404_v52  ;;  %4305 = vmatprep.subr.bf16.mxu1 %v12103_v30  ;;  %v13443_v30 = vld [vmem:[#allocation10 + $0x1f0] ss:$8 sps:$4 sm:$0xff]  }
 0x3c5   :  { %5951 = vmatprep.subr.bf16.mxu0 %v13409_v8  ;;  %v4326_v8 = vmax.f32 %v13146_v4, 0.0  ;;  %v13496_v4 = vld [vmem:[#allocation10 + $0x304] ss:$8 sps:$4 sm:$0xff]  }
 0x3c7   :  { %4306 = vmatpush1.bf16.msra.mxu1 %v12102_v42  ;;  %v13446_v42 = vld [vmem:[#allocation10 + $0x200] ss:$8 sps:$4 sm:$0xff]  }
 0x3c8   :  { %5952 = vmatpush1.bf16.msra.mxu0 %v13407_v43  ;;  %4307 = vmatprep.subr.bf16.mxu1 %v12119_v13  ;;  %v4342_v43 = vpack.c.bf16 %v4326_v8, %v4326_v8  ;;  %v13451_v13 = vld [vmem:[#allocation10 + $0x214] ss:$8 sps:$4 sm:$0xff]  }
 0x3c9   :  { %5953 = vmatprep.subr.bf16.mxu0 %v13412_v14  ;;  %v13499_v8 = vld [vmem:[#allocation10 + $0x314] ss:$8 sps:$4 sm:$0xff]  }
 0x3cb   :  { %4308 = vmatpush1.bf16.msra.mxu1 %v12118_v17  ;;  %v13455_v17 = vld [vmem:[#allocation10 + $0x230] ss:$8 sps:$4 sm:$0xff]  }
 0x3cc   :  { %5954 = vmatpush1.bf16.msra.mxu0 %v13410_v6  ;;  %4309 = vmatprep.subr.bf16.mxu1 %v12135_v9  ;;  %v13460_v6 = vld [vmem:[#allocation10 + $0x244] ss:$8 sps:$4 sm:$0xff]   ;;  %v13458_v9 = vld [vmem:[#allocation10 + $0x240] ss:$8 sps:$4 sm:$0xff]  }
 0x3cd   :  { %5955 = vmatprep.subr.bf16.mxu0 %v13415_v10  ;;  %v13463_v10 = vld [vmem:[#allocation10 + $0x254] ss:$8 sps:$4 sm:$0xff]  }
 0x3ce   :  { %v15325_v32 = vpop.f32.mrb[8].mxu0 }
 0x3cf   :  { %v15327_v33 = vpop.f32.mrb[9].mxu0  ;;  %4310 = vmatpush1.bf16.msra.mxu1 %v12134_v23  ;;  %v13464_v23 = vld [vmem:[#allocation10 + $0x260] ss:$8 sps:$4 sm:$0xff]  }
 0x3d0   :  { %v4075_v36 = vpop.f32.mrb[10].mxu0  ;;  %5956 = vmatpush1.bf16.msra.mxu0 %v13413_v25  ;;  %4311 = vmatprep.subr.bf16.mxu1 %v12151_v27  ;;  %v13469_v25 = vld [vmem:[#allocation10 + $0x274] ss:$8 sps:$4 sm:$0xff]   ;;  %v13467_v27 = vld [vmem:[#allocation10 + $0x270] ss:$8 sps:$4 sm:$0xff]  }
 0x3d1   :  { %v4076_v40 = vpop.f32.mrb[11].mxu0  ;;  %5957 = vmatprep.subr.bf16.mxu0 %v13418_v28  ;;  %v13472_v28 = vld [vmem:[#allocation10 + $0x284] ss:$8 sps:$4 sm:$0xff]  }
 0x3d2   :  { %v13478_v36 = vld [vmem:[#allocation10 + $0x2a4] ss:$8 sps:$4 sm:$0xff]   ;;  %v13479_v40 = vld [vmem:[#allocation10 + $0x2b0] ss:$8 sps:$4 sm:$0xff]  }
 0x3d3   :  { %4312 = vmatpush1.bf16.msra.mxu1 %v12150_v35  ;;  %v13473_v35 = vld [vmem:[#allocation10 + $0x290] ss:$8 sps:$4 sm:$0xff]  }
 0x3d4   :  { %5958 = vmatpush1.bf16.msra.mxu0 %v13416_v37  ;;  %4313 = vmatprep.subr.bf16.mxu1 %v12167_v38  ;;  %v13476_v37 = vld [vmem:[#allocation10 + $0x2a0] ss:$8 sps:$4 sm:$0xff]   ;;  %v13481_v38 = vld [vmem:[#allocation10 + $0x2b4] ss:$8 sps:$4 sm:$0xff]  }
 0x3d5   :  { %5959 = vmatprep.subr.bf16.mxu0 %v13421_v44  ;;  %v13484_v44 = vld [vmem:[#allocation10 + $0x2c4] ss:$8 sps:$4 sm:$0xff]  }
 0x3d7   :  { %4314 = vmatpush1.bf16.msra.mxu1 %v12166_v45  ;;  %v13482_v45 = vld [vmem:[#allocation10 + $0x2c0] ss:$8 sps:$4 sm:$0xff]  }
 0x3d8   :  { %5960 = vmatpush1.bf16.msra.mxu0 %v13419_v51  ;;  %v15341_v51 = vsub.s32 4, %v15225_v46 }
 0x3d9   :  { %5961 = vmatprep.subr.bf16.mxu0 %v13424_v47  ;;  %v13487_v47 = vld [vmem:[#allocation10 + $0x2d4] ss:$8 sps:$4 sm:$0xff]  }
 0x3da   :  { %4316 = vmatmul.mubr.bf16.vlgmr.msra.gmra.mrb[24].mxu1 %v15261_v54  ;;  %v15332_v54 = vsub.s32 5, %v15225_v46 }
 0x3db   :  { %7123 = vmatprep.mubr.bf16.mxu1 %v14933_v0 }
 0x3dc   :  { %5962 = vmatpush1.bf16.msra.mxu0 %v13422_v53  ;;  %v1051_v3 = vrot.slane %v15317_v24, %v15332_v54  ;;  %v15344_v53 = vsub.s32 7, %v15225_v46 }
 0x3dd   :  { %5963 = vmatprep.subr.bf16.mxu0 %v13427_v55  ;;  %v13485_v55 = vld [vmem:[#allocation10 + $0x2d0] ss:$8 sps:$4 sm:$0xff]  }
 0x3de   :  { %v13149_v52 = vadd.f32 %v15307_v41, %v1051_v3  ;;  %v13452_v41 = vld [vmem:[#allocation10 + $0x220] ss:$8 sps:$4 sm:$0xff]   ;;  %v13491_v3 = vld [vmem:[#allocation10 + $0x2f0] ss:$8 sps:$4 sm:$0xff]  }
 0x3e0   :  { %5964 = vmatpush1.bf16.msra.mxu0 %v13425_v56  ;;  %v4329_v34 = vmax.f32 %v13149_v52, 0.0  ;;  %v1047_v56 = vrot.slane %v15317_v24, %v15341_v51  ;;  %v13494_v52 = vld [vmem:[#allocation10 + $0x300] ss:$8 sps:$4 sm:$0xff]  }
 0x3e1   :  { %5965 = vmatprep.subr.bf16.mxu0 %v13430_v57 }
 0x3e2   :  { %v4345_v14 = vpack.c.bf16 %v4329_v34, %v4329_v34  ;;  %v13502_v34 = vld [vmem:[#allocation10 + $0x324] ss:$8 sps:$4 sm:$0xff]  }
 0x3e4   :  { %5966 = vmatpush1.bf16.msra.mxu0 %v13428_v58  ;;  %v13490_v58 = vld [vmem:[#allocation10 + $0x2e4] ss:$8 sps:$4 sm:$0xff]  }
 0x3e5   :  { %5967 = vmatprep.subr.bf16.mxu0 %v13433_v50  ;;  %v1059_v50 = vrot.slane %v15317_v24, %v15344_v53 }
 0x3e8   :  { %5968 = vmatpush1.bf16.msra.mxu0 %v13431_v59 }
 0x3e9   :  { %5969 = vmatprep.subr.bf16.mxu0 %v13436_v7 }
 0x3ec   :  { %5970 = vmatpush1.bf16.msra.mxu0 %v13434_v63 }
 0x3ed   :  { %5971 = vmatprep.subr.bf16.mxu0 %v13439_v60  ;;  %v13488_v60 = vld [vmem:[#allocation10 + $0x2e0] ss:$8 sps:$4 sm:$0xff]  }
 0x3f0   :  { %5972 = vmatpush1.bf16.msra.mxu0 %v13437_v2  ;;  %v13148_v2 = vadd.f32 %v15305_v11, %v1047_v56  ;;  %v13497_v11 = vld [vmem:[#allocation10 + $0x310] ss:$8 sps:$4 sm:$0xff]   ;;  %v13538_v56 = vld [vmem:[#allocation10 + $0x3e4] ss:$8 sps:$4 sm:$0xff]  }
 0x3f1   :  { %5973 = vmatprep.subr.bf16.mxu0 %v13442_v1  ;;  %v13151_v1 = vadd.f32 %v15321_v26, %v1059_v50  ;;  %v13500_v26 = vld [vmem:[#allocation10 + $0x320] ss:$8 sps:$4 sm:$0xff]  }
 0x3f2   :  { %v13536_v50 = vld [vmem:[#allocation10 + $0x3e0] ss:$8 sps:$4 sm:$0xff]  }
 0x3f4   :  { %5974 = vmatpush1.bf16.msra.mxu0 %v13440_v62  ;;  %v4328_v62 = vmax.f32 %v13148_v2, 0.0 }
 0x3f5   :  { %5975 = vmatprep.subr.bf16.mxu0 %v13445_v5  ;;  %v4331_v5 = vmax.f32 %v13151_v1, 0.0 }
 0x3f8   :  { %5976 = vmatpush1.bf16.msra.mxu0 %v13443_v30  ;;  %v4344_v30 = vpack.c.bf16 %v4328_v62, %v4328_v62  ;;  %v13547_v62 = vld [vmem:[#allocation10 + $0x414] ss:$8 sps:$4 sm:$0xff]  }
 0x3f9   :  { %5986 = vmatprep.subr.bf16.mxu0 %v13448_v12  ;;  %v4347_v12 = vpack.c.bf16 %v4331_v5, %v4331_v5  ;;  %v13550_v5 = vld [vmem:[#allocation10 + $0x424] ss:$8 sps:$4 sm:$0xff]  }
 0x3fb   :  { %5978 = vmatmul.mubr.bf16.vlgmr.msra.gmra.mrb[16].mxu0 %v4342_v43  ;;  %v13503_v43 = vld [vmem:[#allocation10 + $0x330] ss:$8 sps:$4 sm:$0xff]  }
 0x3fc   :  { %5987 = vmatpush1.bf16.msra.mxu0 %v13446_v42  ;;  %6018 = vmatprep.mubr.bf16.mxu0 %v4345_v14  ;;  %v13505_v42 = vld [vmem:[#allocation10 + $0x334] ss:$8 sps:$4 sm:$0xff]   ;;  %v13506_v14 = vld [vmem:[#allocation10 + $0x340] ss:$8 sps:$4 sm:$0xff]  }
 0x3fd   :  { %5988 = vmatprep.subr.bf16.mxu0 %v13451_v13  ;;  %v13508_v13 = vld [vmem:[#allocation10 + $0x344] ss:$8 sps:$4 sm:$0xff]  }
 0x400   :  { %5989 = vmatpush1.bf16.msra.mxu0 %v13449_v39  ;;  %v13511_v39 = vld [vmem:[#allocation10 + $0x354] ss:$8 sps:$4 sm:$0xff]  }
 0x401   :  { %5990 = vmatprep.subr.bf16.mxu0 %v13454_v15  ;;  %v13509_v15 = vld [vmem:[#allocation10 + $0x350] ss:$8 sps:$4 sm:$0xff]  }
 0x404   :  { %5991 = vmatpush1.bf16.msra.mxu0 %v13452_v41  ;;  %v13514_v41 = vld [vmem:[#allocation10 + $0x364] ss:$8 sps:$4 sm:$0xff]  }
 0x405   :  { %5992 = vmatprep.subr.bf16.mxu0 %v13457_v16 }
 0x408   :  { %5993 = vmatpush1.bf16.msra.mxu0 %v13455_v17 }
 0x409   :  { %5994 = vmatprep.subr.bf16.mxu0 %v13460_v6 }
 0x40c   :  { %5995 = vmatpush1.bf16.msra.mxu0 %v13458_v9  ;;  %v13512_v9 = vld [vmem:[#allocation10 + $0x360] ss:$8 sps:$4 sm:$0xff]  }
 0x40d   :  { %5996 = vmatprep.subr.bf16.mxu0 %v13463_v10 }
 0x410   :  { %5997 = vmatpush1.bf16.msra.mxu0 %v13461_v19  ;;  %v13517_v19 = vld [vmem:[#allocation10 + $0x374] ss:$8 sps:$4 sm:$0xff]  }
 0x411   :  { %5998 = vmatprep.subr.bf16.mxu0 %v13466_v21  ;;  %v13515_v21 = vld [vmem:[#allocation10 + $0x370] ss:$8 sps:$4 sm:$0xff]  }
 0x414   :  { %5999 = vmatpush1.bf16.msra.mxu0 %v13464_v23  ;;  %v13520_v23 = vld [vmem:[#allocation10 + $0x384] ss:$8 sps:$4 sm:$0xff]  }
 0x415   :  { %6000 = vmatprep.subr.bf16.mxu0 %v13469_v25  ;;  %v13518_v25 = vld [vmem:[#allocation10 + $0x380] ss:$8 sps:$4 sm:$0xff]  }
 0x418   :  { %6001 = vmatpush1.bf16.msra.mxu0 %v13467_v27  ;;  %v13523_v27 = vld [vmem:[#allocation10 + $0x394] ss:$8 sps:$4 sm:$0xff]  }
 0x419   :  { %6002 = vmatprep.subr.bf16.mxu0 %v13472_v28  ;;  %v13521_v28 = vld [vmem:[#allocation10 + $0x390] ss:$8 sps:$4 sm:$0xff]  }
 0x41c   :  { %6003 = vmatpush1.bf16.msra.mxu0 %v13470_v29  ;;  %v13526_v29 = vld [vmem:[#allocation10 + $0x3a4] ss:$8 sps:$4 sm:$0xff]  }
 0x41d   :  { %6004 = vmatprep.subr.bf16.mxu0 %v13475_v31  ;;  %v13524_v31 = vld [vmem:[#allocation10 + $0x3a0] ss:$8 sps:$4 sm:$0xff]  }
 0x420   :  { %6005 = vmatpush1.bf16.msra.mxu0 %v13473_v35  ;;  %v13529_v35 = vld [vmem:[#allocation10 + $0x3b4] ss:$8 sps:$4 sm:$0xff]  }
 0x421   :  { %6006 = vmatprep.subr.bf16.mxu0 %v13478_v36  ;;  %v13527_v36 = vld [vmem:[#allocation10 + $0x3b0] ss:$8 sps:$4 sm:$0xff]  }
 0x424   :  { %6007 = vmatpush1.bf16.msra.mxu0 %v13476_v37  ;;  %v13532_v37 = vld [vmem:[#allocation10 + $0x3c4] ss:$8 sps:$4 sm:$0xff]  }
 0x425   :  { %6008 = vmatprep.subr.bf16.mxu0 %v13481_v38  ;;  %v13530_v38 = vld [vmem:[#allocation10 + $0x3c0] ss:$8 sps:$4 sm:$0xff]  }
 0x428   :  { %6009 = vmatpush1.bf16.msra.mxu0 %v13479_v40  ;;  %v15361_v40 = vsub.s32 6, %v15225_v46  ;;  %v13541_v46 = vld [vmem:[#allocation10 + $0x3f4] ss:$8 sps:$4 sm:$0xff]  }
 0x429   :  { %6010 = vmatprep.subr.bf16.mxu0 %v13484_v44  ;;  %v13535_v44 = vld [vmem:[#allocation10 + $0x3d4] ss:$8 sps:$4 sm:$0xff]  }
 0x42c   :  { %6011 = vmatpush1.bf16.msra.mxu0 %v13482_v45  ;;  %v15363_v45 = vld [vmem:[#allocation8 + $0x8] sm:$0xff] }
 0x42d   :  { %v15348_v57 = vpop.f32.mrb[20].mxu1  ;;  %6012 = vmatprep.subr.bf16.mxu0 %v13487_v47  ;;  %v13533_v47 = vld [vmem:[#allocation10 + $0x3d0] ss:$8 sps:$4 sm:$0xff]  }
 0x42e   :  { %v15352_v59 = vpop.f32.mrb[21].mxu1 }
 0x42f   :  { %v4157_v7 = vpop.f32.mrb[22].mxu1 }
 0x430   :  { %6013 = vmatpush1.bf16.msra.mxu0 %v13485_v55  ;;  %v4158_v63 = vpop.f32.mrb[23].mxu1  ;;  %v1055_v55 = vrot.slane %v15317_v24, %v15361_v40  ;;  %v13542_v24 = vld [vmem:[#allocation10 + $0x400] ss:$8 sps:$4 sm:$0xff]  }
 0x431   :  { %6014 = vmatprep.subr.bf16.mxu0 %v13490_v58  ;;  %v1067_v58 = vrot.slane %v15363_v45, %v15233_v49 }
 0x432   :  { %v13150_v7 = vadd.f32 %v15315_v18, %v1055_v55  ;;  %v13545_v18 = vld [vmem:[#allocation10 + $0x410] ss:$8 sps:$4 sm:$0xff]   ;;  %v13589_v55 = vld [vmem:[#allocation10 + $0x4f4] ss:$8 sps:$4 sm:$0xff]  }
 0x433   :  { %v13153_v63 = vadd.f32 %v15327_v33, %v1067_v58  ;;  %v13548_v33 = vld [vmem:[#allocation10 + $0x420] ss:$8 sps:$4 sm:$0xff]   ;;  %v13587_v58 = vld [vmem:[#allocation10 + $0x4f0] ss:$8 sps:$4 sm:$0xff]  }
 0x434   :  { %6015 = vmatpush1.bf16.msra.mxu0 %v13488_v60  ;;  %v13539_v60 = vld [vmem:[#allocation10 + $0x3f0] ss:$8 sps:$4 sm:$0xff]   ;;  %v4330_v2 = vmax.f32 %v13150_v7, 0.0  ;;  %v13592_v7 = vld [vmem:[#allocation10 + $0x504] ss:$8 sps:$4 sm:$0xff]  }
 0x435   :  { %6016 = vmatprep.subr.bf16.mxu0 %v13493_v61  ;;  %v13544_v61 = vld [vmem:[#allocation10 + $0x404] ss:$8 sps:$4 sm:$0xff]   ;;  %v4333_v1 = vmax.f32 %v13153_v63, 0.0  ;;  %v13590_v63 = vld [vmem:[#allocation10 + $0x500] ss:$8 sps:$4 sm:$0xff]  }
 0x438   :  { %6017 = vmatpush1.bf16.msra.mxu0 %v13491_v3  ;;  %v4346_v3 = vpack.c.bf16 %v4330_v2, %v4330_v2  ;;  %v13595_v2 = vld [vmem:[#allocation10 + $0x514] ss:$8 sps:$4 sm:$0xff]  }
 0x439   :  { %6027 = vmatprep.subr.bf16.mxu0 %v13496_v4  ;;  %v4349_v4 = vpack.c.bf16 %v4333_v1, %v4333_v1  ;;  %v13598_v1 = vld [vmem:[#allocation10 + $0x524] ss:$8 sps:$4 sm:$0xff]  }
 0x43b   :  { %6019 = vmatmul.mubr.bf16.vlgmr.msra.gmra.mrb[16].mxu0 %v4344_v30  ;;  %v13551_v30 = vld [vmem:[#allocation10 + $0x430] ss:$8 sps:$4 sm:$0xff]  }
 0x43c   :  { %6028 = vmatpush1.bf16.msra.mxu0 %v13494_v52  ;;  %6059 = vmatprep.mubr.bf16.mxu0 %v4347_v12  ;;  %v13553_v52 = vld [vmem:[#allocation10 + $0x434] ss:$8 sps:$4 sm:$0xff]   ;;  %v13554_v12 = vld [vmem:[#allocation10 + $0x440] ss:$8 sps:$4 sm:$0xff]  }
 0x43d   :  { %6029 = vmatprep.subr.bf16.mxu0 %v13499_v8  ;;  %v13556_v8 = vld [vmem:[#allocation10 + $0x444] ss:$8 sps:$4 sm:$0xff]  }
 0x440   :  { %6030 = vmatpush1.bf16.msra.mxu0 %v13497_v11  ;;  %v13559_v11 = vld [vmem:[#allocation10 + $0x454] ss:$8 sps:$4 sm:$0xff]  }
 0x441   :  { %6031 = vmatprep.subr.bf16.mxu0 %v13502_v34  ;;  %v13557_v34 = vld [vmem:[#allocation10 + $0x450] ss:$8 sps:$4 sm:$0xff]  }
 0x444   :  { %6032 = vmatpush1.bf16.msra.mxu0 %v13500_v26  ;;  %v13562_v26 = vld [vmem:[#allocation10 + $0x464] ss:$8 sps:$4 sm:$0xff]  }
 0x445   :  { %6033 = vmatprep.subr.bf16.mxu0 %v13505_v42  ;;  %v13560_v42 = vld [vmem:[#allocation10 + $0x460] ss:$8 sps:$4 sm:$0xff]  }
 0x448   :  { %6034 = vmatpush1.bf16.msra.mxu0 %v13503_v43  ;;  %v13565_v43 = vld [vmem:[#allocation10 + $0x474] ss:$8 sps:$4 sm:$0xff]  }
 0x449   :  { %6035 = vmatprep.subr.bf16.mxu0 %v13508_v13  ;;  %v13563_v13 = vld [vmem:[#allocation10 + $0x470] ss:$8 sps:$4 sm:$0xff]  }
 0x44c   :  { %6036 = vmatpush1.bf16.msra.mxu0 %v13506_v14  ;;  %v13568_v14 = vld [vmem:[#allocation10 + $0x484] ss:$8 sps:$4 sm:$0xff]  }
 0x44d   :  { %6037 = vmatprep.subr.bf16.mxu0 %v13511_v39  ;;  %v13566_v39 = vld [vmem:[#allocation10 + $0x480] ss:$8 sps:$4 sm:$0xff]  }
 0x44e   :  { %v15356_v16 = vpop.f32.mrb[12].mxu0 }
 0x44f   :  { %v15358_v17 = vpop.f32.mrb[13].mxu0 }
 0x450   :  { %v4239_v6 = vpop.f32.mrb[14].mxu0  ;;  %6038 = vmatpush1.bf16.msra.mxu0 %v13509_v15  ;;  %v13571_v15 = vld [vmem:[#allocation10 + $0x494] ss:$8 sps:$4 sm:$0xff]  }
 0x451   :  { %v4240_v10 = vpop.f32.mrb[15].mxu0  ;;  %6039 = vmatprep.subr.bf16.mxu0 %v13514_v41  ;;  %v13569_v41 = vld [vmem:[#allocation10 + $0x490] ss:$8 sps:$4 sm:$0xff]   ;;  %v13574_v6 = vld [vmem:[#allocation10 + $0x4a4] ss:$8 sps:$4 sm:$0xff]  }
 0x452   :  { %v13577_v10 = vld [vmem:[#allocation10 + $0x4b4] ss:$8 sps:$4 sm:$0xff]  }
 0x454   :  { %6040 = vmatpush1.bf16.msra.mxu0 %v13512_v9  ;;  %v13572_v9 = vld [vmem:[#allocation10 + $0x4a0] ss:$8 sps:$4 sm:$0xff]  }
 0x455   :  { %6041 = vmatprep.subr.bf16.mxu0 %v13517_v19  ;;  %v13575_v19 = vld [vmem:[#allocation10 + $0x4b0] ss:$8 sps:$4 sm:$0xff]  }
 0x458   :  { %6042 = vmatpush1.bf16.msra.mxu0 %v13515_v21  ;;  %v13580_v21 = vld [vmem:[#allocation10 + $0x4c4] ss:$8 sps:$4 sm:$0xff]  }
 0x459   :  { %6043 = vmatprep.subr.bf16.mxu0 %v13520_v23  ;;  %v13578_v23 = vld [vmem:[#allocation10 + $0x4c0] ss:$8 sps:$4 sm:$0xff]  }
 0x45c   :  { %6044 = vmatpush1.bf16.msra.mxu0 %v13518_v25  ;;  %v13583_v25 = vld [vmem:[#allocation10 + $0x4d4] ss:$8 sps:$4 sm:$0xff]  }
 0x45d   :  { %6045 = vmatprep.subr.bf16.mxu0 %v13523_v27  ;;  %v13581_v27 = vld [vmem:[#allocation10 + $0x4d0] ss:$8 sps:$4 sm:$0xff]  }
 0x460   :  { %6046 = vmatpush1.bf16.msra.mxu0 %v13521_v28  ;;  %v1063_v28 = vrot.slane %v15363_v45, %v15230_v48 }
 0x461   :  { %6047 = vmatprep.subr.bf16.mxu0 %v13526_v29 }
 0x464   :  { %6048 = vmatpush1.bf16.msra.mxu0 %v13524_v31  ;;  %v13586_v31 = vld [vmem:[#allocation10 + $0x4e4] ss:$8 sps:$4 sm:$0xff]  }
 0x465   :  { %6049 = vmatprep.subr.bf16.mxu0 %v13529_v35  ;;  %v1075_v35 = vrot.slane %v15363_v45, %v15253_v22 }
 0x468   :  { %6050 = vmatpush1.bf16.msra.mxu0 %v13527_v36 }
 0x469   :  { %6051 = vmatprep.subr.bf16.mxu0 %v13532_v37 }
 0x46c   :  { %6052 = vmatpush1.bf16.msra.mxu0 %v13530_v38 }
 0x46d   :  { %6053 = vmatprep.subr.bf16.mxu0 %v13535_v44  ;;  %v13584_v44 = vld [vmem:[#allocation10 + $0x4e0] ss:$8 sps:$4 sm:$0xff]  }
 0x470   :  { %6054 = vmatpush1.bf16.msra.mxu0 %v13533_v47  ;;  %v13152_v47 = vadd.f32 %v15325_v32, %v1063_v28  ;;  %v13593_v32 = vld [vmem:[#allocation10 + $0x510] ss:$8 sps:$4 sm:$0xff]  }
 0x471   :  { %6055 = vmatprep.subr.bf16.mxu0 %v13538_v56  ;;  %v13155_v56 = vadd.f32 %v15352_v59, %v1075_v35  ;;  %v13596_v59 = vld [vmem:[#allocation10 + $0x520] ss:$8 sps:$4 sm:$0xff]   ;;  %v13635_v28 = vld [vmem:[#allocation10 + $0x5f0] ss:$8 sps:$4 sm:$0xff]   ;;  %v13640_v35 = vld [vmem:[#allocation10 + $0x604] ss:$8 sps:$4 sm:$0xff]  }
 0x474   :  { %6056 = vmatpush1.bf16.msra.mxu0 %v13536_v50  ;;  %v4332_v50 = vmax.f32 %v13152_v47, 0.0  ;;  %v13643_v47 = vld [vmem:[#allocation10 + $0x614] ss:$8 sps:$4 sm:$0xff]  }
 0x475   :  { %6057 = vmatprep.subr.bf16.mxu0 %v13541_v46  ;;  %v4335_v46 = vmax.f32 %v13155_v56, 0.0  ;;  %v6239_v56 = vld [vmem:[#allocation13] sm:$0xff] }
 0x478   :  { %6058 = vmatpush1.bf16.msra.mxu0 %v13539_v60  ;;  %v4348_v60 = vpack.c.bf16 %v4332_v50, %v4332_v50  ;;  %v13641_v50 = vld [vmem:[#allocation10 + $0x610] ss:$8 sps:$4 sm:$0xff]  }
 0x479   :  { %6068 = vmatprep.subr.bf16.mxu0 %v13544_v61  ;;  %v4351_v61 = vpack.c.bf16 %v4335_v46, %v4335_v46  ;;  %v6263_v46 = vld [vmem:[#allocation13 + $0xc0] sm:$0xff] }
 0x47b   :  { %6060 = vmatmul.mubr.bf16.vlgmr.msra.gmra.mrb[16].mxu0 %v4346_v3  ;;  %v13599_v3 = vld [vmem:[#allocation10 + $0x530] ss:$8 sps:$4 sm:$0xff]  }
 0x47c   :  { %6069 = vmatpush1.bf16.msra.mxu0 %v13542_v24  ;;  %6100 = vmatprep.mubr.bf16.mxu0 %v4349_v4  ;;  %v13601_v24 = vld [vmem:[#allocation10 + $0x534] ss:$8 sps:$4 sm:$0xff]   ;;  %v13602_v4 = vld [vmem:[#allocation10 + $0x540] ss:$8 sps:$4 sm:$0xff]  }
 0x47d   :  { %6070 = vmatprep.subr.bf16.mxu0 %v13547_v62  ;;  %v13604_v62 = vld [vmem:[#allocation10 + $0x544] ss:$8 sps:$4 sm:$0xff]  }
 0x480   :  { %6071 = vmatpush1.bf16.msra.mxu0 %v13545_v18  ;;  %v13607_v18 = vld [vmem:[#allocation10 + $0x554] ss:$8 sps:$4 sm:$0xff]  }
 0x481   :  { %6072 = vmatprep.subr.bf16.mxu0 %v13550_v5  ;;  %v13605_v5 = vld [vmem:[#allocation10 + $0x550] ss:$8 sps:$4 sm:$0xff]  }
 0x484   :  { %6073 = vmatpush1.bf16.msra.mxu0 %v13548_v33  ;;  %v13610_v33 = vld [vmem:[#allocation10 + $0x564] ss:$8 sps:$4 sm:$0xff]  }
 0x485   :  { %6074 = vmatprep.subr.bf16.mxu0 %v13553_v52  ;;  %v13608_v52 = vld [vmem:[#allocation10 + $0x560] ss:$8 sps:$4 sm:$0xff]  }
 0x488   :  { %6075 = vmatpush1.bf16.msra.mxu0 %v13551_v30  ;;  %v13613_v30 = vld [vmem:[#allocation10 + $0x574] ss:$8 sps:$4 sm:$0xff]  }
 0x489   :  { %6076 = vmatprep.subr.bf16.mxu0 %v13556_v8  ;;  %v13611_v8 = vld [vmem:[#allocation10 + $0x570] ss:$8 sps:$4 sm:$0xff]  }
 0x48c   :  { %6077 = vmatpush1.bf16.msra.mxu0 %v13554_v12  ;;  %v13616_v12 = vld [vmem:[#allocation10 + $0x584] ss:$8 sps:$4 sm:$0xff]  }
 0x48d   :  { %6078 = vmatprep.subr.bf16.mxu0 %v13559_v11  ;;  %v13614_v11 = vld [vmem:[#allocation10 + $0x580] ss:$8 sps:$4 sm:$0xff]  }
 0x490   :  { %6079 = vmatpush1.bf16.msra.mxu0 %v13557_v34  ;;  %v13619_v34 = vld [vmem:[#allocation10 + $0x594] ss:$8 sps:$4 sm:$0xff]  }
 0x491   :  { %6080 = vmatprep.subr.bf16.mxu0 %v13562_v26  ;;  %v13617_v26 = vld [vmem:[#allocation10 + $0x590] ss:$8 sps:$4 sm:$0xff]  }
 0x494   :  { %6081 = vmatpush1.bf16.msra.mxu0 %v13560_v42  ;;  %v13622_v42 = vld [vmem:[#allocation10 + $0x5a4] ss:$8 sps:$4 sm:$0xff]  }
 0x495   :  { %6082 = vmatprep.subr.bf16.mxu0 %v13565_v43  ;;  %v13620_v43 = vld [vmem:[#allocation10 + $0x5a0] ss:$8 sps:$4 sm:$0xff]  }
 0x498   :  { %6083 = vmatpush1.bf16.msra.mxu0 %v13563_v13  ;;  %v13625_v13 = vld [vmem:[#allocation10 + $0x5b4] ss:$8 sps:$4 sm:$0xff]  }
 0x499   :  { %6084 = vmatprep.subr.bf16.mxu0 %v13568_v14  ;;  %v13623_v14 = vld [vmem:[#allocation10 + $0x5b0] ss:$8 sps:$4 sm:$0xff]  }
 0x49c   :  { %6085 = vmatpush1.bf16.msra.mxu0 %v13566_v39  ;;  %v13628_v39 = vld [vmem:[#allocation10 + $0x5c4] ss:$8 sps:$4 sm:$0xff]  }
 0x49d   :  { %6086 = vmatprep.subr.bf16.mxu0 %v13571_v15  ;;  %v13626_v15 = vld [vmem:[#allocation10 + $0x5c0] ss:$8 sps:$4 sm:$0xff]  }
 0x4a0   :  { %6087 = vmatpush1.bf16.msra.mxu0 %v13569_v41  ;;  %v13631_v41 = vld [vmem:[#allocation10 + $0x5d4] ss:$8 sps:$4 sm:$0xff]  }
 0x4a1   :  { %6088 = vmatprep.subr.bf16.mxu0 %v13574_v6  ;;  %v13629_v6 = vld [vmem:[#allocation10 + $0x5d0] ss:$8 sps:$4 sm:$0xff]  }
 0x4a4   :  { %6089 = vmatpush1.bf16.msra.mxu0 %v13572_v9  ;;  %v1071_v9 = vrot.slane %v15363_v45, %v15250_v20 }
 0x4a5   :  { %6090 = vmatprep.subr.bf16.mxu0 %v13577_v10  ;;  %v13634_v10 = vld [vmem:[#allocation10 + $0x5e4] ss:$8 sps:$4 sm:$0xff]  }
 0x4a8   :  { %6091 = vmatpush1.bf16.msra.mxu0 %v13575_v19  ;;  %v1083_v19 = vrot.slane %v15363_v45, %v15332_v54 }
 0x4a9   :  { %6092 = vmatprep.subr.bf16.mxu0 %v13580_v21  ;;  %v13632_v21 = vld [vmem:[#allocation10 + $0x5e0] ss:$8 sps:$4 sm:$0xff]  }
 0x4ac   :  { %6093 = vmatpush1.bf16.msra.mxu0 %v13578_v23  ;;  %v13154_v23 = vadd.f32 %v15348_v57, %v1071_v9  ;;  %v6255_v57 = vld [vmem:[#allocation13 + $0x80] sm:$0xff] }
 0x4ad   :  { %v15373_v29 = vpop.f32.mrb[24].mxu1  ;;  %6094 = vmatprep.subr.bf16.mxu0 %v13583_v25  ;;  %v13637_v25 = vld [vmem:[#allocation10 + $0x5f4] ss:$8 sps:$4 sm:$0xff]   ;;  %v13680_v9 = vld [vmem:[#allocation10 + $0x6e0] ss:$8 sps:$4 sm:$0xff]  }
 0x4ae   :  { %v15377_v36 = vpop.f32.mrb[25].mxu1 }
 0x4af   :  { %v4321_v37 = vpop.f32.mrb[26].mxu1 }
 0x4b0   :  { %6095 = vmatpush1.bf16.msra.mxu0 %v13581_v27  ;;  %v4322_v38 = vpop.f32.mrb[27].mxu1  ;;  %v13157_v27 = vadd.f32 %v15358_v17, %v1083_v19  ;;  %v13685_v19 = vld [vmem:[#allocation10 + $0x6f4] ss:$8 sps:$4 sm:$0xff]  }
 0x4b1   :  { %6096 = vmatprep.subr.bf16.mxu0 %v13586_v31  ;;  %v4334_v31 = vmax.f32 %v13154_v23, 0.0  ;;  %v13638_v38 = vld [vmem:[#allocation10 + $0x600] ss:$8 sps:$4 sm:$0xff]   ;;  %v13683_v23 = vld [vmem:[#allocation10 + $0x6f0] ss:$8 sps:$4 sm:$0xff]  }
 0x4b2   :  { %v4337_v37 = vmax.f32 %v13157_v27, 0.0  ;;  %v13688_v27 = vld [vmem:[#allocation10 + $0x704] ss:$8 sps:$4 sm:$0xff]  }
 0x4b4   :  { %6097 = vmatpush1.bf16.msra.mxu0 %v13584_v44  ;;  %v4350_v44 = vpack.c.bf16 %v4334_v31, %v4334_v31  ;;  %v13686_v31 = vld [vmem:[#allocation10 + $0x700] ss:$8 sps:$4 sm:$0xff]  }
 0x4b5   :  { %6098 = vmatprep.subr.bf16.mxu0 %v13589_v55  ;;  %v4353_v55 = vpack.c.bf16 %v4337_v37, %v4337_v37  ;;  %v13691_v37 = vld [vmem:[#allocation10 + $0x714] ss:$8 sps:$4 sm:$0xff]  }
 0x4b8   :  { %6099 = vmatpush1.bf16.msra.mxu0 %v13587_v58  ;;  %v6247_v58 = vld [vmem:[#allocation13 + $0x40] sm:$0xff] }
 0x4b9   :  { %6109 = vmatprep.subr.bf16.mxu0 %v13592_v7  ;;  %v12424_v17 = vcombine.low %v6239_v56, %v6247_v58  ;;  %v12425_v7 = vcombine.high %v6239_v56, %v6247_v58  ;;  %v13700_v56 = vld [vmem:[#allocation10 + $0x744] ss:$8 sps:$4 sm:$0xff]   ;;  %v13698_v58 = vld [vmem:[#allocation10 + $0x740] ss:$8 sps:$4 sm:$0xff]  }
 0x4bb   :  { %6101 = vmatmul.mubr.bf16.vlgmr.msra.gmra.mrb[16].mxu0 %v4348_v60  ;;  %v12441_v60 = vcombine.high %v6255_v57, %v6263_v46  ;;  %7091 = vmatprep.subr.bf16.mxu1 %v12425_v7  ;;  %v13704_v7 = vld [vmem:[#allocation10 + $0x760] ss:$8 sps:$4 sm:$0xff]  }
 0x4bc   :  { %6110 = vmatpush1.bf16.msra.mxu0 %v13590_v63  ;;  %6141 = vmatprep.mubr.bf16.mxu0 %v4351_v61  ;;  %v13646_v63 = vld [vmem:[#allocation10 + $0x624] ss:$8 sps:$4 sm:$0xff]   ;;  %v13644_v61 = vld [vmem:[#allocation10 + $0x620] ss:$8 sps:$4 sm:$0xff]  }
 0x4bd   :  { %6111 = vmatprep.subr.bf16.mxu0 %v13595_v2  ;;  %7092 = vmatpush1.bf16.msra.mxu1 %v12424_v17  ;;  %v12440_v2 = vcombine.low %v6255_v57, %v6263_v46  ;;  %v13703_v57 = vld [vmem:[#allocation10 + $0x754] ss:$8 sps:$4 sm:$0xff]   ;;  %v13706_v17 = vld [vmem:[#allocation10 + $0x764] ss:$8 sps:$4 sm:$0xff]  }
 0x4be   :  { %7093 = vmatprep.subr.bf16.mxu1 %v12441_v60  ;;  %v13709_v46 = vld [vmem:[#allocation10 + $0x774] ss:$8 sps:$4 sm:$0xff]   ;;  %v13712_v60 = vld [vmem:[#allocation10 + $0x784] ss:$8 sps:$4 sm:$0xff]  }
 0x4c0   :  { %6112 = vmatpush1.bf16.msra.mxu0 %v13593_v32  ;;  %v13649_v32 = vld [vmem:[#allocation10 + $0x634] ss:$8 sps:$4 sm:$0xff]  }
 0x4c1   :  { %6113 = vmatprep.subr.bf16.mxu0 %v13598_v1  ;;  %7094 = vmatpush1.bf16.msra.mxu1 %v12440_v2  ;;  %v13647_v1 = vld [vmem:[#allocation10 + $0x630] ss:$8 sps:$4 sm:$0xff]   ;;  %v13710_v2 = vld [vmem:[#allocation10 + $0x780] ss:$8 sps:$4 sm:$0xff]  }
 0x4c4   :  { %6114 = vmatpush1.bf16.msra.mxu0 %v13596_v59  ;;  %v13652_v59 = vld [vmem:[#allocation10 + $0x644] ss:$8 sps:$4 sm:$0xff]  }
 0x4c5   :  { %6115 = vmatprep.subr.bf16.mxu0 %v13601_v24  ;;  %v13650_v24 = vld [vmem:[#allocation10 + $0x640] ss:$8 sps:$4 sm:$0xff]  }
 0x4c8   :  { %6116 = vmatpush1.bf16.msra.mxu0 %v13599_v3  ;;  %v13655_v3 = vld [vmem:[#allocation10 + $0x654] ss:$8 sps:$4 sm:$0xff]  }
 0x4c9   :  { %6117 = vmatprep.subr.bf16.mxu0 %v13604_v62  ;;  %v13653_v62 = vld [vmem:[#allocation10 + $0x650] ss:$8 sps:$4 sm:$0xff]  }
 0x4cc   :  { %6118 = vmatpush1.bf16.msra.mxu0 %v13602_v4  ;;  %v13658_v4 = vld [vmem:[#allocation10 + $0x664] ss:$8 sps:$4 sm:$0xff]  }
 0x4cd   :  { %6119 = vmatprep.subr.bf16.mxu0 %v13607_v18  ;;  %v13656_v18 = vld [vmem:[#allocation10 + $0x660] ss:$8 sps:$4 sm:$0xff]  }
 0x4d0   :  { %6120 = vmatpush1.bf16.msra.mxu0 %v13605_v5  ;;  %v13661_v5 = vld [vmem:[#allocation10 + $0x674] ss:$8 sps:$4 sm:$0xff]  }
 0x4d1   :  { %6121 = vmatprep.subr.bf16.mxu0 %v13610_v33  ;;  %v13659_v33 = vld [vmem:[#allocation10 + $0x670] ss:$8 sps:$4 sm:$0xff]  }
 0x4d4   :  { %6122 = vmatpush1.bf16.msra.mxu0 %v13608_v52  ;;  %v13664_v52 = vld [vmem:[#allocation10 + $0x684] ss:$8 sps:$4 sm:$0xff]  }
 0x4d5   :  { %6123 = vmatprep.subr.bf16.mxu0 %v13613_v30  ;;  %v13662_v30 = vld [vmem:[#allocation10 + $0x680] ss:$8 sps:$4 sm:$0xff]  }
 0x4d8   :  { %6124 = vmatpush1.bf16.msra.mxu0 %v13611_v8  ;;  %v13667_v8 = vld [vmem:[#allocation10 + $0x694] ss:$8 sps:$4 sm:$0xff]  }
 0x4d9   :  { %6125 = vmatprep.subr.bf16.mxu0 %v13616_v12  ;;  %v13665_v12 = vld [vmem:[#allocation10 + $0x690] ss:$8 sps:$4 sm:$0xff]  }
 0x4dc   :  { %6126 = vmatpush1.bf16.msra.mxu0 %v13614_v11  ;;  %v13670_v11 = vld [vmem:[#allocation10 + $0x6a4] ss:$8 sps:$4 sm:$0xff]  }
 0x4dd   :  { %6127 = vmatprep.subr.bf16.mxu0 %v13619_v34  ;;  %v13668_v34 = vld [vmem:[#allocation10 + $0x6a0] ss:$8 sps:$4 sm:$0xff]  }
 0x4e0   :  { %6128 = vmatpush1.bf16.msra.mxu0 %v13617_v26  ;;  %v13673_v26 = vld [vmem:[#allocation10 + $0x6b4] ss:$8 sps:$4 sm:$0xff]  }
 0x4e1   :  { %6129 = vmatprep.subr.bf16.mxu0 %v13622_v42  ;;  %v13671_v42 = vld [vmem:[#allocation10 + $0x6b0] ss:$8 sps:$4 sm:$0xff]  }
 0x4e4   :  { %6130 = vmatpush1.bf16.msra.mxu0 %v13620_v43  ;;  %v13676_v43 = vld [vmem:[#allocation10 + $0x6c4] ss:$8 sps:$4 sm:$0xff]  }
 0x4e5   :  { %6131 = vmatprep.subr.bf16.mxu0 %v13625_v13  ;;  %v13674_v13 = vld [vmem:[#allocation10 + $0x6c0] ss:$8 sps:$4 sm:$0xff]  }
 0x4e8   :  { %6132 = vmatpush1.bf16.msra.mxu0 %v13623_v14  ;;  %v13679_v14 = vld [vmem:[#allocation10 + $0x6d4] ss:$8 sps:$4 sm:$0xff]  }
 0x4e9   :  { %6133 = vmatprep.subr.bf16.mxu0 %v13628_v39  ;;  %v13677_v39 = vld [vmem:[#allocation10 + $0x6d0] ss:$8 sps:$4 sm:$0xff]  }
 0x4ec   :  { %6134 = vmatpush1.bf16.msra.mxu0 %v13626_v15  ;;  %v1079_v15 = vrot.slane %v15363_v45, %v15341_v51 }
 0x4ed   :  { %6135 = vmatprep.subr.bf16.mxu0 %v13631_v41  ;;  %v13682_v41 = vld [vmem:[#allocation10 + $0x6e4] ss:$8 sps:$4 sm:$0xff]  }
 0x4f0   :  { %6136 = vmatpush1.bf16.msra.mxu0 %v13629_v6  ;;  %v1091_v6 = vrot.slane %v15363_v45, %v15344_v53 }
 0x4f1   :  { %6137 = vmatprep.subr.bf16.mxu0 %v13634_v10  ;;  %v13156_v10 = vadd.f32 %v15356_v16, %v1079_v15  ;;  %v13689_v16 = vld [vmem:[#allocation10 + $0x710] ss:$8 sps:$4 sm:$0xff]  }
 0x4f4   :  { %6138 = vmatpush1.bf16.msra.mxu0 %v13632_v21  ;;  %v13159_v21 = vadd.f32 %v15377_v36, %v1091_v6  ;;  %v13692_v36 = vld [vmem:[#allocation10 + $0x720] ss:$8 sps:$4 sm:$0xff]  }
 0x4f5   :  { %6139 = vmatprep.subr.bf16.mxu0 %v13637_v25  ;;  %v4336_v25 = vmax.f32 %v13156_v10, 0.0  ;;  %v6311_v6 = vld [vmem:[#allocation13 + $0x240] sm:$0xff] }
 0x4f8   :  { %6140 = vmatpush1.bf16.msra.mxu0 %v13635_v28  ;;  %v4339_v28 = vmax.f32 %v13159_v21, 0.0  ;;  %v6327_v21 = vld [vmem:[#allocation13 + $0x2c0] sm:$0xff] }
 0x4f9   :  { %6150 = vmatprep.subr.bf16.mxu0 %v13640_v35  ;;  %v4352_v35 = vpack.c.bf16 %v4336_v25, %v4336_v25 }
 0x4fb   :  { %6142 = vmatmul.mubr.bf16.vlgmr.msra.gmra.mrb[16].mxu0 %v4350_v44  ;;  %v13694_v44 = vld [vmem:[#allocation10 + $0x724] ss:$8 sps:$4 sm:$0xff]  }
 0x4fc   :  { %6151 = vmatpush1.bf16.msra.mxu0 %v13638_v38  ;;  %6182 = vmatprep.mubr.bf16.mxu0 %v4353_v55  ;;  %v4355_v38 = vpack.c.bf16 %v4339_v28, %v4339_v28  ;;  %v13695_v55 = vld [vmem:[#allocation10 + $0x730] ss:$8 sps:$4 sm:$0xff]   ;;  %v6343_v28 = vld [vmem:[#allocation13 + $0x340] sm:$0xff] }
 0x4fd   :  { %6152 = vmatprep.subr.bf16.mxu0 %v13643_v47  ;;  %v13697_v47 = vld [vmem:[#allocation10 + $0x734] ss:$8 sps:$4 sm:$0xff]  }
 0x500   :  { %6153 = vmatpush1.bf16.msra.mxu0 %v13641_v50  ;;  %v13701_v50 = vld [vmem:[#allocation10 + $0x750] ss:$8 sps:$4 sm:$0xff]  }
 0x501   :  { %6154 = vmatprep.subr.bf16.mxu0 %v13646_v63  ;;  %v13707_v63 = vld [vmem:[#allocation10 + $0x770] ss:$8 sps:$4 sm:$0xff]  }
 0x504   :  { %6155 = vmatpush1.bf16.msra.mxu0 %v13644_v61  ;;  %v13715_v61 = vld [vmem:[#allocation10 + $0x794] ss:$8 sps:$4 sm:$0xff]  }
 0x505   :  { %6156 = vmatprep.subr.bf16.mxu0 %v13649_v32  ;;  %v13713_v32 = vld [vmem:[#allocation10 + $0x790] ss:$8 sps:$4 sm:$0xff]  }
 0x508   :  { %6157 = vmatpush1.bf16.msra.mxu0 %v13647_v1  ;;  %v13718_v1 = vld [vmem:[#allocation10 + $0x7a4] ss:$8 sps:$4 sm:$0xff]  }
 0x509   :  { %6158 = vmatprep.subr.bf16.mxu0 %v13652_v59  ;;  %v13716_v59 = vld [vmem:[#allocation10 + $0x7a0] ss:$8 sps:$4 sm:$0xff]  }
 0x50c   :  { %6159 = vmatpush1.bf16.msra.mxu0 %v13650_v24  ;;  %v13721_v24 = vld [vmem:[#allocation10 + $0x7b4] ss:$8 sps:$4 sm:$0xff]  }
 0x50d   :  { %6160 = vmatprep.subr.bf16.mxu0 %v13655_v3  ;;  %v13719_v3 = vld [vmem:[#allocation10 + $0x7b0] ss:$8 sps:$4 sm:$0xff]  }
 0x510   :  { %6161 = vmatpush1.bf16.msra.mxu0 %v13653_v62  ;;  %v13724_v62 = vld [vmem:[#allocation10 + $0x7c4] ss:$8 sps:$4 sm:$0xff]  }
 0x511   :  { %6162 = vmatprep.subr.bf16.mxu0 %v13658_v4  ;;  %v13722_v4 = vld [vmem:[#allocation10 + $0x7c0] ss:$8 sps:$4 sm:$0xff]  }
 0x514   :  { %6163 = vmatpush1.bf16.msra.mxu0 %v13656_v18  ;;  %v13727_v18 = vld [vmem:[#allocation10 + $0x7d4] ss:$8 sps:$4 sm:$0xff]  }
 0x515   :  { %6164 = vmatprep.subr.bf16.mxu0 %v13661_v5  ;;  %v13725_v5 = vld [vmem:[#allocation10 + $0x7d0] ss:$8 sps:$4 sm:$0xff]  }
 0x518   :  { %6165 = vmatpush1.bf16.msra.mxu0 %v13659_v33  ;;  %v1087_v33 = vrot.slane %v15363_v45, %v15361_v40  ;;  %v6287_v45 = vld [vmem:[#allocation13 + $0x180] sm:$0xff] }
 0x519   :  { %6166 = vmatprep.subr.bf16.mxu0 %v13664_v52  ;;  %v13730_v52 = vld [vmem:[#allocation10 + $0x7e4] ss:$8 sps:$4 sm:$0xff]  }
 0x51c   :  { %6167 = vmatpush1.bf16.msra.mxu0 %v13662_v30  ;;  %v13728_v30 = vld [vmem:[#allocation10 + $0x7e0] ss:$8 sps:$4 sm:$0xff]  }
 0x51d   :  { %6168 = vmatprep.subr.bf16.mxu0 %v13667_v8  ;;  %v13158_v8 = vadd.f32 %v15373_v29, %v1087_v33  ;;  %v6303_v29 = vld [vmem:[#allocation13 + $0x200] sm:$0xff]  ;;  %v6272_v33 = vld [vmem:[#allocation13 + $0x108] sm:$0xff] }
 0x51e   :  { %v12488_v10 = vcombine.low %v6303_v29, %v6311_v6 }
 0x520   :  { %6169 = vmatpush1.bf16.msra.mxu0 %v13665_v12  ;;  %v13733_v12 = vld [vmem:[#allocation10 + $0x7f4] ss:$8 sps:$4 sm:$0xff]  }
 0x521   :  { %6170 = vmatprep.subr.bf16.mxu0 %v13670_v11  ;;  %v13731_v11 = vld [vmem:[#allocation10 + $0x7f0] ss:$8 sps:$4 sm:$0xff]  }
 0x524   :  { %6171 = vmatpush1.bf16.msra.mxu0 %v13668_v34  ;;  %v4338_v34 = vmax.f32 %v13158_v8, 0.0 }
 0x525   :  { %6172 = vmatprep.subr.bf16.mxu0 %v13673_v26 }
 0x526   :  { %v4354_v26 = vpack.c.bf16 %v4338_v34, %v4338_v34 }
 0x528   :  { %6173 = vmatpush1.bf16.msra.mxu0 %v13671_v42  ;;  %v6271_v42 = vld [vmem:[#allocation13 + $0x100] sm:$0xff] }
 0x529   :  { %6174 = vmatprep.subr.bf16.mxu0 %v13676_v43  ;;  %v6279_v43 = vld [vmem:[#allocation13 + $0x140] sm:$0xff] }
 0x52c   :  { %6175 = vmatpush1.bf16.msra.mxu0 %v13674_v13  ;;  %v12457_v13 = vcombine.high %v6271_v42, %v6279_v43 }
 0x52d   :  { %6176 = vmatprep.subr.bf16.mxu0 %v13679_v14  ;;  %v12456_v14 = vcombine.low %v6271_v42, %v6279_v43  ;;  %v6304_v42 = vld [vmem:[#allocation13 + $0x208] sm:$0xff] }
 0x52e   :  { %7095 = vmatprep.subr.bf16.mxu1 %v12457_v13  ;;  %v6312_v43 = vld [vmem:[#allocation13 + $0x248] sm:$0xff] }
 0x52f   :  { %7096 = vmatpush1.bf16.msra.mxu1 %v12456_v14  ;;  %v12491_v14 = vcombine.high %v6304_v42, %v6312_v43 }
 0x530   :  { %6177 = vmatpush1.bf16.msra.mxu0 %v13677_v39  ;;  %v6295_v39 = vld [vmem:[#allocation13 + $0x1c0] sm:$0xff] }
 0x531   :  { %6178 = vmatprep.subr.bf16.mxu0 %v13682_v41  ;;  %v12473_v15 = vcombine.high %v6287_v45, %v6295_v39  ;;  %v12472_v41 = vcombine.low %v6287_v45, %v6295_v39  ;;  %v6320_v45 = vld [vmem:[#allocation13 + $0x288] sm:$0xff] }
 0x532   :  { %v6328_v39 = vld [vmem:[#allocation13 + $0x2c8] sm:$0xff] }
 0x533   :  { %7097 = vmatprep.subr.bf16.mxu1 %v12473_v15  ;;  %v12490_v15 = vcombine.low %v6304_v42, %v6312_v43 }
 0x534   :  { %6179 = vmatpush1.bf16.msra.mxu0 %v13680_v9  ;;  %7098 = vmatpush1.bf16.msra.mxu1 %v12472_v41  ;;  %v12489_v9 = vcombine.high %v6303_v29, %v6311_v6  ;;  %v12507_v41 = vcombine.high %v6320_v45, %v6328_v39  ;;  %v6336_v29 = vld [vmem:[#allocation13 + $0x308] sm:$0xff] }
 0x535   :  { %6180 = vmatprep.subr.bf16.mxu0 %v13685_v19  ;;  %v6319_v19 = vld [vmem:[#allocation13 + $0x280] sm:$0xff]  ;;  %v6344_v6 = vld [vmem:[#allocation13 + $0x348] sm:$0xff] }
 0x536   :  { %7099 = vmatprep.subr.bf16.mxu1 %v12489_v9  ;;  %v12504_v25 = vcombine.low %v6319_v19, %v6327_v21  ;;  %v12506_v9 = vcombine.low %v6320_v45, %v6328_v39  ;;  %v6353_v45 = vld [vmem:[#allocation13 + $0x390] sm:$0xff] }
 0x537   :  { %v6361_v39 = vld [vmem:[#allocation13 + $0x3d0] sm:$0xff] }
 0x538   :  { %6181 = vmatpush1.bf16.msra.mxu0 %v13683_v23  ;;  %7100 = vmatpush1.bf16.msra.mxu1 %v12488_v10  ;;  %v12505_v23 = vcombine.high %v6319_v19, %v6327_v21  ;;  %v12523_v10 = vcombine.high %v6336_v29, %v6344_v6  ;;  %v6352_v19 = vld [vmem:[#allocation13 + $0x388] sm:$0xff] }
 0x539   :  { %6191 = vmatprep.subr.bf16.mxu0 %v13688_v27  ;;  %v6335_v27 = vld [vmem:[#allocation13 + $0x300] sm:$0xff]  ;;  %v6360_v21 = vld [vmem:[#allocation13 + $0x3c8] sm:$0xff] }
 0x53a   :  { %7101 = vmatprep.subr.bf16.mxu1 %v12505_v23  ;;  %v12522_v23 = vcombine.low %v6336_v29, %v6344_v6  ;;  %v13755_v29 = vld [vmem:[#allocation16 + $0xe8] ss:$16 sps:$4 sm:$0xff]   ;;  %v13757_v6 = vld [vmem:[#allocation16 + $0xec] ss:$16 sps:$4 sm:$0xff]  }
 0x53b   :  { %6183 = vmatmul.mubr.bf16.vlgmr.msra.gmra.mrb[16].mxu0 %v4352_v35  ;;  %v12520_v35 = vcombine.low %v6335_v27, %v6343_v28 }
 0x53c   :  { %6192 = vmatpush1.bf16.msra.mxu0 %v13686_v31  ;;  %6223 = vmatprep.mubr.bf16.mxu0 %v4355_v38  ;;  %v12521_v31 = vcombine.high %v6335_v27, %v6343_v28  ;;  %v6359_v38 = vld [vmem:[#allocation13 + $0x3c0] sm:$0xff]  ;;  %v6241_v27 = vld [vmem:[#allocation13 + $0x10] sm:$0xff] }
 0x53d   :  { %6193 = vmatprep.subr.bf16.mxu0 %v13691_v37  ;;  %7102 = vmatpush1.bf16.msra.mxu1 %v12504_v25  ;;  %v6351_v37 = vld [vmem:[#allocation13 + $0x380] sm:$0xff]  ;;  %v12539_v25 = vcombine.high %v6352_v19, %v6360_v21  ;;  %v6249_v28 = vld [vmem:[#allocation13 + $0x50] sm:$0xff] }
 0x53e   :  { %7103 = vmatprep.subr.bf16.mxu1 %v12521_v31  ;;  %v12538_v31 = vcombine.low %v6352_v19, %v6360_v21  ;;  %v12540_v19 = vcombine.low %v6353_v45, %v6361_v39 }
 0x540   :  { %6194 = vmatpush1.bf16.msra.mxu0 %v13689_v16  ;;  %v12537_v16 = vcombine.high %v6351_v37, %v6359_v38 }
 0x541   :  { %6195 = vmatprep.subr.bf16.mxu0 %v13694_v44  ;;  %7104 = vmatpush1.bf16.msra.mxu1 %v12520_v35  ;;  %v12536_v44 = vcombine.low %v6351_v37, %v6359_v38  ;;  %v12429_v35 = vcombine.high %v6241_v27, %v6249_v28  ;;  %v13734_v37 = vld [vmem:[#allocation16 + $0x8] ss:$16 sps:$4 sm:$0xff]   ;;  %v13736_v38 = vld [vmem:[#allocation16 + $0xc] ss:$16 sps:$4 sm:$0xff]  }
 0x542   :  { %7105 = vmatprep.subr.bf16.mxu1 %v12537_v16  ;;  %v6257_v16 = vld [vmem:[#allocation13 + $0x90] sm:$0xff] }
 0x544   :  { %6196 = vmatpush1.bf16.msra.mxu0 %v13692_v36  ;;  %v6240_v36 = vld [vmem:[#allocation13 + $0x8] sm:$0xff] }
 0x545   :  { %6197 = vmatprep.subr.bf16.mxu0 %v13697_v47  ;;  %7106 = vmatpush1.bf16.msra.mxu1 %v12536_v44  ;;  %v6248_v47 = vld [vmem:[#allocation13 + $0x48] sm:$0xff]  ;;  %v6265_v44 = vld [vmem:[#allocation13 + $0xd0] sm:$0xff] }
 0x548   :  { %6198 = vmatpush1.bf16.msra.mxu0 %v13695_v55  ;;  %v12427_v55 = vcombine.high %v6240_v36, %v6248_v47 }
 0x549   :  { %6199 = vmatprep.subr.bf16.mxu0 %v13700_v56  ;;  %v12426_v56 = vcombine.low %v6240_v36, %v6248_v47  ;;  %v12428_v36 = vcombine.low %v6241_v27, %v6249_v28  ;;  %v12445_v47 = vcombine.high %v6257_v16, %v6265_v44  ;;  %v6258_v27 = vld [vmem:[#allocation13 + $0x98] sm:$0xff] }
 0x54a   :  { %7132 = vmatprep.subr.bf16.mxu1 %v12427_v55  ;;  %v13739_v55 = vld [vmem:[#allocation16 + $0x2c] ss:$16 sps:$4 sm:$0xff]  }
 0x54b   :  { %v6266_v28 = vld [vmem:[#allocation13 + $0xd8] sm:$0xff] }
 0x54c   :  { %6200 = vmatpush1.bf16.msra.mxu0 %v13698_v58  ;;  %v4612_v58 = vld [vmem:[#allocation11] sm:$0x3] }
 0x54d   :  { %6201 = vmatprep.subr.bf16.mxu0 %v13703_v57  ;;  %v4617_v57 = vrot.slane %v4612_v58, %v15230_v48 }
 0x550   :  { %6202 = vmatpush1.bf16.msra.mxu0 %v13701_v50  ;;  %v4621_v50 = vrot.slane %v4612_v58, %v15233_v49  ;;  %v6281_v58 = vld [vmem:[#allocation13 + $0x150] sm:$0xff] }
 0x551   :  { %6203 = vmatprep.subr.bf16.mxu0 %v13706_v17 }
 0x554   :  { %6204 = vmatpush1.bf16.msra.mxu0 %v13704_v7 }
 0x555   :  { %6205 = vmatprep.subr.bf16.mxu0 %v13709_v46 }
 0x558   :  { %6206 = vmatpush1.bf16.msra.mxu0 %v13707_v63 }
 0x559   :  { %6207 = vmatprep.subr.bf16.mxu0 %v13712_v60 }
 0x55c   :  { %6208 = vmatpush1.bf16.msra.mxu0 %v13710_v2 }
 0x55d   :  { %6209 = vmatprep.subr.bf16.mxu0 %v13715_v61 }
 0x560   :  { %6210 = vmatpush1.bf16.msra.mxu0 %v13713_v32 }
 0x561   :  { %6211 = vmatprep.subr.bf16.mxu0 %v13718_v1  ;;  %v6235_v1 = vld [vmem:[%s15622_s18] sm:$0xff] }
 0x564   :  { %6212 = vmatpush1.bf16.msra.mxu0 %v13716_v59 }
 0x565   :  { %6213 = vmatprep.subr.bf16.mxu0 %v13721_v24 }
 0x568   :  { %6214 = vmatpush1.bf16.msra.mxu0 %v13719_v3  ;;  %v6256_v3 = vld [vmem:[#allocation13 + $0x88] sm:$0xff] }
 0x569   :  { %6215 = vmatprep.subr.bf16.mxu0 %v13724_v62  ;;  %v6264_v62 = vld [vmem:[#allocation13 + $0xc8] sm:$0xff] }
 0x56c   :  { %6216 = vmatpush1.bf16.msra.mxu0 %v13722_v4 }
 0x56d   :  { %6217 = vmatprep.subr.bf16.mxu0 %v13727_v18 }
 0x570   :  { %6218 = vmatpush1.bf16.msra.mxu0 %v13725_v5  ;;  %v12443_v5 = vcombine.high %v6256_v3, %v6264_v62 }
 0x571   :  { %6219 = vmatprep.subr.bf16.mxu0 %v13730_v52  ;;  %v6280_v52 = vld [vmem:[#allocation13 + $0x148] sm:$0xff] }
 0x572   :  { %v12459_v8 = vcombine.high %v6272_v33, %v6280_v52  ;;  %v12458_v34 = vcombine.low %v6272_v33, %v6280_v52  ;;  %v6321_v33 = vld [vmem:[#allocation13 + $0x290] sm:$0xff] }
 0x573   :  { %v6329_v52 = vld [vmem:[#allocation13 + $0x2d0] sm:$0xff] }
 0x574   :  { %6220 = vmatpush1.bf16.msra.mxu0 %v13728_v30  ;;  %v12442_v30 = vcombine.low %v6256_v3, %v6264_v62  ;;  %v12508_v42 = vcombine.low %v6321_v33, %v6329_v52 }
 0x575   :  { %6221 = vmatprep.subr.bf16.mxu0 %v13733_v12  ;;  %v6288_v12 = vld [vmem:[#allocation13 + $0x188] sm:$0xff] }
 0x578   :  { %6222 = vmatpush1.bf16.msra.mxu0 %v13731_v11  ;;  %v6296_v11 = vld [vmem:[#allocation13 + $0x1c8] sm:$0xff] }
 0x579   :  { %v12474_v13 = vcombine.low %v6288_v12, %v6296_v11  ;;  %10873 = vmatprep.subr.bf16.mxu0 %v13736_v38  ;;  %v6274_v38 = vld [vmem:[#allocation13 + $0x118] sm:$0xff] }
 0x57b   :  { %6224 = vmatmul.mubr.bf16.vlgmr.msra.gmra.mrb[16].mxu0 %v4354_v26  ;;  %v12475_v26 = vcombine.high %v6288_v12, %v6296_v11  ;;  %v13749_v12 = vld [vmem:[#allocation16 + $0xa8] ss:$16 sps:$4 sm:$0xff]   ;;  %v13751_v11 = vld [vmem:[#allocation16 + $0xac] ss:$16 sps:$4 sm:$0xff]  }
 0x57c   :  { %10874 = vmatpush1.bf16.msra.mxu0 %v13734_v37  ;;  %v13763_v37 = vld [vmem:[#allocation16 + $0x12c] ss:$16 sps:$4 sm:$0xff]  }
 0x57d   :  { %10875 = vmatprep.subr.bf16.mxu0 %v13739_v55  ;;  %v13764_v55 = vld [vmem:[#allocation16 + $0x148] ss:$16 sps:$4 sm:$0xff]  }
 0x64e   :  { %v6225_v17 = vpop.f32.mrb[16].mxu0 }
 0x64f   :  { %v13160_v7 = vadd.f32 %v6225_v17, %v4617_v57  ;;  %v6227_v46 = vpop.f32.mrb[17].mxu0  ;;  %v13737_v57 = vld [vmem:[#allocation16 + $0x28] ss:$16 sps:$4 sm:$0xff]  }
 0x650   :  { %v13161_v63 = vadd.f32 %v6227_v46, %v4621_v50  ;;  %v6229_v60 = vpop.f32.mrb[18].mxu0  ;;  %v12444_v50 = vcombine.low %v6257_v16, %v6265_v44  ;;  %10876 = vmatpush1.bf16.msra.mxu0 %v13737_v57  ;;  %v13742_v46 = vld [vmem:[#allocation16 + $0x4c] ss:$16 sps:$4 sm:$0xff]   ;;  %v13761_v44 = vld [vmem:[#allocation16 + $0x128] ss:$16 sps:$4 sm:$0xff]  }
 0x651   :  { %11559 = vst [vmem:[#allocation23] sm:$0xff] %v13160_v7  ;;  %v6230_v2 = vpop.f32.mrb[19].mxu0  ;;  %v6297_v60 = vld [vmem:[#allocation13 + $0x1d0] sm:$0xff]  ;;  %10877 = vmatprep.subr.bf16.mxu0 %v13742_v46  ;;  %v6282_v16 = vld [vmem:[#allocation13 + $0x158] sm:$0xff] }
 0x652   :  { %v6232_v61 = vmul.f32 0.5, %v13161_v63  ;;  %11560 = vst [vmem:[#allocation25] sm:$0xff] %v13161_v63  ;;  %v6289_v63 = vld [vmem:[#allocation13 + $0x190] sm:$0xff]  ;;  %v6298_v57 = vld [vmem:[#allocation13 + $0x1d8] sm:$0xff] }
 0x653   :  { %v12476_v3 = vcombine.low %v6289_v63, %v6297_v60  ;;  %v13769_v46 = vld [vmem:[#allocation16 + $0x16c] ss:$16 sps:$4 sm:$0xff]  }
 0x654   :  { %v6233_v32 = vmul.f32 1.442695, %v6232_v61  ;;  %v12477_v61 = vcombine.high %v6289_v63, %v6297_v60  ;;  %v6306_v63 = vld [vmem:[#allocation13 + $0x218] sm:$0xff] }
 0x655   :  { %v6314_v60 = vld [vmem:[#allocation13 + $0x258] sm:$0xff] }
 0x656   :  { %14534 = vpow2.f32 %v6233_v32  ;;  %v13743_v32 = vld [vmem:[#allocation16 + $0x68] ss:$16 sps:$4 sm:$0xff]  }
 0x660   :  { %v14535_v59 = vpop.eup %14534 }
 0x661   :  { %v6236_v24 = vmul.f32 %v14535_v59, %v6235_v1  ;;  %v13745_v1 = vld [vmem:[#allocation16 + $0x6c] ss:$16 sps:$4 sm:$0xff]   ;;  %v6305_v59 = vld [vmem:[#allocation13 + $0x210] sm:$0xff] }
 0x663   :  { %v6237_v4 = vadd.f32 %v13160_v7, %v6236_v24  ;;  %v13740_v7 = vld [vmem:[#allocation16 + $0x48] ss:$16 sps:$4 sm:$0xff]   ;;  %v6313_v24 = vld [vmem:[#allocation13 + $0x250] sm:$0xff] }
 0x664   :  { %10878 = vmatpush1.bf16.msra.mxu0 %v13740_v7  ;;  %v12493_v62 = vcombine.high %v6305_v59, %v6313_v24  ;;  %v13767_v7 = vld [vmem:[#allocation16 + $0x168] ss:$16 sps:$4 sm:$0xff]  }
 0x665   :  { %v15401_v18 = vpack.c.bf16 %v6237_v4, %v6237_v4  ;;  %11561 = vst [vmem:[#allocation26] sm:$0xff] %v6237_v4  ;;  %10879 = vmatprep.subr.bf16.mxu0 %v13745_v1  ;;  %v13746_v4 = vld [vmem:[#allocation16 + $0x88] ss:$16 sps:$4 sm:$0xff]   ;;  %v13772_v1 = vld [vmem:[#allocation16 + $0x18c] ss:$16 sps:$4 sm:$0xff]  }
 0x667   :  { %7124 = vmatmul.mubr.bf16.vlgmr.msra.gmra.mrb[28].mxu1 %v15401_v18 }
 0x668   :  { %7133 = vmatpush1.bf16.msra.mxu1 %v12426_v56  ;;  %7164 = vmatprep.mubr.bf16.mxu1 %v14933_v0  ;;  %v6273_v56 = vld [vmem:[#allocation13 + $0x110] sm:$0xff] }
 0x669   :  { %7134 = vmatprep.subr.bf16.mxu1 %v12443_v5  ;;  %v12461_v17 = vcombine.high %v6273_v56, %v6281_v58  ;;  %v12460_v2 = vcombine.low %v6273_v56, %v6281_v58  ;;  %10880 = vmatpush1.bf16.msra.mxu0 %v13743_v32  ;;  %v13748_v5 = vld [vmem:[#allocation16 + $0x8c] ss:$16 sps:$4 sm:$0xff]   ;;  %v13770_v32 = vld [vmem:[#allocation16 + $0x188] ss:$16 sps:$4 sm:$0xff]  }
 0x66a   :  { %10881 = vmatprep.subr.bf16.mxu0 %v13748_v5  ;;  %v13766_v56 = vld [vmem:[#allocation16 + $0x14c] ss:$16 sps:$4 sm:$0xff]  }
 0x66b   :  { %v6290_v58 = vld [vmem:[#allocation13 + $0x198] sm:$0xff] }
 0x66c   :  { %7135 = vmatpush1.bf16.msra.mxu1 %v12442_v30  ;;  %v12492_v30 = vcombine.low %v6305_v59, %v6313_v24  ;;  %v6322_v59 = vld [vmem:[#allocation13 + $0x298] sm:$0xff] }
 0x66d   :  { %7136 = vmatprep.subr.bf16.mxu1 %v12459_v8  ;;  %v12509_v8 = vcombine.high %v6321_v33, %v6329_v52  ;;  %10882 = vmatpush1.bf16.msra.mxu0 %v13746_v4  ;;  %v6330_v24 = vld [vmem:[#allocation13 + $0x2d8] sm:$0xff] }
 0x66e   :  { %10883 = vmatprep.subr.bf16.mxu0 %v13751_v11  ;;  %v13773_v4 = vld [vmem:[#allocation16 + $0x1a8] ss:$16 sps:$4 sm:$0xff]   ;;  %v13775_v5 = vld [vmem:[#allocation16 + $0x1ac] ss:$16 sps:$4 sm:$0xff]  }
 0x66f   :  { %v6338_v33 = vld [vmem:[#allocation13 + $0x318] sm:$0xff] }
 0x670   :  { %7137 = vmatpush1.bf16.msra.mxu1 %v12458_v34  ;;  %v6337_v34 = vld [vmem:[#allocation13 + $0x310] sm:$0xff]  ;;  %v6346_v52 = vld [vmem:[#allocation13 + $0x358] sm:$0xff] }
 0x671   :  { %7138 = vmatprep.subr.bf16.mxu1 %v12475_v26  ;;  %v6345_v26 = vld [vmem:[#allocation13 + $0x350] sm:$0xff]  ;;  %10884 = vmatpush1.bf16.msra.mxu0 %v13749_v12  ;;  %v13778_v12 = vld [vmem:[#allocation16 + $0x1cc] ss:$16 sps:$4 sm:$0xff]  }
 0x672   :  { %v12525_v43 = vcombine.high %v6337_v34, %v6345_v26  ;;  %v6354_v11 = vld [vmem:[#allocation13 + $0x398] sm:$0xff] }
 0x674   :  { %7139 = vmatpush1.bf16.msra.mxu1 %v12474_v13  ;;  %v13752_v13 = vld [vmem:[#allocation16 + $0xc8] ss:$16 sps:$4 sm:$0xff]  }
 0x675   :  { %7140 = vmatprep.subr.bf16.mxu1 %v12491_v14  ;;  %v13754_v14 = vld [vmem:[#allocation16 + $0xcc] ss:$16 sps:$4 sm:$0xff]  }
 0x676   :  { %10885 = vmatprep.subr.bf16.mxu0 %v13754_v14  ;;  %v6243_v14 = vld [vmem:[#allocation13 + $0x20] sm:$0xff] }
 0x677   :  { %10886 = vmatpush1.bf16.msra.mxu0 %v13752_v13  ;;  %v13781_v13 = vld [vmem:[#allocation16 + $0x1ec] ss:$16 sps:$4 sm:$0xff]  }
 0x678   :  { %7141 = vmatpush1.bf16.msra.mxu1 %v12490_v15  ;;  %v12524_v15 = vcombine.low %v6337_v34, %v6345_v26  ;;  %10887 = vmatprep.subr.bf16.mxu0 %v13757_v6  ;;  %v6362_v34 = vld [vmem:[#allocation13 + $0x3d8] sm:$0xff]  ;;  %v6259_v6 = vld [vmem:[#allocation13 + $0xa0] sm:$0xff] }
 0x679   :  { %7142 = vmatprep.subr.bf16.mxu1 %v12507_v41  ;;  %v12541_v41 = vcombine.high %v6353_v45, %v6361_v39  ;;  %v13776_v26 = vld [vmem:[#allocation16 + $0x1c8] ss:$16 sps:$4 sm:$0xff]   ;;  %v6251_v45 = vld [vmem:[#allocation13 + $0x60] sm:$0xff] }
 0x67a   :  { %v13779_v39 = vld [vmem:[#allocation16 + $0x1e8] ss:$16 sps:$4 sm:$0xff]  }
 0x67b   :  { %10888 = vmatpush1.bf16.msra.mxu0 %v13755_v29  ;;  %v13784_v29 = vld [vmem:[#allocation16 + $0x20c] ss:$16 sps:$4 sm:$0xff]  }
 0x67c   :  { %7143 = vmatpush1.bf16.msra.mxu1 %v12506_v9  ;;  %v6242_v9 = vld [vmem:[#allocation13 + $0x18] sm:$0xff] }
 0x67d   :  { %7144 = vmatprep.subr.bf16.mxu1 %v12523_v10  ;;  %v6250_v10 = vld [vmem:[#allocation13 + $0x58] sm:$0xff] }
 0x67e   :  { %v12431_v21 = vcombine.high %v6242_v9, %v6250_v10 }
 0x680   :  { %7145 = vmatpush1.bf16.msra.mxu1 %v12522_v23  ;;  %v13758_v23 = vld [vmem:[#allocation16 + $0x108] ss:$16 sps:$4 sm:$0xff]  }
 0x681   :  { %7146 = vmatprep.subr.bf16.mxu1 %v12539_v25  ;;  %v13760_v25 = vld [vmem:[#allocation16 + $0x10c] ss:$16 sps:$4 sm:$0xff]  }
 0x682   :  { %10889 = vmatprep.subr.bf16.mxu0 %v13760_v25 }
 0x683   :  { %10890 = vmatpush1.bf16.msra.mxu0 %v13758_v23  ;;  %v6283_v23 = vld [vmem:[#allocation13 + $0x160] sm:$0xff] }
 0x684   :  { %7147 = vmatpush1.bf16.msra.mxu1 %v12538_v31  ;;  %v12430_v31 = vcombine.low %v6242_v9, %v6250_v10  ;;  %10891 = vmatprep.subr.bf16.mxu0 %v13763_v37  ;;  %v6267_v9 = vld [vmem:[#allocation13 + $0xe0] sm:$0xff]  ;;  %v12432_v10 = vcombine.low %v6243_v14, %v6251_v45 }
 0x685   :  { %7173 = vmatprep.subr.bf16.mxu1 %v12429_v35  ;;  %v12447_v35 = vcombine.high %v6258_v27, %v6266_v28  ;;  %v12448_v25 = vcombine.low %v6259_v6, %v6267_v9 }
 0x687   :  { %7165 = vmatmul.mubr.bf16.vlgmr.msra.gmra.mrb[32].mxu1 %v15401_v18  ;;  %10892 = vmatpush1.bf16.msra.mxu0 %v13761_v44 }
 0x688   :  { %7174 = vmatpush1.bf16.msra.mxu1 %v12428_v36  ;;  %7205 = vmatprep.mubr.bf16.mxu1 %v14933_v0  ;;  %v12446_v36 = vcombine.low %v6258_v27, %v6266_v28  ;;  %v6291_v28 = vld [vmem:[#allocation13 + $0x1a0] sm:$0xff] }
 0x689   :  { %7175 = vmatprep.subr.bf16.mxu1 %v12445_v47  ;;  %v12463_v47 = vcombine.high %v6274_v38, %v6282_v16  ;;  %10893 = vmatprep.subr.bf16.mxu0 %v13766_v56 }
 0x68b   :  { %10894 = vmatpush1.bf16.msra.mxu0 %v13764_v55  ;;  %v6331_v55 = vld [vmem:[#allocation13 + $0x2e0] sm:$0xff] }
 0x68c   :  { %7176 = vmatpush1.bf16.msra.mxu1 %v12444_v50  ;;  %v12462_v50 = vcombine.low %v6274_v38, %v6282_v16  ;;  %10895 = vmatprep.subr.bf16.mxu0 %v13769_v46  ;;  %v6307_v38 = vld [vmem:[#allocation13 + $0x220] sm:$0xff] }
 0x68d   :  { %7177 = vmatprep.subr.bf16.mxu1 %v12461_v17  ;;  %v12479_v17 = vcombine.high %v6290_v58, %v6298_v57  ;;  %v6315_v16 = vld [vmem:[#allocation13 + $0x260] sm:$0xff] }
 0x68e   :  { %v12496_v56 = vcombine.low %v6307_v38, %v6315_v16  ;;  %v6355_v46 = vld [vmem:[#allocation13 + $0x3a0] sm:$0xff] }
 0x68f   :  { %10896 = vmatpush1.bf16.msra.mxu0 %v13767_v7 }
 0x690   :  { %7178 = vmatpush1.bf16.msra.mxu1 %v12460_v2  ;;  %v12478_v2 = vcombine.low %v6290_v58, %v6298_v57  ;;  %10897 = vmatprep.subr.bf16.mxu0 %v13772_v1  ;;  %v6339_v57 = vld [vmem:[#allocation13 + $0x320] sm:$0xff] }
 0x691   :  { %7179 = vmatprep.subr.bf16.mxu1 %v12477_v61  ;;  %v12495_v61 = vcombine.high %v6306_v63, %v6314_v60 }
 0x693   :  { %10898 = vmatpush1.bf16.msra.mxu0 %v13770_v32  ;;  %v6252_v32 = vld [vmem:[#allocation13 + $0x68] sm:$0xff] }
 0x694   :  { %7180 = vmatpush1.bf16.msra.mxu1 %v12476_v3  ;;  %v12494_v3 = vcombine.low %v6306_v63, %v6314_v60  ;;  %10899 = vmatprep.subr.bf16.mxu0 %v13775_v5  ;;  %v6363_v63 = vld [vmem:[#allocation13 + $0x3e0] sm:$0xff]  ;;  %v6276_v5 = vld [vmem:[#allocation13 + $0x128] sm:$0xff] }
 0x695   :  { %7181 = vmatprep.subr.bf16.mxu1 %v12493_v62  ;;  %v12511_v62 = vcombine.high %v6322_v59, %v6330_v24  ;;  %v12544_v1 = vcombine.low %v6355_v46, %v6363_v63 }
 0x697   :  { %10900 = vmatpush1.bf16.msra.mxu0 %v13773_v4 }
 0x698   :  { %7182 = vmatpush1.bf16.msra.mxu1 %v12492_v30  ;;  %v12510_v30 = vcombine.low %v6322_v59, %v6330_v24  ;;  %10901 = vmatprep.subr.bf16.mxu0 %v13778_v12  ;;  %v6260_v24 = vld [vmem:[#allocation13 + $0xa8] sm:$0xff] }
 0x699   :  { %7183 = vmatprep.subr.bf16.mxu1 %v12509_v8  ;;  %v12527_v8 = vcombine.high %v6338_v33, %v6346_v52  ;;  %v6300_v12 = vld [vmem:[#allocation13 + $0x1e8] sm:$0xff] }
 0x69b   :  { %10902 = vmatpush1.bf16.msra.mxu0 %v13776_v26  ;;  %v6308_v26 = vld [vmem:[#allocation13 + $0x228] sm:$0xff] }
 0x69c   :  { %7184 = vmatpush1.bf16.msra.mxu1 %v12508_v42  ;;  %v12526_v42 = vcombine.low %v6338_v33, %v6346_v52  ;;  %10903 = vmatprep.subr.bf16.mxu0 %v13781_v13  ;;  %v6284_v33 = vld [vmem:[#allocation13 + $0x168] sm:$0xff] }
 0x69d   :  { %7185 = vmatprep.subr.bf16.mxu1 %v12525_v43  ;;  %v12543_v43 = vcombine.high %v6354_v11, %v6362_v34 }
 0x69f   :  { %10904 = vmatpush1.bf16.msra.mxu0 %v13779_v39 }
 0x6a0   :  { %7186 = vmatpush1.bf16.msra.mxu1 %v12524_v15  ;;  %v12542_v15 = vcombine.low %v6354_v11, %v6362_v34  ;;  %10914 = vmatprep.subr.bf16.mxu0 %v13784_v29  ;;  %v12466_v11 = vcombine.low %v6276_v5, %v6284_v33  ;;  %v6348_v29 = vld [vmem:[#allocation13 + $0x368] sm:$0xff] }
 0x6a1   :  { %7187 = vmatprep.subr.bf16.mxu1 %v12541_v41  ;;  %v12433_v41 = vcombine.high %v6243_v14, %v6251_v45  ;;  %v6324_v14 = vld [vmem:[#allocation13 + $0x2a8] sm:$0xff] }
 0x6a2   :  { %v6332_v45 = vld [vmem:[#allocation13 + $0x2e8] sm:$0xff] }
 0x6a4   :  { %7188 = vmatpush1.bf16.msra.mxu1 %v12540_v19  ;;  %v12449_v19 = vcombine.high %v6259_v6, %v6267_v9  ;;  %v12514_v6 = vcombine.low %v6324_v14, %v6332_v45 }
 0x6a5   :  { %7214 = vmatprep.subr.bf16.mxu1 %v12431_v21  ;;  %v6275_v21 = vld [vmem:[#allocation13 + $0x120] sm:$0xff] }
 0x6a6   :  { %v12465_v27 = vcombine.high %v6275_v21, %v6283_v23 }
 0x6a7   :  { %7206 = vmatmul.mubr.bf16.vlgmr.msra.gmra.mrb[36].mxu1 %v15401_v18 }
 0x6a8   :  { %7215 = vmatpush1.bf16.msra.mxu1 %v12430_v31  ;;  %7246 = vmatprep.mubr.bf16.mxu1 %v14933_v0  ;;  %v6299_v31 = vld [vmem:[#allocation13 + $0x1e0] sm:$0xff] }
 0x6a9   :  { %7216 = vmatprep.subr.bf16.mxu1 %v12447_v35  ;;  %v12464_v35 = vcombine.low %v6275_v21, %v6283_v23  ;;  %v12481_v37 = vcombine.high %v6291_v28, %v6299_v31  ;;  %v12480_v44 = vcombine.low %v6291_v28, %v6299_v31 }
 0x6ac   :  { %7217 = vmatpush1.bf16.msra.mxu1 %v12446_v36  ;;  %v12497_v36 = vcombine.high %v6307_v38, %v6315_v16 }
 0x6ad   :  { %7218 = vmatprep.subr.bf16.mxu1 %v12463_v47  ;;  %v6323_v47 = vld [vmem:[#allocation13 + $0x2a0] sm:$0xff] }
 0x6ae   :  { %v12513_v58 = vcombine.high %v6323_v47, %v6331_v55 }
 0x6b0   :  { %7219 = vmatpush1.bf16.msra.mxu1 %v12462_v50  ;;  %v6347_v50 = vld [vmem:[#allocation13 + $0x360] sm:$0xff] }
 0x6b1   :  { %7220 = vmatprep.subr.bf16.mxu1 %v12479_v17  ;;  %v12512_v17 = vcombine.low %v6323_v47, %v6331_v55  ;;  %v12529_v7 = vcombine.high %v6339_v57, %v6347_v50  ;;  %v12528_v60 = vcombine.low %v6339_v57, %v6347_v50 }
 0x6b4   :  { %7221 = vmatpush1.bf16.msra.mxu1 %v12478_v2  ;;  %v12545_v2 = vcombine.high %v6355_v46, %v6363_v63 }
 0x6b5   :  { %7222 = vmatprep.subr.bf16.mxu1 %v12495_v61  ;;  %v6244_v61 = vld [vmem:[#allocation13 + $0x28] sm:$0xff] }
 0x6b6   :  { %v12435_v59 = vcombine.high %v6244_v61, %v6252_v32 }
 0x6b8   :  { %7223 = vmatpush1.bf16.msra.mxu1 %v12494_v3  ;;  %v6268_v3 = vld [vmem:[#allocation13 + $0xe8] sm:$0xff] }
 0x6b9   :  { %7224 = vmatprep.subr.bf16.mxu1 %v12511_v62  ;;  %v12434_v62 = vcombine.low %v6244_v61, %v6252_v32  ;;  %v12451_v4 = vcombine.high %v6260_v24, %v6268_v3  ;;  %v12450_v52 = vcombine.low %v6260_v24, %v6268_v3 }
 0x6bc   :  { %7225 = vmatpush1.bf16.msra.mxu1 %v12510_v30  ;;  %v12467_v30 = vcombine.high %v6276_v5, %v6284_v33 }
 0x6bd   :  { %7226 = vmatprep.subr.bf16.mxu1 %v12527_v8  ;;  %v6292_v8 = vld [vmem:[#allocation13 + $0x1a8] sm:$0xff] }
 0x6be   :  { %v12483_v34 = vcombine.high %v6292_v8, %v6300_v12 }
 0x6c0   :  { %7227 = vmatpush1.bf16.msra.mxu1 %v12526_v42  ;;  %v6316_v42 = vld [vmem:[#allocation13 + $0x268] sm:$0xff] }
 0x6c1   :  { %7228 = vmatprep.subr.bf16.mxu1 %v12543_v43  ;;  %v12482_v43 = vcombine.low %v6292_v8, %v6300_v12  ;;  %v12499_v13 = vcombine.high %v6308_v26, %v6316_v42  ;;  %v12498_v39 = vcombine.low %v6308_v26, %v6316_v42 }
 0x6c4   :  { %7229 = vmatpush1.bf16.msra.mxu1 %v12542_v15  ;;  %v12515_v15 = vcombine.high %v6324_v14, %v6332_v45 }
 0x6c5   :  { %7255 = vmatprep.subr.bf16.mxu1 %v12433_v41  ;;  %v6340_v41 = vld [vmem:[#allocation13 + $0x328] sm:$0xff] }
 0x6c6   :  { %v12531_v9 = vcombine.high %v6340_v41, %v6348_v29  ;;  %v12530_v21 = vcombine.low %v6340_v41, %v6348_v29 }
 0x6c7   :  { %7247 = vmatmul.mubr.bf16.vlgmr.msra.gmra.mrb[40].mxu1 %v15401_v18 }
 0x6c8   :  { %7256 = vmatpush1.bf16.msra.mxu1 %v12432_v10  ;;  %7287 = vmatprep.mubr.bf16.mxu1 %v14933_v0  ;;  %v6356_v10 = vld [vmem:[#allocation13 + $0x3a8] sm:$0xff] }
 0x6c9   :  { %7257 = vmatprep.subr.bf16.mxu1 %v12449_v19  ;;  %v6364_v19 = vld [vmem:[#allocation13 + $0x3e8] sm:$0xff] }
 0x6ca   :  { %v12547_v23 = vcombine.high %v6356_v10, %v6364_v19  ;;  %v12546_v28 = vcombine.low %v6356_v10, %v6364_v19 }
 0x6cc   :  { %7258 = vmatpush1.bf16.msra.mxu1 %v12448_v25  ;;  %v6245_v25 = vld [vmem:[#allocation13 + $0x30] sm:$0xff] }
 0x6cd   :  { %7259 = vmatprep.subr.bf16.mxu1 %v12465_v27  ;;  %v6253_v27 = vld [vmem:[#allocation13 + $0x70] sm:$0xff] }
 0x6ce   :  { %v12437_v31 = vcombine.high %v6245_v25, %v6253_v27  ;;  %v12436_v38 = vcombine.low %v6245_v25, %v6253_v27  ;;  %v15417_v27 = vld [vmem:[#allocation14] sm:$0xff] }
 0x6d0   :  { %7260 = vmatpush1.bf16.msra.mxu1 %v12464_v35  ;;  %v6261_v35 = vld [vmem:[#allocation13 + $0xb0] sm:$0xff] }
 0x6d1   :  { %7261 = vmatprep.subr.bf16.mxu1 %v12481_v37  ;;  %v6269_v37 = vld [vmem:[#allocation13 + $0xf0] sm:$0xff] }
 0x6d2   :  { %v12453_v16 = vcombine.high %v6261_v35, %v6269_v37  ;;  %v12452_v47 = vcombine.low %v6261_v35, %v6269_v37  ;;  %v6374_v35 = vrot.slane %v15417_v27, %v15230_v48 }
 0x6d4   :  { %7262 = vmatpush1.bf16.msra.mxu1 %v12480_v44  ;;  %v6277_v44 = vld [vmem:[#allocation13 + $0x130] sm:$0xff] }
 0x6d5   :  { %7263 = vmatprep.subr.bf16.mxu1 %v12497_v36  ;;  %v6285_v36 = vld [vmem:[#allocation13 + $0x170] sm:$0xff] }
 0x6d6   :  { %v12469_v55 = vcombine.high %v6277_v44, %v6285_v36  ;;  %v12468_v57 = vcombine.low %v6277_v44, %v6285_v36  ;;  %v6358_v36 = vld [vmem:[#allocation13 + $0x3b8] sm:$0xff] }
 0x6d8   :  { %7264 = vmatpush1.bf16.msra.mxu1 %v12496_v56  ;;  %v6293_v56 = vld [vmem:[#allocation13 + $0x1b0] sm:$0xff] }
 0x6d9   :  { %7265 = vmatprep.subr.bf16.mxu1 %v12513_v58  ;;  %v6301_v58 = vld [vmem:[#allocation13 + $0x1f0] sm:$0xff] }
 0x6da   :  { %v12485_v50 = vcombine.high %v6293_v56, %v6301_v58  ;;  %v12484_v46 = vcombine.low %v6293_v56, %v6301_v58 }
 0x6dc   :  { %7266 = vmatpush1.bf16.msra.mxu1 %v12512_v17  ;;  %v6309_v17 = vld [vmem:[#allocation13 + $0x230] sm:$0xff] }
 0x6dd   :  { %7267 = vmatprep.subr.bf16.mxu1 %v12529_v7  ;;  %v6317_v7 = vld [vmem:[#allocation13 + $0x270] sm:$0xff] }
 0x6de   :  { %v12501_v63 = vcombine.high %v6309_v17, %v6317_v7  ;;  %v12500_v61 = vcombine.low %v6309_v17, %v6317_v7 }
 0x6e0   :  { %7268 = vmatpush1.bf16.msra.mxu1 %v12528_v60  ;;  %v6325_v60 = vld [vmem:[#allocation13 + $0x2b0] sm:$0xff] }
 0x6e1   :  { %7269 = vmatprep.subr.bf16.mxu1 %v12545_v2  ;;  %v6333_v2 = vld [vmem:[#allocation13 + $0x2f0] sm:$0xff] }
 0x6e2   :  { %v12517_v32 = vcombine.high %v6325_v60, %v6333_v2  ;;  %v12516_v24 = vcombine.low %v6325_v60, %v6333_v2 }
 0x6e4   :  { %7270 = vmatpush1.bf16.msra.mxu1 %v12544_v1  ;;  %v6341_v1 = vld [vmem:[#allocation13 + $0x330] sm:$0xff] }
 0x6e5   :  { %7296 = vmatprep.subr.bf16.mxu1 %v12435_v59  ;;  %v6349_v59 = vld [vmem:[#allocation13 + $0x370] sm:$0xff] }
 0x6e6   :  { %v12533_v3 = vcombine.high %v6341_v1, %v6349_v59  ;;  %v12532_v5 = vcombine.low %v6341_v1, %v6349_v59  ;;  %v13787_v1 = vld [vmem:[#allocation16 + $0x4] ss:$16 sps:$4 sm:$0xff]   ;;  %v13790_v59 = vld [vmem:[#allocation16 + $0x22c] ss:$16 sps:$4 sm:$0xff]  }
 0x6e7   :  { %7288 = vmatmul.mubr.bf16.vlgmr.msra.gmra.mrb[44].mxu1 %v15401_v18 }
 0x6e8   :  { %7297 = vmatpush1.bf16.msra.mxu1 %v12434_v62  ;;  %7328 = vmatprep.mubr.bf16.mxu1 %v14933_v0  ;;  %v6357_v62 = vld [vmem:[#allocation13 + $0x3b0] sm:$0xff] }
 0x6e9   :  { %7298 = vmatprep.subr.bf16.mxu1 %v12451_v4  ;;  %v6365_v4 = vld [vmem:[#allocation13 + $0x3f0] sm:$0xff] }
 0x6ea   :  { %v12549_v33 = vcombine.high %v6357_v62, %v6365_v4  ;;  %v12548_v8 = vcombine.low %v6357_v62, %v6365_v4  ;;  %v13793_v62 = vld [vmem:[#allocation16 + $0x24] ss:$16 sps:$4 sm:$0xff]   ;;  %v13796_v4 = vld [vmem:[#allocation16 + $0x24c] ss:$16 sps:$4 sm:$0xff]  }
 0x6ec   :  { %7299 = vmatpush1.bf16.msra.mxu1 %v12450_v52  ;;  %v6246_v52 = vld [vmem:[#allocation13 + $0x38] sm:$0xff] }
 0x6ed   :  { %7300 = vmatprep.subr.bf16.mxu1 %v12467_v30  ;;  %v6254_v30 = vld [vmem:[#allocation13 + $0x78] sm:$0xff] }
 0x6ee   :  { %v12439_v12 = vcombine.high %v6246_v52, %v6254_v30  ;;  %v12438_v26 = vcombine.low %v6246_v52, %v6254_v30  ;;  %v13799_v52 = vld [vmem:[#allocation16 + $0x44] ss:$16 sps:$4 sm:$0xff]   ;;  %v13802_v30 = vld [vmem:[#allocation16 + $0x26c] ss:$16 sps:$4 sm:$0xff]  }
 0x6f0   :  { %7301 = vmatpush1.bf16.msra.mxu1 %v12466_v11  ;;  %v6262_v11 = vld [vmem:[#allocation13 + $0xb8] sm:$0xff] }
 0x6f1   :  { %7302 = vmatprep.subr.bf16.mxu1 %v12483_v34  ;;  %v6270_v34 = vld [vmem:[#allocation13 + $0xf8] sm:$0xff] }
 0x6f2   :  { %v12455_v42 = vcombine.high %v6262_v11, %v6270_v34  ;;  %v12454_v14 = vcombine.low %v6262_v11, %v6270_v34  ;;  %v13805_v11 = vld [vmem:[#allocation16 + $0x64] ss:$16 sps:$4 sm:$0xff]   ;;  %v13808_v34 = vld [vmem:[#allocation16 + $0x28c] ss:$16 sps:$4 sm:$0xff]  }
 0x6f4   :  { %7303 = vmatpush1.bf16.msra.mxu1 %v12482_v43  ;;  %v6278_v43 = vld [vmem:[#allocation13 + $0x138] sm:$0xff] }
 0x6f5   :  { %7304 = vmatprep.subr.bf16.mxu1 %v12499_v13  ;;  %v6286_v13 = vld [vmem:[#allocation13 + $0x178] sm:$0xff] }
 0x6f6   :  { %v12471_v45 = vcombine.high %v6278_v43, %v6286_v13  ;;  %v12470_v41 = vcombine.low %v6278_v43, %v6286_v13  ;;  %v13814_v43 = vld [vmem:[#allocation16 + $0x2ac] ss:$16 sps:$4 sm:$0xff]   ;;  %v13809_v13 = vld [vmem:[#allocation16 + $0x80] ss:$16 sps:$4 sm:$0xff]  }
 0x6f8   :  { %7305 = vmatpush1.bf16.msra.mxu1 %v12498_v39  ;;  %v6294_v39 = vld [vmem:[#allocation13 + $0x1b8] sm:$0xff] }
 0x6f9   :  { %7306 = vmatprep.subr.bf16.mxu1 %v12515_v15  ;;  %v6302_v15 = vld [vmem:[#allocation13 + $0x1f8] sm:$0xff] }
 0x6fa   :  { %v12487_v29 = vcombine.high %v6294_v39, %v6302_v15  ;;  %v12486_v10 = vcombine.low %v6294_v39, %v6302_v15  ;;  %v13820_v39 = vld [vmem:[#allocation16 + $0x2cc] ss:$16 sps:$4 sm:$0xff]   ;;  %v6386_v15 = vrot.slane %v15417_v27, %v15253_v22 }
 0x6fc   :  { %7307 = vmatpush1.bf16.msra.mxu1 %v12514_v6  ;;  %v6310_v6 = vld [vmem:[#allocation13 + $0x238] sm:$0xff] }
 0x6fd   :  { %7308 = vmatprep.subr.bf16.mxu1 %v12531_v9  ;;  %v6318_v9 = vld [vmem:[#allocation13 + $0x278] sm:$0xff] }
 0x6fe   :  { %v12503_v19 = vcombine.high %v6310_v6, %v6318_v9  ;;  %v12502_v25 = vcombine.low %v6310_v6, %v6318_v9  ;;  %v13823_v6 = vld [vmem:[#allocation16 + $0xc4] ss:$16 sps:$4 sm:$0xff]  }
 0x700   :  { %7309 = vmatpush1.bf16.msra.mxu1 %v12530_v21  ;;  %v6326_v21 = vld [vmem:[#allocation13 + $0x2b8] sm:$0xff] }
 0x701   :  { %7310 = vmatprep.subr.bf16.mxu1 %v12547_v23  ;;  %v6334_v23 = vld [vmem:[#allocation13 + $0x2f8] sm:$0xff] }
 0x702   :  { %v12518_v37 = vcombine.low %v6326_v21, %v6334_v23 }
 0x704   :  { %7311 = vmatpush1.bf16.msra.mxu1 %v12546_v28  ;;  %v6342_v28 = vld [vmem:[#allocation13 + $0x338] sm:$0xff] }
 0x705   :  { %7337 = vmatprep.subr.bf16.mxu1 %v12437_v31  ;;  %v6350_v31 = vld [vmem:[#allocation13 + $0x378] sm:$0xff] }
 0x707   :  { %7329 = vmatmul.mubr.bf16.vlgmr.msra.gmra.mrb[48].mxu1 %v15401_v18 }
 0x708   :  { %7338 = vmatpush1.bf16.msra.mxu1 %v12436_v38  ;;  %7369 = vmatprep.mubr.bf16.mxu1 %v14933_v0  ;;  %v6378_v38 = vrot.slane %v15417_v27, %v15233_v49 }
 0x709   :  { %7339 = vmatprep.subr.bf16.mxu1 %v12453_v16  ;;  %v12535_v16 = vcombine.high %v6342_v28, %v6350_v31 }
 0x70c   :  { %7340 = vmatpush1.bf16.msra.mxu1 %v12452_v47  ;;  %v6366_v47 = vld [vmem:[#allocation13 + $0x3f8] sm:$0xff] }
 0x70d   :  { %7341 = vmatprep.subr.bf16.mxu1 %v12469_v55  ;;  %v12550_v2 = vcombine.low %v6358_v36, %v6366_v47 }
 0x710   :  { %7342 = vmatpush1.bf16.msra.mxu1 %v12468_v57 }
 0x711   :  { %7343 = vmatprep.subr.bf16.mxu1 %v12485_v50  ;;  %v12534_v50 = vcombine.low %v6342_v28, %v6350_v31  ;;  %v13824_v28 = vld [vmem:[#allocation16 + $0x2e8] ss:$16 sps:$4 sm:$0xff]   ;;  %v13829_v31 = vld [vmem:[#allocation16 + $0xe4] ss:$16 sps:$4 sm:$0xff]  }
 0x714   :  { %7344 = vmatpush1.bf16.msra.mxu1 %v12484_v46  ;;  %v12551_v46 = vcombine.high %v6358_v36, %v6366_v47  ;;  %v13835_v36 = vld [vmem:[#allocation16 + $0x104] ss:$16 sps:$4 sm:$0xff]   ;;  %v13838_v47 = vld [vmem:[#allocation16 + $0x32c] ss:$16 sps:$4 sm:$0xff]  }
 0x715   :  { %7345 = vmatprep.subr.bf16.mxu1 %v12501_v63 }
 0x718   :  { %7346 = vmatpush1.bf16.msra.mxu1 %v12500_v61  ;;  %v13782_v61 = vld [vmem:[#allocation16 + $0x208] ss:$16 sps:$4 sm:$0xff]  }
 0x719   :  { %7347 = vmatprep.subr.bf16.mxu1 %v12517_v32 }
 0x71c   :  { %7348 = vmatpush1.bf16.msra.mxu1 %v12516_v24  ;;  %v13785_v24 = vld [vmem:[#allocation16] ss:$16 sps:$4 sm:$0xff]  }
 0x71d   :  { %7349 = vmatprep.subr.bf16.mxu1 %v12533_v3  ;;  %v13788_v3 = vld [vmem:[#allocation16 + $0x228] ss:$16 sps:$4 sm:$0xff]  }
 0x720   :  { %7350 = vmatpush1.bf16.msra.mxu1 %v12532_v5  ;;  %v13791_v5 = vld [vmem:[#allocation16 + $0x20] ss:$16 sps:$4 sm:$0xff]  }
 0x721   :  { %7351 = vmatprep.subr.bf16.mxu1 %v12549_v33  ;;  %v13794_v33 = vld [vmem:[#allocation16 + $0x248] ss:$16 sps:$4 sm:$0xff]  }
 0x724   :  { %7352 = vmatpush1.bf16.msra.mxu1 %v12548_v8  ;;  %v13797_v8 = vld [vmem:[#allocation16 + $0x40] ss:$16 sps:$4 sm:$0xff]  }
 0x725   :  { %7378 = vmatprep.subr.bf16.mxu1 %v12439_v12  ;;  %v13800_v12 = vld [vmem:[#allocation16 + $0x268] ss:$16 sps:$4 sm:$0xff]  }
 0x727   :  { %7370 = vmatmul.mubr.bf16.vlgmr.msra.gmra.mrb[52].mxu1 %v15401_v18 }
 0x728   :  { %7379 = vmatpush1.bf16.msra.mxu1 %v12438_v26  ;;  %7410 = vmatprep.mubr.bf16.mxu1 %v14933_v0  ;;  %v12519_v0 = vcombine.high %v6326_v21, %v6334_v23  ;;  %v13803_v26 = vld [vmem:[#allocation16 + $0x60] ss:$16 sps:$4 sm:$0xff]  }
 0x729   :  { %7380 = vmatprep.subr.bf16.mxu1 %v12455_v42  ;;  %v13811_v42 = vld [vmem:[#allocation16 + $0x84] ss:$16 sps:$4 sm:$0xff]  }
 0x72c   :  { %7381 = vmatpush1.bf16.msra.mxu1 %v12454_v14  ;;  %v13812_v14 = vld [vmem:[#allocation16 + $0x2a8] ss:$16 sps:$4 sm:$0xff]  }
 0x72d   :  { %7382 = vmatprep.subr.bf16.mxu1 %v12471_v45  ;;  %v13817_v45 = vld [vmem:[#allocation16 + $0xa4] ss:$16 sps:$4 sm:$0xff]  }
 0x730   :  { %7383 = vmatpush1.bf16.msra.mxu1 %v12470_v41  ;;  %v13815_v41 = vld [vmem:[#allocation16 + $0xa0] ss:$16 sps:$4 sm:$0xff]  }
 0x731   :  { %7384 = vmatprep.subr.bf16.mxu1 %v12487_v29  ;;  %v13818_v29 = vld [vmem:[#allocation16 + $0x2c8] ss:$16 sps:$4 sm:$0xff]  }
 0x734   :  { %7385 = vmatpush1.bf16.msra.mxu1 %v12486_v10  ;;  %v13826_v10 = vld [vmem:[#allocation16 + $0x2ec] ss:$16 sps:$4 sm:$0xff]  }
 0x735   :  { %7386 = vmatprep.subr.bf16.mxu1 %v12503_v19 }
 0x738   :  { %7387 = vmatpush1.bf16.msra.mxu1 %v12502_v25  ;;  %v13821_v25 = vld [vmem:[#allocation16 + $0xc0] ss:$16 sps:$4 sm:$0xff]  }
 0x739   :  { %7388 = vmatprep.subr.bf16.mxu1 %v12519_v0 }
 0x73a   :  { %v7125_v44 = vpop.f32.mrb[28].mxu1 }
 0x73b   :  { %v7126_v55 = vadd.f32 %v7125_v44, %v6374_v35  ;;  %v7127_v56 = vpop.f32.mrb[29].mxu1  ;;  %v13830_v44 = vld [vmem:[#allocation16 + $0x308] ss:$16 sps:$4 sm:$0xff]  }
 0x73c   :  { %v7128_v58 = vadd.f32 %v7127_v56, %v6378_v38  ;;  %7389 = vmatpush1.bf16.msra.mxu1 %v12518_v37  ;;  %v7129_v57 = vpop.f32.mrb[30].mxu1  ;;  %v13832_v37 = vld [vmem:[#allocation16 + $0x30c] ss:$16 sps:$4 sm:$0xff]   ;;  %v13836_v56 = vld [vmem:[#allocation16 + $0x328] ss:$16 sps:$4 sm:$0xff]  }
 0x73d   :  { %v7419_v17 = vmax.f32 %v7126_v55, 0.0  ;;  %v7130_v7 = vpop.f32.mrb[31].mxu1  ;;  %7390 = vmatprep.subr.bf16.mxu1 %v12535_v16  ;;  %v13827_v16 = vld [vmem:[#allocation16 + $0xe0] ss:$16 sps:$4 sm:$0xff]   ;;  %v13844_v57 = vld [vmem:[#allocation16 + $0x34c] ss:$16 sps:$4 sm:$0xff]  }
 0x73e   :  { %v7420_v63 = vmax.f32 %v7128_v58, 0.0  ;;  %v13833_v55 = vld [vmem:[#allocation16 + $0x100] ss:$16 sps:$4 sm:$0xff]   ;;  %v13841_v58 = vld [vmem:[#allocation16 + $0x124] ss:$16 sps:$4 sm:$0xff]  }
 0x73f   :  { %v15423_v32 = vpack.c.bf16 %v7419_v17, %v7419_v17  ;;  %v13842_v17 = vld [vmem:[#allocation16 + $0x348] ss:$16 sps:$4 sm:$0xff]   ;;  %v13847_v7 = vld [vmem:[#allocation16 + $0x144] ss:$16 sps:$4 sm:$0xff]  }
 0x740   :  { %v7436_v60 = vpack.c.bf16 %v7420_v63, %v7420_v63  ;;  %7391 = vmatpush1.bf16.msra.mxu1 %v12534_v50  ;;  %v13839_v50 = vld [vmem:[#allocation16 + $0x120] ss:$16 sps:$4 sm:$0xff]  }
 0x741   :  { %7392 = vmatprep.subr.bf16.mxu1 %v12551_v46  ;;  %v13850_v46 = vld [vmem:[#allocation16 + $0x36c] ss:$16 sps:$4 sm:$0xff]   ;;  %v13845_v63 = vld [vmem:[#allocation16 + $0x140] ss:$16 sps:$4 sm:$0xff]  }
 0x742   :  { %10905 = vmatprep.mubr.bf16.mxu0 %v7436_v60 }
 0x743   :  { %10906 = vmatmul.mubr.bf16.vlgmr.msra.gmra.mrb[20].mxu0 %v15423_v32 }
 0x744   :  { %7393 = vmatpush1.bf16.msra.mxu1 %v12550_v2  ;;  %10915 = vmatpush1.bf16.msra.mxu0 %v13782_v61  ;;  %v13853_v2 = vld [vmem:[#allocation16 + $0x164] ss:$16 sps:$4 sm:$0xff]   ;;  %v13856_v61 = vld [vmem:[#allocation16 + $0x38c] ss:$16 sps:$4 sm:$0xff]  }
 0x745   :  { %10545 = vmatprep.subr.bf16.mxu1 %v13787_v1  ;;  %10916 = vmatprep.subr.bf16.mxu0 %v13790_v59  ;;  %v13851_v1 = vld [vmem:[#allocation16 + $0x160] ss:$16 sps:$4 sm:$0xff]   ;;  %v13854_v59 = vld [vmem:[#allocation16 + $0x388] ss:$16 sps:$4 sm:$0xff]  }
 0x747   :  { %7411 = vmatmul.mubr.bf16.vlgmr.msra.gmra.mrb[56].mxu1 %v15401_v18  ;;  %v13806_v18 = vld [vmem:[#allocation16 + $0x288] ss:$16 sps:$4 sm:$0xff]  }
 0x748   :  { %10546 = vmatpush1.bf16.msra.mxu1 %v13785_v24  ;;  %10577 = vmatprep.mubr.bf16.mxu1 %v7436_v60  ;;  %v13848_v60 = vld [vmem:[#allocation16 + $0x368] ss:$16 sps:$4 sm:$0xff]   ;;  %v13859_v24 = vld [vmem:[#allocation16 + $0x184] ss:$16 sps:$4 sm:$0xff]  }
 0x749   :  { %10917 = vmatpush1.bf16.msra.mxu0 %v13788_v3  ;;  %10547 = vmatprep.subr.bf16.mxu1 %v13793_v62  ;;  %v13862_v3 = vld [vmem:[#allocation16 + $0x3ac] ss:$16 sps:$4 sm:$0xff]   ;;  %v13857_v62 = vld [vmem:[#allocation16 + $0x180] ss:$16 sps:$4 sm:$0xff]  }
 0x74a   :  { %10918 = vmatprep.subr.bf16.mxu0 %v13796_v4  ;;  %v13860_v4 = vld [vmem:[#allocation16 + $0x3a8] ss:$16 sps:$4 sm:$0xff]  }
 0x74c   :  { %10548 = vmatpush1.bf16.msra.mxu1 %v13791_v5  ;;  %v13865_v5 = vld [vmem:[#allocation16 + $0x1a4] ss:$16 sps:$4 sm:$0xff]  }
 0x74d   :  { %10919 = vmatpush1.bf16.msra.mxu0 %v13794_v33  ;;  %10549 = vmatprep.subr.bf16.mxu1 %v13799_v52  ;;  %v6382_v33 = vrot.slane %v15417_v27, %v15250_v20  ;;  %v13868_v52 = vld [vmem:[#allocation16 + $0x3cc] ss:$16 sps:$4 sm:$0xff]  }
 0x74e   :  { %10920 = vmatprep.subr.bf16.mxu0 %v13802_v30  ;;  %v6394_v30 = vrot.slane %v15417_v27, %v15332_v54 }
 0x750   :  { %10550 = vmatpush1.bf16.msra.mxu1 %v13797_v8  ;;  %v13863_v8 = vld [vmem:[#allocation16 + $0x1a0] ss:$16 sps:$4 sm:$0xff]  }
 0x751   :  { %10921 = vmatpush1.bf16.msra.mxu0 %v13800_v12  ;;  %10551 = vmatprep.subr.bf16.mxu1 %v13805_v11  ;;  %v13866_v12 = vld [vmem:[#allocation16 + $0x3c8] ss:$16 sps:$4 sm:$0xff]   ;;  %v13871_v11 = vld [vmem:[#allocation16 + $0x1c4] ss:$16 sps:$4 sm:$0xff]  }
 0x752   :  { %10922 = vmatprep.subr.bf16.mxu0 %v13808_v34 }
 0x754   :  { %10552 = vmatpush1.bf16.msra.mxu1 %v13803_v26 }
 0x755   :  { %10923 = vmatpush1.bf16.msra.mxu0 %v13806_v18  ;;  %10553 = vmatprep.subr.bf16.mxu1 %v13811_v42  ;;  %v13874_v18 = vld [vmem:[#allocation16 + $0x3ec] ss:$16 sps:$4 sm:$0xff]  }
 0x756   :  { %10924 = vmatprep.subr.bf16.mxu0 %v13814_v43 }
 0x758   :  { %10554 = vmatpush1.bf16.msra.mxu1 %v13809_v13 }
 0x759   :  { %10925 = vmatpush1.bf16.msra.mxu0 %v13812_v14  ;;  %10555 = vmatprep.subr.bf16.mxu1 %v13817_v45  ;;  %v13869_v14 = vld [vmem:[#allocation16 + $0x1c0] ss:$16 sps:$4 sm:$0xff]  }
 0x75a   :  { %v15429_v9 = vpop.f32.mrb[32].mxu1  ;;  %10926 = vmatprep.subr.bf16.mxu0 %v13820_v39  ;;  %v13872_v39 = vld [vmem:[#allocation16 + $0x3e8] ss:$16 sps:$4 sm:$0xff]  }
 0x75b   :  { %v7168_v19 = vpop.f32.mrb[33].mxu1  ;;  %v7167_v34 = vadd.f32 %v15429_v9, %v6382_v33  ;;  %v13875_v9 = vld [vmem:[#allocation16 + $0x1e0] ss:$16 sps:$4 sm:$0xff]   ;;  %v13925_v33 = vld [vmem:[#allocation16 + $0x2e4] ss:$16 sps:$4 sm:$0xff]  }
 0x75c   :  { %v7169_v21 = vadd.f32 %v7168_v19, %v6386_v15  ;;  %v7170_v23 = vpop.f32.mrb[34].mxu1  ;;  %10556 = vmatpush1.bf16.msra.mxu1 %v13815_v41  ;;  %v13877_v15 = vld [vmem:[#allocation16 + $0x1e4] ss:$16 sps:$4 sm:$0xff]  }
 0x75d   :  { %10927 = vmatpush1.bf16.msra.mxu0 %v13818_v29  ;;  %v7171_v0 = vpop.f32.mrb[35].mxu1  ;;  %10557 = vmatprep.subr.bf16.mxu1 %v13823_v6  ;;  %v7421_v41 = vmax.f32 %v7167_v34, 0.0  ;;  %v13880_v29 = vld [vmem:[#allocation16 + $0x40c] ss:$16 sps:$4 sm:$0xff]   ;;  %v13929_v34 = vld [vmem:[#allocation16 + $0x300] ss:$16 sps:$4 sm:$0xff]  }
 0x75e   :  { %v7422_v35 = vmax.f32 %v7169_v21, 0.0  ;;  %10928 = vmatprep.subr.bf16.mxu0 %v13826_v10  ;;  %v13878_v10 = vld [vmem:[#allocation16 + $0x408] ss:$16 sps:$4 sm:$0xff]   ;;  %v13883_v21 = vld [vmem:[#allocation16 + $0x204] ss:$16 sps:$4 sm:$0xff]  }
 0x75f   :  { %v15441_v19 = vpack.c.bf16 %v7421_v41, %v7421_v41  ;;  %v13886_v23 = vld [vmem:[#allocation16 + $0x42c] ss:$16 sps:$4 sm:$0xff]   ;;  %v13881_v0 = vld [vmem:[#allocation16 + $0x200] ss:$16 sps:$4 sm:$0xff]   ;;  %v13944_v41 = vld [vmem:[#allocation16 + $0x568] ss:$16 sps:$4 sm:$0xff]  }
 0x760   :  { %v15431_v38 = vpack.c.bf16 %v7422_v35, %v7422_v35  ;;  %10558 = vmatpush1.bf16.msra.mxu1 %v13821_v25  ;;  %v13892_v35 = vld [vmem:[#allocation16 + $0x44c] ss:$16 sps:$4 sm:$0xff]  }
 0x761   :  { %10929 = vmatpush1.bf16.msra.mxu0 %v13824_v28  ;;  %10559 = vmatprep.subr.bf16.mxu1 %v13829_v31  ;;  %v13884_v28 = vld [vmem:[#allocation16 + $0x428] ss:$16 sps:$4 sm:$0xff]   ;;  %v13889_v31 = vld [vmem:[#allocation16 + $0x224] ss:$16 sps:$4 sm:$0xff]  }
 0x762   :  { %10946 = vmatprep.mubr.bf16.mxu0 %v15431_v38  ;;  %10930 = vmatprep.subr.bf16.mxu0 %v13832_v37  ;;  %v13887_v37 = vld [vmem:[#allocation16 + $0x220] ss:$16 sps:$4 sm:$0xff]  }
 0x764   :  { %10560 = vmatpush1.bf16.msra.mxu1 %v13827_v16  ;;  %v13890_v16 = vld [vmem:[#allocation16 + $0x448] ss:$16 sps:$4 sm:$0xff]  }
 0x765   :  { %10931 = vmatpush1.bf16.msra.mxu0 %v13830_v44  ;;  %10561 = vmatprep.subr.bf16.mxu1 %v13835_v36  ;;  %v13895_v44 = vld [vmem:[#allocation16 + $0x244] ss:$16 sps:$4 sm:$0xff]   ;;  %v13898_v36 = vld [vmem:[#allocation16 + $0x46c] ss:$16 sps:$4 sm:$0xff]  }
 0x766   :  { %10932 = vmatprep.subr.bf16.mxu0 %v13838_v47  ;;  %v13893_v47 = vld [vmem:[#allocation16 + $0x240] ss:$16 sps:$4 sm:$0xff]  }
 0x768   :  { %10562 = vmatpush1.bf16.msra.mxu1 %v13833_v55  ;;  %v13896_v55 = vld [vmem:[#allocation16 + $0x468] ss:$16 sps:$4 sm:$0xff]  }
 0x769   :  { %10933 = vmatpush1.bf16.msra.mxu0 %v13836_v56  ;;  %10563 = vmatprep.subr.bf16.mxu1 %v13841_v58  ;;  %v13901_v56 = vld [vmem:[#allocation16 + $0x264] ss:$16 sps:$4 sm:$0xff]   ;;  %v13904_v58 = vld [vmem:[#allocation16 + $0x48c] ss:$16 sps:$4 sm:$0xff]  }
 0x76a   :  { %10934 = vmatprep.subr.bf16.mxu0 %v13844_v57  ;;  %v13907_v57 = vld [vmem:[#allocation16 + $0x284] ss:$16 sps:$4 sm:$0xff]  }
 0x76c   :  { %10564 = vmatpush1.bf16.msra.mxu1 %v13839_v50  ;;  %v13910_v50 = vld [vmem:[#allocation16 + $0x4ac] ss:$16 sps:$4 sm:$0xff]  }
 0x76d   :  { %10935 = vmatpush1.bf16.msra.mxu0 %v13842_v17  ;;  %10565 = vmatprep.subr.bf16.mxu1 %v13847_v7  ;;  %v13905_v17 = vld [vmem:[#allocation16 + $0x280] ss:$16 sps:$4 sm:$0xff]   ;;  %v13908_v7 = vld [vmem:[#allocation16 + $0x4a8] ss:$16 sps:$4 sm:$0xff]  }
 0x76e   :  { %10936 = vmatprep.subr.bf16.mxu0 %v13850_v46  ;;  %v13913_v46 = vld [vmem:[#allocation16 + $0x2a4] ss:$16 sps:$4 sm:$0xff]  }
 0x770   :  { %10566 = vmatpush1.bf16.msra.mxu1 %v13845_v63  ;;  %v13916_v63 = vld [vmem:[#allocation16 + $0x4cc] ss:$16 sps:$4 sm:$0xff]  }
 0x771   :  { %10937 = vmatpush1.bf16.msra.mxu0 %v13848_v60  ;;  %10567 = vmatprep.subr.bf16.mxu1 %v13853_v2  ;;  %v13911_v60 = vld [vmem:[#allocation16 + $0x2a0] ss:$16 sps:$4 sm:$0xff]   ;;  %v13914_v2 = vld [vmem:[#allocation16 + $0x4c8] ss:$16 sps:$4 sm:$0xff]  }
 0x772   :  { %10938 = vmatprep.subr.bf16.mxu0 %v13856_v61  ;;  %v13919_v61 = vld [vmem:[#allocation16 + $0x2c4] ss:$16 sps:$4 sm:$0xff]  }
 0x774   :  { %10568 = vmatpush1.bf16.msra.mxu1 %v13851_v1 }
 0x775   :  { %10939 = vmatpush1.bf16.msra.mxu0 %v13854_v59  ;;  %10569 = vmatprep.subr.bf16.mxu1 %v13859_v24  ;;  %v13922_v59 = vld [vmem:[#allocation16 + $0x4ec] ss:$16 sps:$4 sm:$0xff]  }
 0x776   :  { %10940 = vmatprep.subr.bf16.mxu0 %v13862_v3 }
 0x778   :  { %10570 = vmatpush1.bf16.msra.mxu1 %v13857_v62  ;;  %v13917_v62 = vld [vmem:[#allocation16 + $0x2c0] ss:$16 sps:$4 sm:$0xff]  }
 0x779   :  { %10941 = vmatpush1.bf16.msra.mxu0 %v13860_v4  ;;  %10571 = vmatprep.subr.bf16.mxu1 %v13865_v5  ;;  %v13920_v5 = vld [vmem:[#allocation16 + $0x4e8] ss:$16 sps:$4 sm:$0xff]  }
 0x77a   :  { %v15439_v26 = vpop.f32.mrb[36].mxu1  ;;  %10942 = vmatprep.subr.bf16.mxu0 %v13868_v52  ;;  %v13928_v52 = vld [vmem:[#allocation16 + $0x50c] ss:$16 sps:$4 sm:$0xff]  }
 0x77b   :  { %v7209_v42 = vpop.f32.mrb[37].mxu1 }
 0x77c   :  { %v7210_v43 = vadd.f32 %v7209_v42, %v6394_v30  ;;  %v7211_v13 = vpop.f32.mrb[38].mxu1  ;;  %10572 = vmatpush1.bf16.msra.mxu1 %v13863_v8  ;;  %v13923_v30 = vld [vmem:[#allocation16 + $0x2e0] ss:$16 sps:$4 sm:$0xff]   ;;  %v13926_v8 = vld [vmem:[#allocation16 + $0x508] ss:$16 sps:$4 sm:$0xff]  }
 0x77d   :  { %10943 = vmatpush1.bf16.msra.mxu0 %v13866_v12  ;;  %v7212_v45 = vpop.f32.mrb[39].mxu1  ;;  %10573 = vmatprep.subr.bf16.mxu1 %v13871_v11  ;;  %v13931_v12 = vld [vmem:[#allocation16 + $0x304] ss:$16 sps:$4 sm:$0xff]   ;;  %v13934_v11 = vld [vmem:[#allocation16 + $0x52c] ss:$16 sps:$4 sm:$0xff]  }
 0x77e   :  { %10944 = vmatprep.subr.bf16.mxu0 %v13874_v18  ;;  %v7424_v6 = vmax.f32 %v7210_v43, 0.0  ;;  %v13932_v18 = vld [vmem:[#allocation16 + $0x528] ss:$16 sps:$4 sm:$0xff]   ;;  %v13937_v42 = vld [vmem:[#allocation16 + $0x324] ss:$16 sps:$4 sm:$0xff]  }
 0x77f   :  { %v13940_v43 = vld [vmem:[#allocation16 + $0x54c] ss:$16 sps:$4 sm:$0xff]   ;;  %v13935_v13 = vld [vmem:[#allocation16 + $0x320] ss:$16 sps:$4 sm:$0xff]   ;;  %v13943_v45 = vld [vmem:[#allocation16 + $0x344] ss:$16 sps:$4 sm:$0xff]  }
 0x780   :  { %10574 = vmatpush1.bf16.msra.mxu1 %v13869_v14  ;;  %v15443_v25 = vpack.c.bf16 %v7424_v6, %v7424_v6  ;;  %v13938_v14 = vld [vmem:[#allocation16 + $0x548] ss:$16 sps:$4 sm:$0xff]   ;;  %v13952_v6 = vld [vmem:[#allocation16 + $0x58c] ss:$16 sps:$4 sm:$0xff]  }
 0x781   :  { %10945 = vmatpush1.bf16.msra.mxu0 %v13872_v39  ;;  %10575 = vmatprep.subr.bf16.mxu1 %v13877_v15  ;;  %v13946_v39 = vld [vmem:[#allocation16 + $0x56c] ss:$16 sps:$4 sm:$0xff]   ;;  %v13941_v15 = vld [vmem:[#allocation16 + $0x340] ss:$16 sps:$4 sm:$0xff]  }
 0x782   :  { %10955 = vmatprep.subr.bf16.mxu0 %v13880_v29  ;;  %v13949_v29 = vld [vmem:[#allocation16 + $0x364] ss:$16 sps:$4 sm:$0xff]  }
 0x784   :  { %10947 = vmatmul.mubr.bf16.vlgmr.msra.gmra.mrb[20].mxu0 %v15441_v19  ;;  %10576 = vmatpush1.bf16.msra.mxu1 %v13875_v9  ;;  %v13947_v9 = vld [vmem:[#allocation16 + $0x360] ss:$16 sps:$4 sm:$0xff]  }
 0x785   :  { %10956 = vmatpush1.bf16.msra.mxu0 %v13878_v10  ;;  %10987 = vmatprep.mubr.bf16.mxu0 %v15443_v25  ;;  %v13950_v10 = vld [vmem:[#allocation16 + $0x588] ss:$16 sps:$4 sm:$0xff]  }
 0x786   :  { %10586 = vmatprep.subr.bf16.mxu1 %v13883_v21  ;;  %10957 = vmatprep.subr.bf16.mxu0 %v13886_v23  ;;  %v13955_v21 = vld [vmem:[#allocation16 + $0x384] ss:$16 sps:$4 sm:$0xff]   ;;  %v13958_v23 = vld [vmem:[#allocation16 + $0x5ac] ss:$16 sps:$4 sm:$0xff]  }
 0x787   :  { %10578 = vmatmul.mubr.bf16.vlgmr.msra.gmra.mrb[60].mxu1 %v15423_v32  ;;  %v13899_v32 = vld [vmem:[#allocation16 + $0x260] ss:$16 sps:$4 sm:$0xff]  }
 0x788   :  { %10587 = vmatpush1.bf16.msra.mxu1 %v13881_v0  ;;  %10618 = vmatprep.mubr.bf16.mxu1 %v15431_v38  ;;  %v13902_v38 = vld [vmem:[#allocation16 + $0x488] ss:$16 sps:$4 sm:$0xff]   ;;  %v13953_v0 = vld [vmem:[#allocation16 + $0x380] ss:$16 sps:$4 sm:$0xff]  }
 0x789   :  { %10958 = vmatpush1.bf16.msra.mxu0 %v13884_v28  ;;  %10588 = vmatprep.subr.bf16.mxu1 %v13889_v31  ;;  %v13956_v28 = vld [vmem:[#allocation16 + $0x5a8] ss:$16 sps:$4 sm:$0xff]   ;;  %v13961_v31 = vld [vmem:[#allocation16 + $0x3a4] ss:$16 sps:$4 sm:$0xff]  }
 0x78a   :  { %10959 = vmatprep.subr.bf16.mxu0 %v13892_v35  ;;  %v6390_v35 = vrot.slane %v15417_v27, %v15341_v51 }
 0x78c   :  { %10589 = vmatpush1.bf16.msra.mxu1 %v13887_v37  ;;  %v13964_v37 = vld [vmem:[#allocation16 + $0x5cc] ss:$16 sps:$4 sm:$0xff]  }
 0x78d   :  { %10960 = vmatpush1.bf16.msra.mxu0 %v13890_v16  ;;  %10590 = vmatprep.subr.bf16.mxu1 %v13895_v44  ;;  %v6402_v16 = vrot.slane %v15417_v27, %v15344_v53  ;;  %v13959_v44 = vld [vmem:[#allocation16 + $0x3a0] ss:$16 sps:$4 sm:$0xff]  }
 0x78e   :  { %10961 = vmatprep.subr.bf16.mxu0 %v13898_v36  ;;  %v13962_v36 = vld [vmem:[#allocation16 + $0x5c8] ss:$16 sps:$4 sm:$0xff]  }
 0x790   :  { %10591 = vmatpush1.bf16.msra.mxu1 %v13893_v47  ;;  %v13967_v47 = vld [vmem:[#allocation16 + $0x3c4] ss:$16 sps:$4 sm:$0xff]  }
 0x791   :  { %10962 = vmatpush1.bf16.msra.mxu0 %v13896_v55  ;;  %10592 = vmatprep.subr.bf16.mxu1 %v13901_v56  ;;  %v7208_v55 = vadd.f32 %v15439_v26, %v6390_v35  ;;  %v14016_v35 = vld [vmem:[#allocation16 + $0x6e8] ss:$16 sps:$4 sm:$0xff]  }
 0x792   :  { %10963 = vmatprep.subr.bf16.mxu0 %v13904_v58  ;;  %v13970_v58 = vld [vmem:[#allocation16 + $0x5ec] ss:$16 sps:$4 sm:$0xff]  }
 0x794   :  { %10593 = vmatpush1.bf16.msra.mxu1 %v13899_v32 }
 0x795   :  { %10964 = vmatpush1.bf16.msra.mxu0 %v13902_v38  ;;  %10594 = vmatprep.subr.bf16.mxu1 %v13907_v57 }
 0x796   :  { %10965 = vmatprep.subr.bf16.mxu0 %v13910_v50  ;;  %v13965_v50 = vld [vmem:[#allocation16 + $0x3c0] ss:$16 sps:$4 sm:$0xff]  }
 0x798   :  { %10595 = vmatpush1.bf16.msra.mxu1 %v13905_v17 }
 0x799   :  { %10966 = vmatpush1.bf16.msra.mxu0 %v13908_v7  ;;  %10596 = vmatprep.subr.bf16.mxu1 %v13913_v46  ;;  %v13968_v7 = vld [vmem:[#allocation16 + $0x5e8] ss:$16 sps:$4 sm:$0xff]   ;;  %v13973_v46 = vld [vmem:[#allocation16 + $0x3e4] ss:$16 sps:$4 sm:$0xff]  }
 0x79a   :  { %v15449_v1 = vpop.f32.mrb[40].mxu1  ;;  %10967 = vmatprep.subr.bf16.mxu0 %v13916_v63  ;;  %v7423_v63 = vmax.f32 %v7208_v55, 0.0  ;;  %v14030_v55 = vld [vmem:[#allocation16 + $0x72c] ss:$16 sps:$4 sm:$0xff]  }
 0x79b   :  { %v15451_v24 = vpop.f32.mrb[41].mxu1 }
 0x79c   :  { %v7252_v3 = vpop.f32.mrb[42].mxu1  ;;  %10597 = vmatpush1.bf16.msra.mxu1 %v13911_v60  ;;  %v7251_v32 = vadd.f32 %v15451_v24, %v6402_v16  ;;  %v13976_v60 = vld [vmem:[#allocation16 + $0x60c] ss:$16 sps:$4 sm:$0xff]   ;;  %v13979_v24 = vld [vmem:[#allocation16 + $0x404] ss:$16 sps:$4 sm:$0xff]  }
 0x79d   :  { %10968 = vmatpush1.bf16.msra.mxu0 %v13914_v2  ;;  %v7253_v4 = vpop.f32.mrb[43].mxu1  ;;  %10598 = vmatprep.subr.bf16.mxu1 %v13919_v61  ;;  %v13971_v2 = vld [vmem:[#allocation16 + $0x3e0] ss:$16 sps:$4 sm:$0xff]   ;;  %v13974_v61 = vld [vmem:[#allocation16 + $0x608] ss:$16 sps:$4 sm:$0xff]  }
 0x79e   :  { %10969 = vmatprep.subr.bf16.mxu0 %v13922_v59  ;;  %v7426_v26 = vmax.f32 %v7251_v32, 0.0  ;;  %v15463_v59 = vpack.c.bf16 %v7423_v63, %v7423_v63  ;;  %v13982_v3 = vld [vmem:[#allocation16 + $0x62c] ss:$16 sps:$4 sm:$0xff]   ;;  %v13977_v4 = vld [vmem:[#allocation16 + $0x400] ss:$16 sps:$4 sm:$0xff]  }
 0x79f   :  { %v14024_v16 = vld [vmem:[#allocation16 + $0x70c] ss:$16 sps:$4 sm:$0xff]   ;;  %v14028_v32 = vld [vmem:[#allocation16 + $0x728] ss:$16 sps:$4 sm:$0xff]  }
 0x7a0   :  { %10599 = vmatpush1.bf16.msra.mxu1 %v13917_v62  ;;  %v15465_v62 = vpack.c.bf16 %v7426_v26, %v7426_v26  ;;  %v14042_v63 = vld [vmem:[#allocation16 + $0x76c] ss:$16 sps:$4 sm:$0xff]   ;;  %v14040_v26 = vld [vmem:[#allocation16 + $0x768] ss:$16 sps:$4 sm:$0xff]  }
 0x7a1   :  { %10970 = vmatpush1.bf16.msra.mxu0 %v13920_v5  ;;  %10600 = vmatprep.subr.bf16.mxu1 %v13925_v33  ;;  %v13980_v5 = vld [vmem:[#allocation16 + $0x628] ss:$16 sps:$4 sm:$0xff]   ;;  %v13985_v33 = vld [vmem:[#allocation16 + $0x424] ss:$16 sps:$4 sm:$0xff]  }
 0x7a2   :  { %10971 = vmatprep.subr.bf16.mxu0 %v13928_v52  ;;  %v13988_v52 = vld [vmem:[#allocation16 + $0x64c] ss:$16 sps:$4 sm:$0xff]  }
 0x7a4   :  { %10601 = vmatpush1.bf16.msra.mxu1 %v13923_v30  ;;  %v13983_v30 = vld [vmem:[#allocation16 + $0x420] ss:$16 sps:$4 sm:$0xff]  }
 0x7a5   :  { %10972 = vmatpush1.bf16.msra.mxu0 %v13926_v8  ;;  %10602 = vmatprep.subr.bf16.mxu1 %v13931_v12  ;;  %v13986_v8 = vld [vmem:[#allocation16 + $0x648] ss:$16 sps:$4 sm:$0xff]   ;;  %v13991_v12 = vld [vmem:[#allocation16 + $0x444] ss:$16 sps:$4 sm:$0xff]  }
 0x7a6   :  { %10973 = vmatprep.subr.bf16.mxu0 %v13934_v11  ;;  %v13994_v11 = vld [vmem:[#allocation16 + $0x66c] ss:$16 sps:$4 sm:$0xff]  }
 0x7a8   :  { %10603 = vmatpush1.bf16.msra.mxu1 %v13929_v34  ;;  %v13989_v34 = vld [vmem:[#allocation16 + $0x440] ss:$16 sps:$4 sm:$0xff]  }
 0x7a9   :  { %10974 = vmatpush1.bf16.msra.mxu0 %v13932_v18  ;;  %10604 = vmatprep.subr.bf16.mxu1 %v13937_v42  ;;  %v13992_v18 = vld [vmem:[#allocation16 + $0x668] ss:$16 sps:$4 sm:$0xff]   ;;  %v13997_v42 = vld [vmem:[#allocation16 + $0x464] ss:$16 sps:$4 sm:$0xff]  }
 0x7aa   :  { %10975 = vmatprep.subr.bf16.mxu0 %v13940_v43  ;;  %v14000_v43 = vld [vmem:[#allocation16 + $0x68c] ss:$16 sps:$4 sm:$0xff]  }
 0x7ac   :  { %10605 = vmatpush1.bf16.msra.mxu1 %v13935_v13  ;;  %v14003_v13 = vld [vmem:[#allocation16 + $0x484] ss:$16 sps:$4 sm:$0xff]  }
 0x7ad   :  { %10976 = vmatpush1.bf16.msra.mxu0 %v13938_v14  ;;  %10606 = vmatprep.subr.bf16.mxu1 %v13943_v45  ;;  %v14006_v14 = vld [vmem:[#allocation16 + $0x6ac] ss:$16 sps:$4 sm:$0xff]   ;;  %v14001_v45 = vld [vmem:[#allocation16 + $0x480] ss:$16 sps:$4 sm:$0xff]  }
 0x7ae   :  { %10977 = vmatprep.subr.bf16.mxu0 %v13946_v39  ;;  %v14004_v39 = vld [vmem:[#allocation16 + $0x6a8] ss:$16 sps:$4 sm:$0xff]  }
 0x7b0   :  { %10607 = vmatpush1.bf16.msra.mxu1 %v13941_v15  ;;  %v14009_v15 = vld [vmem:[#allocation16 + $0x4a4] ss:$16 sps:$4 sm:$0xff]  }
 0x7b1   :  { %10978 = vmatpush1.bf16.msra.mxu0 %v13944_v41  ;;  %10608 = vmatprep.subr.bf16.mxu1 %v13949_v29  ;;  %v14012_v41 = vld [vmem:[#allocation16 + $0x6cc] ss:$16 sps:$4 sm:$0xff]   ;;  %v14007_v29 = vld [vmem:[#allocation16 + $0x4a0] ss:$16 sps:$4 sm:$0xff]  }
 0x7b2   :  { %10979 = vmatprep.subr.bf16.mxu0 %v13952_v6  ;;  %v14010_v6 = vld [vmem:[#allocation16 + $0x6c8] ss:$16 sps:$4 sm:$0xff]  }
 0x7b4   :  { %10609 = vmatpush1.bf16.msra.mxu1 %v13947_v9  ;;  %v14015_v9 = vld [vmem:[#allocation16 + $0x4c4] ss:$16 sps:$4 sm:$0xff]  }
 0x7b5   :  { %10980 = vmatpush1.bf16.msra.mxu0 %v13950_v10  ;;  %10610 = vmatprep.subr.bf16.mxu1 %v13955_v21  ;;  %v14018_v21 = vld [vmem:[#allocation16 + $0x6ec] ss:$16 sps:$4 sm:$0xff]  }
 0x7b6   :  { %10981 = vmatprep.subr.bf16.mxu0 %v13958_v23 }
 0x7b8   :  { %10611 = vmatpush1.bf16.msra.mxu1 %v13953_v0 }
 0x7b9   :  { %10982 = vmatpush1.bf16.msra.mxu0 %v13956_v28  ;;  %10612 = vmatprep.subr.bf16.mxu1 %v13961_v31  ;;  %v14013_v28 = vld [vmem:[#allocation16 + $0x4c0] ss:$16 sps:$4 sm:$0xff]  }
 0x7ba   :  { %v15458_v56 = vpop.f32.mrb[44].mxu1  ;;  %10983 = vmatprep.subr.bf16.mxu0 %v13964_v37  ;;  %v14021_v37 = vld [vmem:[#allocation16 + $0x4e4] ss:$16 sps:$4 sm:$0xff]  }
 0x7bb   :  { %v15461_v38 = vpop.f32.mrb[45].mxu1 }
 0x7bc   :  { %v7293_v57 = vpop.f32.mrb[46].mxu1  ;;  %10613 = vmatpush1.bf16.msra.mxu1 %v13959_v44  ;;  %v14019_v44 = vld [vmem:[#allocation16 + $0x4e0] ss:$16 sps:$4 sm:$0xff]  }
 0x7bd   :  { %10984 = vmatpush1.bf16.msra.mxu0 %v13962_v36  ;;  %v7294_v17 = vpop.f32.mrb[47].mxu1  ;;  %10614 = vmatprep.subr.bf16.mxu1 %v13967_v47  ;;  %v14022_v36 = vld [vmem:[#allocation16 + $0x708] ss:$16 sps:$4 sm:$0xff]   ;;  %v14027_v47 = vld [vmem:[#allocation16 + $0x504] ss:$16 sps:$4 sm:$0xff]  }
 0x7be   :  { %10985 = vmatprep.subr.bf16.mxu0 %v13970_v58  ;;  %v14025_v58 = vld [vmem:[#allocation16 + $0x500] ss:$16 sps:$4 sm:$0xff]   ;;  %v14033_v57 = vld [vmem:[#allocation16 + $0x524] ss:$16 sps:$4 sm:$0xff]  }
 0x7bf   :  { %v14031_v17 = vld [vmem:[#allocation16 + $0x520] ss:$16 sps:$4 sm:$0xff]  }
 0x7c0   :  { %10615 = vmatpush1.bf16.msra.mxu1 %v13965_v50  ;;  %v14036_v50 = vld [vmem:[#allocation16 + $0x74c] ss:$16 sps:$4 sm:$0xff]  }
 0x7c1   :  { %10986 = vmatpush1.bf16.msra.mxu0 %v13968_v7  ;;  %10616 = vmatprep.subr.bf16.mxu1 %v13973_v46  ;;  %v14034_v7 = vld [vmem:[#allocation16 + $0x748] ss:$16 sps:$4 sm:$0xff]   ;;  %v14039_v46 = vld [vmem:[#allocation16 + $0x544] ss:$16 sps:$4 sm:$0xff]  }
 0x7c2   :  { %10996 = vmatprep.subr.bf16.mxu0 %v13976_v60  ;;  %v14037_v60 = vld [vmem:[#allocation16 + $0x540] ss:$16 sps:$4 sm:$0xff]  }
 0x7c4   :  { %10988 = vmatmul.mubr.bf16.vlgmr.msra.gmra.mrb[20].mxu0 %v15463_v59  ;;  %10617 = vmatpush1.bf16.msra.mxu1 %v13971_v2  ;;  %v14045_v2 = vld [vmem:[#allocation16 + $0x564] ss:$16 sps:$4 sm:$0xff]  }
 0x7c5   :  { %10997 = vmatpush1.bf16.msra.mxu0 %v13974_v61  ;;  %11028 = vmatprep.mubr.bf16.mxu0 %v15465_v62  ;;  %v14048_v61 = vld [vmem:[#allocation16 + $0x78c] ss:$16 sps:$4 sm:$0xff]  }
 0x7c6   :  { %10627 = vmatprep.subr.bf16.mxu1 %v13979_v24  ;;  %10998 = vmatprep.subr.bf16.mxu0 %v13982_v3  ;;  %v14043_v24 = vld [vmem:[#allocation16 + $0x560] ss:$16 sps:$4 sm:$0xff]   ;;  %v14046_v3 = vld [vmem:[#allocation16 + $0x788] ss:$16 sps:$4 sm:$0xff]  }
 0x7c7   :  { %10619 = vmatmul.mubr.bf16.vlgmr.msra.gmra.mrb[60].mxu1 %v15441_v19  ;;  %v13995_v19 = vld [vmem:[#allocation16 + $0x460] ss:$16 sps:$4 sm:$0xff]  }
 0x7c8   :  { %10628 = vmatpush1.bf16.msra.mxu1 %v13977_v4  ;;  %10659 = vmatprep.mubr.bf16.mxu1 %v15443_v25  ;;  %v13998_v25 = vld [vmem:[#allocation16 + $0x688] ss:$16 sps:$4 sm:$0xff]   ;;  %v14051_v4 = vld [vmem:[#allocation16 + $0x584] ss:$16 sps:$4 sm:$0xff]  }
 0x7c9   :  { %10999 = vmatpush1.bf16.msra.mxu0 %v13980_v5  ;;  %10629 = vmatprep.subr.bf16.mxu1 %v13985_v33  ;;  %v14054_v5 = vld [vmem:[#allocation16 + $0x7ac] ss:$16 sps:$4 sm:$0xff]  }
 0x7ca   :  { %11000 = vmatprep.subr.bf16.mxu0 %v13988_v52  ;;  %v15475_v33 = vld [vmem:[#allocation14 + $0x8] sm:$0xff]  ;;  %v14049_v52 = vld [vmem:[#allocation16 + $0x580] ss:$16 sps:$4 sm:$0xff]  }
 0x7cc   :  { %10630 = vmatpush1.bf16.msra.mxu1 %v13983_v30  ;;  %v14052_v30 = vld [vmem:[#allocation16 + $0x7a8] ss:$16 sps:$4 sm:$0xff]  }
 0x7cd   :  { %11001 = vmatpush1.bf16.msra.mxu0 %v13986_v8  ;;  %10631 = vmatprep.subr.bf16.mxu1 %v13991_v12  ;;  %v14057_v8 = vld [vmem:[#allocation16 + $0x5a4] ss:$16 sps:$4 sm:$0xff]   ;;  %v6398_v12 = vrot.slane %v15417_v27, %v15361_v40 }
 0x7ce   :  { %11002 = vmatprep.subr.bf16.mxu0 %v13994_v11  ;;  %v14060_v11 = vld [vmem:[#allocation16 + $0x7cc] ss:$16 sps:$4 sm:$0xff]  }
 0x7d0   :  { %10632 = vmatpush1.bf16.msra.mxu1 %v13989_v34  ;;  %v6410_v34 = vrot.slane %v15475_v33, %v15233_v49 }
 0x7d1   :  { %11003 = vmatpush1.bf16.msra.mxu0 %v13992_v18  ;;  %10633 = vmatprep.subr.bf16.mxu1 %v13997_v42  ;;  %v14055_v18 = vld [vmem:[#allocation16 + $0x5a0] ss:$16 sps:$4 sm:$0xff]   ;;  %v14058_v42 = vld [vmem:[#allocation16 + $0x7c8] ss:$16 sps:$4 sm:$0xff]  }
 0x7d2   :  { %11004 = vmatprep.subr.bf16.mxu0 %v14000_v43  ;;  %v14063_v43 = vld [vmem:[#allocation16 + $0x5c4] ss:$16 sps:$4 sm:$0xff]  }
 0x7d4   :  { %10634 = vmatpush1.bf16.msra.mxu1 %v13995_v19  ;;  %v7249_v19 = vadd.f32 %v15449_v1, %v6398_v12  ;;  %v14109_v12 = vld [vmem:[#allocation16 + $0x6c0] ss:$16 sps:$4 sm:$0xff]  }
 0x7d5   :  { %11005 = vmatpush1.bf16.msra.mxu0 %v13998_v25  ;;  %10635 = vmatprep.subr.bf16.mxu1 %v14003_v13  ;;  %v14066_v13 = vld [vmem:[#allocation16 + $0x7ec] ss:$16 sps:$4 sm:$0xff]  }
 0x7d6   :  { %11006 = vmatprep.subr.bf16.mxu0 %v14006_v14  ;;  %v7292_v14 = vadd.f32 %v15461_v38, %v6410_v34  ;;  %v14112_v34 = vld [vmem:[#allocation16 + $0x8e8] ss:$16 sps:$4 sm:$0xff]  }
 0x7d8   :  { %10636 = vmatpush1.bf16.msra.mxu1 %v14001_v45  ;;  %v7428_v1 = vmax.f32 %v7292_v14, 0.0  ;;  %v14126_v14 = vld [vmem:[#allocation16 + $0x92c] ss:$16 sps:$4 sm:$0xff]  }
 0x7d9   :  { %11007 = vmatpush1.bf16.msra.mxu0 %v14004_v39  ;;  %10637 = vmatprep.subr.bf16.mxu1 %v14009_v15  ;;  %v14061_v39 = vld [vmem:[#allocation16 + $0x5c0] ss:$16 sps:$4 sm:$0xff]  }
 0x7da   :  { %v15471_v10 = vpop.f32.mrb[48].mxu1  ;;  %11008 = vmatprep.subr.bf16.mxu0 %v14012_v41  ;;  %v14064_v41 = vld [vmem:[#allocation16 + $0x7e8] ss:$16 sps:$4 sm:$0xff]  }
 0x7db   :  { %v15473_v23 = vpop.f32.mrb[49].mxu1 }
 0x7dc   :  { %v7334_v0 = vpop.f32.mrb[50].mxu1  ;;  %10638 = vmatpush1.bf16.msra.mxu1 %v14007_v29  ;;  %v14069_v29 = vld [vmem:[#allocation16 + $0x5e4] ss:$16 sps:$4 sm:$0xff]  }
 0x7dd   :  { %11009 = vmatpush1.bf16.msra.mxu0 %v14010_v6  ;;  %v7335_v31 = vpop.f32.mrb[51].mxu1  ;;  %10639 = vmatprep.subr.bf16.mxu1 %v14015_v9  ;;  %v7425_v6 = vmax.f32 %v7249_v19, 0.0  ;;  %v14072_v9 = vld [vmem:[#allocation16 + $0x80c] ss:$16 sps:$4 sm:$0xff]   ;;  %v14070_v0 = vld [vmem:[#allocation16 + $0x808] ss:$16 sps:$4 sm:$0xff]  }
 0x7de   :  { %11010 = vmatprep.subr.bf16.mxu0 %v14018_v21  ;;  %v14067_v21 = vld [vmem:[#allocation16 + $0x5e0] ss:$16 sps:$4 sm:$0xff]   ;;  %v14078_v31 = vld [vmem:[#allocation16 + $0x82c] ss:$16 sps:$4 sm:$0xff]   ;;  %v14118_v19 = vld [vmem:[#allocation16 + $0x908] ss:$16 sps:$4 sm:$0xff]  }
 0x7df   :  { %v15487_v38 = vpack.c.bf16 %v7425_v6, %v7425_v6  ;;  %v14130_v6 = vld [vmem:[#allocation16 + $0x948] ss:$16 sps:$4 sm:$0xff]  }
 0x7e0   :  { %10640 = vmatpush1.bf16.msra.mxu1 %v14013_v28  ;;  %v14075_v28 = vld [vmem:[#allocation16 + $0x604] ss:$16 sps:$4 sm:$0xff]  }
 0x7e1   :  { %11011 = vmatpush1.bf16.msra.mxu0 %v14016_v35  ;;  %10641 = vmatprep.subr.bf16.mxu1 %v14021_v37  ;;  %v15489_v35 = vpack.c.bf16 %v7428_v1, %v7428_v1  ;;  %v14073_v37 = vld [vmem:[#allocation16 + $0x600] ss:$16 sps:$4 sm:$0xff]   ;;  %v14138_v1 = vld [vmem:[#allocation16 + $0x96c] ss:$16 sps:$4 sm:$0xff]  }
 0x7e2   :  { %11012 = vmatprep.subr.bf16.mxu0 %v14024_v16  ;;  %v14076_v16 = vld [vmem:[#allocation16 + $0x828] ss:$16 sps:$4 sm:$0xff]  }
 0x7e4   :  { %10642 = vmatpush1.bf16.msra.mxu1 %v14019_v44  ;;  %v14081_v44 = vld [vmem:[#allocation16 + $0x624] ss:$16 sps:$4 sm:$0xff]  }
 0x7e5   :  { %11013 = vmatpush1.bf16.msra.mxu0 %v14022_v36  ;;  %10643 = vmatprep.subr.bf16.mxu1 %v14027_v47  ;;  %v14084_v36 = vld [vmem:[#allocation16 + $0x84c] ss:$16 sps:$4 sm:$0xff]   ;;  %v14079_v47 = vld [vmem:[#allocation16 + $0x620] ss:$16 sps:$4 sm:$0xff]  }
 0x7e6   :  { %11014 = vmatprep.subr.bf16.mxu0 %v14030_v55  ;;  %v14082_v55 = vld [vmem:[#allocation16 + $0x848] ss:$16 sps:$4 sm:$0xff]  }
 0x7e8   :  { %10644 = vmatpush1.bf16.msra.mxu1 %v14025_v58  ;;  %v14087_v58 = vld [vmem:[#allocation16 + $0x644] ss:$16 sps:$4 sm:$0xff]  }
 0x7e9   :  { %11015 = vmatpush1.bf16.msra.mxu0 %v14028_v32  ;;  %10645 = vmatprep.subr.bf16.mxu1 %v14033_v57  ;;  %v14090_v32 = vld [vmem:[#allocation16 + $0x86c] ss:$16 sps:$4 sm:$0xff]   ;;  %v14085_v57 = vld [vmem:[#allocation16 + $0x640] ss:$16 sps:$4 sm:$0xff]  }
 0x7ea   :  { %11016 = vmatprep.subr.bf16.mxu0 %v14036_v50  ;;  %v14088_v50 = vld [vmem:[#allocation16 + $0x868] ss:$16 sps:$4 sm:$0xff]  }
 0x7ec   :  { %10646 = vmatpush1.bf16.msra.mxu1 %v14031_v17  ;;  %v14093_v17 = vld [vmem:[#allocation16 + $0x664] ss:$16 sps:$4 sm:$0xff]  }
 0x7ed   :  { %11017 = vmatpush1.bf16.msra.mxu0 %v14034_v7  ;;  %10647 = vmatprep.subr.bf16.mxu1 %v14039_v46  ;;  %v14096_v7 = vld [vmem:[#allocation16 + $0x88c] ss:$16 sps:$4 sm:$0xff]   ;;  %v14099_v46 = vld [vmem:[#allocation16 + $0x684] ss:$16 sps:$4 sm:$0xff]  }
 0x7ee   :  { %11018 = vmatprep.subr.bf16.mxu0 %v14042_v63  ;;  %v14102_v63 = vld [vmem:[#allocation16 + $0x8ac] ss:$16 sps:$4 sm:$0xff]  }
 0x7f0   :  { %10648 = vmatpush1.bf16.msra.mxu1 %v14037_v60  ;;  %v14097_v60 = vld [vmem:[#allocation16 + $0x680] ss:$16 sps:$4 sm:$0xff]  }
 0x7f1   :  { %11019 = vmatpush1.bf16.msra.mxu0 %v14040_v26  ;;  %10649 = vmatprep.subr.bf16.mxu1 %v14045_v2  ;;  %v14100_v26 = vld [vmem:[#allocation16 + $0x8a8] ss:$16 sps:$4 sm:$0xff]   ;;  %v14105_v2 = vld [vmem:[#allocation16 + $0x6a4] ss:$16 sps:$4 sm:$0xff]  }
 0x7f2   :  { %11020 = vmatprep.subr.bf16.mxu0 %v14048_v61  ;;  %v14108_v61 = vld [vmem:[#allocation16 + $0x8cc] ss:$16 sps:$4 sm:$0xff]  }
 0x7f4   :  { %10650 = vmatpush1.bf16.msra.mxu1 %v14043_v24  ;;  %v14103_v24 = vld [vmem:[#allocation16 + $0x6a0] ss:$16 sps:$4 sm:$0xff]  }
 0x7f5   :  { %11021 = vmatpush1.bf16.msra.mxu0 %v14046_v3  ;;  %10651 = vmatprep.subr.bf16.mxu1 %v14051_v4  ;;  %v14106_v3 = vld [vmem:[#allocation16 + $0x8c8] ss:$16 sps:$4 sm:$0xff]   ;;  %v14111_v4 = vld [vmem:[#allocation16 + $0x6c4] ss:$16 sps:$4 sm:$0xff]  }
 0x7f6   :  { %11022 = vmatprep.subr.bf16.mxu0 %v14054_v5 }
 0x7f8   :  { %10652 = vmatpush1.bf16.msra.mxu1 %v14049_v52  ;;  %v14114_v52 = vld [vmem:[#allocation16 + $0x8ec] ss:$16 sps:$4 sm:$0xff]  }
 0x7f9   :  { %11023 = vmatpush1.bf16.msra.mxu0 %v14052_v30  ;;  %10653 = vmatprep.subr.bf16.mxu1 %v14057_v8 }
 0x7fa   :  { %v15482_v25 = vpop.f32.mrb[52].mxu1  ;;  %11024 = vmatprep.subr.bf16.mxu0 %v14060_v11 }
 0x7fb   :  { %v15485_v27 = vpop.f32.mrb[53].mxu1 }
 0x7fc   :  { %v7375_v45 = vpop.f32.mrb[54].mxu1  ;;  %10654 = vmatpush1.bf16.msra.mxu1 %v14055_v18  ;;  %v14117_v18 = vld [vmem:[#allocation16 + $0x6e4] ss:$16 sps:$4 sm:$0xff]  }
 0x7fd   :  { %11025 = vmatpush1.bf16.msra.mxu0 %v14058_v42  ;;  %v7376_v15 = vpop.f32.mrb[55].mxu1  ;;  %10655 = vmatprep.subr.bf16.mxu1 %v14063_v43  ;;  %v14120_v42 = vld [vmem:[#allocation16 + $0x90c] ss:$16 sps:$4 sm:$0xff]   ;;  %v14115_v43 = vld [vmem:[#allocation16 + $0x6e0] ss:$16 sps:$4 sm:$0xff]  }
 0x7fe   :  { %11026 = vmatprep.subr.bf16.mxu0 %v14066_v13  ;;  %v14123_v13 = vld [vmem:[#allocation16 + $0x704] ss:$16 sps:$4 sm:$0xff]   ;;  %v14121_v45 = vld [vmem:[#allocation16 + $0x700] ss:$16 sps:$4 sm:$0xff]  }
 0x7ff   :  { %v14129_v15 = vld [vmem:[#allocation16 + $0x724] ss:$16 sps:$4 sm:$0xff]  }
 0x800   :  { %10656 = vmatpush1.bf16.msra.mxu1 %v14061_v39  ;;  %v14124_v39 = vld [vmem:[#allocation16 + $0x928] ss:$16 sps:$4 sm:$0xff]  }
 0x801   :  { %11027 = vmatpush1.bf16.msra.mxu0 %v14064_v41  ;;  %10657 = vmatprep.subr.bf16.mxu1 %v14069_v29  ;;  %v14132_v41 = vld [vmem:[#allocation16 + $0x94c] ss:$16 sps:$4 sm:$0xff]   ;;  %v14127_v29 = vld [vmem:[#allocation16 + $0x720] ss:$16 sps:$4 sm:$0xff]  }
 0x802   :  { %11037 = vmatprep.subr.bf16.mxu0 %v14072_v9  ;;  %v14135_v9 = vld [vmem:[#allocation16 + $0x744] ss:$16 sps:$4 sm:$0xff]  }
 0x804   :  { %11029 = vmatmul.mubr.bf16.vlgmr.msra.gmra.mrb[20].mxu0 %v15487_v38  ;;  %10658 = vmatpush1.bf16.msra.mxu1 %v14067_v21  ;;  %v14133_v21 = vld [vmem:[#allocation16 + $0x740] ss:$16 sps:$4 sm:$0xff]  }
 0x805   :  { %11038 = vmatpush1.bf16.msra.mxu0 %v14070_v0  ;;  %11069 = vmatprep.mubr.bf16.mxu0 %v15489_v35  ;;  %v14136_v0 = vld [vmem:[#allocation16 + $0x968] ss:$16 sps:$4 sm:$0xff]  }
 0x806   :  { %10668 = vmatprep.subr.bf16.mxu1 %v14075_v28  ;;  %11039 = vmatprep.subr.bf16.mxu0 %v14078_v31  ;;  %v14141_v28 = vld [vmem:[#allocation16 + $0x764] ss:$16 sps:$4 sm:$0xff]   ;;  %v14144_v31 = vld [vmem:[#allocation16 + $0x98c] ss:$16 sps:$4 sm:$0xff]  }
 0x807   :  { %10660 = vmatmul.mubr.bf16.vlgmr.msra.gmra.mrb[60].mxu1 %v15463_v59  ;;  %v14091_v59 = vld [vmem:[#allocation16 + $0x660] ss:$16 sps:$4 sm:$0xff]  }
 0x808   :  { %10669 = vmatpush1.bf16.msra.mxu1 %v14073_v37  ;;  %10700 = vmatprep.mubr.bf16.mxu1 %v15465_v62  ;;  %v14094_v62 = vld [vmem:[#allocation16 + $0x888] ss:$16 sps:$4 sm:$0xff]   ;;  %v14139_v37 = vld [vmem:[#allocation16 + $0x760] ss:$16 sps:$4 sm:$0xff]  }
 0x809   :  { %11040 = vmatpush1.bf16.msra.mxu0 %v14076_v16  ;;  %10670 = vmatprep.subr.bf16.mxu1 %v14081_v44  ;;  %v14142_v16 = vld [vmem:[#allocation16 + $0x988] ss:$16 sps:$4 sm:$0xff]   ;;  %v14147_v44 = vld [vmem:[#allocation16 + $0x784] ss:$16 sps:$4 sm:$0xff]  }
 0x80a   :  { %11041 = vmatprep.subr.bf16.mxu0 %v14084_v36  ;;  %v14150_v36 = vld [vmem:[#allocation16 + $0x9ac] ss:$16 sps:$4 sm:$0xff]  }
 0x80c   :  { %10671 = vmatpush1.bf16.msra.mxu1 %v14079_v47  ;;  %v14145_v47 = vld [vmem:[#allocation16 + $0x780] ss:$16 sps:$4 sm:$0xff]  }
 0x80d   :  { %11042 = vmatpush1.bf16.msra.mxu0 %v14082_v55  ;;  %10672 = vmatprep.subr.bf16.mxu1 %v14087_v58  ;;  %v14148_v55 = vld [vmem:[#allocation16 + $0x9a8] ss:$16 sps:$4 sm:$0xff]   ;;  %v14153_v58 = vld [vmem:[#allocation16 + $0x7a4] ss:$16 sps:$4 sm:$0xff]  }
 0x80e   :  { %11043 = vmatprep.subr.bf16.mxu0 %v14090_v32  ;;  %v6406_v32 = vrot.slane %v15475_v33, %v15230_v48 }
 0x810   :  { %10673 = vmatpush1.bf16.msra.mxu1 %v14085_v57  ;;  %v14156_v57 = vld [vmem:[#allocation16 + $0x9cc] ss:$16 sps:$4 sm:$0xff]  }
 0x811   :  { %11044 = vmatpush1.bf16.msra.mxu0 %v14088_v50  ;;  %10674 = vmatprep.subr.bf16.mxu1 %v14093_v17  ;;  %v6418_v50 = vrot.slane %v15475_v33, %v15253_v22  ;;  %v14151_v17 = vld [vmem:[#allocation16 + $0x7a0] ss:$16 sps:$4 sm:$0xff]  }
 0x812   :  { %11045 = vmatprep.subr.bf16.mxu0 %v14096_v7  ;;  %v14154_v7 = vld [vmem:[#allocation16 + $0x9c8] ss:$16 sps:$4 sm:$0xff]  }
 0x814   :  { %10675 = vmatpush1.bf16.msra.mxu1 %v14091_v59  ;;  %v14159_v59 = vld [vmem:[#allocation16 + $0x7c4] ss:$16 sps:$4 sm:$0xff]  }
 0x815   :  { %11046 = vmatpush1.bf16.msra.mxu0 %v14094_v62  ;;  %10676 = vmatprep.subr.bf16.mxu1 %v14099_v46  ;;  %v7290_v62 = vadd.f32 %v15458_v56, %v6406_v32  ;;  %v14162_v46 = vld [vmem:[#allocation16 + $0x9ec] ss:$16 sps:$4 sm:$0xff]   ;;  %v14214_v32 = vld [vmem:[#allocation16 + $0xb08] ss:$16 sps:$4 sm:$0xff]  }
 0x816   :  { %11047 = vmatprep.subr.bf16.mxu0 %v14102_v63  ;;  %v7333_v63 = vadd.f32 %v15473_v23, %v6418_v50  ;;  %v14174_v23 = vld [vmem:[#allocation16 + $0xa2c] ss:$16 sps:$4 sm:$0xff]  }
 0x817   :  { %v14222_v50 = vld [vmem:[#allocation16 + $0xb2c] ss:$16 sps:$4 sm:$0xff]  }
 0x818   :  { %10677 = vmatpush1.bf16.msra.mxu1 %v14097_v60  ;;  %v14157_v60 = vld [vmem:[#allocation16 + $0x7c0] ss:$16 sps:$4 sm:$0xff]  }
 0x819   :  { %11048 = vmatpush1.bf16.msra.mxu0 %v14100_v26  ;;  %10678 = vmatprep.subr.bf16.mxu1 %v14105_v2  ;;  %v14160_v26 = vld [vmem:[#allocation16 + $0x9e8] ss:$16 sps:$4 sm:$0xff]   ;;  %v14165_v2 = vld [vmem:[#allocation16 + $0x7e4] ss:$16 sps:$4 sm:$0xff]  }
 0x81a   :  { %v15495_v5 = vpop.f32.mrb[56].mxu1  ;;  %11049 = vmatprep.subr.bf16.mxu0 %v14108_v61  ;;  %v7427_v61 = vmax.f32 %v7290_v62, 0.0  ;;  %v14228_v62 = vld [vmem:[#allocation16 + $0xb4c] ss:$16 sps:$4 sm:$0xff]  }
 0x81b   :  { %v15497_v30 = vpop.f32.mrb[57].mxu1 }
 0x81c   :  { %v7416_v8 = vpop.f32.mrb[58].mxu1  ;;  %10679 = vmatpush1.bf16.msra.mxu1 %v14103_v24  ;;  %v14168_v24 = vld [vmem:[#allocation16 + $0xa0c] ss:$16 sps:$4 sm:$0xff]   ;;  %v15505_v56 = vpack.c.bf16 %v7427_v61, %v7427_v61  ;;  %v14232_v61 = vld [vmem:[#allocation16 + $0xb68] ss:$16 sps:$4 sm:$0xff]  }
 0x81d   :  { %11050 = vmatpush1.bf16.msra.mxu0 %v14106_v3  ;;  %v7417_v11 = vpop.f32.mrb[59].mxu1  ;;  %10680 = vmatprep.subr.bf16.mxu1 %v14111_v4  ;;  %v7430_v3 = vmax.f32 %v7333_v63, 0.0  ;;  %v14163_v4 = vld [vmem:[#allocation16 + $0x7e0] ss:$16 sps:$4 sm:$0xff]   ;;  %v14171_v8 = vld [vmem:[#allocation16 + $0x804] ss:$16 sps:$4 sm:$0xff]  }
 0x81e   :  { %11051 = vmatprep.subr.bf16.mxu0 %v14114_v52  ;;  %v14166_v52 = vld [vmem:[#allocation16 + $0xa08] ss:$16 sps:$4 sm:$0xff]   ;;  %v14169_v11 = vld [vmem:[#allocation16 + $0x800] ss:$16 sps:$4 sm:$0xff]  }
 0x81f   :  { %v14226_v63 = vld [vmem:[#allocation16 + $0xb48] ss:$16 sps:$4 sm:$0xff]  }
 0x820   :  { %10681 = vmatpush1.bf16.msra.mxu1 %v14109_v12  ;;  %v15507_v12 = vpack.c.bf16 %v7430_v3, %v7430_v3  ;;  %v14240_v3 = vld [vmem:[#allocation16 + $0xb8c] ss:$16 sps:$4 sm:$0xff]  }
 0x821   :  { %11052 = vmatpush1.bf16.msra.mxu0 %v14112_v34  ;;  %10682 = vmatprep.subr.bf16.mxu1 %v14117_v18  ;;  %v14172_v34 = vld [vmem:[#allocation16 + $0xa28] ss:$16 sps:$4 sm:$0xff]   ;;  %v14177_v18 = vld [vmem:[#allocation16 + $0x824] ss:$16 sps:$4 sm:$0xff]  }
 0x822   :  { %11053 = vmatprep.subr.bf16.mxu0 %v14120_v42  ;;  %v14180_v42 = vld [vmem:[#allocation16 + $0xa4c] ss:$16 sps:$4 sm:$0xff]  }
 0x824   :  { %10683 = vmatpush1.bf16.msra.mxu1 %v14115_v43  ;;  %v14175_v43 = vld [vmem:[#allocation16 + $0x820] ss:$16 sps:$4 sm:$0xff]  }
 0x825   :  { %11054 = vmatpush1.bf16.msra.mxu0 %v14118_v19  ;;  %10684 = vmatprep.subr.bf16.mxu1 %v14123_v13  ;;  %v14178_v19 = vld [vmem:[#allocation16 + $0xa48] ss:$16 sps:$4 sm:$0xff]   ;;  %v14183_v13 = vld [vmem:[#allocation16 + $0x844] ss:$16 sps:$4 sm:$0xff]  }
 0x826   :  { %11055 = vmatprep.subr.bf16.mxu0 %v14126_v14  ;;  %v14186_v14 = vld [vmem:[#allocation16 + $0xa6c] ss:$16 sps:$4 sm:$0xff]  }
 0x828   :  { %10685 = vmatpush1.bf16.msra.mxu1 %v14121_v45  ;;  %v14181_v45 = vld [vmem:[#allocation16 + $0x840] ss:$16 sps:$4 sm:$0xff]  }
 0x829   :  { %11056 = vmatpush1.bf16.msra.mxu0 %v14124_v39  ;;  %10686 = vmatprep.subr.bf16.mxu1 %v14129_v15  ;;  %v14184_v39 = vld [vmem:[#allocation16 + $0xa68] ss:$16 sps:$4 sm:$0xff]   ;;  %v14189_v15 = vld [vmem:[#allocation16 + $0x864] ss:$16 sps:$4 sm:$0xff]  }
 0x82a   :  { %11057 = vmatprep.subr.bf16.mxu0 %v14132_v41  ;;  %v14192_v41 = vld [vmem:[#allocation16 + $0xa8c] ss:$16 sps:$4 sm:$0xff]  }
 0x82c   :  { %10687 = vmatpush1.bf16.msra.mxu1 %v14127_v29  ;;  %v14195_v29 = vld [vmem:[#allocation16 + $0x884] ss:$16 sps:$4 sm:$0xff]  }
 0x82d   :  { %11058 = vmatpush1.bf16.msra.mxu0 %v14130_v6  ;;  %10688 = vmatprep.subr.bf16.mxu1 %v14135_v9  ;;  %v14198_v6 = vld [vmem:[#allocation16 + $0xaac] ss:$16 sps:$4 sm:$0xff]   ;;  %v14193_v9 = vld [vmem:[#allocation16 + $0x880] ss:$16 sps:$4 sm:$0xff]  }
 0x82e   :  { %11059 = vmatprep.subr.bf16.mxu0 %v14138_v1  ;;  %v14196_v1 = vld [vmem:[#allocation16 + $0xaa8] ss:$16 sps:$4 sm:$0xff]  }
 0x830   :  { %10689 = vmatpush1.bf16.msra.mxu1 %v14133_v21  ;;  %v14201_v21 = vld [vmem:[#allocation16 + $0x8a4] ss:$16 sps:$4 sm:$0xff]  }
 0x831   :  { %11060 = vmatpush1.bf16.msra.mxu0 %v14136_v0  ;;  %10690 = vmatprep.subr.bf16.mxu1 %v14141_v28  ;;  %v14204_v0 = vld [vmem:[#allocation16 + $0xacc] ss:$16 sps:$4 sm:$0xff]   ;;  %v14199_v28 = vld [vmem:[#allocation16 + $0x8a0] ss:$16 sps:$4 sm:$0xff]  }
 0x832   :  { %11061 = vmatprep.subr.bf16.mxu0 %v14144_v31  ;;  %v14202_v31 = vld [vmem:[#allocation16 + $0xac8] ss:$16 sps:$4 sm:$0xff]  }
 0x834   :  { %10691 = vmatpush1.bf16.msra.mxu1 %v14139_v37  ;;  %v14207_v37 = vld [vmem:[#allocation16 + $0x8c4] ss:$16 sps:$4 sm:$0xff]  }
 0x835   :  { %11062 = vmatpush1.bf16.msra.mxu0 %v14142_v16  ;;  %10692 = vmatprep.subr.bf16.mxu1 %v14147_v44  ;;  %v14210_v16 = vld [vmem:[#allocation16 + $0xaec] ss:$16 sps:$4 sm:$0xff]   ;;  %v14205_v44 = vld [vmem:[#allocation16 + $0x8c0] ss:$16 sps:$4 sm:$0xff]  }
 0x836   :  { %11063 = vmatprep.subr.bf16.mxu0 %v14150_v36  ;;  %v14208_v36 = vld [vmem:[#allocation16 + $0xae8] ss:$16 sps:$4 sm:$0xff]  }
 0x838   :  { %10693 = vmatpush1.bf16.msra.mxu1 %v14145_v47  ;;  %v14213_v47 = vld [vmem:[#allocation16 + $0x8e4] ss:$16 sps:$4 sm:$0xff]  }
 0x839   :  { %11064 = vmatpush1.bf16.msra.mxu0 %v14148_v55  ;;  %10694 = vmatprep.subr.bf16.mxu1 %v14153_v58  ;;  %v14216_v55 = vld [vmem:[#allocation16 + $0xb0c] ss:$16 sps:$4 sm:$0xff]   ;;  %v14211_v58 = vld [vmem:[#allocation16 + $0x8e0] ss:$16 sps:$4 sm:$0xff]  }
 0x83a   :  { %11065 = vmatprep.subr.bf16.mxu0 %v14156_v57  ;;  %v14219_v57 = vld [vmem:[#allocation16 + $0x904] ss:$16 sps:$4 sm:$0xff]  }
 0x83c   :  { %10695 = vmatpush1.bf16.msra.mxu1 %v14151_v17  ;;  %v14217_v17 = vld [vmem:[#allocation16 + $0x900] ss:$16 sps:$4 sm:$0xff]  }
 0x83d   :  { %11066 = vmatpush1.bf16.msra.mxu0 %v14154_v7  ;;  %10696 = vmatprep.subr.bf16.mxu1 %v14159_v59  ;;  %v14220_v7 = vld [vmem:[#allocation16 + $0xb28] ss:$16 sps:$4 sm:$0xff]   ;;  %v14225_v59 = vld [vmem:[#allocation16 + $0x924] ss:$16 sps:$4 sm:$0xff]  }
 0x83e   :  { %11067 = vmatprep.subr.bf16.mxu0 %v14162_v46  ;;  %v14223_v46 = vld [vmem:[#allocation16 + $0x920] ss:$16 sps:$4 sm:$0xff]  }
 0x840   :  { %10697 = vmatpush1.bf16.msra.mxu1 %v14157_v60  ;;  %v14231_v60 = vld [vmem:[#allocation16 + $0x944] ss:$16 sps:$4 sm:$0xff]  }
 0x841   :  { %11068 = vmatpush1.bf16.msra.mxu0 %v14160_v26  ;;  %10698 = vmatprep.subr.bf16.mxu1 %v14165_v2  ;;  %v14234_v26 = vld [vmem:[#allocation16 + $0xb6c] ss:$16 sps:$4 sm:$0xff]   ;;  %v14229_v2 = vld [vmem:[#allocation16 + $0x940] ss:$16 sps:$4 sm:$0xff]  }
 0x842   :  { %11078 = vmatprep.subr.bf16.mxu0 %v14168_v24  ;;  %v14237_v24 = vld [vmem:[#allocation16 + $0x964] ss:$16 sps:$4 sm:$0xff]  }
 0x844   :  { %11070 = vmatmul.mubr.bf16.vlgmr.msra.gmra.mrb[20].mxu0 %v15505_v56  ;;  %10699 = vmatpush1.bf16.msra.mxu1 %v14163_v4  ;;  %v14235_v4 = vld [vmem:[#allocation16 + $0x960] ss:$16 sps:$4 sm:$0xff]  }
 0x845   :  { %11079 = vmatpush1.bf16.msra.mxu0 %v14166_v52  ;;  %11110 = vmatprep.mubr.bf16.mxu0 %v15507_v12  ;;  %v14238_v52 = vld [vmem:[#allocation16 + $0xb88] ss:$16 sps:$4 sm:$0xff]  }
 0x846   :  { %10709 = vmatprep.subr.bf16.mxu1 %v14171_v8  ;;  %11080 = vmatprep.subr.bf16.mxu0 %v14174_v23  ;;  %v14243_v8 = vld [vmem:[#allocation16 + $0x984] ss:$16 sps:$4 sm:$0xff]   ;;  %v14246_v23 = vld [vmem:[#allocation16 + $0xbac] ss:$16 sps:$4 sm:$0xff]  }
 0x847   :  { %10701 = vmatmul.mubr.bf16.vlgmr.msra.gmra.mrb[60].mxu1 %v15487_v38  ;;  %v14187_v38 = vld [vmem:[#allocation16 + $0x860] ss:$16 sps:$4 sm:$0xff]  }
 0x848   :  { %10710 = vmatpush1.bf16.msra.mxu1 %v14169_v11  ;;  %10741 = vmatprep.mubr.bf16.mxu1 %v15489_v35  ;;  %v14190_v35 = vld [vmem:[#allocation16 + $0xa88] ss:$16 sps:$4 sm:$0xff]   ;;  %v14241_v11 = vld [vmem:[#allocation16 + $0x980] ss:$16 sps:$4 sm:$0xff]  }
 0x849   :  { %11081 = vmatpush1.bf16.msra.mxu0 %v14172_v34  ;;  %10711 = vmatprep.subr.bf16.mxu1 %v14177_v18  ;;  %v14244_v34 = vld [vmem:[#allocation16 + $0xba8] ss:$16 sps:$4 sm:$0xff]   ;;  %v14249_v18 = vld [vmem:[#allocation16 + $0x9a4] ss:$16 sps:$4 sm:$0xff]  }
 0x84a   :  { %11082 = vmatprep.subr.bf16.mxu0 %v14180_v42  ;;  %v6414_v42 = vrot.slane %v15475_v33, %v15250_v20 }
 0x84c   :  { %10712 = vmatpush1.bf16.msra.mxu1 %v14175_v43  ;;  %v14252_v43 = vld [vmem:[#allocation16 + $0xbcc] ss:$16 sps:$4 sm:$0xff]  }
 0x84d   :  { %11083 = vmatpush1.bf16.msra.mxu0 %v14178_v19  ;;  %10713 = vmatprep.subr.bf16.mxu1 %v14183_v13  ;;  %v6426_v19 = vrot.slane %v15475_v33, %v15332_v54  ;;  %v14247_v13 = vld [vmem:[#allocation16 + $0x9a0] ss:$16 sps:$4 sm:$0xff]   ;;  %v14264_v54 = vld [vmem:[#allocation16 + $0xc0c] ss:$16 sps:$4 sm:$0xff]  }
 0x84e   :  { %11084 = vmatprep.subr.bf16.mxu0 %v14186_v14  ;;  %v14250_v14 = vld [vmem:[#allocation16 + $0xbc8] ss:$16 sps:$4 sm:$0xff]  }
 0x850   :  { %10714 = vmatpush1.bf16.msra.mxu1 %v14181_v45  ;;  %v14255_v45 = vld [vmem:[#allocation16 + $0x9c4] ss:$16 sps:$4 sm:$0xff]  }
 0x851   :  { %11085 = vmatpush1.bf16.msra.mxu0 %v14184_v39  ;;  %10715 = vmatprep.subr.bf16.mxu1 %v14189_v15  ;;  %v7331_v39 = vadd.f32 %v15471_v10, %v6414_v42  ;;  %v14258_v15 = vld [vmem:[#allocation16 + $0xbec] ss:$16 sps:$4 sm:$0xff]   ;;  %v14313_v42 = vld [vmem:[#allocation16 + $0xb00] ss:$16 sps:$4 sm:$0xff]  }
 0x852   :  { %11086 = vmatprep.subr.bf16.mxu0 %v14192_v41  ;;  %v7374_v41 = vadd.f32 %v15485_v27, %v6426_v19  ;;  %v14270_v27 = vld [vmem:[#allocation16 + $0xc2c] ss:$16 sps:$4 sm:$0xff]   ;;  %v14321_v19 = vld [vmem:[#allocation16 + $0xb24] ss:$16 sps:$4 sm:$0xff]  }
 0x854   :  { %10716 = vmatpush1.bf16.msra.mxu1 %v14187_v38  ;;  %v14253_v38 = vld [vmem:[#allocation16 + $0x9c0] ss:$16 sps:$4 sm:$0xff]  }
 0x855   :  { %11087 = vmatpush1.bf16.msra.mxu0 %v14190_v35  ;;  %10717 = vmatprep.subr.bf16.mxu1 %v14195_v29  ;;  %v14256_v35 = vld [vmem:[#allocation16 + $0xbe8] ss:$16 sps:$4 sm:$0xff]   ;;  %v14261_v29 = vld [vmem:[#allocation16 + $0x9e4] ss:$16 sps:$4 sm:$0xff]  }
 0x856   :  { %11088 = vmatprep.subr.bf16.mxu0 %v14198_v6  ;;  %v7429_v6 = vmax.f32 %v7331_v39, 0.0  ;;  %v14327_v39 = vld [vmem:[#allocation16 + $0xb44] ss:$16 sps:$4 sm:$0xff]  }
 0x858   :  { %10718 = vmatpush1.bf16.msra.mxu1 %v14193_v9  ;;  %v7432_v9 = vmax.f32 %v7374_v41, 0.0  ;;  %v15519_v10 = vpack.c.bf16 %v7429_v6, %v7429_v6  ;;  %v14325_v41 = vld [vmem:[#allocation16 + $0xb40] ss:$16 sps:$4 sm:$0xff]  }
 0x859   :  { %11089 = vmatpush1.bf16.msra.mxu0 %v14196_v1  ;;  %10719 = vmatprep.subr.bf16.mxu1 %v14201_v21  ;;  %v14259_v1 = vld [vmem:[#allocation16 + $0x9e0] ss:$16 sps:$4 sm:$0xff]   ;;  %v14262_v21 = vld [vmem:[#allocation16 + $0xc08] ss:$16 sps:$4 sm:$0xff]  }
 0x85a   :  { %11090 = vmatprep.subr.bf16.mxu0 %v14204_v0  ;;  %v14267_v0 = vld [vmem:[#allocation16 + $0xa04] ss:$16 sps:$4 sm:$0xff]   ;;  %v14331_v6 = vld [vmem:[#allocation16 + $0xb60] ss:$16 sps:$4 sm:$0xff]  }
 0x85c   :  { %10720 = vmatpush1.bf16.msra.mxu1 %v14199_v28  ;;  %v15521_v28 = vpack.c.bf16 %v7432_v9, %v7432_v9  ;;  %v14339_v9 = vld [vmem:[#allocation16 + $0xb84] ss:$16 sps:$4 sm:$0xff]  }
 0x85d   :  { %11091 = vmatpush1.bf16.msra.mxu0 %v14202_v31  ;;  %10721 = vmatprep.subr.bf16.mxu1 %v14207_v37  ;;  %v14265_v31 = vld [vmem:[#allocation16 + $0xa00] ss:$16 sps:$4 sm:$0xff]   ;;  %v14268_v37 = vld [vmem:[#allocation16 + $0xc28] ss:$16 sps:$4 sm:$0xff]  }
 0x85e   :  { %11092 = vmatprep.subr.bf16.mxu0 %v14210_v16  ;;  %v14273_v16 = vld [vmem:[#allocation16 + $0xa24] ss:$16 sps:$4 sm:$0xff]  }
 0x860   :  { %10722 = vmatpush1.bf16.msra.mxu1 %v14205_v44  ;;  %v14276_v44 = vld [vmem:[#allocation16 + $0xc4c] ss:$16 sps:$4 sm:$0xff]  }
 0x861   :  { %11093 = vmatpush1.bf16.msra.mxu0 %v14208_v36  ;;  %10723 = vmatprep.subr.bf16.mxu1 %v14213_v47  ;;  %v14271_v36 = vld [vmem:[#allocation16 + $0xa20] ss:$16 sps:$4 sm:$0xff]   ;;  %v14274_v47 = vld [vmem:[#allocation16 + $0xc48] ss:$16 sps:$4 sm:$0xff]  }
 0x862   :  { %11094 = vmatprep.subr.bf16.mxu0 %v14216_v55  ;;  %v14279_v55 = vld [vmem:[#allocation16 + $0xa44] ss:$16 sps:$4 sm:$0xff]  }
 0x864   :  { %10724 = vmatpush1.bf16.msra.mxu1 %v14211_v58  ;;  %v14282_v58 = vld [vmem:[#allocation16 + $0xc6c] ss:$16 sps:$4 sm:$0xff]  }
 0x865   :  { %11095 = vmatpush1.bf16.msra.mxu0 %v14214_v32  ;;  %10725 = vmatprep.subr.bf16.mxu1 %v14219_v57  ;;  %v14277_v32 = vld [vmem:[#allocation16 + $0xa40] ss:$16 sps:$4 sm:$0xff]   ;;  %v14280_v57 = vld [vmem:[#allocation16 + $0xc68] ss:$16 sps:$4 sm:$0xff]  }
 0x866   :  { %11096 = vmatprep.subr.bf16.mxu0 %v14222_v50  ;;  %v14285_v50 = vld [vmem:[#allocation16 + $0xa64] ss:$16 sps:$4 sm:$0xff]  }
 0x868   :  { %10726 = vmatpush1.bf16.msra.mxu1 %v14217_v17  ;;  %v14288_v17 = vld [vmem:[#allocation16 + $0xc8c] ss:$16 sps:$4 sm:$0xff]  }
 0x869   :  { %11097 = vmatpush1.bf16.msra.mxu0 %v14220_v7  ;;  %10727 = vmatprep.subr.bf16.mxu1 %v14225_v59  ;;  %v14291_v7 = vld [vmem:[#allocation16 + $0xa84] ss:$16 sps:$4 sm:$0xff]   ;;  %v14294_v59 = vld [vmem:[#allocation16 + $0xcac] ss:$16 sps:$4 sm:$0xff]  }
 0x86a   :  { %11098 = vmatprep.subr.bf16.mxu0 %v14228_v62  ;;  %v14289_v62 = vld [vmem:[#allocation16 + $0xa80] ss:$16 sps:$4 sm:$0xff]  }
 0x86c   :  { %10728 = vmatpush1.bf16.msra.mxu1 %v14223_v46  ;;  %v14292_v46 = vld [vmem:[#allocation16 + $0xca8] ss:$16 sps:$4 sm:$0xff]  }
 0x86d   :  { %11099 = vmatpush1.bf16.msra.mxu0 %v14226_v63  ;;  %10729 = vmatprep.subr.bf16.mxu1 %v14231_v60  ;;  %v14297_v63 = vld [vmem:[#allocation16 + $0xaa4] ss:$16 sps:$4 sm:$0xff]   ;;  %v14300_v60 = vld [vmem:[#allocation16 + $0xccc] ss:$16 sps:$4 sm:$0xff]  }
 0x86e   :  { %11100 = vmatprep.subr.bf16.mxu0 %v14234_v26  ;;  %v14295_v26 = vld [vmem:[#allocation16 + $0xaa0] ss:$16 sps:$4 sm:$0xff]  }
 0x870   :  { %10730 = vmatpush1.bf16.msra.mxu1 %v14229_v2  ;;  %v14298_v2 = vld [vmem:[#allocation16 + $0xcc8] ss:$16 sps:$4 sm:$0xff]  }
 0x871   :  { %11101 = vmatpush1.bf16.msra.mxu0 %v14232_v61  ;;  %10731 = vmatprep.subr.bf16.mxu1 %v14237_v24  ;;  %v14303_v61 = vld [vmem:[#allocation16 + $0xac4] ss:$16 sps:$4 sm:$0xff]   ;;  %v14306_v24 = vld [vmem:[#allocation16 + $0xcec] ss:$16 sps:$4 sm:$0xff]  }
 0x872   :  { %11102 = vmatprep.subr.bf16.mxu0 %v14240_v3  ;;  %v14301_v3 = vld [vmem:[#allocation16 + $0xac0] ss:$16 sps:$4 sm:$0xff]  }
 0x874   :  { %10732 = vmatpush1.bf16.msra.mxu1 %v14235_v4  ;;  %v14304_v4 = vld [vmem:[#allocation16 + $0xce8] ss:$16 sps:$4 sm:$0xff]  }
 0x875   :  { %11103 = vmatpush1.bf16.msra.mxu0 %v14238_v52  ;;  %10733 = vmatprep.subr.bf16.mxu1 %v14243_v8  ;;  %v14309_v52 = vld [vmem:[#allocation16 + $0xae4] ss:$16 sps:$4 sm:$0xff]   ;;  %v14312_v8 = vld [vmem:[#allocation16 + $0xd0c] ss:$16 sps:$4 sm:$0xff]  }
 0x876   :  { %11104 = vmatprep.subr.bf16.mxu0 %v14246_v23  ;;  %v14307_v23 = vld [vmem:[#allocation16 + $0xae0] ss:$16 sps:$4 sm:$0xff]  }
 0x878   :  { %10734 = vmatpush1.bf16.msra.mxu1 %v14241_v11  ;;  %v14310_v11 = vld [vmem:[#allocation16 + $0xd08] ss:$16 sps:$4 sm:$0xff]  }
 0x879   :  { %11105 = vmatpush1.bf16.msra.mxu0 %v14244_v34  ;;  %10735 = vmatprep.subr.bf16.mxu1 %v14249_v18  ;;  %v14315_v34 = vld [vmem:[#allocation16 + $0xb04] ss:$16 sps:$4 sm:$0xff]   ;;  %v14318_v18 = vld [vmem:[#allocation16 + $0xd2c] ss:$16 sps:$4 sm:$0xff]  }
 0x87a   :  { %11106 = vmatprep.subr.bf16.mxu0 %v14252_v43  ;;  %v14316_v43 = vld [vmem:[#allocation16 + $0xd28] ss:$16 sps:$4 sm:$0xff]  }
 0x87c   :  { %10736 = vmatpush1.bf16.msra.mxu1 %v14247_v13  ;;  %v14324_v13 = vld [vmem:[#allocation16 + $0xd4c] ss:$16 sps:$4 sm:$0xff]  }
 0x87d   :  { %11107 = vmatpush1.bf16.msra.mxu0 %v14250_v14  ;;  %10737 = vmatprep.subr.bf16.mxu1 %v14255_v45  ;;  %v14319_v14 = vld [vmem:[#allocation16 + $0xb20] ss:$16 sps:$4 sm:$0xff]   ;;  %v14322_v45 = vld [vmem:[#allocation16 + $0xd48] ss:$16 sps:$4 sm:$0xff]  }
 0x87e   :  { %11108 = vmatprep.subr.bf16.mxu0 %v14258_v15  ;;  %v14330_v15 = vld [vmem:[#allocation16 + $0xd6c] ss:$16 sps:$4 sm:$0xff]  }
 0x880   :  { %10738 = vmatpush1.bf16.msra.mxu1 %v14253_v38  ;;  %v14328_v38 = vld [vmem:[#allocation16 + $0xd68] ss:$16 sps:$4 sm:$0xff]  }
 0x881   :  { %11109 = vmatpush1.bf16.msra.mxu0 %v14256_v35  ;;  %10739 = vmatprep.subr.bf16.mxu1 %v14261_v29  ;;  %v14333_v35 = vld [vmem:[#allocation16 + $0xb64] ss:$16 sps:$4 sm:$0xff]   ;;  %v14336_v29 = vld [vmem:[#allocation16 + $0xd8c] ss:$16 sps:$4 sm:$0xff]  }
 0x882   :  { %11119 = vmatprep.subr.bf16.mxu0 %v14264_v54  ;;  %v14334_v54 = vld [vmem:[#allocation16 + $0xd88] ss:$16 sps:$4 sm:$0xff]  }
 0x884   :  { %11111 = vmatmul.mubr.bf16.vlgmr.msra.gmra.mrb[20].mxu0 %v15519_v10  ;;  %10740 = vmatpush1.bf16.msra.mxu1 %v14259_v1  ;;  %v14342_v1 = vld [vmem:[#allocation16 + $0xdac] ss:$16 sps:$4 sm:$0xff]  }
 0x885   :  { %11120 = vmatpush1.bf16.msra.mxu0 %v14262_v21  ;;  %11151 = vmatprep.mubr.bf16.mxu0 %v15521_v28  ;;  %v14337_v21 = vld [vmem:[#allocation16 + $0xb80] ss:$16 sps:$4 sm:$0xff]  }
 0x886   :  { %10750 = vmatprep.subr.bf16.mxu1 %v14267_v0  ;;  %11121 = vmatprep.subr.bf16.mxu0 %v14270_v27  ;;  %v14340_v0 = vld [vmem:[#allocation16 + $0xda8] ss:$16 sps:$4 sm:$0xff]   ;;  %v14345_v27 = vld [vmem:[#allocation16 + $0xba4] ss:$16 sps:$4 sm:$0xff]  }
 0x887   :  { %10742 = vmatmul.mubr.bf16.vlgmr.msra.gmra.mrb[60].mxu1 %v15505_v56  ;;  %v14283_v56 = vld [vmem:[#allocation16 + $0xa60] ss:$16 sps:$4 sm:$0xff]  }
 0x888   :  { %10751 = vmatpush1.bf16.msra.mxu1 %v14265_v31  ;;  %10782 = vmatprep.mubr.bf16.mxu1 %v15507_v12  ;;  %v14286_v12 = vld [vmem:[#allocation16 + $0xc88] ss:$16 sps:$4 sm:$0xff]   ;;  %v6422_v31 = vrot.slane %v15475_v33, %v15341_v51 }
 0x889   :  { %11122 = vmatpush1.bf16.msra.mxu0 %v14268_v37  ;;  %10752 = vmatprep.subr.bf16.mxu1 %v14273_v16  ;;  %v14348_v37 = vld [vmem:[#allocation16 + $0xdcc] ss:$16 sps:$4 sm:$0xff]   ;;  %v6434_v16 = vrot.slane %v15475_v33, %v15344_v53  ;;  %v14352_v51 = vld [vmem:[#allocation16 + $0xde8] ss:$16 sps:$4 sm:$0xff]  }
 0x88a   :  { %11123 = vmatprep.subr.bf16.mxu0 %v14276_v44  ;;  %v14343_v44 = vld [vmem:[#allocation16 + $0xba0] ss:$16 sps:$4 sm:$0xff]   ;;  %v14360_v53 = vld [vmem:[#allocation16 + $0xe0c] ss:$16 sps:$4 sm:$0xff]  }
 0x88c   :  { %10753 = vmatpush1.bf16.msra.mxu1 %v14271_v36  ;;  %v14346_v36 = vld [vmem:[#allocation16 + $0xdc8] ss:$16 sps:$4 sm:$0xff]  }
 0x88d   :  { %11124 = vmatpush1.bf16.msra.mxu0 %v14274_v47  ;;  %10754 = vmatprep.subr.bf16.mxu1 %v14279_v55  ;;  %v14351_v47 = vld [vmem:[#allocation16 + $0xbc4] ss:$16 sps:$4 sm:$0xff]   ;;  %v7372_v55 = vadd.f32 %v15482_v25, %v6422_v31  ;;  %v14418_v31 = vld [vmem:[#allocation16 + $0xf48] ss:$16 sps:$4 sm:$0xff]  }
 0x88e   :  { %11125 = vmatprep.subr.bf16.mxu0 %v14282_v58  ;;  %v14354_v58 = vld [vmem:[#allocation16 + $0xdec] ss:$16 sps:$4 sm:$0xff]  }
 0x890   :  { %10755 = vmatpush1.bf16.msra.mxu1 %v14277_v32  ;;  %v7415_v32 = vadd.f32 %v15497_v30, %v6434_v16  ;;  %v14366_v30 = vld [vmem:[#allocation16 + $0xe2c] ss:$16 sps:$4 sm:$0xff]  }
 0x891   :  { %11126 = vmatpush1.bf16.msra.mxu0 %v14280_v57  ;;  %10756 = vmatprep.subr.bf16.mxu1 %v14285_v50  ;;  %v14349_v57 = vld [vmem:[#allocation16 + $0xbc0] ss:$16 sps:$4 sm:$0xff]   ;;  %v14357_v50 = vld [vmem:[#allocation16 + $0xbe4] ss:$16 sps:$4 sm:$0xff]   ;;  %v14426_v16 = vld [vmem:[#allocation16 + $0xf6c] ss:$16 sps:$4 sm:$0xff]  }
 0x892   :  { %11127 = vmatprep.subr.bf16.mxu0 %v14288_v17  ;;  %v7431_v17 = vmax.f32 %v7372_v55, 0.0  ;;  %v7434_v33 = vmax.f32 %v7415_v32, 0.0  ;;  %v14432_v55 = vld [vmem:[#allocation16 + $0xf8c] ss:$16 sps:$4 sm:$0xff]   ;;  %v14430_v32 = vld [vmem:[#allocation16 + $0xf88] ss:$16 sps:$4 sm:$0xff]  }
 0x894   :  { %10757 = vmatpush1.bf16.msra.mxu1 %v14283_v56  ;;  %v14355_v56 = vld [vmem:[#allocation16 + $0xbe0] ss:$16 sps:$4 sm:$0xff]   ;;  %v15533_v25 = vpack.c.bf16 %v7431_v17, %v7431_v17  ;;  %v14436_v17 = vld [vmem:[#allocation16 + $0xfa8] ss:$16 sps:$4 sm:$0xff]  }
 0x895   :  { %11128 = vmatpush1.bf16.msra.mxu0 %v14286_v12  ;;  %10758 = vmatprep.subr.bf16.mxu1 %v14291_v7  ;;  %v14358_v12 = vld [vmem:[#allocation16 + $0xe08] ss:$16 sps:$4 sm:$0xff]   ;;  %v14363_v7 = vld [vmem:[#allocation16 + $0xc04] ss:$16 sps:$4 sm:$0xff]  }
 0x896   :  { %11129 = vmatprep.subr.bf16.mxu0 %v14294_v59  ;;  %v15535_v59 = vpack.c.bf16 %v7434_v33, %v7434_v33  ;;  %v14541_v33 = vld [vmem:[#allocation14 + $0x8] sm:$0xff] }
 0x898   :  { %10759 = vmatpush1.bf16.msra.mxu1 %v14289_v62  ;;  %v14361_v62 = vld [vmem:[#allocation16 + $0xc00] ss:$16 sps:$4 sm:$0xff]  }
 0x899   :  { %11130 = vmatpush1.bf16.msra.mxu0 %v14292_v46  ;;  %10760 = vmatprep.subr.bf16.mxu1 %v14297_v63  ;;  %v14364_v46 = vld [vmem:[#allocation16 + $0xe28] ss:$16 sps:$4 sm:$0xff]   ;;  %v14369_v63 = vld [vmem:[#allocation16 + $0xc24] ss:$16 sps:$4 sm:$0xff]  }
 0x89a   :  { %11131 = vmatprep.subr.bf16.mxu0 %v14300_v60  ;;  %v14372_v60 = vld [vmem:[#allocation16 + $0xe4c] ss:$16 sps:$4 sm:$0xff]  }
 0x89c   :  { %10761 = vmatpush1.bf16.msra.mxu1 %v14295_v26  ;;  %v14367_v26 = vld [vmem:[#allocation16 + $0xc20] ss:$16 sps:$4 sm:$0xff]  }
 0x89d   :  { %11132 = vmatpush1.bf16.msra.mxu0 %v14298_v2  ;;  %10762 = vmatprep.subr.bf16.mxu1 %v14303_v61  ;;  %v14370_v2 = vld [vmem:[#allocation16 + $0xe48] ss:$16 sps:$4 sm:$0xff]   ;;  %v14375_v61 = vld [vmem:[#allocation16 + $0xc44] ss:$16 sps:$4 sm:$0xff]  }
 0x89e   :  { %11133 = vmatprep.subr.bf16.mxu0 %v14306_v24  ;;  %v14378_v24 = vld [vmem:[#allocation16 + $0xe6c] ss:$16 sps:$4 sm:$0xff]  }
 0x8a0   :  { %10763 = vmatpush1.bf16.msra.mxu1 %v14301_v3  ;;  %v14373_v3 = vld [vmem:[#allocation16 + $0xc40] ss:$16 sps:$4 sm:$0xff]  }
 0x8a1   :  { %11134 = vmatpush1.bf16.msra.mxu0 %v14304_v4  ;;  %10764 = vmatprep.subr.bf16.mxu1 %v14309_v52  ;;  %v14376_v4 = vld [vmem:[#allocation16 + $0xe68] ss:$16 sps:$4 sm:$0xff]   ;;  %v14381_v52 = vld [vmem:[#allocation16 + $0xc64] ss:$16 sps:$4 sm:$0xff]  }
 0x8a2   :  { %11135 = vmatprep.subr.bf16.mxu0 %v14312_v8  ;;  %v14384_v8 = vld [vmem:[#allocation16 + $0xe8c] ss:$16 sps:$4 sm:$0xff]  }
 0x8a4   :  { %10765 = vmatpush1.bf16.msra.mxu1 %v14307_v23  ;;  %v14387_v23 = vld [vmem:[#allocation16 + $0xc84] ss:$16 sps:$4 sm:$0xff]  }
 0x8a5   :  { %11136 = vmatpush1.bf16.msra.mxu0 %v14310_v11  ;;  %10766 = vmatprep.subr.bf16.mxu1 %v14315_v34  ;;  %v14390_v11 = vld [vmem:[#allocation16 + $0xeac] ss:$16 sps:$4 sm:$0xff]   ;;  %v14385_v34 = vld [vmem:[#allocation16 + $0xc80] ss:$16 sps:$4 sm:$0xff]  }
 0x8a6   :  { %11137 = vmatprep.subr.bf16.mxu0 %v14318_v18  ;;  %v14388_v18 = vld [vmem:[#allocation16 + $0xea8] ss:$16 sps:$4 sm:$0xff]  }
 0x8a8   :  { %10767 = vmatpush1.bf16.msra.mxu1 %v14313_v42  ;;  %v14393_v42 = vld [vmem:[#allocation16 + $0xca4] ss:$16 sps:$4 sm:$0xff]  }
 0x8a9   :  { %11138 = vmatpush1.bf16.msra.mxu0 %v14316_v43  ;;  %10768 = vmatprep.subr.bf16.mxu1 %v14321_v19  ;;  %v14396_v43 = vld [vmem:[#allocation16 + $0xecc] ss:$16 sps:$4 sm:$0xff]   ;;  %v14391_v19 = vld [vmem:[#allocation16 + $0xca0] ss:$16 sps:$4 sm:$0xff]  }
 0x8aa   :  { %11139 = vmatprep.subr.bf16.mxu0 %v14324_v13  ;;  %v14394_v13 = vld [vmem:[#allocation16 + $0xec8] ss:$16 sps:$4 sm:$0xff]  }
 0x8ac   :  { %10769 = vmatpush1.bf16.msra.mxu1 %v14319_v14  ;;  %v14399_v14 = vld [vmem:[#allocation16 + $0xcc4] ss:$16 sps:$4 sm:$0xff]  }
 0x8ad   :  { %11140 = vmatpush1.bf16.msra.mxu0 %v14322_v45  ;;  %10770 = vmatprep.subr.bf16.mxu1 %v14327_v39  ;;  %v14402_v45 = vld [vmem:[#allocation16 + $0xeec] ss:$16 sps:$4 sm:$0xff]   ;;  %v14397_v39 = vld [vmem:[#allocation16 + $0xcc0] ss:$16 sps:$4 sm:$0xff]  }
 0x8ae   :  { %11141 = vmatprep.subr.bf16.mxu0 %v14330_v15  ;;  %v14400_v15 = vld [vmem:[#allocation16 + $0xee8] ss:$16 sps:$4 sm:$0xff]  }
 0x8b0   :  { %10771 = vmatpush1.bf16.msra.mxu1 %v14325_v41  ;;  %v14405_v41 = vld [vmem:[#allocation16 + $0xce4] ss:$16 sps:$4 sm:$0xff]  }
 0x8b1   :  { %11142 = vmatpush1.bf16.msra.mxu0 %v14328_v38  ;;  %10772 = vmatprep.subr.bf16.mxu1 %v14333_v35  ;;  %v14408_v38 = vld [vmem:[#allocation16 + $0xf0c] ss:$16 sps:$4 sm:$0xff]   ;;  %v14403_v35 = vld [vmem:[#allocation16 + $0xce0] ss:$16 sps:$4 sm:$0xff]  }
 0x8b2   :  { %11143 = vmatprep.subr.bf16.mxu0 %v14336_v29  ;;  %v14406_v29 = vld [vmem:[#allocation16 + $0xf08] ss:$16 sps:$4 sm:$0xff]  }
 0x8b4   :  { %10773 = vmatpush1.bf16.msra.mxu1 %v14331_v6  ;;  %v14411_v6 = vld [vmem:[#allocation16 + $0xd04] ss:$16 sps:$4 sm:$0xff]  }
 0x8b5   :  { %11144 = vmatpush1.bf16.msra.mxu0 %v14334_v54  ;;  %10774 = vmatprep.subr.bf16.mxu1 %v14339_v9  ;;  %v14414_v54 = vld [vmem:[#allocation16 + $0xf2c] ss:$16 sps:$4 sm:$0xff]   ;;  %v14409_v9 = vld [vmem:[#allocation16 + $0xd00] ss:$16 sps:$4 sm:$0xff]  }
 0x8b6   :  { %11145 = vmatprep.subr.bf16.mxu0 %v14342_v1  ;;  %v14412_v1 = vld [vmem:[#allocation16 + $0xf28] ss:$16 sps:$4 sm:$0xff]  }
 0x8b8   :  { %10775 = vmatpush1.bf16.msra.mxu1 %v14337_v21  ;;  %v14417_v21 = vld [vmem:[#allocation16 + $0xd24] ss:$16 sps:$4 sm:$0xff]  }
 0x8b9   :  { %11146 = vmatpush1.bf16.msra.mxu0 %v14340_v0  ;;  %10776 = vmatprep.subr.bf16.mxu1 %v14345_v27  ;;  %v14420_v0 = vld [vmem:[#allocation16 + $0xf4c] ss:$16 sps:$4 sm:$0xff]   ;;  %v14415_v27 = vld [vmem:[#allocation16 + $0xd20] ss:$16 sps:$4 sm:$0xff]  }
 0x8ba   :  { %11147 = vmatprep.subr.bf16.mxu0 %v14348_v37  ;;  %v14423_v37 = vld [vmem:[#allocation16 + $0xd44] ss:$16 sps:$4 sm:$0xff]  }
 0x8bc   :  { %10777 = vmatpush1.bf16.msra.mxu1 %v14343_v44  ;;  %v14421_v44 = vld [vmem:[#allocation16 + $0xd40] ss:$16 sps:$4 sm:$0xff]  }
 0x8bd   :  { %11148 = vmatpush1.bf16.msra.mxu0 %v14346_v36  ;;  %10778 = vmatprep.subr.bf16.mxu1 %v14351_v47  ;;  %v14424_v36 = vld [vmem:[#allocation16 + $0xf68] ss:$16 sps:$4 sm:$0xff]   ;;  %v14429_v47 = vld [vmem:[#allocation16 + $0xd64] ss:$16 sps:$4 sm:$0xff]  }
 0x8be   :  { %11149 = vmatprep.subr.bf16.mxu0 %v14354_v58  ;;  %v14427_v58 = vld [vmem:[#allocation16 + $0xd60] ss:$16 sps:$4 sm:$0xff]  }
 0x8c0   :  { %10779 = vmatpush1.bf16.msra.mxu1 %v14349_v57  ;;  %v14435_v57 = vld [vmem:[#allocation16 + $0xd84] ss:$16 sps:$4 sm:$0xff]  }
 0x8c1   :  { %11150 = vmatpush1.bf16.msra.mxu0 %v14352_v51  ;;  %10780 = vmatprep.subr.bf16.mxu1 %v14357_v50  ;;  %v14438_v51 = vld [vmem:[#allocation16 + $0xfac] ss:$16 sps:$4 sm:$0xff]   ;;  %v14433_v50 = vld [vmem:[#allocation16 + $0xd80] ss:$16 sps:$4 sm:$0xff]  }
 0x8c2   :  { %11160 = vmatprep.subr.bf16.mxu0 %v14360_v53  ;;  %v14441_v53 = vld [vmem:[#allocation16 + $0xda4] ss:$16 sps:$4 sm:$0xff]  }
 0x8c4   :  { %11152 = vmatmul.mubr.bf16.vlgmr.msra.gmra.mrb[20].mxu0 %v15533_v25  ;;  %10781 = vmatpush1.bf16.msra.mxu1 %v14355_v56  ;;  %v6430_v56 = vrot.slane %v14541_v33, %v15361_v40  ;;  %v14451_v40 = vld [vmem:[#allocation16 + $0xde0] ss:$16 sps:$4 sm:$0xff]  }
 0x8c5   :  { %11161 = vmatpush1.bf16.msra.mxu0 %v14358_v12  ;;  %11192 = vmatprep.mubr.bf16.mxu0 %v15535_v59  ;;  %v14444_v12 = vld [vmem:[#allocation16 + $0xfcc] ss:$16 sps:$4 sm:$0xff]  }
 0x8c6   :  { %10791 = vmatprep.subr.bf16.mxu1 %v14363_v7  ;;  %11162 = vmatprep.subr.bf16.mxu0 %v14366_v30  ;;  %v14439_v7 = vld [vmem:[#allocation16 + $0xda0] ss:$16 sps:$4 sm:$0xff]   ;;  %v14442_v30 = vld [vmem:[#allocation16 + $0xfc8] ss:$16 sps:$4 sm:$0xff]  }
 0x8c7   :  { %10783 = vmatmul.mubr.bf16.vlgmr.msra.gmra.mrb[60].mxu1 %v15519_v10  ;;  %v14379_v10 = vld [vmem:[#allocation16 + $0xc60] ss:$16 sps:$4 sm:$0xff]  }
 0x8c8   :  { %10792 = vmatpush1.bf16.msra.mxu1 %v14361_v62  ;;  %10823 = vmatprep.mubr.bf16.mxu1 %v15521_v28  ;;  %v14382_v28 = vld [vmem:[#allocation16 + $0xe88] ss:$16 sps:$4 sm:$0xff]   ;;  %v14447_v62 = vld [vmem:[#allocation16 + $0xdc4] ss:$16 sps:$4 sm:$0xff]   ;;  %v14516_v33 = vld [vmem:[#allocation19 + $0x78] sm:$0xff]  }
 0x8c9   :  { %11163 = vmatpush1.bf16.msra.mxu0 %v14364_v46  ;;  %10793 = vmatprep.subr.bf16.mxu1 %v14369_v63  ;;  %v7413_v46 = vadd.f32 %v15495_v5, %v6430_v56  ;;  %v14450_v63 = vld [vmem:[#allocation16 + $0xfec] ss:$16 sps:$4 sm:$0xff]   ;;  %v14454_v5 = vld [vmem:[#allocation16 + $0xe00] ss:$16 sps:$4 sm:$0xff]  }
 0x8ca   :  { %11164 = vmatprep.subr.bf16.mxu0 %v14372_v60  ;;  %v14445_v60 = vld [vmem:[#allocation16 + $0xdc0] ss:$16 sps:$4 sm:$0xff]  }
 0x8cb   :  { %v14517_v56 = vld [vmem:[#allocation19 + $0x38] sm:$0xff]  }
 0x8cc   :  { %10794 = vmatpush1.bf16.msra.mxu1 %v14367_v26  ;;  %v14448_v26 = vld [vmem:[#allocation16 + $0xfe8] ss:$16 sps:$4 sm:$0xff]  }
 0x8cd   :  { %11165 = vmatpush1.bf16.msra.mxu0 %v14370_v2  ;;  %10795 = vmatprep.subr.bf16.mxu1 %v14375_v61  ;;  %v14453_v2 = vld [vmem:[#allocation16 + $0xde4] ss:$16 sps:$4 sm:$0xff]   ;;  %v7433_v61 = vmax.f32 %v7413_v46, 0.0 }
 0x8ce   :  { %11166 = vmatprep.subr.bf16.mxu0 %v14378_v24  ;;  %v14456_v24 = vld [vmem:[#allocation16 + $0xe04] ss:$16 sps:$4 sm:$0xff]  }
 0x8d0   :  { %10796 = vmatpush1.bf16.msra.mxu1 %v14373_v3  ;;  %v15543_v3 = vpack.c.bf16 %v7433_v61, %v7433_v61 }
 0x8d1   :  { %11167 = vmatpush1.bf16.msra.mxu0 %v14376_v4  ;;  %10797 = vmatprep.subr.bf16.mxu1 %v14381_v52  ;;  %v14459_v4 = vld [vmem:[#allocation16 + $0xe24] ss:$16 sps:$4 sm:$0xff]   ;;  %v14457_v52 = vld [vmem:[#allocation16 + $0xe20] ss:$16 sps:$4 sm:$0xff]  }
 0x8d2   :  { %11168 = vmatprep.subr.bf16.mxu0 %v14384_v8  ;;  %v14462_v8 = vld [vmem:[#allocation16 + $0xe44] ss:$16 sps:$4 sm:$0xff]  }
 0x8d4   :  { %10798 = vmatpush1.bf16.msra.mxu1 %v14379_v10  ;;  %v14460_v10 = vld [vmem:[#allocation16 + $0xe40] ss:$16 sps:$4 sm:$0xff]  }
 0x8d5   :  { %11169 = vmatpush1.bf16.msra.mxu0 %v14382_v28  ;;  %10799 = vmatprep.subr.bf16.mxu1 %v14387_v23  ;;  %v14465_v28 = vld [vmem:[#allocation16 + $0xe64] ss:$16 sps:$4 sm:$0xff]   ;;  %v14463_v23 = vld [vmem:[#allocation16 + $0xe60] ss:$16 sps:$4 sm:$0xff]  }
 0x8d6   :  { %11170 = vmatprep.subr.bf16.mxu0 %v14390_v11  ;;  %v14468_v11 = vld [vmem:[#allocation16 + $0xe84] ss:$16 sps:$4 sm:$0xff]  }
 0x8d8   :  { %10800 = vmatpush1.bf16.msra.mxu1 %v14385_v34  ;;  %v14466_v34 = vld [vmem:[#allocation16 + $0xe80] ss:$16 sps:$4 sm:$0xff]  }
 0x8d9   :  { %11171 = vmatpush1.bf16.msra.mxu0 %v14388_v18  ;;  %10801 = vmatprep.subr.bf16.mxu1 %v14393_v42  ;;  %v14471_v18 = vld [vmem:[#allocation16 + $0xea4] ss:$16 sps:$4 sm:$0xff]  }
 0x8da   :  { %11172 = vmatprep.subr.bf16.mxu0 %v14396_v43  ;;  %v14474_v42 = vld [vmem:[#allocation16 + $0xec4] ss:$16 sps:$4 sm:$0xff]  }
 0x8db   :  { %v14477_v43 = vld [vmem:[#allocation16 + $0xee4] ss:$16 sps:$4 sm:$0xff]  }
 0x8dc   :  { %10802 = vmatpush1.bf16.msra.mxu1 %v14391_v19  ;;  %v14475_v19 = vld [vmem:[#allocation16 + $0xee0] ss:$16 sps:$4 sm:$0xff]  }
 0x8dd   :  { %11173 = vmatpush1.bf16.msra.mxu0 %v14394_v13  ;;  %10803 = vmatprep.subr.bf16.mxu1 %v14399_v14  ;;  %v14480_v13 = vld [vmem:[#allocation16 + $0xf04] ss:$16 sps:$4 sm:$0xff]   ;;  %v14478_v14 = vld [vmem:[#allocation16 + $0xf00] ss:$16 sps:$4 sm:$0xff]  }
 0x8de   :  { %11174 = vmatprep.subr.bf16.mxu0 %v14402_v45  ;;  %v14483_v45 = vld [vmem:[#allocation16 + $0xf24] ss:$16 sps:$4 sm:$0xff]  }
 0x8e0   :  { %10804 = vmatpush1.bf16.msra.mxu1 %v14397_v39  ;;  %v14481_v39 = vld [vmem:[#allocation16 + $0xf20] ss:$16 sps:$4 sm:$0xff]  }
 0x8e1   :  { %11175 = vmatpush1.bf16.msra.mxu0 %v14400_v15  ;;  %10805 = vmatprep.subr.bf16.mxu1 %v14405_v41  ;;  %v14486_v15 = vld [vmem:[#allocation16 + $0xf44] ss:$16 sps:$4 sm:$0xff]   ;;  %v14484_v41 = vld [vmem:[#allocation16 + $0xf40] ss:$16 sps:$4 sm:$0xff]  }
 0x8e2   :  { %11176 = vmatprep.subr.bf16.mxu0 %v14408_v38  ;;  %v14489_v38 = vld [vmem:[#allocation16 + $0xf64] ss:$16 sps:$4 sm:$0xff]  }
 0x8e4   :  { %10806 = vmatpush1.bf16.msra.mxu1 %v14403_v35  ;;  %v14487_v35 = vld [vmem:[#allocation16 + $0xf60] ss:$16 sps:$4 sm:$0xff]  }
 0x8e5   :  { %11177 = vmatpush1.bf16.msra.mxu0 %v14406_v29  ;;  %10807 = vmatprep.subr.bf16.mxu1 %v14411_v6  ;;  %v14492_v29 = vld [vmem:[#allocation16 + $0xf84] ss:$16 sps:$4 sm:$0xff]   ;;  %v14490_v6 = vld [vmem:[#allocation16 + $0xf80] ss:$16 sps:$4 sm:$0xff]  }
 0x8e6   :  { %11178 = vmatprep.subr.bf16.mxu0 %v14414_v54  ;;  %v14495_v54 = vld [vmem:[#allocation16 + $0xfa4] ss:$16 sps:$4 sm:$0xff]  }
 0x8e8   :  { %10808 = vmatpush1.bf16.msra.mxu1 %v14409_v9  ;;  %v14493_v9 = vld [vmem:[#allocation16 + $0xfa0] ss:$16 sps:$4 sm:$0xff]  }
 0x8e9   :  { %11179 = vmatpush1.bf16.msra.mxu0 %v14412_v1  ;;  %10809 = vmatprep.subr.bf16.mxu1 %v14417_v21  ;;  %v14498_v1 = vld [vmem:[#allocation16 + $0xfc4] ss:$16 sps:$4 sm:$0xff]   ;;  %v14496_v21 = vld [vmem:[#allocation16 + $0xfc0] ss:$16 sps:$4 sm:$0xff]  }
 0x8ea   :  { %11180 = vmatprep.subr.bf16.mxu0 %v14420_v0  ;;  %v14501_v0 = vld [vmem:[#allocation16 + $0xfe4] ss:$16 sps:$4 sm:$0xff]  }
 0x8ec   :  { %10810 = vmatpush1.bf16.msra.mxu1 %v14415_v27  ;;  %v14499_v27 = vld [vmem:[#allocation16 + $0xfe0] ss:$16 sps:$4 sm:$0xff]  }
 0x8ed   :  { %11181 = vmatpush1.bf16.msra.mxu0 %v14418_v31  ;;  %10811 = vmatprep.subr.bf16.mxu1 %v14423_v37  ;;  %v14502_v31 = vld [vmem:[#allocation19 + $0x40] sm:$0xff]  }
 0x8ee   :  { %11182 = vmatprep.subr.bf16.mxu0 %v14426_v16  ;;  %v14503_v37 = vld [vmem:[#allocation19] sm:$0xff]   ;;  %v14504_v16 = vld [vmem:[#allocation19 + $0x48] sm:$0xff]  }
 0x8f0   :  { %10812 = vmatpush1.bf16.msra.mxu1 %v14421_v44  ;;  %v14505_v44 = vld [vmem:[#allocation19 + $0x8] sm:$0xff]  }
 0x8f1   :  { %11183 = vmatpush1.bf16.msra.mxu0 %v14424_v36  ;;  %10813 = vmatprep.subr.bf16.mxu1 %v14429_v47  ;;  %v14506_v36 = vld [vmem:[#allocation19 + $0x50] sm:$0xff]  }
 0x8f2   :  { %11184 = vmatprep.subr.bf16.mxu0 %v14432_v55  ;;  %v14507_v47 = vld [vmem:[#allocation19 + $0x10] sm:$0xff]   ;;  %v14508_v55 = vld [vmem:[#allocation19 + $0x58] sm:$0xff]  }
 0x8f4   :  { %10814 = vmatpush1.bf16.msra.mxu1 %v14427_v58  ;;  %v14509_v58 = vld [vmem:[#allocation19 + $0x18] sm:$0xff]  }
 0x8f5   :  { %11185 = vmatpush1.bf16.msra.mxu0 %v14430_v32  ;;  %10815 = vmatprep.subr.bf16.mxu1 %v14435_v57  ;;  %v14510_v32 = vld [vmem:[#allocation19 + $0x60] sm:$0xff]  }
 0x8f6   :  { %11186 = vmatprep.subr.bf16.mxu0 %v14438_v51  ;;  %v14511_v57 = vld [vmem:[#allocation19 + $0x20] sm:$0xff]   ;;  %v14512_v51 = vld [vmem:[#allocation19 + $0x68] sm:$0xff]  }
 0x8f8   :  { %10816 = vmatpush1.bf16.msra.mxu1 %v14433_v50  ;;  %v14513_v50 = vld [vmem:[#allocation19 + $0x28] sm:$0xff]  }
 0x8f9   :  { %11187 = vmatpush1.bf16.msra.mxu0 %v14436_v17  ;;  %10817 = vmatprep.subr.bf16.mxu1 %v14441_v53  ;;  %v14514_v17 = vld [vmem:[#allocation19 + $0x70] sm:$0xff]  }
 0x8fa   :  { %11188 = vmatprep.subr.bf16.mxu0 %v14444_v12  ;;  %v14515_v53 = vld [vmem:[#allocation19 + $0x30] sm:$0xff]   ;;  %v14518_v12 = vld [vmem:[#allocation19 + $0xc0] sm:$0xff]  }
 0x8fc   :  { %10818 = vmatpush1.bf16.msra.mxu1 %v14439_v7 }
 0x8fd   :  { %11189 = vmatpush1.bf16.msra.mxu0 %v14442_v30  ;;  %10819 = vmatprep.subr.bf16.mxu1 %v14447_v62 }
 0x8fe   :  { %11190 = vmatprep.subr.bf16.mxu0 %v14450_v63  ;;  %v7963_v63 = vld [vmem:[#allocation17] sm:$0xf] }
 0x900   :  { %10820 = vmatpush1.bf16.msra.mxu1 %v14445_v60  ;;  %v7980_v60 = vrot.slane %v7963_v63, %v15253_v22  ;;  %v14523_v22 = vld [vmem:[#allocation19 + $0x90] sm:$0xff]  }
 0x901   :  { %11191 = vmatpush1.bf16.msra.mxu0 %v14448_v26  ;;  %10821 = vmatprep.subr.bf16.mxu1 %v14453_v2  ;;  %v7968_v26 = vrot.slane %v7963_v63, %v15230_v48  ;;  %v7972_v2 = vrot.slane %v7963_v63, %v15233_v49  ;;  %v14521_v48 = vld [vmem:[#allocation19 + $0x88] sm:$0xff]   ;;  %v14522_v49 = vld [vmem:[#allocation19 + $0xd0] sm:$0xff]  }
 0x904   :  { %11193 = vmatmul.mubr.bf16.vlgmr.msra.gmra.mrb[20].mxu0 %v15543_v3  ;;  %10822 = vmatpush1.bf16.msra.mxu1 %v14451_v40 }
 0x905   :  { %10832 = vmatprep.subr.bf16.mxu1 %v14456_v24 }
 0x907   :  { %10824 = vmatmul.mubr.bf16.vlgmr.msra.gmra.mrb[60].mxu1 %v15533_v25  ;;  %v14469_v25 = vld [vmem:[#allocation16 + $0xea0] ss:$16 sps:$4 sm:$0xff]  }
 0x908   :  { %10833 = vmatpush1.bf16.msra.mxu1 %v14454_v5  ;;  %10864 = vmatprep.mubr.bf16.mxu1 %v15535_v59  ;;  %v14472_v59 = vld [vmem:[#allocation16 + $0xec0] ss:$16 sps:$4 sm:$0xff]  }
 0x909   :  { %10834 = vmatprep.subr.bf16.mxu1 %v14459_v4 }
 0x90c   :  { %10835 = vmatpush1.bf16.msra.mxu1 %v14457_v52 }
 0x90d   :  { %10836 = vmatprep.subr.bf16.mxu1 %v14462_v8 }
 0x910   :  { %10837 = vmatpush1.bf16.msra.mxu1 %v14460_v10 }
 0x911   :  { %10838 = vmatprep.subr.bf16.mxu1 %v14465_v28 }
 0x914   :  { %10839 = vmatpush1.bf16.msra.mxu1 %v14463_v23 }
 0x915   :  { %10840 = vmatprep.subr.bf16.mxu1 %v14468_v11  ;;  %v14519_v11 = vld [vmem:[#allocation19 + $0x80] sm:$0xff]  }
 0x918   :  { %10841 = vmatpush1.bf16.msra.mxu1 %v14466_v34 }
 0x919   :  { %10842 = vmatprep.subr.bf16.mxu1 %v14471_v18  ;;  %v14520_v18 = vld [vmem:[#allocation19 + $0xc8] sm:$0xff]  }
 0x91c   :  { %10843 = vmatpush1.bf16.msra.mxu1 %v14469_v25 }
 0x91d   :  { %10844 = vmatprep.subr.bf16.mxu1 %v14474_v42  ;;  %v14524_v42 = vld [vmem:[#allocation19 + $0xd8] sm:$0xff]  }
 0x920   :  { %10845 = vmatpush1.bf16.msra.mxu1 %v14472_v59  ;;  %v14525_v59 = vld [vmem:[#allocation19 + $0x98] sm:$0xff]  }
 0x921   :  { %10846 = vmatprep.subr.bf16.mxu1 %v14477_v43  ;;  %v14526_v43 = vld [vmem:[#allocation19 + $0xe0] sm:$0xff]  }
 0x924   :  { %10847 = vmatpush1.bf16.msra.mxu1 %v14475_v19  ;;  %v14527_v19 = vld [vmem:[#allocation19 + $0xa0] sm:$0xff]  }
 0x925   :  { %10848 = vmatprep.subr.bf16.mxu1 %v14480_v13  ;;  %v14528_v13 = vld [vmem:[#allocation19 + $0xe8] sm:$0xff]  }
 0x928   :  { %10849 = vmatpush1.bf16.msra.mxu1 %v14478_v14  ;;  %v14529_v14 = vld [vmem:[#allocation19 + $0xa8] sm:$0xff]  }
 0x929   :  { %10850 = vmatprep.subr.bf16.mxu1 %v14483_v45  ;;  %v7976_v45 = vrot.slane %v7963_v63, %v15250_v20 }
 0x92c   :  { %10851 = vmatpush1.bf16.msra.mxu1 %v14481_v39  ;;  %v14530_v39 = vld [vmem:[#allocation19 + $0xf0] sm:$0xff]  }
 0x92d   :  { %10852 = vmatprep.subr.bf16.mxu1 %v14486_v15  ;;  %v14531_v15 = vld [vmem:[#allocation19 + $0xb0] sm:$0xff]  }
 0x930   :  { %10853 = vmatpush1.bf16.msra.mxu1 %v14484_v41 }
 0x931   :  { %10854 = vmatprep.subr.bf16.mxu1 %v14489_v38  ;;  %v14532_v38 = vld [vmem:[#allocation19 + $0xf8] sm:$0xff]  }
 0x934   :  { %10855 = vmatpush1.bf16.msra.mxu1 %v14487_v35  ;;  %v14533_v35 = vld [vmem:[#allocation19 + $0xb8] sm:$0xff]  }
 0x935   :  { %10856 = vmatprep.subr.bf16.mxu1 %v14492_v29 }
 0x938   :  { %10857 = vmatpush1.bf16.msra.mxu1 %v14490_v6 }
 0x939   :  { %10858 = vmatprep.subr.bf16.mxu1 %v14495_v54 }
 0x93c   :  { %10859 = vmatpush1.bf16.msra.mxu1 %v14493_v9 }
 0x93d   :  { %10860 = vmatprep.subr.bf16.mxu1 %v14498_v1 }
 0x940   :  { %10861 = vmatpush1.bf16.msra.mxu1 %v14496_v21 }
 0x941   :  { %10862 = vmatprep.subr.bf16.mxu1 %v14501_v0 }
 0x944   :  { %10863 = vmatpush1.bf16.msra.mxu1 %v14499_v27 }
 0x945   :  { %13098 = vmatprep.subr.bf16.mxu1 %v14502_v31 }
 0x947   :  { %10865 = vmatmul.mubr.bf16.vlgmr.msra.gmra.mrb[60].mxu1 %v15543_v3 }
 0x948   :  { %13099 = vmatpush3.bf16.msra.mxu1 %v14503_v37 }
 0x949   :  { %13100 = vmatprep.subr.bf16.mxu1 %v14504_v16 }
 0x94c   :  { %13101 = vmatpush3.bf16.msra.mxu1 %v14505_v44 }
 0x94d   :  { %13102 = vmatprep.subr.bf16.mxu1 %v14506_v36 }
 0x950   :  { %13103 = vmatpush3.bf16.msra.mxu1 %v14507_v47 }
 0x951   :  { %13104 = vmatprep.subr.bf16.mxu1 %v14508_v55 }
 0x954   :  { %13105 = vmatpush3.bf16.msra.mxu1 %v14509_v58 }
 0x955   :  { %13106 = vmatprep.subr.bf16.mxu1 %v14510_v32 }
 0x958   :  { %13107 = vmatpush3.bf16.msra.mxu1 %v14511_v57 }
 0x959   :  { %13108 = vmatprep.subr.bf16.mxu1 %v14512_v51 }
 0x95c   :  { %13109 = vmatpush3.bf16.msra.mxu1 %v14513_v50 }
 0x95d   :  { %13110 = vmatprep.subr.bf16.mxu1 %v14514_v17 }
 0x960   :  { %13111 = vmatpush3.bf16.msra.mxu1 %v14515_v53 }
 0x961   :  { %13112 = vmatprep.subr.bf16.mxu1 %v14516_v33 }
 0x964   :  { %13113 = vmatpush3.bf16.msra.mxu1 %v14517_v56 }
 0x965   :  { %13120 = vmatprep.subr.bf16.mxu1 %v14518_v12 }
 0x9d7   :  { %v11194_v7 = vpop.f32.mrb[20].mxu0 }
 0x9d8   :  { %v11196_v30 = vpop.f32.mrb[21].mxu0  ;;  %v13164_v41 = vadd.f32 %v11194_v7, %v7976_v45 }
 0x9d9   :  { %v11198_v62 = vpop.f32.mrb[22].mxu0  ;;  %v13165_v61 = vadd.f32 %v11196_v30, %v7980_v60 }
 0x9da   :  { %v11199_v46 = vpop.f32.mrb[23].mxu0  ;;  %v11203_v29 = vmax.f32 %v13164_v41, 0.0 }
 0x9db   :  { %v11204_v10 = vmax.f32 %v13165_v61, 0.0 }
 0x9dc   :  { %v11207_v6 = vpack.c.bf16 %v11203_v29, %v11203_v29 }
 0x9dd   :  { %v11208_v25 = vpack.c.bf16 %v11204_v10, %v11204_v10 }
 0xa1a   :  { %v10866_v40 = vpop.f32.mrb[60].mxu1 }
 0xa1b   :  { %v13162_v24 = vadd.f32 %v10866_v40, %v7968_v26  ;;  %v10868_v3 = vpop.f32.mrb[61].mxu1 }
 0xa1c   :  { %v13163_v5 = vadd.f32 %v10868_v3, %v7972_v2  ;;  %v10870_v4 = vpop.f32.mrb[62].mxu1 }
 0xa1d   :  { %v11201_v52 = vmax.f32 %v13162_v24, 0.0  ;;  %v10871_v8 = vpop.f32.mrb[63].mxu1 }
 0xa1e   :  { %v11202_v28 = vmax.f32 %v13163_v5, 0.0 }
 0xa1f   :  { %v11205_v34 = vpack.c.bf16 %v11201_v52, %v11201_v52 }
 0xa20   :  { %v11206_v23 = vpack.c.bf16 %v11202_v28, %v11202_v28 }
 0xa22   :  { %11504 = vmatprep.mubr.bf16.mxu1 %v11206_v23 }
 0xa23   :  { %11505 = vmatmul.mubr.bf16.vlgmr.msra.gmra.mrb[64].mxu1 %v11205_v34 }
 0xa24   :  { %13121 = vmatpush3.bf16.msra.mxu1 %v14519_v11  ;;  %11544 = vmatprep.mubr.bf16.mxu1 %v11208_v25 }
 0xa25   :  { %13122 = vmatprep.subr.bf16.mxu1 %v14520_v18 }
 0xa28   :  { %13123 = vmatpush3.bf16.msra.mxu1 %v14521_v48 }
 0xa29   :  { %13124 = vmatprep.subr.bf16.mxu1 %v14522_v49 }
 0xa2c   :  { %13125 = vmatpush3.bf16.msra.mxu1 %v14523_v22 }
 0xa2d   :  { %13126 = vmatprep.subr.bf16.mxu1 %v14524_v42 }
 0xa30   :  { %13127 = vmatpush3.bf16.msra.mxu1 %v14525_v59 }
 0xa31   :  { %13128 = vmatprep.subr.bf16.mxu1 %v14526_v43 }
 0xa34   :  { %13129 = vmatpush3.bf16.msra.mxu1 %v14527_v19 }
 0xa35   :  { %13130 = vmatprep.subr.bf16.mxu1 %v14528_v13 }
 0xa38   :  { %13131 = vmatpush3.bf16.msra.mxu1 %v14529_v14 }
 0xa39   :  { %13132 = vmatprep.subr.bf16.mxu1 %v14530_v39 }
 0xa3c   :  { %13133 = vmatpush3.bf16.msra.mxu1 %v14531_v15 }
 0xa3d   :  { %13134 = vmatprep.subr.bf16.mxu1 %v14532_v38 }
 0xa40   :  { %13135 = vmatpush3.bf16.msra.mxu1 %v14533_v35 }
 0xa43   :  { %11545 = vmatmul.mubr.bf16.vlgmr.msra.gmra.mrb[68].mxu1 %v11207_v6 }
 0xa44   :  { %14817 = shalt.err (!%p14814_p2)
}
 0xa45   :  { %s14818_s21 = scalar_lea.hbm %s15616_s15, 128 }
 0xa46   :  { %p14819_p3 = scmp.ne.s32.totalorder %s15616_s15, %s14818_s21  ;;  %p14822_p4 = scmp.lt.u32.totalorder %s14818_s21, %s15616_s15 }
 0xa48   :  { %p14824_p5 = pnand %p14822_p4, %p14819_p3 }
 0xa4a   :  { %14827 = shalt.err (!%p14824_p5)
}
 0xa4b   :  { %11581 = dma.vmem_to_hbm [thread:$0]  %s11579_s19, 128, %s15616_s15, [#allocation24]  }
 0xa4c   :  { %s14935_s20 = smov [#allocation25]   ;;  %s14936_s23 = smov [#allocation26]  }
 0xa4d   :  { %s11588_s22 = sshll.u32 %s14935_s20, 4  ;;  %s11598_s7 = sshll.u32 %s14936_s23, 4  ;;  %s11589_s22 = int_to_ptr.vmem [resolvable:$true] %s11588_s22  ;;  %s11599_s7 = int_to_ptr.vmem [resolvable:$true] %s11598_s7 }
 0xa4e   :  { %s14828_s26 = scalar_lea.vmem %s11589_s22, 128  ;;  %p14833_p7 = scmp.lt.s32.totalorder %s11589_s22, %s11589_s22 }
 0xa4f   :  { %p14829_p6 = scmp.ne.s32.totalorder %s11589_s22, %s14828_s26  ;;  %p14834_p8 = scmp.lt.s32.totalorder %s14828_s26, %s14828_s26 }
 0xa51   :  { %p14835_p9 = por %p14834_p8, %p14833_p7 }
 0xa53   :  { %p14836_p10 = pnand %p14835_p9, %p14829_p6 }
 0xa55   :  { %14839 = shalt.err (!%p14836_p10)
}
 0xa56   :  { %s14840_s12 = scalar_lea.hbm %s15617_s16, 128 }
 0xa57   :  { %p14841_p11 = scmp.ne.s32.totalorder %s15617_s16, %s14840_s12  ;;  %p14844_p12 = scmp.lt.u32.totalorder %s14840_s12, %s15617_s16 }
 0xa59   :  { %p14846_p13 = pnand %p14844_p12, %p14841_p11 }
 0xa5b   :  { %14849 = shalt.err (!%p14846_p13)
}
 0xa5c   :  { %11591 = dma.vmem_to_hbm [thread:$0]  %s11589_s22, 128, %s15617_s16, [#allocation24]  }
 0xa5d   :  { %s14850_s30 = scalar_lea.vmem %s11599_s7, 128  ;;  %p14855_p1 = scmp.lt.s32.totalorder %s11599_s7, %s11599_s7 }
 0xa5e   :  { %p14851_p0 = scmp.ne.s32.totalorder %s11599_s7, %s14850_s30  ;;  %p14856_p2 = scmp.lt.s32.totalorder %s14850_s30, %s14850_s30 }
 0xa60   :  { %p14857_p3 = por %p14856_p2, %p14855_p1 }
 0xa62   :  { %p14858_p4 = pnand %p14857_p3, %p14851_p0 }
 0xa64   :  { %14861 = shalt.err (!%p14858_p4)
}
 0xa65   :  { %s14862_s19 = scalar_lea.hbm %s15618_s17, 128 }
 0xa66   :  { %p14863_p5 = scmp.ne.s32.totalorder %s15618_s17, %s14862_s19  ;;  %p14866_p6 = scmp.lt.u32.totalorder %s14862_s19, %s15618_s17 }
 0xa68   :  { %p14868_p7 = pnand %p14866_p6, %p14863_p5 }
 0xa6a   :  { %14871 = shalt.err (!%p14868_p7)
}
 0xa6b   :  { %11601 = dma.vmem_to_hbm [thread:$0]  %s11599_s7, 128, %s15618_s17, [#allocation27]   ;;  %v13064_v0 = vld [vmem:[#allocation20] ss:$0 sm:$0xff] }
 0xa6c   :  { %s14937_s11 = smov [#allocation22]  }
 0xa6d   :  { %s11568_s17 = sshll.u32 %s14937_s11, 4  ;;  %s11569_s17 = int_to_ptr.vmem [resolvable:$true] %s11568_s17 }
 0xa6e   :  { %s14872_s28 = scalar_lea.vmem %s11569_s17, 128  ;;  %p14877_p9 = scmp.lt.s32.totalorder %s11569_s17, %s11569_s17 }
 0xa6f   :  { %p14873_p8 = scmp.ne.s32.totalorder %s11569_s17, %s14872_s28  ;;  %p14878_p10 = scmp.lt.s32.totalorder %s14872_s28, %s14872_s28 }
 0xa71   :  { %p14879_p11 = por %p14878_p10, %p14877_p9 }
 0xa73   :  { %p14880_p12 = pnand %p14879_p11, %p14873_p8 }
 0xaf6   :  { %v13114_v20 = vpop.f32.mrb[64].mxu1 }
 0xaf7   :  { %v13115_v54 = vpop.f32.mrb[65].mxu1 }
 0xaf8   :  { %v13116_v9 = vadd.f32 %v13115_v54, %v13114_v20  ;;  %v13117_v1 = vpop.f32.mrb[66].mxu1 }
 0xaf9   :  { %v13118_v21 = vpop.f32.mrb[67].mxu1 }
 0xafa   :  { %v11507_v37 = vadd.f32 %v13116_v9, %v13064_v0 }
 0xb16   :  { %v13136_v27 = vpop.f32.mrb[68].mxu1 }
 0xb17   :  { %v13137_v31 = vpop.f32.mrb[69].mxu1 }
 0xb18   :  { %v13138_v16 = vadd.f32 %v13137_v31, %v13136_v27  ;;  %v13139_v44 = vpop.f32.mrb[70].mxu1 }
 0xb19   :  { %v13140_v36 = vpop.f32.mrb[71].mxu1 }
 0xb1a   :  { %v11547_v47 = vadd.f32 %v13138_v16, %v11507_v37 }
 0xb1c   :  { %v13097_v55 = vmul.f32 -1.442695, %v11547_v47 }
 0xb1e   :  { %14536 = vpow2.f32 %v13097_v55 }
 0xb28   :  { %v14537_v58 = vpop.eup %14536 }
 0xb29   :  { %v11555_v32 = vadd.f32 1.0, %v14537_v58 }
 0xb2b   :  { %14538 = vrcp.f32 %v11555_v32 }
 0xb35   :  { %v14539_v57 = vpop.eup %14538 }
 0xb36   :  { %11558 = vst [vmem:[#allocation22] sm:$0xff] %v14539_v57 }
 0xb37   :  { %14883 = shalt.err (!%p14880_p12)
}
 0xb38   :  { %s14884_s3 = scalar_lea.hbm %s15615_s14, 128 }
 0xb39   :  { %p14885_p13 = scmp.ne.s32.totalorder %s15615_s14, %s14884_s3  ;;  %p14888_p0 = scmp.lt.u32.totalorder %s14884_s3, %s15615_s14 }
 0xb3b   :  { %p14890_p1 = pnand %p14888_p0, %p14885_p13 }
 0xb3d   :  { %14893 = shalt.err (!%p14890_p1)
}
 0xb3e   :  { %11571 = dma.vmem_to_hbm [thread:$0]  %s11569_s17, 128, %s15615_s14, [#allocation4]  }
 0xb3f   :  { %14908 = dma.done.wait [#allocation4], 128  }
 0xb40   :  { %14909 = vsyncadd [#allocation4], 4294967168 }
 0xb41   :  { %14910 = dma.done.wait [#allocation24], 256  }
 0xb42   :  { %14911 = vsyncadd [#allocation24], 4294967040 }
 0xb43   :  { %14912 = dma.done.wait [#allocation27], 128  }
 0xb44   :  { %14913 = vsyncadd [#allocation27], 4294967168 }
 0xb45   :  { %11614 = vsyncpa [#allocation3], 1 }
 0xb46   :  { %11615 = vsyncpa [#allocation6], 1 }
 0xb47   :  { %11616 = vsyncpa [#allocation9], 1 }
 0xb48   :  { %11617 = vsyncpa [#allocation12], 1 }
 0xb49   :  { %11618 = vsyncpa [#allocation15], 1 }
 0xb4a   :  { %11619 = vsyncpa [#allocation18], 1 }
 0xb4b   :  { %11620 = vsyncpa [#allocation21], 1 }
 0xb4c   :  { %11621 = vsyncpa [#allocation4], 1 }
 0xb4d   :  { %11622 = vsyncpa [#allocation24], 1 }
 0xb4e   :  { %11623 = vsyncpa [#allocation27], 1 }

</bundles_post_ra>
